<compile_context>
chip_gen: v7x
topology: tpu7x:2x2x1
jax: 0.10.0
libtpu: 0.0.40
codegen_flags: <defaults>
</compile_context>

<pallas_src>
import functools

import jax
import jax.numpy as jnp
from jax.experimental import pallas as pl
from jax.experimental.pallas import tpu as pltpu


# ----------------------------------------------------------------------------
# Helpers
# ----------------------------------------------------------------------------
def _round_up(x, m):
    return ((x + m - 1) // m) * m


@functools.lru_cache(maxsize=1)
def _vmem_limit_bytes():
    # Generation-aware VMEM budget: stay well below physical capacity
    # (64 MiB/TC on v7x, 128 MiB on v5e/v6e) and leave compiler headroom.
    try:
        info = pltpu.get_tpu_info()
        cap = int(getattr(info, "vmem_capacity_bytes", 64 * 1024 * 1024))
    except Exception:  # pragma: no cover - conservative fallback
        cap = 64 * 1024 * 1024
    return max(16 * 1024 * 1024, min(cap - 32 * 1024 * 1024, 64 * 1024 * 1024))


def _pick_tk(kp):
    """kp is a multiple of 128; pick a lane-aligned K tile <= 512 dividing kp."""
    q = kp // 128
    for m in (4, 3, 2, 1):
        if q % m == 0:
            return 128 * m
    return 128


# ----------------------------------------------------------------------------
# Fused matmul kernel: (M,K)x(K,N) + bias (+ residual) (+ ReLU)
#   - bf16 operands, f32 accumulation directly into the resident output block
#   - grid = (M tiles, N tiles, K tiles); K innermost, M/N parallel
# ----------------------------------------------------------------------------
def _mm_bias_kernel(a_ref, b_ref, s_ref, o_ref, *, relu):
    k = pl.program_id(2)

    @pl.when(k == 0)
    def _():
        o_ref[...] = jnp.zeros_like(o_ref)

    o_ref[...] += jnp.dot(a_ref[...], b_ref[...],
                          preferred_element_type=jnp.float32)

    @pl.when(k == pl.num_programs(2) - 1)
    def _():
        y = o_ref[...] + s_ref[...]
        if relu:
            y = jnp.maximum(y, 0.0)
        o_ref[...] = y


def _mm_bias_res_kernel(a_ref, b_ref, s_ref, r_ref, o_ref, *, relu):
    k = pl.program_id(2)

    @pl.when(k == 0)
    def _():
        o_ref[...] = jnp.zeros_like(o_ref)

    o_ref[...] += jnp.dot(a_ref[...], b_ref[...],
                          preferred_element_type=jnp.float32)

    @pl.when(k == pl.num_programs(2) - 1)
    def _():
        y = o_ref[...] + s_ref[...] + r_ref[...]
        if relu:
            y = jnp.maximum(y, 0.0)
        o_ref[...] = y


def fused_matmul(a, b, bias, residual=None, relu=False):
    """a: (M,K) f32, b: (K,N) f32, bias: (N,), residual: (M,N) or None."""
    M, K = a.shape
    K2, N = b.shape
    assert K == K2 and bias.shape == (N,)

    tn = min(N, 256)
    assert N % tn == 0, (N, tn)
    Mp = _round_up(M, 8)
    tm = Mp if Mp <= 256 else 256
    Mp = _round_up(Mp, tm)
    Kp = _round_up(K, 128)
    tk = _pick_tk(Kp)

    a_p = jnp.pad(a, ((0, Mp - M), (0, Kp - K))).astype(jnp.bfloat16)
    b_p = jnp.pad(b, ((0, Kp - K), (0, 0))).astype(jnp.bfloat16)
    bias2 = bias.reshape(1, N).astype(jnp.float32)

    in_specs = [
        pl.BlockSpec((tm, tk), lambda i, j, k: (i, k)),
        pl.BlockSpec((tk, tn), lambda i, j, k: (k, j)),
        pl.BlockSpec((1, tn), lambda i, j, k: (0, j)),
    ]
    operands = [a_p, b_p, bias2]
    if residual is not None:
        r_p = jnp.pad(residual, ((0, Mp - M), (0, 0))).astype(jnp.float32)
        in_specs.append(pl.BlockSpec((tm, tn), lambda i, j, k: (i, j)))
        operands.append(r_p)
        kern = functools.partial(_mm_bias_res_kernel, relu=relu)
    else:
        kern = functools.partial(_mm_bias_kernel, relu=relu)

    out = pl.pallas_call(
        kern,
        out_shape=jax.ShapeDtypeStruct((Mp, N), jnp.float32),
        grid_spec=pltpu.PrefetchScalarGridSpec(
            num_scalar_prefetch=0,
            grid=(Mp // tm, N // tn, Kp // tk),
            in_specs=in_specs,
            out_specs=pl.BlockSpec((tm, tn), lambda i, j, k: (i, j)),
        ),
        compiler_params=pltpu.CompilerParams(
            dimension_semantics=("parallel", "parallel", "arbitrary"),
            vmem_limit_bytes=_vmem_limit_bytes()),
    )(*operands)
    return out[:M]


# ----------------------------------------------------------------------------
# Conv + folded BatchNorm (+ residual) (+ ReLU)
# ----------------------------------------------------------------------------
def _im2col(x, kh, kw, stride, pad):
    """x: NHWC -> (N*OH*OW, kh*kw*C). Pure data movement (glue)."""
    # TODO(synk): im2col is still materialized in plain JAX; an in-kernel
    # tap-accumulating conv would avoid the KH*KW activation expansion.
    N, H, W, C = x.shape
    xp = jnp.pad(x, ((0, 0), (pad, pad), (pad, pad), (0, 0)))
    OH = (H + 2 * pad - kh) // stride + 1
    OW = (W + 2 * pad - kw) // stride + 1
    cols = []
    for dh in range(kh):
        for dw in range(kw):
            patch = jax.lax.slice(
                xp,
                (0, dh, dw, 0),
                (N, dh + (OH - 1) * stride + 1, dw + (OW - 1) * stride + 1, C),
                (1, stride, stride, 1))          # (N, OH, OW, C)
            cols.append(patch)
    col = jnp.concatenate(cols, axis=-1)         # (N, OH, OW, kh*kw*C)
    return col.reshape(N * OH * OW, kh * kw * C), OH, OW


def conv_bn(x, w, bnp, stride, pad, relu, residual=None, eps=1e-5):
    """Conv2d (torch-layout weight) with BN folded in; bias/res/ReLU fused."""
    OC, IC, KH, KW = w.shape
    gamma, beta, mean, var = bnp
    scale = gamma / jnp.sqrt(var + eps)                      # (OC,)
    bias = beta - mean * scale
    w_fold = w * scale[:, None, None, None]                  # fold BN scale
    w2 = jnp.transpose(w_fold, (2, 3, 1, 0)).reshape(KH * KW * IC, OC)

    col, OH, OW = _im2col(x, KH, KW, stride, pad)
    N = x.shape[0]
    res2 = None if residual is None else residual.reshape(N * OH * OW, OC)
    out = fused_matmul(col, w2, bias, residual=res2, relu=relu)
    return out.reshape(N, OH, OW, OC)


# ----------------------------------------------------------------------------
# MaxPool / global average pool / Linear
# ----------------------------------------------------------------------------
def _max9_kernel(*refs):
    o_ref = refs[-1]
    m = refs[0][...]
    for r in refs[1:-1]:
        m = jnp.maximum(m, r[...])
    o_ref[...] = m


def maxpool_3x3_s2_p1(x):
    """MaxPool2d(kernel=3, stride=2, padding=1) on NHWC."""
    N, H, W, C = x.shape
    neg = jnp.float32(jnp.finfo(jnp.float32).min)
    xp = jnp.pad(x, ((0, 0), (1, 1), (1, 1), (0, 0)), constant_values=neg)
    OH = (H + 2 - 3) // 2 + 1
    OW = (W + 2 - 3) // 2 + 1
    M = N * OH * OW
    wins = []
    for dh in range(3):
        for dw in range(3):
            patch = jax.lax.slice(
                xp, (0, dh, dw, 0),
                (N, dh + (OH - 1) * 2 + 1, dw + (OW - 1) * 2 + 1, C),
                (1, 2, 2, 1))
            wins.append(patch.reshape(M, C))

    Mp = _round_up(M, 8)
    tm = Mp if Mp <= 512 else 512
    Mp = _round_up(Mp, tm)
    wins = [jnp.pad(wv, ((0, Mp - M), (0, 0))) for wv in wins]

    out = pl.pallas_call(
        _max9_kernel,
        out_shape=jax.ShapeDtypeStruct((Mp, C), jnp.float32),
        grid_spec=pltpu.PrefetchScalarGridSpec(
            num_scalar_prefetch=0,
            grid=(Mp // tm,),
            in_specs=[pl.BlockSpec((tm, C), lambda i: (i, 0))] * 9,
            out_specs=pl.BlockSpec((tm, C), lambda i: (i, 0)),
        ),
        compiler_params=pltpu.CompilerParams(
            dimension_semantics=("parallel",),
            vmem_limit_bytes=_vmem_limit_bytes()),
    )(*wins)
    return out[:M].reshape(N, OH, OW, C)


def _mean_kernel(x_ref, o_ref):
    o_ref[...] = jnp.mean(x_ref[...], axis=1)


def global_avgpool(x):
    """AdaptiveAvgPool2d((1,1)) + flatten -> (N, C)."""
    N, H, W, C = x.shape
    xr = x.reshape(N, H * W, C)
    if C % 128 == 0:
        tc = 128
        return pl.pallas_call(
            _mean_kernel,
            out_shape=jax.ShapeDtypeStruct((N, C), jnp.float32),
            grid_spec=pltpu.PrefetchScalarGridSpec(
                num_scalar_prefetch=0,
                grid=(C // tc,),
                in_specs=[pl.BlockSpec((N, H * W, tc), lambda j: (0, 0, j))],
                out_specs=pl.BlockSpec((N, tc), lambda j: (0, j)),
            ),
            compiler_params=pltpu.CompilerParams(
                dimension_semantics=("parallel",),
                vmem_limit_bytes=_vmem_limit_bytes()),
        )(xr)
    # Fallback for non-lane-aligned channel counts (not hit by ResNet18).
    return pl.pallas_call(
        _mean_kernel,
        out_shape=jax.ShapeDtypeStruct((N, C), jnp.float32),
    )(xr)


def linear(x, w, b):
    """x: (N, Cin), w: (Cout, Cin) torch layout, b: (Cout,). Bias fused."""
    Cout, Cin = w.shape
    Np = _round_up(Cout, 128)                    # lane-dense output stores
    w_p = jnp.pad(jnp.transpose(w), ((0, 0), (0, Np - Cout)))   # (Cin, Np)
    b_p = jnp.pad(b, (0, Np - Cout))
    y = fused_matmul(x, w_p, b_p, relu=False)
    return y[:, :Cout]


# ----------------------------------------------------------------------------
# ResNet18 forward
# ----------------------------------------------------------------------------
def basic_block(x, p, stride):
    out = conv_bn(x, p["conv1"], p["bn1"], stride, 1, relu=True)
    if "down_conv" in p:
        idn = conv_bn(x, p["down_conv"], p["down_bn"], stride, 0, relu=False)
    else:
        idn = x
    # conv2 + BN2 + residual add + ReLU, all fused into one matmul epilogue.
    return conv_bn(out, p["conv2"], p["bn2"], 1, 1, relu=True, residual=idn)


def resnet18_forward(params, x_nchw):
    x = jnp.transpose(x_nchw.astype(jnp.float32), (0, 2, 3, 1))  # NCHW -> NHWC
    x = conv_bn(x, params["conv1"], params["bn1"], stride=2, pad=3, relu=True)
    x = maxpool_3x3_s2_p1(x)
    for li, layer in enumerate(params["layers"]):
        for bi, blk in enumerate(layer):
            stride = 2 if (li > 0 and bi == 0) else 1
            x = basic_block(x, blk, stride)
    x = global_avgpool(x)                        # (N, 512) == reshape(N, -1)
    return linear(x, params["fc_w"], params["fc_b"])


# ----------------------------------------------------------------------------
# Deterministic synthetic parameters
# ----------------------------------------------------------------------------
def _conv_w(key, oc, ic, k):
    fan_in = ic * k * k
    return jax.random.normal(key, (oc, ic, k, k), jnp.float32) / jnp.sqrt(fan_in)


def _bn_p(key, c):
    k = jax.random.split(key, 4)
    gamma = 1.0 + 0.1 * jax.random.normal(k[0], (c,), jnp.float32)
    beta = 0.1 * jax.random.normal(k[1], (c,), jnp.float32)
    mean = 0.1 * jax.random.normal(k[2], (c,), jnp.float32)
    var = jax.random.uniform(k[3], (c,), jnp.float32, minval=0.5, maxval=1.5)
    return (gamma, beta, mean, var)


def _block_p(key, cin, cout, downsample):
    ks = jax.random.split(key, 6)
    p = {"conv1": _conv_w(ks[0], cout, cin, 3), "bn1": _bn_p(ks[1], cout),
         "conv2": _conv_w(ks[2], cout, cout, 3), "bn2": _bn_p(ks[3], cout)}
    if downsample:
        p["down_conv"] = _conv_w(ks[4], cout, cin, 1)
        p["down_bn"] = _bn_p(ks[5], cout)
    return p


def init_resnet18(key, output_size):
    # TODO(synk): no pretrained-checkpoint loading; weights are synthetic.
    ks = jax.random.split(key, 8)
    params = {"conv1": _conv_w(ks[0], 64, 3, 7), "bn1": _bn_p(ks[1], 64)}
    layers = []
    cin = 64
    for i, cout in enumerate([64, 128, 256, 512]):
        kk = jax.random.split(ks[2 + i], 2)
        layers.append([
            _block_p(kk[0], cin, cout, downsample=(i > 0)),
            _block_p(kk[1], cout, cout, downsample=False),
        ])
        cin = cout
    params["layers"] = layers
    kf = jax.random.split(ks[6], 2)
    params["fc_w"] = jax.random.normal(kf[0], (output_size, 512),
                                       jnp.float32) / jnp.sqrt(512.0)
    params["fc_b"] = 0.1 * jax.random.normal(kf[1], (output_size,), jnp.float32)
    return params


if __name__ == "__main__":
    key = jax.random.PRNGKey(0)
    kp, kx = jax.random.split(key)
    output_size = 10
    params = init_resnet18(kp, output_size)
    x = jax.random.normal(kx, (2, 3, 32, 32), jnp.float32)   # small NCHW input

    fwd = jax.jit(resnet18_forward)
    y = fwd(params, x)
    jax.block_until_ready(y)
    assert y.shape == (2, output_size), y.shape
    assert bool(jnp.all(jnp.isfinite(y)))
    print("KERNEL_OK")
</pallas_src>

<mosaic_0001>
module attributes {stable_mosaic.version = 11 : i64} {
  func.func @_mm_bias_kernel(%arg0: i32, %arg1: i32, %arg2: i32, %arg3: memref<256x256xbf16, #tpu.memory_space<vmem>>, %arg4: memref<256x64xbf16, #tpu.memory_space<vmem>>, %arg5: memref<1x64xf32, #tpu.memory_space<vmem>>, %arg6: memref<256x64xf32, #tpu.memory_space<vmem>>) attributes {dimension_semantics = [#tpu.dimension_semantics<parallel>, #tpu.dimension_semantics<parallel>, #tpu.dimension_semantics<arbitrary>], iteration_bounds = array<i64: 2, 1, 1>, scalar_prefetch = 0 : i64, scratch_operands = 0 : i64, tpu.core_type = #tpu.core_type<tc>, window_params = [{transform_indices = @transform_0, window_bounds = array<i64: 256, 256>}, {transform_indices = @transform_1, window_bounds = array<i64: 256, 64>}, {transform_indices = @transform_2, window_bounds = array<i64: 1, 64>}, {transform_indices = @transform_3, window_bounds = array<i64: 256, 64>}]} {
    %c0_i32 = arith.constant 0 : i32
    %0 = arith.cmpi eq, %arg2, %c0_i32 : i32
    %1 = arith.extui %0 : i1 to i32
    %c0_i32_0 = arith.constant 0 : i32
    %2 = arith.cmpi ne, %1, %c0_i32_0 : i32
    scf.if %2 {
      %cst_10 = arith.constant 0.000000e+00 : f32
      %12 = vector.broadcast %cst_10 : f32 to vector<256x64xf32>
      %c0_11 = arith.constant 0 : index
      %c0_12 = arith.constant 0 : index
      %13 = vector.load %arg6[%c0_11, %c0_12] : memref<256x64xf32, #tpu.memory_space<vmem>>, vector<256x64xf32>
      tpu.vector_store %arg6[%c0_11, %c0_12], %12 {strides = array<i32>} : memref<256x64xf32, #tpu.memory_space<vmem>>, vector<256x64xf32>,
    } else {
    }
    %c0 = arith.constant 0 : index
    %c0_1 = arith.constant 0 : index
    %3 = vector.load %arg6[%c0, %c0_1] : memref<256x64xf32, #tpu.memory_space<vmem>>, vector<256x64xf32>
    %c0_2 = arith.constant 0 : index
    %c0_3 = arith.constant 0 : index
    %4 = vector.load %arg3[%c0_2, %c0_3] : memref<256x256xbf16, #tpu.memory_space<vmem>>, vector<256x256xbf16>
    %c0_4 = arith.constant 0 : index
    %c0_5 = arith.constant 0 : index
    %5 = vector.load %arg4[%c0_4, %c0_5] : memref<256x64xbf16, #tpu.memory_space<vmem>>, vector<256x64xbf16>
    %cst = arith.constant dense<0.000000e+00> : vector<256x64xf32>
    %6 = tpu.matmul %4, %5, %cst {dimension_numbers = #tpu.dot_dimension_numbers<[1], [0], [0], [1], [0, 0, 1, 1], [], []>} : vector<256x256xbf16>, vector<256x64xbf16>, vector<256x64xf32> -> vector<256x64xf32>
    %7 = arith.addf %3, %6 : vector<256x64xf32>
    %c0_6 = arith.constant 0 : index
    %c0_7 = arith.constant 0 : index
    %8 = vector.load %arg6[%c0_6, %c0_7] : memref<256x64xf32, #tpu.memory_space<vmem>>, vector<256x64xf32>
    tpu.vector_store %arg6[%c0_6, %c0_7], %7 {strides = array<i32>} : memref<256x64xf32, #tpu.memory_space<vmem>>, vector<256x64xf32>,
    %c0_i32_8 = arith.constant 0 : i32
    %9 = arith.cmpi eq, %arg2, %c0_i32_8 : i32
    %10 = arith.extui %9 : i1 to i32
    %c0_i32_9 = arith.constant 0 : i32
    %11 = arith.cmpi ne, %10, %c0_i32_9 : i32
    scf.if %11 {
      %c0_10 = arith.constant 0 : index
      %c0_11 = arith.constant 0 : index
      %12 = vector.load %arg6[%c0_10, %c0_11] : memref<256x64xf32, #tpu.memory_space<vmem>>, vector<256x64xf32>
      %c0_12 = arith.constant 0 : index
      %c0_13 = arith.constant 0 : index
      %13 = vector.load %arg5[%c0_12, %c0_13] : memref<1x64xf32, #tpu.memory_space<vmem>>, vector<1x64xf32>
      %14 = vector.broadcast %13 : vector<1x64xf32> to vector<256x64xf32>
      %15 = arith.addf %12, %14 : vector<256x64xf32>
      %cst_14 = arith.constant 0.000000e+00 : f32
      %16 = vector.broadcast %cst_14 : f32 to vector<256x64xf32>
      %17 = arith.maximumf %15, %16 : vector<256x64xf32>
      %c0_15 = arith.constant 0 : index
      %c0_16 = arith.constant 0 : index
      %18 = vector.load %arg6[%c0_15, %c0_16] : memref<256x64xf32, #tpu.memory_space<vmem>>, vector<256x64xf32>
      tpu.vector_store %arg6[%c0_15, %c0_16], %17 {strides = array<i32>} : memref<256x64xf32, #tpu.memory_space<vmem>>, vector<256x64xf32>,
    } else {
    }
    return
  }
  func.func @transform_0(%arg0: i32, %arg1: i32, %arg2: i32) -> (i32, i32) {
    %c0_i32 = arith.constant 0 : i32
    return %arg0, %arg2 : i32, i32
  }
  func.func @transform_1(%arg0: i32, %arg1: i32, %arg2: i32) -> (i32, i32) {
    %c0_i32 = arith.constant 0 : i32
    return %arg2, %arg1 : i32, i32
  }
  func.func @transform_2(%arg0: i32, %arg1: i32, %arg2: i32) -> (i32, i32) {
    %c0_i32 = arith.constant 0 : i32
    %c0_i32_0 = arith.constant 0 : i32
    return %c0_i32, %arg1 : i32, i32
  }
  func.func @transform_3(%arg0: i32, %arg1: i32, %arg2: i32) -> (i32, i32) {
    %c0_i32 = arith.constant 0 : i32
    return %arg0, %arg1 : i32, i32
  }
}

module attributes {stable_mosaic.version = 11 : i64} {
  func.func @_max9_kernel(%arg0: i32, %arg1: memref<128x64xf32, #tpu.memory_space<vmem>>, %arg2: memref<128x64xf32, #tpu.memory_space<vmem>>, %arg3: memref<128x64xf32, #tpu.memory_space<vmem>>, %arg4: memref<128x64xf32, #tpu.memory_space<vmem>>, %arg5: memref<128x64xf32, #tpu.memory_space<vmem>>, %arg6: memref<128x64xf32, #tpu.memory_space<vmem>>, %arg7: memref<128x64xf32, #tpu.memory_space<vmem>>, %arg8: memref<128x64xf32, #tpu.memory_space<vmem>>, %arg9: memref<128x64xf32, #tpu.memory_space<vmem>>, %arg10: memref<128x64xf32, #tpu.memory_space<vmem>>) attributes {dimension_semantics = [#tpu.dimension_semantics<parallel>], iteration_bounds = array<i64: 1>, scalar_prefetch = 0 : i64, scratch_operands = 0 : i64, tpu.core_type = #tpu.core_type<tc>, window_params = [{transform_indices = @transform_0, window_bounds = array<i64: 128, 64>}, {transform_indices = @transform_1, window_bounds = array<i64: 128, 64>}, {transform_indices = @transform_2, window_bounds = array<i64: 128, 64>}, {transform_indices = @transform_3, window_bounds = array<i64: 128, 64>}, {transform_indices = @transform_4, window_bounds = array<i64: 128, 64>}, {transform_indices = @transform_5, window_bounds = array<i64: 128, 64>}, {transform_indices = @transform_6, window_bounds = array<i64: 128, 64>}, {transform_indices = @transform_7, window_bounds = array<i64: 128, 64>}, {transform_indices = @transform_8, window_bounds = array<i64: 128, 64>}, {transform_indices = @transform_9, window_bounds = array<i64: 128, 64>}]} {
    %c0 = arith.constant 0 : index
    %c0_0 = arith.constant 0 : index
    %0 = vector.load %arg1[%c0, %c0_0] : memref<128x64xf32, #tpu.memory_space<vmem>>, vector<128x64xf32>
    %c0_1 = arith.constant 0 : index
    %c0_2 = arith.constant 0 : index
    %1 = vector.load %arg2[%c0_1, %c0_2] : memref<128x64xf32, #tpu.memory_space<vmem>>, vector<128x64xf32>
    %2 = arith.maximumf %0, %1 : vector<128x64xf32>
    %c0_3 = arith.constant 0 : index
    %c0_4 = arith.constant 0 : index
    %3 = vector.load %arg3[%c0_3, %c0_4] : memref<128x64xf32, #tpu.memory_space<vmem>>, vector<128x64xf32>
    %4 = arith.maximumf %2, %3 : vector<128x64xf32>
    %c0_5 = arith.constant 0 : index
    %c0_6 = arith.constant 0 : index
    %5 = vector.load %arg4[%c0_5, %c0_6] : memref<128x64xf32, #tpu.memory_space<vmem>>, vector<128x64xf32>
    %6 = arith.maximumf %4, %5 : vector<128x64xf32>
    %c0_7 = arith.constant 0 : index
    %c0_8 = arith.constant 0 : index
    %7 = vector.load %arg5[%c0_7, %c0_8] : memref<128x64xf32, #tpu.memory_space<vmem>>, vector<128x64xf32>
    %8 = arith.maximumf %6, %7 : vector<128x64xf32>
    %c0_9 = arith.constant 0 : index
    %c0_10 = arith.constant 0 : index
    %9 = vector.load %arg6[%c0_9, %c0_10] : memref<128x64xf32, #tpu.memory_space<vmem>>, vector<128x64xf32>
    %10 = arith.maximumf %8, %9 : vector<128x64xf32>
    %c0_11 = arith.constant 0 : index
    %c0_12 = arith.constant 0 : index
    %11 = vector.load %arg7[%c0_11, %c0_12] : memref<128x64xf32, #tpu.memory_space<vmem>>, vector<128x64xf32>
    %12 = arith.maximumf %10, %11 : vector<128x64xf32>
    %c0_13 = arith.constant 0 : index
    %c0_14 = arith.constant 0 : index
    %13 = vector.load %arg8[%c0_13, %c0_14] : memref<128x64xf32, #tpu.memory_space<vmem>>, vector<128x64xf32>
    %14 = arith.maximumf %12, %13 : vector<128x64xf32>
    %c0_15 = arith.constant 0 : index
    %c0_16 = arith.constant 0 : index
    %15 = vector.load %arg9[%c0_15, %c0_16] : memref<128x64xf32, #tpu.memory_space<vmem>>, vector<128x64xf32>
    %16 = arith.maximumf %14, %15 : vector<128x64xf32>
    %c0_17 = arith.constant 0 : index
    %c0_18 = arith.constant 0 : index
    %17 = vector.load %arg10[%c0_17, %c0_18] : memref<128x64xf32, #tpu.memory_space<vmem>>, vector<128x64xf32>
    tpu.vector_store %arg10[%c0_17, %c0_18], %16 {strides = array<i32>} : memref<128x64xf32, #tpu.memory_space<vmem>>, vector<128x64xf32>,
    return
  }
  func.func @transform_0(%arg0: i32) -> (i32, i32) {
    %c0_i32 = arith.constant 0 : i32
    %c0_i32_0 = arith.constant 0 : i32
    return %arg0, %c0_i32 : i32, i32
  }
  func.func @transform_1(%arg0: i32) -> (i32, i32) {
    %c0_i32 = arith.constant 0 : i32
    %c0_i32_0 = arith.constant 0 : i32
    return %arg0, %c0_i32 : i32, i32
  }
  func.func @transform_2(%arg0: i32) -> (i32, i32) {
    %c0_i32 = arith.constant 0 : i32
    %c0_i32_0 = arith.constant 0 : i32
    return %arg0, %c0_i32 : i32, i32
  }
  func.func @transform_3(%arg0: i32) -> (i32, i32) {
    %c0_i32 = arith.constant 0 : i32
    %c0_i32_0 = arith.constant 0 : i32
    return %arg0, %c0_i32 : i32, i32
  }
  func.func @transform_4(%arg0: i32) -> (i32, i32) {
    %c0_i32 = arith.constant 0 : i32
    %c0_i32_0 = arith.constant 0 : i32
    return %arg0, %c0_i32 : i32, i32
  }
  func.func @transform_5(%arg0: i32) -> (i32, i32) {
    %c0_i32 = arith.constant 0 : i32
    %c0_i32_0 = arith.constant 0 : i32
    return %arg0, %c0_i32 : i32, i32
  }
  func.func @transform_6(%arg0: i32) -> (i32, i32) {
    %c0_i32 = arith.constant 0 : i32
    %c0_i32_0 = arith.constant 0 : i32
    return %arg0, %c0_i32 : i32, i32
  }
  func.func @transform_7(%arg0: i32) -> (i32, i32) {
    %c0_i32 = arith.constant 0 : i32
    %c0_i32_0 = arith.constant 0 : i32
    return %arg0, %c0_i32 : i32, i32
  }
  func.func @transform_8(%arg0: i32) -> (i32, i32) {
    %c0_i32 = arith.constant 0 : i32
    %c0_i32_0 = arith.constant 0 : i32
    return %arg0, %c0_i32 : i32, i32
  }
  func.func @transform_9(%arg0: i32) -> (i32, i32) {
    %c0_i32 = arith.constant 0 : i32
    %c0_i32_0 = arith.constant 0 : i32
    return %arg0, %c0_i32 : i32, i32
  }
}

module attributes {stable_mosaic.version = 11 : i64} {
  func.func @_mm_bias_res_kernel(%arg0: i32, %arg1: i32, %arg2: i32, %arg3: memref<128x128xbf16, #tpu.memory_space<vmem>>, %arg4: memref<128x64xbf16, #tpu.memory_space<vmem>>, %arg5: memref<1x64xf32, #tpu.memory_space<vmem>>, %arg6: memref<128x64xf32, #tpu.memory_space<vmem>>, %arg7: memref<128x64xf32, #tpu.memory_space<vmem>>) attributes {dimension_semantics = [#tpu.dimension_semantics<parallel>, #tpu.dimension_semantics<parallel>, #tpu.dimension_semantics<arbitrary>], iteration_bounds = array<i64: 1, 1, 5>, scalar_prefetch = 0 : i64, scratch_operands = 0 : i64, tpu.core_type = #tpu.core_type<tc>, window_params = [{transform_indices = @transform_0, window_bounds = array<i64: 128, 128>}, {transform_indices = @transform_1, window_bounds = array<i64: 128, 64>}, {transform_indices = @transform_2, window_bounds = array<i64: 1, 64>}, {transform_indices = @transform_3, window_bounds = array<i64: 128, 64>}, {transform_indices = @transform_4, window_bounds = array<i64: 128, 64>}]} {
    %c0_i32 = arith.constant 0 : i32
    %0 = arith.cmpi eq, %arg2, %c0_i32 : i32
    %1 = arith.extui %0 : i1 to i32
    %c0_i32_0 = arith.constant 0 : i32
    %2 = arith.cmpi ne, %1, %c0_i32_0 : i32
    scf.if %2 {
      %cst_9 = arith.constant 0.000000e+00 : f32
      %12 = vector.broadcast %cst_9 : f32 to vector<128x64xf32>
      %c0_10 = arith.constant 0 : index
      %c0_11 = arith.constant 0 : index
      %13 = vector.load %arg7[%c0_10, %c0_11] : memref<128x64xf32, #tpu.memory_space<vmem>>, vector<128x64xf32>
      tpu.vector_store %arg7[%c0_10, %c0_11], %12 {strides = array<i32>} : memref<128x64xf32, #tpu.memory_space<vmem>>, vector<128x64xf32>,
    } else {
    }
    %c0 = arith.constant 0 : index
    %c0_1 = arith.constant 0 : index
    %3 = vector.load %arg7[%c0, %c0_1] : memref<128x64xf32, #tpu.memory_space<vmem>>, vector<128x64xf32>
    %c0_2 = arith.constant 0 : index
    %c0_3 = arith.constant 0 : index
    %4 = vector.load %arg3[%c0_2, %c0_3] : memref<128x128xbf16, #tpu.memory_space<vmem>>, vector<128x128xbf16>
    %c0_4 = arith.constant 0 : index
    %c0_5 = arith.constant 0 : index
    %5 = vector.load %arg4[%c0_4, %c0_5] : memref<128x64xbf16, #tpu.memory_space<vmem>>, vector<128x64xbf16>
    %cst = arith.constant dense<0.000000e+00> : vector<128x64xf32>
    %6 = tpu.matmul %4, %5, %cst {dimension_numbers = #tpu.dot_dimension_numbers<[1], [0], [0], [1], [0, 0, 1, 1], [], []>} : vector<128x128xbf16>, vector<128x64xbf16>, vector<128x64xf32> -> vector<128x64xf32>
    %7 = arith.addf %3, %6 : vector<128x64xf32>
    %c0_6 = arith.constant 0 : index
    %c0_7 = arith.constant 0 : index
    %8 = vector.load %arg7[%c0_6, %c0_7] : memref<128x64xf32, #tpu.memory_space<vmem>>, vector<128x64xf32>
    tpu.vector_store %arg7[%c0_6, %c0_7], %7 {strides = array<i32>} : memref<128x64xf32, #tpu.memory_space<vmem>>, vector<128x64xf32>,
    %c4_i32 = arith.constant 4 : i32
    %9 = arith.cmpi eq, %arg2, %c4_i32 : i32
    %10 = arith.extui %9 : i1 to i32
    %c0_i32_8 = arith.constant 0 : i32
    %11 = arith.cmpi ne, %10, %c0_i32_8 : i32
    scf.if %11 {
      %c0_9 = arith.constant 0 : index
      %c0_10 = arith.constant 0 : index
      %12 = vector.load %arg7[%c0_9, %c0_10] : memref<128x64xf32, #tpu.memory_space<vmem>>, vector<128x64xf32>
      %c0_11 = arith.constant 0 : index
      %c0_12 = arith.constant 0 : index
      %13 = vector.load %arg5[%c0_11, %c0_12] : memref<1x64xf32, #tpu.memory_space<vmem>>, vector<1x64xf32>
      %14 = vector.broadcast %13 : vector<1x64xf32> to vector<128x64xf32>
      %15 = arith.addf %12, %14 : vector<128x64xf32>
      %c0_13 = arith.constant 0 : index
      %c0_14 = arith.constant 0 : index
      %16 = vector.load %arg6[%c0_13, %c0_14] : memref<128x64xf32, #tpu.memory_space<vmem>>, vector<128x64xf32>
      %17 = arith.addf %15, %16 : vector<128x64xf32>
      %cst_15 = arith.constant 0.000000e+00 : f32
      %18 = vector.broadcast %cst_15 : f32 to vector<128x64xf32>
      %19 = arith.maximumf %17, %18 : vector<128x64xf32>
      %c0_16 = arith.constant 0 : index
      %c0_17 = arith.constant 0 : index
      %20 = vector.load %arg7[%c0_16, %c0_17] : memref<128x64xf32, #tpu.memory_space<vmem>>, vector<128x64xf32>
      tpu.vector_store %arg7[%c0_16, %c0_17], %19 {strides = array<i32>} : memref<128x64xf32, #tpu.memory_space<vmem>>, vector<128x64xf32>,
    } else {
    }
    return
  }
  func.func @transform_0(%arg0: i32, %arg1: i32, %arg2: i32) -> (i32, i32) {
    %c0_i32 = arith.constant 0 : i32
    return %arg0, %arg2 : i32, i32
  }
  func.func @transform_1(%arg0: i32, %arg1: i32, %arg2: i32) -> (i32, i32) {
    %c0_i32 = arith.constant 0 : i32
    return %arg2, %arg1 : i32, i32
  }
  func.func @transform_2(%arg0: i32, %arg1: i32, %arg2: i32) -> (i32, i32) {
    %c0_i32 = arith.constant 0 : i32
    %c0_i32_0 = arith.constant 0 : i32
    return %c0_i32, %arg1 : i32, i32
  }
  func.func @transform_3(%arg0: i32, %arg1: i32, %arg2: i32) -> (i32, i32) {
    %c0_i32 = arith.constant 0 : i32
    return %arg0, %arg1 : i32, i32
  }
  func.func @transform_4(%arg0: i32, %arg1: i32, %arg2: i32) -> (i32, i32) {
    %c0_i32 = arith.constant 0 : i32
    return %arg0, %arg1 : i32, i32
  }
}

module attributes {stable_mosaic.version = 11 : i64} {
  func.func @_mm_bias_kernel(%arg0: i32, %arg1: i32, %arg2: i32, %arg3: memref<128x128xbf16, #tpu.memory_space<vmem>>, %arg4: memref<128x64xbf16, #tpu.memory_space<vmem>>, %arg5: memref<1x64xf32, #tpu.memory_space<vmem>>, %arg6: memref<128x64xf32, #tpu.memory_space<vmem>>) attributes {dimension_semantics = [#tpu.dimension_semantics<parallel>, #tpu.dimension_semantics<parallel>, #tpu.dimension_semantics<arbitrary>], iteration_bounds = array<i64: 1, 1, 5>, scalar_prefetch = 0 : i64, scratch_operands = 0 : i64, tpu.core_type = #tpu.core_type<tc>, window_params = [{transform_indices = @transform_0, window_bounds = array<i64: 128, 128>}, {transform_indices = @transform_1, window_bounds = array<i64: 128, 64>}, {transform_indices = @transform_2, window_bounds = array<i64: 1, 64>}, {transform_indices = @transform_3, window_bounds = array<i64: 128, 64>}]} {
    %c0_i32 = arith.constant 0 : i32
    %0 = arith.cmpi eq, %arg2, %c0_i32 : i32
    %1 = arith.extui %0 : i1 to i32
    %c0_i32_0 = arith.constant 0 : i32
    %2 = arith.cmpi ne, %1, %c0_i32_0 : i32
    scf.if %2 {
      %cst_9 = arith.constant 0.000000e+00 : f32
      %12 = vector.broadcast %cst_9 : f32 to vector<128x64xf32>
      %c0_10 = arith.constant 0 : index
      %c0_11 = arith.constant 0 : index
      %13 = vector.load %arg6[%c0_10, %c0_11] : memref<128x64xf32, #tpu.memory_space<vmem>>, vector<128x64xf32>
      tpu.vector_store %arg6[%c0_10, %c0_11], %12 {strides = array<i32>} : memref<128x64xf32, #tpu.memory_space<vmem>>, vector<128x64xf32>,
    } else {
    }
    %c0 = arith.constant 0 : index
    %c0_1 = arith.constant 0 : index
    %3 = vector.load %arg6[%c0, %c0_1] : memref<128x64xf32, #tpu.memory_space<vmem>>, vector<128x64xf32>
    %c0_2 = arith.constant 0 : index
    %c0_3 = arith.constant 0 : index
    %4 = vector.load %arg3[%c0_2, %c0_3] : memref<128x128xbf16, #tpu.memory_space<vmem>>, vector<128x128xbf16>
    %c0_4 = arith.constant 0 : index
    %c0_5 = arith.constant 0 : index
    %5 = vector.load %arg4[%c0_4, %c0_5] : memref<128x64xbf16, #tpu.memory_space<vmem>>, vector<128x64xbf16>
    %cst = arith.constant dense<0.000000e+00> : vector<128x64xf32>
    %6 = tpu.matmul %4, %5, %cst {dimension_numbers = #tpu.dot_dimension_numbers<[1], [0], [0], [1], [0, 0, 1, 1], [], []>} : vector<128x128xbf16>, vector<128x64xbf16>, vector<128x64xf32> -> vector<128x64xf32>
    %7 = arith.addf %3, %6 : vector<128x64xf32>
    %c0_6 = arith.constant 0 : index
    %c0_7 = arith.constant 0 : index
    %8 = vector.load %arg6[%c0_6, %c0_7] : memref<128x64xf32, #tpu.memory_space<vmem>>, vector<128x64xf32>
    tpu.vector_store %arg6[%c0_6, %c0_7], %7 {strides = array<i32>} : memref<128x64xf32, #tpu.memory_space<vmem>>, vector<128x64xf32>,
    %c4_i32 = arith.constant 4 : i32
    %9 = arith.cmpi eq, %arg2, %c4_i32 : i32
    %10 = arith.extui %9 : i1 to i32
    %c0_i32_8 = arith.constant 0 : i32
    %11 = arith.cmpi ne, %10, %c0_i32_8 : i32
    scf.if %11 {
      %c0_9 = arith.constant 0 : index
      %c0_10 = arith.constant 0 : index
      %12 = vector.load %arg6[%c0_9, %c0_10] : memref<128x64xf32, #tpu.memory_space<vmem>>, vector<128x64xf32>
      %c0_11 = arith.constant 0 : index
      %c0_12 = arith.constant 0 : index
      %13 = vector.load %arg5[%c0_11, %c0_12] : memref<1x64xf32, #tpu.memory_space<vmem>>, vector<1x64xf32>
      %14 = vector.broadcast %13 : vector<1x64xf32> to vector<128x64xf32>
      %15 = arith.addf %12, %14 : vector<128x64xf32>
      %cst_13 = arith.constant 0.000000e+00 : f32
      %16 = vector.broadcast %cst_13 : f32 to vector<128x64xf32>
      %17 = arith.maximumf %15, %16 : vector<128x64xf32>
      %c0_14 = arith.constant 0 : index
      %c0_15 = arith.constant 0 : index
      %18 = vector.load %arg6[%c0_14, %c0_15] : memref<128x64xf32, #tpu.memory_space<vmem>>, vector<128x64xf32>
      tpu.vector_store %arg6[%c0_14, %c0_15], %17 {strides = array<i32>} : memref<128x64xf32, #tpu.memory_space<vmem>>, vector<128x64xf32>,
    } else {
    }
    return
  }
  func.func @transform_0(%arg0: i32, %arg1: i32, %arg2: i32) -> (i32, i32) {
    %c0_i32 = arith.constant 0 : i32
    return %arg0, %arg2 : i32, i32
  }
  func.func @transform_1(%arg0: i32, %arg1: i32, %arg2: i32) -> (i32, i32) {
    %c0_i32 = arith.constant 0 : i32
    return %arg2, %arg1 : i32, i32
  }
  func.func @transform_2(%arg0: i32, %arg1: i32, %arg2: i32) -> (i32, i32) {
    %c0_i32 = arith.constant 0 : i32
    %c0_i32_0 = arith.constant 0 : i32
    return %c0_i32, %arg1 : i32, i32
  }
  func.func @transform_3(%arg0: i32, %arg1: i32, %arg2: i32) -> (i32, i32) {
    %c0_i32 = arith.constant 0 : i32
    return %arg0, %arg1 : i32, i32
  }
}

module attributes {stable_mosaic.version = 11 : i64} {
  func.func @_mm_bias_kernel(%arg0: i32, %arg1: i32, %arg2: i32, %arg3: memref<32x128xbf16, #tpu.memory_space<vmem>>, %arg4: memref<128x128xbf16, #tpu.memory_space<vmem>>, %arg5: memref<1x128xf32, #tpu.memory_space<vmem>>, %arg6: memref<32x128xf32, #tpu.memory_space<vmem>>) attributes {dimension_semantics = [#tpu.dimension_semantics<parallel>, #tpu.dimension_semantics<parallel>, #tpu.dimension_semantics<arbitrary>], iteration_bounds = array<i64: 1, 1, 5>, scalar_prefetch = 0 : i64, scratch_operands = 0 : i64, tpu.core_type = #tpu.core_type<tc>, window_params = [{transform_indices = @transform_0, window_bounds = array<i64: 32, 128>}, {transform_indices = @transform_1, window_bounds = array<i64: 128, 128>}, {transform_indices = @transform_2, window_bounds = array<i64: 1, 128>}, {transform_indices = @transform_3, window_bounds = array<i64: 32, 128>}]} {
    %c0_i32 = arith.constant 0 : i32
    %0 = arith.cmpi eq, %arg2, %c0_i32 : i32
    %1 = arith.extui %0 : i1 to i32
    %c0_i32_0 = arith.constant 0 : i32
    %2 = arith.cmpi ne, %1, %c0_i32_0 : i32
    scf.if %2 {
      %cst_9 = arith.constant 0.000000e+00 : f32
      %12 = vector.broadcast %cst_9 : f32 to vector<32x128xf32>
      %c0_10 = arith.constant 0 : index
      %c0_11 = arith.constant 0 : index
      %13 = vector.load %arg6[%c0_10, %c0_11] : memref<32x128xf32, #tpu.memory_space<vmem>>, vector<32x128xf32>
      tpu.vector_store %arg6[%c0_10, %c0_11], %12 {strides = array<i32>} : memref<32x128xf32, #tpu.memory_space<vmem>>, vector<32x128xf32>,
    } else {
    }
    %c0 = arith.constant 0 : index
    %c0_1 = arith.constant 0 : index
    %3 = vector.load %arg6[%c0, %c0_1] : memref<32x128xf32, #tpu.memory_space<vmem>>, vector<32x128xf32>
    %c0_2 = arith.constant 0 : index
    %c0_3 = arith.constant 0 : index
    %4 = vector.load %arg3[%c0_2, %c0_3] : memref<32x128xbf16, #tpu.memory_space<vmem>>, vector<32x128xbf16>
    %c0_4 = arith.constant 0 : index
    %c0_5 = arith.constant 0 : index
    %5 = vector.load %arg4[%c0_4, %c0_5] : memref<128x128xbf16, #tpu.memory_space<vmem>>, vector<128x128xbf16>
    %cst = arith.constant dense<0.000000e+00> : vector<32x128xf32>
    %6 = tpu.matmul %4, %5, %cst {dimension_numbers = #tpu.dot_dimension_numbers<[1], [0], [0], [1], [0, 0, 1, 1], [], []>} : vector<32x128xbf16>, vector<128x128xbf16>, vector<32x128xf32> -> vector<32x128xf32>
    %7 = arith.addf %3, %6 : vector<32x128xf32>
    %c0_6 = arith.constant 0 : index
    %c0_7 = arith.constant 0 : index
    %8 = vector.load %arg6[%c0_6, %c0_7] : memref<32x128xf32, #tpu.memory_space<vmem>>, vector<32x128xf32>
    tpu.vector_store %arg6[%c0_6, %c0_7], %7 {strides = array<i32>} : memref<32x128xf32, #tpu.memory_space<vmem>>, vector<32x128xf32>,
    %c4_i32 = arith.constant 4 : i32
    %9 = arith.cmpi eq, %arg2, %c4_i32 : i32
    %10 = arith.extui %9 : i1 to i32
    %c0_i32_8 = arith.constant 0 : i32
    %11 = arith.cmpi ne, %10, %c0_i32_8 : i32
    scf.if %11 {
      %c0_9 = arith.constant 0 : index
      %c0_10 = arith.constant 0 : index
      %12 = vector.load %arg6[%c0_9, %c0_10] : memref<32x128xf32, #tpu.memory_space<vmem>>, vector<32x128xf32>
      %c0_11 = arith.constant 0 : index
      %c0_12 = arith.constant 0 : index
      %13 = vector.load %arg5[%c0_11, %c0_12] : memref<1x128xf32, #tpu.memory_space<vmem>>, vector<1x128xf32>
      %14 = vector.broadcast %13 : vector<1x128xf32> to vector<32x128xf32>
      %15 = arith.addf %12, %14 : vector<32x128xf32>
      %cst_13 = arith.constant 0.000000e+00 : f32
      %16 = vector.broadcast %cst_13 : f32 to vector<32x128xf32>
      %17 = arith.maximumf %15, %16 : vector<32x128xf32>
      %c0_14 = arith.constant 0 : index
      %c0_15 = arith.constant 0 : index
      %18 = vector.load %arg6[%c0_14, %c0_15] : memref<32x128xf32, #tpu.memory_space<vmem>>, vector<32x128xf32>
      tpu.vector_store %arg6[%c0_14, %c0_15], %17 {strides = array<i32>} : memref<32x128xf32, #tpu.memory_space<vmem>>, vector<32x128xf32>,
    } else {
    }
    return
  }
  func.func @transform_0(%arg0: i32, %arg1: i32, %arg2: i32) -> (i32, i32) {
    %c0_i32 = arith.constant 0 : i32
    return %arg0, %arg2 : i32, i32
  }
  func.func @transform_1(%arg0: i32, %arg1: i32, %arg2: i32) -> (i32, i32) {
    %c0_i32 = arith.constant 0 : i32
    return %arg2, %arg1 : i32, i32
  }
  func.func @transform_2(%arg0: i32, %arg1: i32, %arg2: i32) -> (i32, i32) {
    %c0_i32 = arith.constant 0 : i32
    %c0_i32_0 = arith.constant 0 : i32
    return %c0_i32, %arg1 : i32, i32
  }
  func.func @transform_3(%arg0: i32, %arg1: i32, %arg2: i32) -> (i32, i32) {
    %c0_i32 = arith.constant 0 : i32
    return %arg0, %arg1 : i32, i32
  }
}

module attributes {stable_mosaic.version = 11 : i64} {
  func.func @_mm_bias_kernel(%arg0: i32, %arg1: i32, %arg2: i32, %arg3: memref<32x128xbf16, #tpu.memory_space<vmem>>, %arg4: memref<128x128xbf16, #tpu.memory_space<vmem>>, %arg5: memref<1x128xf32, #tpu.memory_space<vmem>>, %arg6: memref<32x128xf32, #tpu.memory_space<vmem>>) attributes {dimension_semantics = [#tpu.dimension_semantics<parallel>, #tpu.dimension_semantics<parallel>, #tpu.dimension_semantics<arbitrary>], iteration_bounds = array<i64: 1, 1, 1>, scalar_prefetch = 0 : i64, scratch_operands = 0 : i64, tpu.core_type = #tpu.core_type<tc>, window_params = [{transform_indices = @transform_0, window_bounds = array<i64: 32, 128>}, {transform_indices = @transform_1, window_bounds = array<i64: 128, 128>}, {transform_indices = @transform_2, window_bounds = array<i64: 1, 128>}, {transform_indices = @transform_3, window_bounds = array<i64: 32, 128>}]} {
    %c0_i32 = arith.constant 0 : i32
    %0 = arith.cmpi eq, %arg2, %c0_i32 : i32
    %1 = arith.extui %0 : i1 to i32
    %c0_i32_0 = arith.constant 0 : i32
    %2 = arith.cmpi ne, %1, %c0_i32_0 : i32
    scf.if %2 {
      %cst_10 = arith.constant 0.000000e+00 : f32
      %12 = vector.broadcast %cst_10 : f32 to vector<32x128xf32>
      %c0_11 = arith.constant 0 : index
      %c0_12 = arith.constant 0 : index
      %13 = vector.load %arg6[%c0_11, %c0_12] : memref<32x128xf32, #tpu.memory_space<vmem>>, vector<32x128xf32>
      tpu.vector_store %arg6[%c0_11, %c0_12], %12 {strides = array<i32>} : memref<32x128xf32, #tpu.memory_space<vmem>>, vector<32x128xf32>,
    } else {
    }
    %c0 = arith.constant 0 : index
    %c0_1 = arith.constant 0 : index
    %3 = vector.load %arg6[%c0, %c0_1] : memref<32x128xf32, #tpu.memory_space<vmem>>, vector<32x128xf32>
    %c0_2 = arith.constant 0 : index
    %c0_3 = arith.constant 0 : index
    %4 = vector.load %arg3[%c0_2, %c0_3] : memref<32x128xbf16, #tpu.memory_space<vmem>>, vector<32x128xbf16>
    %c0_4 = arith.constant 0 : index
    %c0_5 = arith.constant 0 : index
    %5 = vector.load %arg4[%c0_4, %c0_5] : memref<128x128xbf16, #tpu.memory_space<vmem>>, vector<128x128xbf16>
    %cst = arith.constant dense<0.000000e+00> : vector<32x128xf32>
    %6 = tpu.matmul %4, %5, %cst {dimension_numbers = #tpu.dot_dimension_numbers<[1], [0], [0], [1], [0, 0, 1, 1], [], []>} : vector<32x128xbf16>, vector<128x128xbf16>, vector<32x128xf32> -> vector<32x128xf32>
    %7 = arith.addf %3, %6 : vector<32x128xf32>
    %c0_6 = arith.constant 0 : index
    %c0_7 = arith.constant 0 : index
    %8 = vector.load %arg6[%c0_6, %c0_7] : memref<32x128xf32, #tpu.memory_space<vmem>>, vector<32x128xf32>
    tpu.vector_store %arg6[%c0_6, %c0_7], %7 {strides = array<i32>} : memref<32x128xf32, #tpu.memory_space<vmem>>, vector<32x128xf32>,
    %c0_i32_8 = arith.constant 0 : i32
    %9 = arith.cmpi eq, %arg2, %c0_i32_8 : i32
    %10 = arith.extui %9 : i1 to i32
    %c0_i32_9 = arith.constant 0 : i32
    %11 = arith.cmpi ne, %10, %c0_i32_9 : i32
    scf.if %11 {
      %c0_10 = arith.constant 0 : index
      %c0_11 = arith.constant 0 : index
      %12 = vector.load %arg6[%c0_10, %c0_11] : memref<32x128xf32, #tpu.memory_space<vmem>>, vector<32x128xf32>
      %c0_12 = arith.constant 0 : index
      %c0_13 = arith.constant 0 : index
      %13 = vector.load %arg5[%c0_12, %c0_13] : memref<1x128xf32, #tpu.memory_space<vmem>>, vector<1x128xf32>
      %14 = vector.broadcast %13 : vector<1x128xf32> to vector<32x128xf32>
      %15 = arith.addf %12, %14 : vector<32x128xf32>
      %c0_14 = arith.constant 0 : index
      %c0_15 = arith.constant 0 : index
      %16 = vector.load %arg6[%c0_14, %c0_15] : memref<32x128xf32, #tpu.memory_space<vmem>>, vector<32x128xf32>
      tpu.vector_store %arg6[%c0_14, %c0_15], %15 {strides = array<i32>} : memref<32x128xf32, #tpu.memory_space<vmem>>, vector<32x128xf32>,
    } else {
    }
    return
  }
  func.func @transform_0(%arg0: i32, %arg1: i32, %arg2: i32) -> (i32, i32) {
    %c0_i32 = arith.constant 0 : i32
    return %arg0, %arg2 : i32, i32
  }
  func.func @transform_1(%arg0: i32, %arg1: i32, %arg2: i32) -> (i32, i32) {
    %c0_i32 = arith.constant 0 : i32
    return %arg2, %arg1 : i32, i32
  }
  func.func @transform_2(%arg0: i32, %arg1: i32, %arg2: i32) -> (i32, i32) {
    %c0_i32 = arith.constant 0 : i32
    %c0_i32_0 = arith.constant 0 : i32
    return %c0_i32, %arg1 : i32, i32
  }
  func.func @transform_3(%arg0: i32, %arg1: i32, %arg2: i32) -> (i32, i32) {
    %c0_i32 = arith.constant 0 : i32
    return %arg0, %arg1 : i32, i32
  }
}

module attributes {stable_mosaic.version = 11 : i64} {
  func.func @_mm_bias_res_kernel(%arg0: i32, %arg1: i32, %arg2: i32, %arg3: memref<32x384xbf16, #tpu.memory_space<vmem>>, %arg4: memref<384x128xbf16, #tpu.memory_space<vmem>>, %arg5: memref<1x128xf32, #tpu.memory_space<vmem>>, %arg6: memref<32x128xf32, #tpu.memory_space<vmem>>, %arg7: memref<32x128xf32, #tpu.memory_space<vmem>>) attributes {dimension_semantics = [#tpu.dimension_semantics<parallel>, #tpu.dimension_semantics<parallel>, #tpu.dimension_semantics<arbitrary>], iteration_bounds = array<i64: 1, 1, 3>, scalar_prefetch = 0 : i64, scratch_operands = 0 : i64, tpu.core_type = #tpu.core_type<tc>, window_params = [{transform_indices = @transform_0, window_bounds = array<i64: 32, 384>}, {transform_indices = @transform_1, window_bounds = array<i64: 384, 128>}, {transform_indices = @transform_2, window_bounds = array<i64: 1, 128>}, {transform_indices = @transform_3, window_bounds = array<i64: 32, 128>}, {transform_indices = @transform_4, window_bounds = array<i64: 32, 128>}]} {
    %c0_i32 = arith.constant 0 : i32
    %0 = arith.cmpi eq, %arg2, %c0_i32 : i32
    %1 = arith.extui %0 : i1 to i32
    %c0_i32_0 = arith.constant 0 : i32
    %2 = arith.cmpi ne, %1, %c0_i32_0 : i32
    scf.if %2 {
      %cst_9 = arith.constant 0.000000e+00 : f32
      %12 = vector.broadcast %cst_9 : f32 to vector<32x128xf32>
      %c0_10 = arith.constant 0 : index
      %c0_11 = arith.constant 0 : index
      %13 = vector.load %arg7[%c0_10, %c0_11] : memref<32x128xf32, #tpu.memory_space<vmem>>, vector<32x128xf32>
      tpu.vector_store %arg7[%c0_10, %c0_11], %12 {strides = array<i32>} : memref<32x128xf32, #tpu.memory_space<vmem>>, vector<32x128xf32>,
    } else {
    }
    %c0 = arith.constant 0 : index
    %c0_1 = arith.constant 0 : index
    %3 = vector.load %arg7[%c0, %c0_1] : memref<32x128xf32, #tpu.memory_space<vmem>>, vector<32x128xf32>
    %c0_2 = arith.constant 0 : index
    %c0_3 = arith.constant 0 : index
    %4 = vector.load %arg3[%c0_2, %c0_3] : memref<32x384xbf16, #tpu.memory_space<vmem>>, vector<32x384xbf16>
    %c0_4 = arith.constant 0 : index
    %c0_5 = arith.constant 0 : index
    %5 = vector.load %arg4[%c0_4, %c0_5] : memref<384x128xbf16, #tpu.memory_space<vmem>>, vector<384x128xbf16>
    %cst = arith.constant dense<0.000000e+00> : vector<32x128xf32>
    %6 = tpu.matmul %4, %5, %cst {dimension_numbers = #tpu.dot_dimension_numbers<[1], [0], [0], [1], [0, 0, 1, 1], [], []>} : vector<32x384xbf16>, vector<384x128xbf16>, vector<32x128xf32> -> vector<32x128xf32>
    %7 = arith.addf %3, %6 : vector<32x128xf32>
    %c0_6 = arith.constant 0 : index
    %c0_7 = arith.constant 0 : index
    %8 = vector.load %arg7[%c0_6, %c0_7] : memref<32x128xf32, #tpu.memory_space<vmem>>, vector<32x128xf32>
    tpu.vector_store %arg7[%c0_6, %c0_7], %7 {strides = array<i32>} : memref<32x128xf32, #tpu.memory_space<vmem>>, vector<32x128xf32>,
    %c2_i32 = arith.constant 2 : i32
    %9 = arith.cmpi eq, %arg2, %c2_i32 : i32
    %10 = arith.extui %9 : i1 to i32
    %c0_i32_8 = arith.constant 0 : i32
    %11 = arith.cmpi ne, %10, %c0_i32_8 : i32
    scf.if %11 {
      %c0_9 = arith.constant 0 : index
      %c0_10 = arith.constant 0 : index
      %12 = vector.load %arg7[%c0_9, %c0_10] : memref<32x128xf32, #tpu.memory_space<vmem>>, vector<32x128xf32>
      %c0_11 = arith.constant 0 : index
      %c0_12 = arith.constant 0 : index
      %13 = vector.load %arg5[%c0_11, %c0_12] : memref<1x128xf32, #tpu.memory_space<vmem>>, vector<1x128xf32>
      %14 = vector.broadcast %13 : vector<1x128xf32> to vector<32x128xf32>
      %15 = arith.addf %12, %14 : vector<32x128xf32>
      %c0_13 = arith.constant 0 : index
      %c0_14 = arith.constant 0 : index
      %16 = vector.load %arg6[%c0_13, %c0_14] : memref<32x128xf32, #tpu.memory_space<vmem>>, vector<32x128xf32>
      %17 = arith.addf %15, %16 : vector<32x128xf32>
      %cst_15 = arith.constant 0.000000e+00 : f32
      %18 = vector.broadcast %cst_15 : f32 to vector<32x128xf32>
      %19 = arith.maximumf %17, %18 : vector<32x128xf32>
      %c0_16 = arith.constant 0 : index
      %c0_17 = arith.constant 0 : index
      %20 = vector.load %arg7[%c0_16, %c0_17] : memref<32x128xf32, #tpu.memory_space<vmem>>, vector<32x128xf32>
      tpu.vector_store %arg7[%c0_16, %c0_17], %19 {strides = array<i32>} : memref<32x128xf32, #tpu.memory_space<vmem>>, vector<32x128xf32>,
    } else {
    }
    return
  }
  func.func @transform_0(%arg0: i32, %arg1: i32, %arg2: i32) -> (i32, i32) {
    %c0_i32 = arith.constant 0 : i32
    return %arg0, %arg2 : i32, i32
  }
  func.func @transform_1(%arg0: i32, %arg1: i32, %arg2: i32) -> (i32, i32) {
    %c0_i32 = arith.constant 0 : i32
    return %arg2, %arg1 : i32, i32
  }
  func.func @transform_2(%arg0: i32, %arg1: i32, %arg2: i32) -> (i32, i32) {
    %c0_i32 = arith.constant 0 : i32
    %c0_i32_0 = arith.constant 0 : i32
    return %c0_i32, %arg1 : i32, i32
  }
  func.func @transform_3(%arg0: i32, %arg1: i32, %arg2: i32) -> (i32, i32) {
    %c0_i32 = arith.constant 0 : i32
    return %arg0, %arg1 : i32, i32
  }
  func.func @transform_4(%arg0: i32, %arg1: i32, %arg2: i32) -> (i32, i32) {
    %c0_i32 = arith.constant 0 : i32
    return %arg0, %arg1 : i32, i32
  }
}

module attributes {stable_mosaic.version = 11 : i64} {
  func.func @_mm_bias_kernel(%arg0: i32, %arg1: i32, %arg2: i32, %arg3: memref<32x384xbf16, #tpu.memory_space<vmem>>, %arg4: memref<384x128xbf16, #tpu.memory_space<vmem>>, %arg5: memref<1x128xf32, #tpu.memory_space<vmem>>, %arg6: memref<32x128xf32, #tpu.memory_space<vmem>>) attributes {dimension_semantics = [#tpu.dimension_semantics<parallel>, #tpu.dimension_semantics<parallel>, #tpu.dimension_semantics<arbitrary>], iteration_bounds = array<i64: 1, 1, 3>, scalar_prefetch = 0 : i64, scratch_operands = 0 : i64, tpu.core_type = #tpu.core_type<tc>, window_params = [{transform_indices = @transform_0, window_bounds = array<i64: 32, 384>}, {transform_indices = @transform_1, window_bounds = array<i64: 384, 128>}, {transform_indices = @transform_2, window_bounds = array<i64: 1, 128>}, {transform_indices = @transform_3, window_bounds = array<i64: 32, 128>}]} {
    %c0_i32 = arith.constant 0 : i32
    %0 = arith.cmpi eq, %arg2, %c0_i32 : i32
    %1 = arith.extui %0 : i1 to i32
    %c0_i32_0 = arith.constant 0 : i32
    %2 = arith.cmpi ne, %1, %c0_i32_0 : i32
    scf.if %2 {
      %cst_9 = arith.constant 0.000000e+00 : f32
      %12 = vector.broadcast %cst_9 : f32 to vector<32x128xf32>
      %c0_10 = arith.constant 0 : index
      %c0_11 = arith.constant 0 : index
      %13 = vector.load %arg6[%c0_10, %c0_11] : memref<32x128xf32, #tpu.memory_space<vmem>>, vector<32x128xf32>
      tpu.vector_store %arg6[%c0_10, %c0_11], %12 {strides = array<i32>} : memref<32x128xf32, #tpu.memory_space<vmem>>, vector<32x128xf32>,
    } else {
    }
    %c0 = arith.constant 0 : index
    %c0_1 = arith.constant 0 : index
    %3 = vector.load %arg6[%c0, %c0_1] : memref<32x128xf32, #tpu.memory_space<vmem>>, vector<32x128xf32>
    %c0_2 = arith.constant 0 : index
    %c0_3 = arith.constant 0 : index
    %4 = vector.load %arg3[%c0_2, %c0_3] : memref<32x384xbf16, #tpu.memory_space<vmem>>, vector<32x384xbf16>
    %c0_4 = arith.constant 0 : index
    %c0_5 = arith.constant 0 : index
    %5 = vector.load %arg4[%c0_4, %c0_5] : memref<384x128xbf16, #tpu.memory_space<vmem>>, vector<384x128xbf16>
    %cst = arith.constant dense<0.000000e+00> : vector<32x128xf32>
    %6 = tpu.matmul %4, %5, %cst {dimension_numbers = #tpu.dot_dimension_numbers<[1], [0], [0], [1], [0, 0, 1, 1], [], []>} : vector<32x384xbf16>, vector<384x128xbf16>, vector<32x128xf32> -> vector<32x128xf32>
    %7 = arith.addf %3, %6 : vector<32x128xf32>
    %c0_6 = arith.constant 0 : index
    %c0_7 = arith.constant 0 : index
    %8 = vector.load %arg6[%c0_6, %c0_7] : memref<32x128xf32, #tpu.memory_space<vmem>>, vector<32x128xf32>
    tpu.vector_store %arg6[%c0_6, %c0_7], %7 {strides = array<i32>} : memref<32x128xf32, #tpu.memory_space<vmem>>, vector<32x128xf32>,
    %c2_i32 = arith.constant 2 : i32
    %9 = arith.cmpi eq, %arg2, %c2_i32 : i32
    %10 = arith.extui %9 : i1 to i32
    %c0_i32_8 = arith.constant 0 : i32
    %11 = arith.cmpi ne, %10, %c0_i32_8 : i32
    scf.if %11 {
      %c0_9 = arith.constant 0 : index
      %c0_10 = arith.constant 0 : index
      %12 = vector.load %arg6[%c0_9, %c0_10] : memref<32x128xf32, #tpu.memory_space<vmem>>, vector<32x128xf32>
      %c0_11 = arith.constant 0 : index
      %c0_12 = arith.constant 0 : index
      %13 = vector.load %arg5[%c0_11, %c0_12] : memref<1x128xf32, #tpu.memory_space<vmem>>, vector<1x128xf32>
      %14 = vector.broadcast %13 : vector<1x128xf32> to vector<32x128xf32>
      %15 = arith.addf %12, %14 : vector<32x128xf32>
      %cst_13 = arith.constant 0.000000e+00 : f32
      %16 = vector.broadcast %cst_13 : f32 to vector<32x128xf32>
      %17 = arith.maximumf %15, %16 : vector<32x128xf32>
      %c0_14 = arith.constant 0 : index
      %c0_15 = arith.constant 0 : index
      %18 = vector.load %arg6[%c0_14, %c0_15] : memref<32x128xf32, #tpu.memory_space<vmem>>, vector<32x128xf32>
      tpu.vector_store %arg6[%c0_14, %c0_15], %17 {strides = array<i32>} : memref<32x128xf32, #tpu.memory_space<vmem>>, vector<32x128xf32>,
    } else {
    }
    return
  }
  func.func @transform_0(%arg0: i32, %arg1: i32, %arg2: i32) -> (i32, i32) {
    %c0_i32 = arith.constant 0 : i32
    return %arg0, %arg2 : i32, i32
  }
  func.func @transform_1(%arg0: i32, %arg1: i32, %arg2: i32) -> (i32, i32) {
    %c0_i32 = arith.constant 0 : i32
    return %arg2, %arg1 : i32, i32
  }
  func.func @transform_2(%arg0: i32, %arg1: i32, %arg2: i32) -> (i32, i32) {
    %c0_i32 = arith.constant 0 : i32
    %c0_i32_0 = arith.constant 0 : i32
    return %c0_i32, %arg1 : i32, i32
  }
  func.func @transform_3(%arg0: i32, %arg1: i32, %arg2: i32) -> (i32, i32) {
    %c0_i32 = arith.constant 0 : i32
    return %arg0, %arg1 : i32, i32
  }
}

module attributes {stable_mosaic.version = 11 : i64} {
  func.func @_mm_bias_kernel(%arg0: i32, %arg1: i32, %arg2: i32, %arg3: memref<8x384xbf16, #tpu.memory_space<vmem>>, %arg4: memref<384x256xbf16, #tpu.memory_space<vmem>>, %arg5: memref<1x256xf32, #tpu.memory_space<vmem>>, %arg6: memref<8x256xf32, #tpu.memory_space<vmem>>) attributes {dimension_semantics = [#tpu.dimension_semantics<parallel>, #tpu.dimension_semantics<parallel>, #tpu.dimension_semantics<arbitrary>], iteration_bounds = array<i64: 1, 1, 3>, scalar_prefetch = 0 : i64, scratch_operands = 0 : i64, tpu.core_type = #tpu.core_type<tc>, window_params = [{transform_indices = @transform_0, window_bounds = array<i64: 8, 384>}, {transform_indices = @transform_1, window_bounds = array<i64: 384, 256>}, {transform_indices = @transform_2, window_bounds = array<i64: 1, 256>}, {transform_indices = @transform_3, window_bounds = array<i64: 8, 256>}]} {
    %c0_i32 = arith.constant 0 : i32
    %0 = arith.cmpi eq, %arg2, %c0_i32 : i32
    %1 = arith.extui %0 : i1 to i32
    %c0_i32_0 = arith.constant 0 : i32
    %2 = arith.cmpi ne, %1, %c0_i32_0 : i32
    scf.if %2 {
      %cst_9 = arith.constant 0.000000e+00 : f32
      %12 = vector.broadcast %cst_9 : f32 to vector<8x256xf32>
      %c0_10 = arith.constant 0 : index
      %c0_11 = arith.constant 0 : index
      %13 = vector.load %arg6[%c0_10, %c0_11] : memref<8x256xf32, #tpu.memory_space<vmem>>, vector<8x256xf32>
      tpu.vector_store %arg6[%c0_10, %c0_11], %12 {strides = array<i32>} : memref<8x256xf32, #tpu.memory_space<vmem>>, vector<8x256xf32>,
    } else {
    }
    %c0 = arith.constant 0 : index
    %c0_1 = arith.constant 0 : index
    %3 = vector.load %arg6[%c0, %c0_1] : memref<8x256xf32, #tpu.memory_space<vmem>>, vector<8x256xf32>
    %c0_2 = arith.constant 0 : index
    %c0_3 = arith.constant 0 : index
    %4 = vector.load %arg3[%c0_2, %c0_3] : memref<8x384xbf16, #tpu.memory_space<vmem>>, vector<8x384xbf16>
    %c0_4 = arith.constant 0 : index
    %c0_5 = arith.constant 0 : index
    %5 = vector.load %arg4[%c0_4, %c0_5] : memref<384x256xbf16, #tpu.memory_space<vmem>>, vector<384x256xbf16>
    %cst = arith.constant dense<0.000000e+00> : vector<8x256xf32>
    %6 = tpu.matmul %4, %5, %cst {dimension_numbers = #tpu.dot_dimension_numbers<[1], [0], [0], [1], [0, 0, 1, 1], [], []>} : vector<8x384xbf16>, vector<384x256xbf16>, vector<8x256xf32> -> vector<8x256xf32>
    %7 = arith.addf %3, %6 : vector<8x256xf32>
    %c0_6 = arith.constant 0 : index
    %c0_7 = arith.constant 0 : index
    %8 = vector.load %arg6[%c0_6, %c0_7] : memref<8x256xf32, #tpu.memory_space<vmem>>, vector<8x256xf32>
    tpu.vector_store %arg6[%c0_6, %c0_7], %7 {strides = array<i32>} : memref<8x256xf32, #tpu.memory_space<vmem>>, vector<8x256xf32>,
    %c2_i32 = arith.constant 2 : i32
    %9 = arith.cmpi eq, %arg2, %c2_i32 : i32
    %10 = arith.extui %9 : i1 to i32
    %c0_i32_8 = arith.constant 0 : i32
    %11 = arith.cmpi ne, %10, %c0_i32_8 : i32
    scf.if %11 {
      %c0_9 = arith.constant 0 : index
      %c0_10 = arith.constant 0 : index
      %12 = vector.load %arg6[%c0_9, %c0_10] : memref<8x256xf32, #tpu.memory_space<vmem>>, vector<8x256xf32>
      %c0_11 = arith.constant 0 : index
      %c0_12 = arith.constant 0 : index
      %13 = vector.load %arg5[%c0_11, %c0_12] : memref<1x256xf32, #tpu.memory_space<vmem>>, vector<1x256xf32>
      %14 = vector.broadcast %13 : vector<1x256xf32> to vector<8x256xf32>
      %15 = arith.addf %12, %14 : vector<8x256xf32>
      %cst_13 = arith.constant 0.000000e+00 : f32
      %16 = vector.broadcast %cst_13 : f32 to vector<8x256xf32>
      %17 = arith.maximumf %15, %16 : vector<8x256xf32>
      %c0_14 = arith.constant 0 : index
      %c0_15 = arith.constant 0 : index
      %18 = vector.load %arg6[%c0_14, %c0_15] : memref<8x256xf32, #tpu.memory_space<vmem>>, vector<8x256xf32>
      tpu.vector_store %arg6[%c0_14, %c0_15], %17 {strides = array<i32>} : memref<8x256xf32, #tpu.memory_space<vmem>>, vector<8x256xf32>,
    } else {
    }
    return
  }
  func.func @transform_0(%arg0: i32, %arg1: i32, %arg2: i32) -> (i32, i32) {
    %c0_i32 = arith.constant 0 : i32
    return %arg0, %arg2 : i32, i32
  }
  func.func @transform_1(%arg0: i32, %arg1: i32, %arg2: i32) -> (i32, i32) {
    %c0_i32 = arith.constant 0 : i32
    return %arg2, %arg1 : i32, i32
  }
  func.func @transform_2(%arg0: i32, %arg1: i32, %arg2: i32) -> (i32, i32) {
    %c0_i32 = arith.constant 0 : i32
    %c0_i32_0 = arith.constant 0 : i32
    return %c0_i32, %arg1 : i32, i32
  }
  func.func @transform_3(%arg0: i32, %arg1: i32, %arg2: i32) -> (i32, i32) {
    %c0_i32 = arith.constant 0 : i32
    return %arg0, %arg1 : i32, i32
  }
}

module attributes {stable_mosaic.version = 11 : i64} {
  func.func @_mm_bias_kernel(%arg0: i32, %arg1: i32, %arg2: i32, %arg3: memref<8x128xbf16, #tpu.memory_space<vmem>>, %arg4: memref<128x256xbf16, #tpu.memory_space<vmem>>, %arg5: memref<1x256xf32, #tpu.memory_space<vmem>>, %arg6: memref<8x256xf32, #tpu.memory_space<vmem>>) attributes {dimension_semantics = [#tpu.dimension_semantics<parallel>, #tpu.dimension_semantics<parallel>, #tpu.dimension_semantics<arbitrary>], iteration_bounds = array<i64: 1, 1, 1>, scalar_prefetch = 0 : i64, scratch_operands = 0 : i64, tpu.core_type = #tpu.core_type<tc>, window_params = [{transform_indices = @transform_0, window_bounds = array<i64: 8, 128>}, {transform_indices = @transform_1, window_bounds = array<i64: 128, 256>}, {transform_indices = @transform_2, window_bounds = array<i64: 1, 256>}, {transform_indices = @transform_3, window_bounds = array<i64: 8, 256>}]} {
    %c0_i32 = arith.constant 0 : i32
    %0 = arith.cmpi eq, %arg2, %c0_i32 : i32
    %1 = arith.extui %0 : i1 to i32
    %c0_i32_0 = arith.constant 0 : i32
    %2 = arith.cmpi ne, %1, %c0_i32_0 : i32
    scf.if %2 {
      %cst_10 = arith.constant 0.000000e+00 : f32
      %12 = vector.broadcast %cst_10 : f32 to vector<8x256xf32>
      %c0_11 = arith.constant 0 : index
      %c0_12 = arith.constant 0 : index
      %13 = vector.load %arg6[%c0_11, %c0_12] : memref<8x256xf32, #tpu.memory_space<vmem>>, vector<8x256xf32>
      tpu.vector_store %arg6[%c0_11, %c0_12], %12 {strides = array<i32>} : memref<8x256xf32, #tpu.memory_space<vmem>>, vector<8x256xf32>,
    } else {
    }
    %c0 = arith.constant 0 : index
    %c0_1 = arith.constant 0 : index
    %3 = vector.load %arg6[%c0, %c0_1] : memref<8x256xf32, #tpu.memory_space<vmem>>, vector<8x256xf32>
    %c0_2 = arith.constant 0 : index
    %c0_3 = arith.constant 0 : index
    %4 = vector.load %arg3[%c0_2, %c0_3] : memref<8x128xbf16, #tpu.memory_space<vmem>>, vector<8x128xbf16>
    %c0_4 = arith.constant 0 : index
    %c0_5 = arith.constant 0 : index
    %5 = vector.load %arg4[%c0_4, %c0_5] : memref<128x256xbf16, #tpu.memory_space<vmem>>, vector<128x256xbf16>
    %cst = arith.constant dense<0.000000e+00> : vector<8x256xf32>
    %6 = tpu.matmul %4, %5, %cst {dimension_numbers = #tpu.dot_dimension_numbers<[1], [0], [0], [1], [0, 0, 1, 1], [], []>} : vector<8x128xbf16>, vector<128x256xbf16>, vector<8x256xf32> -> vector<8x256xf32>
    %7 = arith.addf %3, %6 : vector<8x256xf32>
    %c0_6 = arith.constant 0 : index
    %c0_7 = arith.constant 0 : index
    %8 = vector.load %arg6[%c0_6, %c0_7] : memref<8x256xf32, #tpu.memory_space<vmem>>, vector<8x256xf32>
    tpu.vector_store %arg6[%c0_6, %c0_7], %7 {strides = array<i32>} : memref<8x256xf32, #tpu.memory_space<vmem>>, vector<8x256xf32>,
    %c0_i32_8 = arith.constant 0 : i32
    %9 = arith.cmpi eq, %arg2, %c0_i32_8 : i32
    %10 = arith.extui %9 : i1 to i32
    %c0_i32_9 = arith.constant 0 : i32
    %11 = arith.cmpi ne, %10, %c0_i32_9 : i32
    scf.if %11 {
      %c0_10 = arith.constant 0 : index
      %c0_11 = arith.constant 0 : index
      %12 = vector.load %arg6[%c0_10, %c0_11] : memref<8x256xf32, #tpu.memory_space<vmem>>, vector<8x256xf32>
      %c0_12 = arith.constant 0 : index
      %c0_13 = arith.constant 0 : index
      %13 = vector.load %arg5[%c0_12, %c0_13] : memref<1x256xf32, #tpu.memory_space<vmem>>, vector<1x256xf32>
      %14 = vector.broadcast %13 : vector<1x256xf32> to vector<8x256xf32>
      %15 = arith.addf %12, %14 : vector<8x256xf32>
      %c0_14 = arith.constant 0 : index
      %c0_15 = arith.constant 0 : index
      %16 = vector.load %arg6[%c0_14, %c0_15] : memref<8x256xf32, #tpu.memory_space<vmem>>, vector<8x256xf32>
      tpu.vector_store %arg6[%c0_14, %c0_15], %15 {strides = array<i32>} : memref<8x256xf32, #tpu.memory_space<vmem>>, vector<8x256xf32>,
    } else {
    }
    return
  }
  func.func @transform_0(%arg0: i32, %arg1: i32, %arg2: i32) -> (i32, i32) {
    %c0_i32 = arith.constant 0 : i32
    return %arg0, %arg2 : i32, i32
  }
  func.func @transform_1(%arg0: i32, %arg1: i32, %arg2: i32) -> (i32, i32) {
    %c0_i32 = arith.constant 0 : i32
    return %arg2, %arg1 : i32, i32
  }
  func.func @transform_2(%arg0: i32, %arg1: i32, %arg2: i32) -> (i32, i32) {
    %c0_i32 = arith.constant 0 : i32
    %c0_i32_0 = arith.constant 0 : i32
    return %c0_i32, %arg1 : i32, i32
  }
  func.func @transform_3(%arg0: i32, %arg1: i32, %arg2: i32) -> (i32, i32) {
    %c0_i32 = arith.constant 0 : i32
    return %arg0, %arg1 : i32, i32
  }
}

module attributes {stable_mosaic.version = 11 : i64} {
  func.func @_mm_bias_res_kernel(%arg0: i32, %arg1: i32, %arg2: i32, %arg3: memref<8x384xbf16, #tpu.memory_space<vmem>>, %arg4: memref<384x256xbf16, #tpu.memory_space<vmem>>, %arg5: memref<1x256xf32, #tpu.memory_space<vmem>>, %arg6: memref<8x256xf32, #tpu.memory_space<vmem>>, %arg7: memref<8x256xf32, #tpu.memory_space<vmem>>) attributes {dimension_semantics = [#tpu.dimension_semantics<parallel>, #tpu.dimension_semantics<parallel>, #tpu.dimension_semantics<arbitrary>], iteration_bounds = array<i64: 1, 1, 6>, scalar_prefetch = 0 : i64, scratch_operands = 0 : i64, tpu.core_type = #tpu.core_type<tc>, window_params = [{transform_indices = @transform_0, window_bounds = array<i64: 8, 384>}, {transform_indices = @transform_1, window_bounds = array<i64: 384, 256>}, {transform_indices = @transform_2, window_bounds = array<i64: 1, 256>}, {transform_indices = @transform_3, window_bounds = array<i64: 8, 256>}, {transform_indices = @transform_4, window_bounds = array<i64: 8, 256>}]} {
    %c0_i32 = arith.constant 0 : i32
    %0 = arith.cmpi eq, %arg2, %c0_i32 : i32
    %1 = arith.extui %0 : i1 to i32
    %c0_i32_0 = arith.constant 0 : i32
    %2 = arith.cmpi ne, %1, %c0_i32_0 : i32
    scf.if %2 {
      %cst_9 = arith.constant 0.000000e+00 : f32
      %12 = vector.broadcast %cst_9 : f32 to vector<8x256xf32>
      %c0_10 = arith.constant 0 : index
      %c0_11 = arith.constant 0 : index
      %13 = vector.load %arg7[%c0_10, %c0_11] : memref<8x256xf32, #tpu.memory_space<vmem>>, vector<8x256xf32>
      tpu.vector_store %arg7[%c0_10, %c0_11], %12 {strides = array<i32>} : memref<8x256xf32, #tpu.memory_space<vmem>>, vector<8x256xf32>,
    } else {
    }
    %c0 = arith.constant 0 : index
    %c0_1 = arith.constant 0 : index
    %3 = vector.load %arg7[%c0, %c0_1] : memref<8x256xf32, #tpu.memory_space<vmem>>, vector<8x256xf32>
    %c0_2 = arith.constant 0 : index
    %c0_3 = arith.constant 0 : index
    %4 = vector.load %arg3[%c0_2, %c0_3] : memref<8x384xbf16, #tpu.memory_space<vmem>>, vector<8x384xbf16>
    %c0_4 = arith.constant 0 : index
    %c0_5 = arith.constant 0 : index
    %5 = vector.load %arg4[%c0_4, %c0_5] : memref<384x256xbf16, #tpu.memory_space<vmem>>, vector<384x256xbf16>
    %cst = arith.constant dense<0.000000e+00> : vector<8x256xf32>
    %6 = tpu.matmul %4, %5, %cst {dimension_numbers = #tpu.dot_dimension_numbers<[1], [0], [0], [1], [0, 0, 1, 1], [], []>} : vector<8x384xbf16>, vector<384x256xbf16>, vector<8x256xf32> -> vector<8x256xf32>
    %7 = arith.addf %3, %6 : vector<8x256xf32>
    %c0_6 = arith.constant 0 : index
    %c0_7 = arith.constant 0 : index
    %8 = vector.load %arg7[%c0_6, %c0_7] : memref<8x256xf32, #tpu.memory_space<vmem>>, vector<8x256xf32>
    tpu.vector_store %arg7[%c0_6, %c0_7], %7 {strides = array<i32>} : memref<8x256xf32, #tpu.memory_space<vmem>>, vector<8x256xf32>,
    %c5_i32 = arith.constant 5 : i32
    %9 = arith.cmpi eq, %arg2, %c5_i32 : i32
    %10 = arith.extui %9 : i1 to i32
    %c0_i32_8 = arith.constant 0 : i32
    %11 = arith.cmpi ne, %10, %c0_i32_8 : i32
    scf.if %11 {
      %c0_9 = arith.constant 0 : index
      %c0_10 = arith.constant 0 : index
      %12 = vector.load %arg7[%c0_9, %c0_10] : memref<8x256xf32, #tpu.memory_space<vmem>>, vector<8x256xf32>
      %c0_11 = arith.constant 0 : index
      %c0_12 = arith.constant 0 : index
      %13 = vector.load %arg5[%c0_11, %c0_12] : memref<1x256xf32, #tpu.memory_space<vmem>>, vector<1x256xf32>
      %14 = vector.broadcast %13 : vector<1x256xf32> to vector<8x256xf32>
      %15 = arith.addf %12, %14 : vector<8x256xf32>
      %c0_13 = arith.constant 0 : index
      %c0_14 = arith.constant 0 : index
      %16 = vector.load %arg6[%c0_13, %c0_14] : memref<8x256xf32, #tpu.memory_space<vmem>>, vector<8x256xf32>
      %17 = arith.addf %15, %16 : vector<8x256xf32>
      %cst_15 = arith.constant 0.000000e+00 : f32
      %18 = vector.broadcast %cst_15 : f32 to vector<8x256xf32>
      %19 = arith.maximumf %17, %18 : vector<8x256xf32>
      %c0_16 = arith.constant 0 : index
      %c0_17 = arith.constant 0 : index
      %20 = vector.load %arg7[%c0_16, %c0_17] : memref<8x256xf32, #tpu.memory_space<vmem>>, vector<8x256xf32>
      tpu.vector_store %arg7[%c0_16, %c0_17], %19 {strides = array<i32>} : memref<8x256xf32, #tpu.memory_space<vmem>>, vector<8x256xf32>,
    } else {
    }
    return
  }
  func.func @transform_0(%arg0: i32, %arg1: i32, %arg2: i32) -> (i32, i32) {
    %c0_i32 = arith.constant 0 : i32
    return %arg0, %arg2 : i32, i32
  }
  func.func @transform_1(%arg0: i32, %arg1: i32, %arg2: i32) -> (i32, i32) {
    %c0_i32 = arith.constant 0 : i32
    return %arg2, %arg1 : i32, i32
  }
  func.func @transform_2(%arg0: i32, %arg1: i32, %arg2: i32) -> (i32, i32) {
    %c0_i32 = arith.constant 0 : i32
    %c0_i32_0 = arith.constant 0 : i32
    return %c0_i32, %arg1 : i32, i32
  }
  func.func @transform_3(%arg0: i32, %arg1: i32, %arg2: i32) -> (i32, i32) {
    %c0_i32 = arith.constant 0 : i32
    return %arg0, %arg1 : i32, i32
  }
  func.func @transform_4(%arg0: i32, %arg1: i32, %arg2: i32) -> (i32, i32) {
    %c0_i32 = arith.constant 0 : i32
    return %arg0, %arg1 : i32, i32
  }
}

module attributes {stable_mosaic.version = 11 : i64} {
  func.func @_mm_bias_kernel(%arg0: i32, %arg1: i32, %arg2: i32, %arg3: memref<8x384xbf16, #tpu.memory_space<vmem>>, %arg4: memref<384x256xbf16, #tpu.memory_space<vmem>>, %arg5: memref<1x256xf32, #tpu.memory_space<vmem>>, %arg6: memref<8x256xf32, #tpu.memory_space<vmem>>) attributes {dimension_semantics = [#tpu.dimension_semantics<parallel>, #tpu.dimension_semantics<parallel>, #tpu.dimension_semantics<arbitrary>], iteration_bounds = array<i64: 1, 1, 6>, scalar_prefetch = 0 : i64, scratch_operands = 0 : i64, tpu.core_type = #tpu.core_type<tc>, window_params = [{transform_indices = @transform_0, window_bounds = array<i64: 8, 384>}, {transform_indices = @transform_1, window_bounds = array<i64: 384, 256>}, {transform_indices = @transform_2, window_bounds = array<i64: 1, 256>}, {transform_indices = @transform_3, window_bounds = array<i64: 8, 256>}]} {
    %c0_i32 = arith.constant 0 : i32
    %0 = arith.cmpi eq, %arg2, %c0_i32 : i32
    %1 = arith.extui %0 : i1 to i32
    %c0_i32_0 = arith.constant 0 : i32
    %2 = arith.cmpi ne, %1, %c0_i32_0 : i32
    scf.if %2 {
      %cst_9 = arith.constant 0.000000e+00 : f32
      %12 = vector.broadcast %cst_9 : f32 to vector<8x256xf32>
      %c0_10 = arith.constant 0 : index
      %c0_11 = arith.constant 0 : index
      %13 = vector.load %arg6[%c0_10, %c0_11] : memref<8x256xf32, #tpu.memory_space<vmem>>, vector<8x256xf32>
      tpu.vector_store %arg6[%c0_10, %c0_11], %12 {strides = array<i32>} : memref<8x256xf32, #tpu.memory_space<vmem>>, vector<8x256xf32>,
    } else {
    }
    %c0 = arith.constant 0 : index
    %c0_1 = arith.constant 0 : index
    %3 = vector.load %arg6[%c0, %c0_1] : memref<8x256xf32, #tpu.memory_space<vmem>>, vector<8x256xf32>
    %c0_2 = arith.constant 0 : index
    %c0_3 = arith.constant 0 : index
    %4 = vector.load %arg3[%c0_2, %c0_3] : memref<8x384xbf16, #tpu.memory_space<vmem>>, vector<8x384xbf16>
    %c0_4 = arith.constant 0 : index
    %c0_5 = arith.constant 0 : index
    %5 = vector.load %arg4[%c0_4, %c0_5] : memref<384x256xbf16, #tpu.memory_space<vmem>>, vector<384x256xbf16>
    %cst = arith.constant dense<0.000000e+00> : vector<8x256xf32>
    %6 = tpu.matmul %4, %5, %cst {dimension_numbers = #tpu.dot_dimension_numbers<[1], [0], [0], [1], [0, 0, 1, 1], [], []>} : vector<8x384xbf16>, vector<384x256xbf16>, vector<8x256xf32> -> vector<8x256xf32>
    %7 = arith.addf %3, %6 : vector<8x256xf32>
    %c0_6 = arith.constant 0 : index
    %c0_7 = arith.constant 0 : index
    %8 = vector.load %arg6[%c0_6, %c0_7] : memref<8x256xf32, #tpu.memory_space<vmem>>, vector<8x256xf32>
    tpu.vector_store %arg6[%c0_6, %c0_7], %7 {strides = array<i32>} : memref<8x256xf32, #tpu.memory_space<vmem>>, vector<8x256xf32>,
    %c5_i32 = arith.constant 5 : i32
    %9 = arith.cmpi eq, %arg2, %c5_i32 : i32
    %10 = arith.extui %9 : i1 to i32
    %c0_i32_8 = arith.constant 0 : i32
    %11 = arith.cmpi ne, %10, %c0_i32_8 : i32
    scf.if %11 {
      %c0_9 = arith.constant 0 : index
      %c0_10 = arith.constant 0 : index
      %12 = vector.load %arg6[%c0_9, %c0_10] : memref<8x256xf32, #tpu.memory_space<vmem>>, vector<8x256xf32>
      %c0_11 = arith.constant 0 : index
      %c0_12 = arith.constant 0 : index
      %13 = vector.load %arg5[%c0_11, %c0_12] : memref<1x256xf32, #tpu.memory_space<vmem>>, vector<1x256xf32>
      %14 = vector.broadcast %13 : vector<1x256xf32> to vector<8x256xf32>
      %15 = arith.addf %12, %14 : vector<8x256xf32>
      %cst_13 = arith.constant 0.000000e+00 : f32
      %16 = vector.broadcast %cst_13 : f32 to vector<8x256xf32>
      %17 = arith.maximumf %15, %16 : vector<8x256xf32>
      %c0_14 = arith.constant 0 : index
      %c0_15 = arith.constant 0 : index
      %18 = vector.load %arg6[%c0_14, %c0_15] : memref<8x256xf32, #tpu.memory_space<vmem>>, vector<8x256xf32>
      tpu.vector_store %arg6[%c0_14, %c0_15], %17 {strides = array<i32>} : memref<8x256xf32, #tpu.memory_space<vmem>>, vector<8x256xf32>,
    } else {
    }
    return
  }
  func.func @transform_0(%arg0: i32, %arg1: i32, %arg2: i32) -> (i32, i32) {
    %c0_i32 = arith.constant 0 : i32
    return %arg0, %arg2 : i32, i32
  }
  func.func @transform_1(%arg0: i32, %arg1: i32, %arg2: i32) -> (i32, i32) {
    %c0_i32 = arith.constant 0 : i32
    return %arg2, %arg1 : i32, i32
  }
  func.func @transform_2(%arg0: i32, %arg1: i32, %arg2: i32) -> (i32, i32) {
    %c0_i32 = arith.constant 0 : i32
    %c0_i32_0 = arith.constant 0 : i32
    return %c0_i32, %arg1 : i32, i32
  }
  func.func @transform_3(%arg0: i32, %arg1: i32, %arg2: i32) -> (i32, i32) {
    %c0_i32 = arith.constant 0 : i32
    return %arg0, %arg1 : i32, i32
  }
}

module attributes {stable_mosaic.version = 11 : i64} {
  func.func @_mm_bias_kernel(%arg0: i32, %arg1: i32, %arg2: i32, %arg3: memref<8x384xbf16, #tpu.memory_space<vmem>>, %arg4: memref<384x256xbf16, #tpu.memory_space<vmem>>, %arg5: memref<1x256xf32, #tpu.memory_space<vmem>>, %arg6: memref<8x256xf32, #tpu.memory_space<vmem>>) attributes {dimension_semantics = [#tpu.dimension_semantics<parallel>, #tpu.dimension_semantics<parallel>, #tpu.dimension_semantics<arbitrary>], iteration_bounds = array<i64: 1, 2, 6>, scalar_prefetch = 0 : i64, scratch_operands = 0 : i64, tpu.core_type = #tpu.core_type<tc>, window_params = [{transform_indices = @transform_0, window_bounds = array<i64: 8, 384>}, {transform_indices = @transform_1, window_bounds = array<i64: 384, 256>}, {transform_indices = @transform_2, window_bounds = array<i64: 1, 256>}, {transform_indices = @transform_3, window_bounds = array<i64: 8, 256>}]} {
    %c0_i32 = arith.constant 0 : i32
    %0 = arith.cmpi eq, %arg2, %c0_i32 : i32
    %1 = arith.extui %0 : i1 to i32
    %c0_i32_0 = arith.constant 0 : i32
    %2 = arith.cmpi ne, %1, %c0_i32_0 : i32
    scf.if %2 {
      %cst_9 = arith.constant 0.000000e+00 : f32
      %12 = vector.broadcast %cst_9 : f32 to vector<8x256xf32>
      %c0_10 = arith.constant 0 : index
      %c0_11 = arith.constant 0 : index
      %13 = vector.load %arg6[%c0_10, %c0_11] : memref<8x256xf32, #tpu.memory_space<vmem>>, vector<8x256xf32>
      tpu.vector_store %arg6[%c0_10, %c0_11], %12 {strides = array<i32>} : memref<8x256xf32, #tpu.memory_space<vmem>>, vector<8x256xf32>,
    } else {
    }
    %c0 = arith.constant 0 : index
    %c0_1 = arith.constant 0 : index
    %3 = vector.load %arg6[%c0, %c0_1] : memref<8x256xf32, #tpu.memory_space<vmem>>, vector<8x256xf32>
    %c0_2 = arith.constant 0 : index
    %c0_3 = arith.constant 0 : index
    %4 = vector.load %arg3[%c0_2, %c0_3] : memref<8x384xbf16, #tpu.memory_space<vmem>>, vector<8x384xbf16>
    %c0_4 = arith.constant 0 : index
    %c0_5 = arith.constant 0 : index
    %5 = vector.load %arg4[%c0_4, %c0_5] : memref<384x256xbf16, #tpu.memory_space<vmem>>, vector<384x256xbf16>
    %cst = arith.constant dense<0.000000e+00> : vector<8x256xf32>
    %6 = tpu.matmul %4, %5, %cst {dimension_numbers = #tpu.dot_dimension_numbers<[1], [0], [0], [1], [0, 0, 1, 1], [], []>} : vector<8x384xbf16>, vector<384x256xbf16>, vector<8x256xf32> -> vector<8x256xf32>
    %7 = arith.addf %3, %6 : vector<8x256xf32>
    %c0_6 = arith.constant 0 : index
    %c0_7 = arith.constant 0 : index
    %8 = vector.load %arg6[%c0_6, %c0_7] : memref<8x256xf32, #tpu.memory_space<vmem>>, vector<8x256xf32>
    tpu.vector_store %arg6[%c0_6, %c0_7], %7 {strides = array<i32>} : memref<8x256xf32, #tpu.memory_space<vmem>>, vector<8x256xf32>,
    %c5_i32 = arith.constant 5 : i32
    %9 = arith.cmpi eq, %arg2, %c5_i32 : i32
    %10 = arith.extui %9 : i1 to i32
    %c0_i32_8 = arith.constant 0 : i32
    %11 = arith.cmpi ne, %10, %c0_i32_8 : i32
    scf.if %11 {
      %c0_9 = arith.constant 0 : index
      %c0_10 = arith.constant 0 : index
      %12 = vector.load %arg6[%c0_9, %c0_10] : memref<8x256xf32, #tpu.memory_space<vmem>>, vector<8x256xf32>
      %c0_11 = arith.constant 0 : index
      %c0_12 = arith.constant 0 : index
      %13 = vector.load %arg5[%c0_11, %c0_12] : memref<1x256xf32, #tpu.memory_space<vmem>>, vector<1x256xf32>
      %14 = vector.broadcast %13 : vector<1x256xf32> to vector<8x256xf32>
      %15 = arith.addf %12, %14 : vector<8x256xf32>
      %cst_13 = arith.constant 0.000000e+00 : f32
      %16 = vector.broadcast %cst_13 : f32 to vector<8x256xf32>
      %17 = arith.maximumf %15, %16 : vector<8x256xf32>
      %c0_14 = arith.constant 0 : index
      %c0_15 = arith.constant 0 : index
      %18 = vector.load %arg6[%c0_14, %c0_15] : memref<8x256xf32, #tpu.memory_space<vmem>>, vector<8x256xf32>
      tpu.vector_store %arg6[%c0_14, %c0_15], %17 {strides = array<i32>} : memref<8x256xf32, #tpu.memory_space<vmem>>, vector<8x256xf32>,
    } else {
    }
    return
  }
  func.func @transform_0(%arg0: i32, %arg1: i32, %arg2: i32) -> (i32, i32) {
    %c0_i32 = arith.constant 0 : i32
    return %arg0, %arg2 : i32, i32
  }
  func.func @transform_1(%arg0: i32, %arg1: i32, %arg2: i32) -> (i32, i32) {
    %c0_i32 = arith.constant 0 : i32
    return %arg2, %arg1 : i32, i32
  }
  func.func @transform_2(%arg0: i32, %arg1: i32, %arg2: i32) -> (i32, i32) {
    %c0_i32 = arith.constant 0 : i32
    %c0_i32_0 = arith.constant 0 : i32
    return %c0_i32, %arg1 : i32, i32
  }
  func.func @transform_3(%arg0: i32, %arg1: i32, %arg2: i32) -> (i32, i32) {
    %c0_i32 = arith.constant 0 : i32
    return %arg0, %arg1 : i32, i32
  }
}

module attributes {stable_mosaic.version = 11 : i64} {
  func.func @_mm_bias_kernel(%arg0: i32, %arg1: i32, %arg2: i32, %arg3: memref<8x256xbf16, #tpu.memory_space<vmem>>, %arg4: memref<256x256xbf16, #tpu.memory_space<vmem>>, %arg5: memref<1x256xf32, #tpu.memory_space<vmem>>, %arg6: memref<8x256xf32, #tpu.memory_space<vmem>>) attributes {dimension_semantics = [#tpu.dimension_semantics<parallel>, #tpu.dimension_semantics<parallel>, #tpu.dimension_semantics<arbitrary>], iteration_bounds = array<i64: 1, 2, 1>, scalar_prefetch = 0 : i64, scratch_operands = 0 : i64, tpu.core_type = #tpu.core_type<tc>, window_params = [{transform_indices = @transform_0, window_bounds = array<i64: 8, 256>}, {transform_indices = @transform_1, window_bounds = array<i64: 256, 256>}, {transform_indices = @transform_2, window_bounds = array<i64: 1, 256>}, {transform_indices = @transform_3, window_bounds = array<i64: 8, 256>}]} {
    %c0_i32 = arith.constant 0 : i32
    %0 = arith.cmpi eq, %arg2, %c0_i32 : i32
    %1 = arith.extui %0 : i1 to i32
    %c0_i32_0 = arith.constant 0 : i32
    %2 = arith.cmpi ne, %1, %c0_i32_0 : i32
    scf.if %2 {
      %cst_10 = arith.constant 0.000000e+00 : f32
      %12 = vector.broadcast %cst_10 : f32 to vector<8x256xf32>
      %c0_11 = arith.constant 0 : index
      %c0_12 = arith.constant 0 : index
      %13 = vector.load %arg6[%c0_11, %c0_12] : memref<8x256xf32, #tpu.memory_space<vmem>>, vector<8x256xf32>
      tpu.vector_store %arg6[%c0_11, %c0_12], %12 {strides = array<i32>} : memref<8x256xf32, #tpu.memory_space<vmem>>, vector<8x256xf32>,
    } else {
    }
    %c0 = arith.constant 0 : index
    %c0_1 = arith.constant 0 : index
    %3 = vector.load %arg6[%c0, %c0_1] : memref<8x256xf32, #tpu.memory_space<vmem>>, vector<8x256xf32>
    %c0_2 = arith.constant 0 : index
    %c0_3 = arith.constant 0 : index
    %4 = vector.load %arg3[%c0_2, %c0_3] : memref<8x256xbf16, #tpu.memory_space<vmem>>, vector<8x256xbf16>
    %c0_4 = arith.constant 0 : index
    %c0_5 = arith.constant 0 : index
    %5 = vector.load %arg4[%c0_4, %c0_5] : memref<256x256xbf16, #tpu.memory_space<vmem>>, vector<256x256xbf16>
    %cst = arith.constant dense<0.000000e+00> : vector<8x256xf32>
    %6 = tpu.matmul %4, %5, %cst {dimension_numbers = #tpu.dot_dimension_numbers<[1], [0], [0], [1], [0, 0, 1, 1], [], []>} : vector<8x256xbf16>, vector<256x256xbf16>, vector<8x256xf32> -> vector<8x256xf32>
    %7 = arith.addf %3, %6 : vector<8x256xf32>
    %c0_6 = arith.constant 0 : index
    %c0_7 = arith.constant 0 : index
    %8 = vector.load %arg6[%c0_6, %c0_7] : memref<8x256xf32, #tpu.memory_space<vmem>>, vector<8x256xf32>
    tpu.vector_store %arg6[%c0_6, %c0_7], %7 {strides = array<i32>} : memref<8x256xf32, #tpu.memory_space<vmem>>, vector<8x256xf32>,
    %c0_i32_8 = arith.constant 0 : i32
    %9 = arith.cmpi eq, %arg2, %c0_i32_8 : i32
    %10 = arith.extui %9 : i1 to i32
    %c0_i32_9 = arith.constant 0 : i32
    %11 = arith.cmpi ne, %10, %c0_i32_9 : i32
    scf.if %11 {
      %c0_10 = arith.constant 0 : index
      %c0_11 = arith.constant 0 : index
      %12 = vector.load %arg6[%c0_10, %c0_11] : memref<8x256xf32, #tpu.memory_space<vmem>>, vector<8x256xf32>
      %c0_12 = arith.constant 0 : index
      %c0_13 = arith.constant 0 : index
      %13 = vector.load %arg5[%c0_12, %c0_13] : memref<1x256xf32, #tpu.memory_space<vmem>>, vector<1x256xf32>
      %14 = vector.broadcast %13 : vector<1x256xf32> to vector<8x256xf32>
      %15 = arith.addf %12, %14 : vector<8x256xf32>
      %c0_14 = arith.constant 0 : index
      %c0_15 = arith.constant 0 : index
      %16 = vector.load %arg6[%c0_14, %c0_15] : memref<8x256xf32, #tpu.memory_space<vmem>>, vector<8x256xf32>
      tpu.vector_store %arg6[%c0_14, %c0_15], %15 {strides = array<i32>} : memref<8x256xf32, #tpu.memory_space<vmem>>, vector<8x256xf32>,
    } else {
    }
    return
  }
  func.func @transform_0(%arg0: i32, %arg1: i32, %arg2: i32) -> (i32, i32) {
    %c0_i32 = arith.constant 0 : i32
    return %arg0, %arg2 : i32, i32
  }
  func.func @transform_1(%arg0: i32, %arg1: i32, %arg2: i32) -> (i32, i32) {
    %c0_i32 = arith.constant 0 : i32
    return %arg2, %arg1 : i32, i32
  }
  func.func @transform_2(%arg0: i32, %arg1: i32, %arg2: i32) -> (i32, i32) {
    %c0_i32 = arith.constant 0 : i32
    %c0_i32_0 = arith.constant 0 : i32
    return %c0_i32, %arg1 : i32, i32
  }
  func.func @transform_3(%arg0: i32, %arg1: i32, %arg2: i32) -> (i32, i32) {
    %c0_i32 = arith.constant 0 : i32
    return %arg0, %arg1 : i32, i32
  }
}

module attributes {stable_mosaic.version = 11 : i64} {
  func.func @_mm_bias_res_kernel(%arg0: i32, %arg1: i32, %arg2: i32, %arg3: memref<8x512xbf16, #tpu.memory_space<vmem>>, %arg4: memref<512x256xbf16, #tpu.memory_space<vmem>>, %arg5: memref<1x256xf32, #tpu.memory_space<vmem>>, %arg6: memref<8x256xf32, #tpu.memory_space<vmem>>, %arg7: memref<8x256xf32, #tpu.memory_space<vmem>>) attributes {dimension_semantics = [#tpu.dimension_semantics<parallel>, #tpu.dimension_semantics<parallel>, #tpu.dimension_semantics<arbitrary>], iteration_bounds = array<i64: 1, 2, 9>, scalar_prefetch = 0 : i64, scratch_operands = 0 : i64, tpu.core_type = #tpu.core_type<tc>, window_params = [{transform_indices = @transform_0, window_bounds = array<i64: 8, 512>}, {transform_indices = @transform_1, window_bounds = array<i64: 512, 256>}, {transform_indices = @transform_2, window_bounds = array<i64: 1, 256>}, {transform_indices = @transform_3, window_bounds = array<i64: 8, 256>}, {transform_indices = @transform_4, window_bounds = array<i64: 8, 256>}]} {
    %c0_i32 = arith.constant 0 : i32
    %0 = arith.cmpi eq, %arg2, %c0_i32 : i32
    %1 = arith.extui %0 : i1 to i32
    %c0_i32_0 = arith.constant 0 : i32
    %2 = arith.cmpi ne, %1, %c0_i32_0 : i32
    scf.if %2 {
      %cst_9 = arith.constant 0.000000e+00 : f32
      %12 = vector.broadcast %cst_9 : f32 to vector<8x256xf32>
      %c0_10 = arith.constant 0 : index
      %c0_11 = arith.constant 0 : index
      %13 = vector.load %arg7[%c0_10, %c0_11] : memref<8x256xf32, #tpu.memory_space<vmem>>, vector<8x256xf32>
      tpu.vector_store %arg7[%c0_10, %c0_11], %12 {strides = array<i32>} : memref<8x256xf32, #tpu.memory_space<vmem>>, vector<8x256xf32>,
    } else {
    }
    %c0 = arith.constant 0 : index
    %c0_1 = arith.constant 0 : index
    %3 = vector.load %arg7[%c0, %c0_1] : memref<8x256xf32, #tpu.memory_space<vmem>>, vector<8x256xf32>
    %c0_2 = arith.constant 0 : index
    %c0_3 = arith.constant 0 : index
    %4 = vector.load %arg3[%c0_2, %c0_3] : memref<8x512xbf16, #tpu.memory_space<vmem>>, vector<8x512xbf16>
    %c0_4 = arith.constant 0 : index
    %c0_5 = arith.constant 0 : index
    %5 = vector.load %arg4[%c0_4, %c0_5] : memref<512x256xbf16, #tpu.memory_space<vmem>>, vector<512x256xbf16>
    %cst = arith.constant dense<0.000000e+00> : vector<8x256xf32>
    %6 = tpu.matmul %4, %5, %cst {dimension_numbers = #tpu.dot_dimension_numbers<[1], [0], [0], [1], [0, 0, 1, 1], [], []>} : vector<8x512xbf16>, vector<512x256xbf16>, vector<8x256xf32> -> vector<8x256xf32>
    %7 = arith.addf %3, %6 : vector<8x256xf32>
    %c0_6 = arith.constant 0 : index
    %c0_7 = arith.constant 0 : index
    %8 = vector.load %arg7[%c0_6, %c0_7] : memref<8x256xf32, #tpu.memory_space<vmem>>, vector<8x256xf32>
    tpu.vector_store %arg7[%c0_6, %c0_7], %7 {strides = array<i32>} : memref<8x256xf32, #tpu.memory_space<vmem>>, vector<8x256xf32>,
    %c8_i32 = arith.constant 8 : i32
    %9 = arith.cmpi eq, %arg2, %c8_i32 : i32
    %10 = arith.extui %9 : i1 to i32
    %c0_i32_8 = arith.constant 0 : i32
    %11 = arith.cmpi ne, %10, %c0_i32_8 : i32
    scf.if %11 {
      %c0_9 = arith.constant 0 : index
      %c0_10 = arith.constant 0 : index
      %12 = vector.load %arg7[%c0_9, %c0_10] : memref<8x256xf32, #tpu.memory_space<vmem>>, vector<8x256xf32>
      %c0_11 = arith.constant 0 : index
      %c0_12 = arith.constant 0 : index
      %13 = vector.load %arg5[%c0_11, %c0_12] : memref<1x256xf32, #tpu.memory_space<vmem>>, vector<1x256xf32>
      %14 = vector.broadcast %13 : vector<1x256xf32> to vector<8x256xf32>
      %15 = arith.addf %12, %14 : vector<8x256xf32>
      %c0_13 = arith.constant 0 : index
      %c0_14 = arith.constant 0 : index
      %16 = vector.load %arg6[%c0_13, %c0_14] : memref<8x256xf32, #tpu.memory_space<vmem>>, vector<8x256xf32>
      %17 = arith.addf %15, %16 : vector<8x256xf32>
      %cst_15 = arith.constant 0.000000e+00 : f32
      %18 = vector.broadcast %cst_15 : f32 to vector<8x256xf32>
      %19 = arith.maximumf %17, %18 : vector<8x256xf32>
      %c0_16 = arith.constant 0 : index
      %c0_17 = arith.constant 0 : index
      %20 = vector.load %arg7[%c0_16, %c0_17] : memref<8x256xf32, #tpu.memory_space<vmem>>, vector<8x256xf32>
      tpu.vector_store %arg7[%c0_16, %c0_17], %19 {strides = array<i32>} : memref<8x256xf32, #tpu.memory_space<vmem>>, vector<8x256xf32>,
    } else {
    }
    return
  }
  func.func @transform_0(%arg0: i32, %arg1: i32, %arg2: i32) -> (i32, i32) {
    %c0_i32 = arith.constant 0 : i32
    return %arg0, %arg2 : i32, i32
  }
  func.func @transform_1(%arg0: i32, %arg1: i32, %arg2: i32) -> (i32, i32) {
    %c0_i32 = arith.constant 0 : i32
    return %arg2, %arg1 : i32, i32
  }
  func.func @transform_2(%arg0: i32, %arg1: i32, %arg2: i32) -> (i32, i32) {
    %c0_i32 = arith.constant 0 : i32
    %c0_i32_0 = arith.constant 0 : i32
    return %c0_i32, %arg1 : i32, i32
  }
  func.func @transform_3(%arg0: i32, %arg1: i32, %arg2: i32) -> (i32, i32) {
    %c0_i32 = arith.constant 0 : i32
    return %arg0, %arg1 : i32, i32
  }
  func.func @transform_4(%arg0: i32, %arg1: i32, %arg2: i32) -> (i32, i32) {
    %c0_i32 = arith.constant 0 : i32
    return %arg0, %arg1 : i32, i32
  }
}

module attributes {stable_mosaic.version = 11 : i64} {
  func.func @_mm_bias_kernel(%arg0: i32, %arg1: i32, %arg2: i32, %arg3: memref<8x512xbf16, #tpu.memory_space<vmem>>, %arg4: memref<512x256xbf16, #tpu.memory_space<vmem>>, %arg5: memref<1x256xf32, #tpu.memory_space<vmem>>, %arg6: memref<8x256xf32, #tpu.memory_space<vmem>>) attributes {dimension_semantics = [#tpu.dimension_semantics<parallel>, #tpu.dimension_semantics<parallel>, #tpu.dimension_semantics<arbitrary>], iteration_bounds = array<i64: 1, 2, 9>, scalar_prefetch = 0 : i64, scratch_operands = 0 : i64, tpu.core_type = #tpu.core_type<tc>, window_params = [{transform_indices = @transform_0, window_bounds = array<i64: 8, 512>}, {transform_indices = @transform_1, window_bounds = array<i64: 512, 256>}, {transform_indices = @transform_2, window_bounds = array<i64: 1, 256>}, {transform_indices = @transform_3, window_bounds = array<i64: 8, 256>}]} {
    %c0_i32 = arith.constant 0 : i32
    %0 = arith.cmpi eq, %arg2, %c0_i32 : i32
    %1 = arith.extui %0 : i1 to i32
    %c0_i32_0 = arith.constant 0 : i32
    %2 = arith.cmpi ne, %1, %c0_i32_0 : i32
    scf.if %2 {
      %cst_9 = arith.constant 0.000000e+00 : f32
      %12 = vector.broadcast %cst_9 : f32 to vector<8x256xf32>
      %c0_10 = arith.constant 0 : index
      %c0_11 = arith.constant 0 : index
      %13 = vector.load %arg6[%c0_10, %c0_11] : memref<8x256xf32, #tpu.memory_space<vmem>>, vector<8x256xf32>
      tpu.vector_store %arg6[%c0_10, %c0_11], %12 {strides = array<i32>} : memref<8x256xf32, #tpu.memory_space<vmem>>, vector<8x256xf32>,
    } else {
    }
    %c0 = arith.constant 0 : index
    %c0_1 = arith.constant 0 : index
    %3 = vector.load %arg6[%c0, %c0_1] : memref<8x256xf32, #tpu.memory_space<vmem>>, vector<8x256xf32>
    %c0_2 = arith.constant 0 : index
    %c0_3 = arith.constant 0 : index
    %4 = vector.load %arg3[%c0_2, %c0_3] : memref<8x512xbf16, #tpu.memory_space<vmem>>, vector<8x512xbf16>
    %c0_4 = arith.constant 0 : index
    %c0_5 = arith.constant 0 : index
    %5 = vector.load %arg4[%c0_4, %c0_5] : memref<512x256xbf16, #tpu.memory_space<vmem>>, vector<512x256xbf16>
    %cst = arith.constant dense<0.000000e+00> : vector<8x256xf32>
    %6 = tpu.matmul %4, %5, %cst {dimension_numbers = #tpu.dot_dimension_numbers<[1], [0], [0], [1], [0, 0, 1, 1], [], []>} : vector<8x512xbf16>, vector<512x256xbf16>, vector<8x256xf32> -> vector<8x256xf32>
    %7 = arith.addf %3, %6 : vector<8x256xf32>
    %c0_6 = arith.constant 0 : index
    %c0_7 = arith.constant 0 : index
    %8 = vector.load %arg6[%c0_6, %c0_7] : memref<8x256xf32, #tpu.memory_space<vmem>>, vector<8x256xf32>
    tpu.vector_store %arg6[%c0_6, %c0_7], %7 {strides = array<i32>} : memref<8x256xf32, #tpu.memory_space<vmem>>, vector<8x256xf32>,
    %c8_i32 = arith.constant 8 : i32
    %9 = arith.cmpi eq, %arg2, %c8_i32 : i32
    %10 = arith.extui %9 : i1 to i32
    %c0_i32_8 = arith.constant 0 : i32
    %11 = arith.cmpi ne, %10, %c0_i32_8 : i32
    scf.if %11 {
      %c0_9 = arith.constant 0 : index
      %c0_10 = arith.constant 0 : index
      %12 = vector.load %arg6[%c0_9, %c0_10] : memref<8x256xf32, #tpu.memory_space<vmem>>, vector<8x256xf32>
      %c0_11 = arith.constant 0 : index
      %c0_12 = arith.constant 0 : index
      %13 = vector.load %arg5[%c0_11, %c0_12] : memref<1x256xf32, #tpu.memory_space<vmem>>, vector<1x256xf32>
      %14 = vector.broadcast %13 : vector<1x256xf32> to vector<8x256xf32>
      %15 = arith.addf %12, %14 : vector<8x256xf32>
      %cst_13 = arith.constant 0.000000e+00 : f32
      %16 = vector.broadcast %cst_13 : f32 to vector<8x256xf32>
      %17 = arith.maximumf %15, %16 : vector<8x256xf32>
      %c0_14 = arith.constant 0 : index
      %c0_15 = arith.constant 0 : index
      %18 = vector.load %arg6[%c0_14, %c0_15] : memref<8x256xf32, #tpu.memory_space<vmem>>, vector<8x256xf32>
      tpu.vector_store %arg6[%c0_14, %c0_15], %17 {strides = array<i32>} : memref<8x256xf32, #tpu.memory_space<vmem>>, vector<8x256xf32>,
    } else {
    }
    return
  }
  func.func @transform_0(%arg0: i32, %arg1: i32, %arg2: i32) -> (i32, i32) {
    %c0_i32 = arith.constant 0 : i32
    return %arg0, %arg2 : i32, i32
  }
  func.func @transform_1(%arg0: i32, %arg1: i32, %arg2: i32) -> (i32, i32) {
    %c0_i32 = arith.constant 0 : i32
    return %arg2, %arg1 : i32, i32
  }
  func.func @transform_2(%arg0: i32, %arg1: i32, %arg2: i32) -> (i32, i32) {
    %c0_i32 = arith.constant 0 : i32
    %c0_i32_0 = arith.constant 0 : i32
    return %c0_i32, %arg1 : i32, i32
  }
  func.func @transform_3(%arg0: i32, %arg1: i32, %arg2: i32) -> (i32, i32) {
    %c0_i32 = arith.constant 0 : i32
    return %arg0, %arg1 : i32, i32
  }
}

module attributes {stable_mosaic.version = 11 : i64} {
  func.func @_mean_kernel(%arg0: i32, %arg1: memref<2x1x128xf32, #tpu.memory_space<vmem>>, %arg2: memref<2x128xf32, #tpu.memory_space<vmem>>) attributes {dimension_semantics = [#tpu.dimension_semantics<parallel>], iteration_bounds = array<i64: 4>, scalar_prefetch = 0 : i64, scratch_operands = 0 : i64, tpu.core_type = #tpu.core_type<tc>, window_params = [{transform_indices = @transform_0, window_bounds = array<i64: 2, 1, 128>}, {transform_indices = @transform_1, window_bounds = array<i64: 2, 128>}]} {
    %c0 = arith.constant 0 : index
    %c0_0 = arith.constant 0 : index
    %c0_1 = arith.constant 0 : index
    %0 = vector.load %arg1[%c0, %c0_0, %c0_1] : memref<2x1x128xf32, #tpu.memory_space<vmem>>, vector<2x1x128xf32>
    %cst = arith.constant dense<0.000000e+00> : vector<2x128xf32>
    %1 = vector.multi_reduction <add>, %0, %cst [1] : vector<2x1x128xf32> to vector<2x128xf32>
    %cst_2 = arith.constant 1.000000e+00 : f32
    %2 = vector.broadcast %cst_2 : f32 to vector<2x128xf32>
    %3 = arith.divf %1, %2 : vector<2x128xf32>
    %c0_3 = arith.constant 0 : index
    %c0_4 = arith.constant 0 : index
    %4 = vector.load %arg2[%c0_3, %c0_4] : memref<2x128xf32, #tpu.memory_space<vmem>>, vector<2x128xf32>
    tpu.vector_store %arg2[%c0_3, %c0_4], %3 {strides = array<i32>} : memref<2x128xf32, #tpu.memory_space<vmem>>, vector<2x128xf32>,
    return
  }
  func.func @transform_0(%arg0: i32) -> (i32, i32, i32) {
    %c0_i32 = arith.constant 0 : i32
    %c0_i32_0 = arith.constant 0 : i32
    %c0_i32_1 = arith.constant 0 : i32
    return %c0_i32, %c0_i32_0, %arg0 : i32, i32, i32
  }
  func.func @transform_1(%arg0: i32) -> (i32, i32) {
    %c0_i32 = arith.constant 0 : i32
    %c0_i32_0 = arith.constant 0 : i32
    return %c0_i32, %arg0 : i32, i32
  }
}

module attributes {stable_mosaic.version = 11 : i64} {
  func.func @_mm_bias_kernel(%arg0: i32, %arg1: i32, %arg2: i32, %arg3: memref<8x512xbf16, #tpu.memory_space<vmem>>, %arg4: memref<512x128xbf16, #tpu.memory_space<vmem>>, %arg5: memref<1x128xf32, #tpu.memory_space<vmem>>, %arg6: memref<8x128xf32, #tpu.memory_space<vmem>>) attributes {dimension_semantics = [#tpu.dimension_semantics<parallel>, #tpu.dimension_semantics<parallel>, #tpu.dimension_semantics<arbitrary>], iteration_bounds = array<i64: 1, 1, 1>, scalar_prefetch = 0 : i64, scratch_operands = 0 : i64, tpu.core_type = #tpu.core_type<tc>, window_params = [{transform_indices = @transform_0, window_bounds = array<i64: 8, 512>}, {transform_indices = @transform_1, window_bounds = array<i64: 512, 128>}, {transform_indices = @transform_2, window_bounds = array<i64: 1, 128>}, {transform_indices = @transform_3, window_bounds = array<i64: 8, 128>}]} {
    %c0_i32 = arith.constant 0 : i32
    %0 = arith.cmpi eq, %arg2, %c0_i32 : i32
    %1 = arith.extui %0 : i1 to i32
    %c0_i32_0 = arith.constant 0 : i32
    %2 = arith.cmpi ne, %1, %c0_i32_0 : i32
    scf.if %2 {
      %cst_10 = arith.constant 0.000000e+00 : f32
      %12 = vector.broadcast %cst_10 : f32 to vector<8x128xf32>
      %c0_11 = arith.constant 0 : index
      %c0_12 = arith.constant 0 : index
      %13 = vector.load %arg6[%c0_11, %c0_12] : memref<8x128xf32, #tpu.memory_space<vmem>>, vector<8x128xf32>
      tpu.vector_store %arg6[%c0_11, %c0_12], %12 {strides = array<i32>} : memref<8x128xf32, #tpu.memory_space<vmem>>, vector<8x128xf32>,
    } else {
    }
    %c0 = arith.constant 0 : index
    %c0_1 = arith.constant 0 : index
    %3 = vector.load %arg6[%c0, %c0_1] : memref<8x128xf32, #tpu.memory_space<vmem>>, vector<8x128xf32>
    %c0_2 = arith.constant 0 : index
    %c0_3 = arith.constant 0 : index
    %4 = vector.load %arg3[%c0_2, %c0_3] : memref<8x512xbf16, #tpu.memory_space<vmem>>, vector<8x512xbf16>
    %c0_4 = arith.constant 0 : index
    %c0_5 = arith.constant 0 : index
    %5 = vector.load %arg4[%c0_4, %c0_5] : memref<512x128xbf16, #tpu.memory_space<vmem>>, vector<512x128xbf16>
    %cst = arith.constant dense<0.000000e+00> : vector<8x128xf32>
    %6 = tpu.matmul %4, %5, %cst {dimension_numbers = #tpu.dot_dimension_numbers<[1], [0], [0], [1], [0, 0, 1, 1], [], []>} : vector<8x512xbf16>, vector<512x128xbf16>, vector<8x128xf32> -> vector<8x128xf32>
    %7 = arith.addf %3, %6 : vector<8x128xf32>
    %c0_6 = arith.constant 0 : index
    %c0_7 = arith.constant 0 : index
    %8 = vector.load %arg6[%c0_6, %c0_7] : memref<8x128xf32, #tpu.memory_space<vmem>>, vector<8x128xf32>
    tpu.vector_store %arg6[%c0_6, %c0_7], %7 {strides = array<i32>} : memref<8x128xf32, #tpu.memory_space<vmem>>, vector<8x128xf32>,
    %c0_i32_8 = arith.constant 0 : i32
    %9 = arith.cmpi eq, %arg2, %c0_i32_8 : i32
    %10 = arith.extui %9 : i1 to i32
    %c0_i32_9 = arith.constant 0 : i32
    %11 = arith.cmpi ne, %10, %c0_i32_9 : i32
    scf.if %11 {
      %c0_10 = arith.constant 0 : index
      %c0_11 = arith.constant 0 : index
      %12 = vector.load %arg6[%c0_10, %c0_11] : memref<8x128xf32, #tpu.memory_space<vmem>>, vector<8x128xf32>
      %c0_12 = arith.constant 0 : index
      %c0_13 = arith.constant 0 : index
      %13 = vector.load %arg5[%c0_12, %c0_13] : memref<1x128xf32, #tpu.memory_space<vmem>>, vector<1x128xf32>
      %14 = vector.broadcast %13 : vector<1x128xf32> to vector<8x128xf32>
      %15 = arith.addf %12, %14 : vector<8x128xf32>
      %c0_14 = arith.constant 0 : index
      %c0_15 = arith.constant 0 : index
      %16 = vector.load %arg6[%c0_14, %c0_15] : memref<8x128xf32, #tpu.memory_space<vmem>>, vector<8x128xf32>
      tpu.vector_store %arg6[%c0_14, %c0_15], %15 {strides = array<i32>} : memref<8x128xf32, #tpu.memory_space<vmem>>, vector<8x128xf32>,
    } else {
    }
    return
  }
  func.func @transform_0(%arg0: i32, %arg1: i32, %arg2: i32) -> (i32, i32) {
    %c0_i32 = arith.constant 0 : i32
    return %arg0, %arg2 : i32, i32
  }
  func.func @transform_1(%arg0: i32, %arg1: i32, %arg2: i32) -> (i32, i32) {
    %c0_i32 = arith.constant 0 : i32
    return %arg2, %arg1 : i32, i32
  }
  func.func @transform_2(%arg0: i32, %arg1: i32, %arg2: i32) -> (i32, i32) {
    %c0_i32 = arith.constant 0 : i32
    %c0_i32_0 = arith.constant 0 : i32
    return %c0_i32, %arg1 : i32, i32
  }
  func.func @transform_3(%arg0: i32, %arg1: i32, %arg2: i32) -> (i32, i32) {
    %c0_i32 = arith.constant 0 : i32
    return %arg0, %arg1 : i32, i32
  }
}

</mosaic_0001>

<bundles_post_ra>
// kernel: resnet18_forward.24
= control target key start
LH: loop header
LB: loop body
LE: loop exit
PB: predicated region body
PF: predicated region fallthrough
CT: control target
= control target key end

     0   :  { %vm304_vm0 = vcmask 523264   ;;  %s871_s0 = inlined_call_operand.vmem [shape: f32[128,64], index: 0, kind: input, shape index: {}]   ;;  %s872_s1 = inlined_call_operand.vmem [shape: f32[128,64], index: 1, kind: input, shape index: {}]   ;;  %s873_s2 = inlined_call_operand.vmem [shape: f32[128,64], index: 2, kind: input, shape index: {}]   ;;  %s874_s3 = inlined_call_operand.vmem [shape: f32[128,64], index: 3, kind: input, shape index: {}]   ;;  %s875_s4 = inlined_call_operand.vmem [shape: f32[128,64], index: 4, kind: input, shape index: {}]   ;;  %s876_s5 = inlined_call_operand.vmem [shape: f32[128,64], index: 5, kind: input, shape index: {}]   ;;  %s877_s6 = inlined_call_operand.vmem [shape: f32[128,64], index: 6, kind: input, shape index: {}]   ;;  %s878_s7 = inlined_call_operand.vmem [shape: f32[128,64], index: 7, kind: input, shape index: {}]   ;;  %s879_s8 = inlined_call_operand.vmem [shape: f32[128,64], index: 8, kind: input, shape index: {}]   ;;  %s880_s9 = inlined_call_operand.vmem [shape: f32[128,64], index: 9, kind: output, shape index: {}]  }
   0x1   :  { %v32_v0 = vld [vmem:[%s871_s0] sm:$0xff]  ;;  %v33_v6 = vld [vmem:[%s871_s0 + $0x8] sm:$0xff]  ;;  %v34_v15 = vld [vmem:[%s871_s0 + $0x10] sm:$0xff] }
   0x2   :  { %v48_v1 = vld [vmem:[%s872_s1] sm:$0xff]  ;;  %v49_v7 = vld [vmem:[%s872_s1 + $0x8] sm:$0xff]  ;;  %v50_v16 = vld [vmem:[%s872_s1 + $0x10] sm:$0xff] }
   0x3   :  { %v80_v2 = vld [vmem:[%s873_s2] sm:$0xff]  ;;  %v64_v3 = vmax.f32 %v32_v0, %v48_v1  ;;  %v81_v8 = vld [vmem:[%s873_s2 + $0x8] sm:$0xff]  ;;  %v65_v10 = vmax.f32 %v33_v6, %v49_v7  ;;  %v82_v17 = vld [vmem:[%s873_s2 + $0x10] sm:$0xff]  ;;  %v66_v20 = vmax.f32 %v34_v15, %v50_v16 }
   0x4   :  { %v112_v4 = vld [vmem:[%s874_s3] sm:$0xff]  ;;  %v113_v13 = vld [vmem:[%s874_s3 + $0x8] sm:$0xff]  ;;  %v114_v24 = vld [vmem:[%s874_s3 + $0x10] sm:$0xff] }
   0x5   :  { %v96_v5 = vmax.f32 %v64_v3, %v80_v2  ;;  %v144_v9 = vld [vmem:[%s875_s4] sm:$0xff]  ;;  %v97_v14 = vmax.f32 %v65_v10, %v81_v8  ;;  %v145_v19 = vld [vmem:[%s875_s4 + $0x8] sm:$0xff]  ;;  %v98_v26 = vmax.f32 %v66_v20, %v82_v17  ;;  %v35_v27 = vld [vmem:[%s871_s0 + $0x18] sm:$0xff] }
   0x6   :  { %v176_v12 = vld [vmem:[%s876_s5] sm:$0xff]  ;;  %v177_v23 = vld [vmem:[%s876_s5 + $0x8] sm:$0xff]  ;;  %v51_v28 = vld [vmem:[%s872_s1 + $0x18] sm:$0xff] }
   0x7   :  { %v128_v11 = vmax.f32 %v96_v5, %v112_v4  ;;  %v208_v21 = vld [vmem:[%s877_s6] sm:$0xff]  ;;  %v129_v22 = vmax.f32 %v97_v14, %v113_v13  ;;  %v83_v29 = vld [vmem:[%s873_s2 + $0x18] sm:$0xff]  ;;  %v146_v33 = vld [vmem:[%s875_s4 + $0x10] sm:$0xff]  ;;  %v67_v34 = vmax.f32 %v35_v27, %v51_v28  ;;  %v130_v37 = vmax.f32 %v98_v26, %v114_v24 }
   0x8   :  { %v240_v30 = vld [vmem:[%s878_s7] sm:$0xff]  ;;  %v209_v36 = vld [vmem:[%s877_s6 + $0x8] sm:$0xff]  ;;  %v178_v38 = vld [vmem:[%s876_s5 + $0x10] sm:$0xff] }
   0x9   :  { %v160_v18 = vmax.f32 %v128_v11, %v144_v9  ;;  %v272_v31 = vld [vmem:[%s879_s8] sm:$0xff]  ;;  %v161_v32 = vmax.f32 %v129_v22, %v145_v19  ;;  %v115_v39 = vld [vmem:[%s874_s3 + $0x18] sm:$0xff]  ;;  %v99_v41 = vmax.f32 %v67_v34, %v83_v29  ;;  %v241_v46 = vld [vmem:[%s878_s7 + $0x8] sm:$0xff]  ;;  %v162_v48 = vmax.f32 %v130_v37, %v146_v33 }
   0xa   :  { %v36_v42 = vld [vmem:[%s871_s0 + $0x20] sm:$0xff]  ;;  %v273_v47 = vld [vmem:[%s879_s8 + $0x8] sm:$0xff]  ;;  %v147_v49 = vld [vmem:[%s875_s4 + $0x18] sm:$0xff] }
   0xb   :  { %v192_v25 = vmax.f32 %v160_v18, %v176_v12  ;;  %v193_v40 = vmax.f32 %v161_v32, %v177_v23  ;;  %v52_v43 = vld [vmem:[%s872_s1 + $0x20] sm:$0xff]  ;;  %v210_v52 = vld [vmem:[%s877_s6 + $0x10] sm:$0xff]  ;;  %v131_v53 = vmax.f32 %v99_v41, %v115_v39  ;;  %v179_v54 = vld [vmem:[%s876_s5 + $0x18] sm:$0xff]  ;;  %v194_v57 = vmax.f32 %v162_v48, %v178_v38 }
   0xc   :  { %v84_v44 = vld [vmem:[%s873_s2 + $0x20] sm:$0xff]  ;;  %v68_v50 = vmax.f32 %v36_v42, %v52_v43  ;;  %v37_v59 = vld [vmem:[%s871_s0 + $0x28] sm:$0xff]  ;;  %v242_v63 = vld [vmem:[%s878_s7 + $0x10] sm:$0xff] }
   0xd   :  { %v224_v35 = vmax.f32 %v192_v25, %v208_v21  ;;  %v225_v51 = vmax.f32 %v193_v40, %v209_v36  ;;  %v116_v55 = vld [vmem:[%s874_s3 + $0x20] sm:$0xff]  ;;  %v53_v60 = vld [vmem:[%s872_s1 + $0x28] sm:$0xff]  ;;  %v274_v0 = vld [vmem:[%s879_s8 + $0x10] sm:$0xff]  ;;  %v163_v1 = vmax.f32 %v131_v53, %v147_v49  ;;  %v226_v4 = vmax.f32 %v194_v57, %v210_v52 }
   0xe   :  { %v100_v58 = vmax.f32 %v68_v50, %v84_v44  ;;  %v85_v61 = vld [vmem:[%s873_s2 + $0x28] sm:$0xff]  ;;  %v148_v2 = vld [vmem:[%s875_s4 + $0x20] sm:$0xff]  ;;  %v69_v3 = vmax.f32 %v37_v59, %v53_v60  ;;  %v211_v5 = vld [vmem:[%s877_s6 + $0x18] sm:$0xff] }
   0xf   :  { %v256_v45 = vmax.f32 %v224_v35, %v240_v30  ;;  %v257_v62 = vmax.f32 %v225_v51, %v241_v46  ;;  %v180_v7 = vld [vmem:[%s876_s5 + $0x20] sm:$0xff]  ;;  %v117_v8 = vld [vmem:[%s874_s3 + $0x28] sm:$0xff]  ;;  %v195_v10 = vmax.f32 %v163_v1, %v179_v54  ;;  %v38_v12 = vld [vmem:[%s871_s0 + $0x30] sm:$0xff]  ;;  %v258_v15 = vmax.f32 %v226_v4, %v242_v63 }
  0x10   :  { %v132_v6 = vmax.f32 %v100_v58, %v116_v55  ;;  %v101_v11 = vmax.f32 %v69_v3, %v85_v61  ;;  %v54_v13 = vld [vmem:[%s872_s1 + $0x30] sm:$0xff]  ;;  %v243_v16 = vld [vmem:[%s878_s7 + $0x18] sm:$0xff]  ;;  %v149_v19 = vld [vmem:[%s875_s4 + $0x28] sm:$0xff] }
  0x11   :  { %v288_v56 = vmax.f32 %v256_v45, %v272_v31  ;;  %v289_v9 = vmax.f32 %v257_v62, %v273_v47  ;;  %v86_v14 = vld [vmem:[%s873_s2 + $0x30] sm:$0xff]  ;;  %v275_v17 = vld [vmem:[%s879_s8 + $0x18] sm:$0xff]  ;;  %v70_v20 = vmax.f32 %v38_v12, %v54_v13  ;;  %v227_v21 = vmax.f32 %v195_v10, %v211_v5  ;;  %v212_v22 = vld [vmem:[%s877_s6 + $0x20] sm:$0xff] }
  0x12   :  { %v164_v18 = vmax.f32 %v132_v6, %v148_v2  ;;  %v133_v23 = vmax.f32 %v101_v11, %v117_v8  ;;  %v181_v24 = vld [vmem:[%s876_s5 + $0x28] sm:$0xff]  ;;  %v118_v25 = vld [vmem:[%s874_s3 + $0x30] sm:$0xff]  ;;  %v290_v26 = vmax.f32 %v258_v15, %v274_v0  ;;  %v39_v29 = vld [vmem:[%s871_s0 + $0x38] sm:$0xff] }
  0x13   :  { %305 = vst.msk [vmem:[%s880_s9] sm:$0xff] %vm304_vm0, %v288_v56  ;;  %306 = vst.msk [vmem:[%s880_s9 + $0x8] sm:$0xff] %vm304_vm0, %v289_v9  ;;  %v102_v28 = vmax.f32 %v70_v20, %v86_v14  ;;  %v55_v30 = vld [vmem:[%s872_s1 + $0x38] sm:$0xff]  ;;  %v259_v32 = vmax.f32 %v227_v21, %v243_v16  ;;  %v244_v33 = vld [vmem:[%s878_s7 + $0x20] sm:$0xff] }
  0x14   :  { %v196_v27 = vmax.f32 %v164_v18, %v180_v7  ;;  %v87_v31 = vld [vmem:[%s873_s2 + $0x38] sm:$0xff]  ;;  %v276_v34 = vld [vmem:[%s879_s8 + $0x20] sm:$0xff]  ;;  %v165_v35 = vmax.f32 %v133_v23, %v149_v19  ;;  %v150_v36 = vld [vmem:[%s875_s4 + $0x30] sm:$0xff]  ;;  %v71_v37 = vmax.f32 %v39_v29, %v55_v30  ;;  %307 = vst.msk [vmem:[%s880_s9 + $0x10] sm:$0xff] %vm304_vm0, %v290_v26 }
  0x15   :  { %v213_v39 = vld [vmem:[%s877_s6 + $0x28] sm:$0xff]  ;;  %v134_v40 = vmax.f32 %v102_v28, %v118_v25  ;;  %v182_v41 = vld [vmem:[%s876_s5 + $0x30] sm:$0xff]  ;;  %v119_v42 = vld [vmem:[%s874_s3 + $0x38] sm:$0xff]  ;;  %v291_v43 = vmax.f32 %v259_v32, %v275_v17 }
  0x16   :  { %v228_v38 = vmax.f32 %v196_v27, %v212_v22  ;;  %v197_v44 = vmax.f32 %v165_v35, %v181_v24  ;;  %v103_v45 = vmax.f32 %v71_v37, %v87_v31  ;;  %v40_v46 = vld [vmem:[%s871_s0 + $0x40] sm:$0xff]  ;;  %v245_v50 = vld [vmem:[%s878_s7 + $0x28] sm:$0xff]  ;;  %v151_v53 = vld [vmem:[%s875_s4 + $0x38] sm:$0xff] }
  0x17   :  { %v56_v47 = vld [vmem:[%s872_s1 + $0x40] sm:$0xff]  ;;  %v277_v51 = vld [vmem:[%s879_s8 + $0x28] sm:$0xff]  ;;  %v166_v52 = vmax.f32 %v134_v40, %v150_v36  ;;  %308 = vst.msk [vmem:[%s880_s9 + $0x18] sm:$0xff] %vm304_vm0, %v291_v43  ;;  %v214_v56 = vld [vmem:[%s877_s6 + $0x30] sm:$0xff] }
  0x18   :  { %v88_v48 = vld [vmem:[%s873_s2 + $0x40] sm:$0xff]  ;;  %v260_v49 = vmax.f32 %v228_v38, %v244_v33  ;;  %v72_v54 = vmax.f32 %v40_v46, %v56_v47  ;;  %v229_v55 = vmax.f32 %v197_v44, %v213_v39  ;;  %v135_v57 = vmax.f32 %v103_v45, %v119_v42  ;;  %v183_v58 = vld [vmem:[%s876_s5 + $0x38] sm:$0xff]  ;;  %v41_v63 = vld [vmem:[%s871_s0 + $0x48] sm:$0xff] }
  0x19   :  { %v120_v59 = vld [vmem:[%s874_s3 + $0x40] sm:$0xff]  ;;  %v198_v61 = vmax.f32 %v166_v52, %v182_v41  ;;  %v57_v0 = vld [vmem:[%s872_s1 + $0x48] sm:$0xff]  ;;  %v246_v3 = vld [vmem:[%s878_s7 + $0x30] sm:$0xff] }
  0x1a   :  { %v292_v60 = vmax.f32 %v260_v49, %v276_v34  ;;  %v104_v62 = vmax.f32 %v72_v54, %v88_v48  ;;  %v89_v1 = vld [vmem:[%s873_s2 + $0x48] sm:$0xff]  ;;  %v261_v2 = vmax.f32 %v229_v55, %v245_v50  ;;  %v278_v4 = vld [vmem:[%s879_s8 + $0x30] sm:$0xff]  ;;  %v167_v5 = vmax.f32 %v135_v57, %v151_v53  ;;  %v152_v6 = vld [vmem:[%s875_s4 + $0x40] sm:$0xff] }
  0x1b   :  { %v73_v7 = vmax.f32 %v41_v63, %v57_v0  ;;  %v230_v8 = vmax.f32 %v198_v61, %v214_v56  ;;  %v215_v9 = vld [vmem:[%s877_s6 + $0x38] sm:$0xff]  ;;  %v184_v11 = vld [vmem:[%s876_s5 + $0x40] sm:$0xff]  ;;  %v121_v12 = vld [vmem:[%s874_s3 + $0x48] sm:$0xff] }
  0x1c   :  { %309 = vst.msk [vmem:[%s880_s9 + $0x20] sm:$0xff] %vm304_vm0, %v292_v60  ;;  %v136_v10 = vmax.f32 %v104_v62, %v120_v59  ;;  %v293_v13 = vmax.f32 %v261_v2, %v277_v51  ;;  %v199_v14 = vmax.f32 %v167_v5, %v183_v58  ;;  %v42_v16 = vld [vmem:[%s871_s0 + $0x50] sm:$0xff]  ;;  %v247_v20 = vld [vmem:[%s878_s7 + $0x38] sm:$0xff]  ;;  %v153_v23 = vld [vmem:[%s875_s4 + $0x48] sm:$0xff] }
  0x1d   :  { %v105_v15 = vmax.f32 %v73_v7, %v89_v1  ;;  %v58_v17 = vld [vmem:[%s872_s1 + $0x50] sm:$0xff]  ;;  %v262_v19 = vmax.f32 %v230_v8, %v246_v3  ;;  %v279_v21 = vld [vmem:[%s879_s8 + $0x38] sm:$0xff]  ;;  %v216_v26 = vld [vmem:[%s877_s6 + $0x40] sm:$0xff] }
  0x1e   :  { %v90_v18 = vld [vmem:[%s873_s2 + $0x50] sm:$0xff]  ;;  %v168_v22 = vmax.f32 %v136_v10, %v152_v6  ;;  %v74_v24 = vmax.f32 %v42_v16, %v58_v17  ;;  %310 = vst.msk [vmem:[%s880_s9 + $0x28] sm:$0xff] %vm304_vm0, %v293_v13  ;;  %v231_v25 = vmax.f32 %v199_v14, %v215_v9  ;;  %v185_v28 = vld [vmem:[%s876_s5 + $0x48] sm:$0xff]  ;;  %v43_v33 = vld [vmem:[%s871_s0 + $0x58] sm:$0xff] }
  0x1f   :  { %v137_v27 = vmax.f32 %v105_v15, %v121_v12  ;;  %v122_v29 = vld [vmem:[%s874_s3 + $0x50] sm:$0xff]  ;;  %v294_v30 = vmax.f32 %v262_v19, %v278_v4  ;;  %v59_v34 = vld [vmem:[%s872_s1 + $0x58] sm:$0xff]  ;;  %v248_v37 = vld [vmem:[%s878_s7 + $0x40] sm:$0xff] }
  0x20   :  { %v200_v31 = vmax.f32 %v168_v22, %v184_v11  ;;  %v106_v32 = vmax.f32 %v74_v24, %v90_v18  ;;  %v91_v35 = vld [vmem:[%s873_s2 + $0x58] sm:$0xff]  ;;  %v263_v36 = vmax.f32 %v231_v25, %v247_v20  ;;  %v280_v38 = vld [vmem:[%s879_s8 + $0x40] sm:$0xff]  ;;  %v154_v40 = vld [vmem:[%s875_s4 + $0x50] sm:$0xff]  ;;  %v75_v41 = vmax.f32 %v43_v33, %v59_v34 }
  0x21   :  { %v169_v39 = vmax.f32 %v137_v27, %v153_v23  ;;  %311 = vst.msk [vmem:[%s880_s9 + $0x30] sm:$0xff] %vm304_vm0, %v294_v30  ;;  %v217_v43 = vld [vmem:[%s877_s6 + $0x48] sm:$0xff]  ;;  %v186_v45 = vld [vmem:[%s876_s5 + $0x50] sm:$0xff]  ;;  %v123_v46 = vld [vmem:[%s874_s3 + $0x58] sm:$0xff] }
  0x22   :  { %v232_v42 = vmax.f32 %v200_v31, %v216_v26  ;;  %v138_v44 = vmax.f32 %v106_v32, %v122_v29  ;;  %v295_v47 = vmax.f32 %v263_v36, %v279_v21  ;;  %v107_v49 = vmax.f32 %v75_v41, %v91_v35  ;;  %v44_v50 = vld [vmem:[%s871_s0 + $0x60] sm:$0xff]  ;;  %v249_v54 = vld [vmem:[%s878_s7 + $0x48] sm:$0xff]  ;;  %v155_v57 = vld [vmem:[%s875_s4 + $0x58] sm:$0xff] }
  0x23   :  { %v201_v48 = vmax.f32 %v169_v39, %v185_v28  ;;  %v60_v51 = vld [vmem:[%s872_s1 + $0x60] sm:$0xff]  ;;  %v281_v55 = vld [vmem:[%s879_s8 + $0x48] sm:$0xff]  ;;  %v218_v60 = vld [vmem:[%s877_s6 + $0x50] sm:$0xff] }
  0x24   :  { %v92_v52 = vld [vmem:[%s873_s2 + $0x60] sm:$0xff]  ;;  %v264_v53 = vmax.f32 %v232_v42, %v248_v37  ;;  %v170_v56 = vmax.f32 %v138_v44, %v154_v40  ;;  %v76_v58 = vmax.f32 %v44_v50, %v60_v51  ;;  %312 = vst.msk [vmem:[%s880_s9 + $0x38] sm:$0xff] %vm304_vm0, %v295_v47  ;;  %v139_v61 = vmax.f32 %v107_v49, %v123_v46  ;;  %v187_v62 = vld [vmem:[%s876_s5 + $0x58] sm:$0xff]  ;;  %v45_v3 = vld [vmem:[%s871_s0 + $0x68] sm:$0xff] }
  0x25   :  { %v233_v59 = vmax.f32 %v201_v48, %v217_v43  ;;  %v124_v63 = vld [vmem:[%s874_s3 + $0x60] sm:$0xff]  ;;  %v61_v4 = vld [vmem:[%s872_s1 + $0x68] sm:$0xff]  ;;  %v250_v7 = vld [vmem:[%s878_s7 + $0x50] sm:$0xff] }
  0x26   :  { %v296_v0 = vmax.f32 %v264_v53, %v280_v38  ;;  %v202_v1 = vmax.f32 %v170_v56, %v186_v45  ;;  %v108_v2 = vmax.f32 %v76_v58, %v92_v52  ;;  %v93_v5 = vld [vmem:[%s873_s2 + $0x68] sm:$0xff]  ;;  %v282_v8 = vld [vmem:[%s879_s8 + $0x50] sm:$0xff]  ;;  %v171_v9 = vmax.f32 %v139_v61, %v155_v57  ;;  %v156_v10 = vld [vmem:[%s875_s4 + $0x60] sm:$0xff] }
  0x27   :  { %v265_v6 = vmax.f32 %v233_v59, %v249_v54  ;;  %v77_v11 = vmax.f32 %v45_v3, %v61_v4  ;;  %v219_v13 = vld [vmem:[%s877_s6 + $0x58] sm:$0xff]  ;;  %v188_v15 = vld [vmem:[%s876_s5 + $0x60] sm:$0xff]  ;;  %v125_v16 = vld [vmem:[%s874_s3 + $0x68] sm:$0xff] }
  0x28   :  { %313 = vst.msk [vmem:[%s880_s9 + $0x40] sm:$0xff] %vm304_vm0, %v296_v0  ;;  %v234_v12 = vmax.f32 %v202_v1, %v218_v60  ;;  %v140_v14 = vmax.f32 %v108_v2, %v124_v63  ;;  %v203_v18 = vmax.f32 %v171_v9, %v187_v62  ;;  %v46_v20 = vld [vmem:[%s871_s0 + $0x70] sm:$0xff]  ;;  %v251_v24 = vld [vmem:[%s878_s7 + $0x58] sm:$0xff]  ;;  %v157_v27 = vld [vmem:[%s875_s4 + $0x68] sm:$0xff] }
  0x29   :  { %v297_v17 = vmax.f32 %v265_v6, %v281_v55  ;;  %v109_v19 = vmax.f32 %v77_v11, %v93_v5  ;;  %v62_v21 = vld [vmem:[%s872_s1 + $0x70] sm:$0xff]  ;;  %v283_v25 = vld [vmem:[%s879_s8 + $0x58] sm:$0xff]  ;;  %v220_v30 = vld [vmem:[%s877_s6 + $0x60] sm:$0xff] }
  0x2a   :  { %v94_v22 = vld [vmem:[%s873_s2 + $0x70] sm:$0xff]  ;;  %v266_v23 = vmax.f32 %v234_v12, %v250_v7  ;;  %v172_v26 = vmax.f32 %v140_v14, %v156_v10  ;;  %v78_v28 = vmax.f32 %v46_v20, %v62_v21  ;;  %v235_v29 = vmax.f32 %v203_v18, %v219_v13  ;;  %v189_v32 = vld [vmem:[%s876_s5 + $0x68] sm:$0xff]  ;;  %v47_v37 = vld [vmem:[%s871_s0 + $0x78] sm:$0xff] }
  0x2b   :  { %314 = vst.msk [vmem:[%s880_s9 + $0x48] sm:$0xff] %vm304_vm0, %v297_v17  ;;  %v141_v31 = vmax.f32 %v109_v19, %v125_v16  ;;  %v126_v33 = vld [vmem:[%s874_s3 + $0x70] sm:$0xff]  ;;  %v63_v38 = vld [vmem:[%s872_s1 + $0x78] sm:$0xff]  ;;  %v252_v41 = vld [vmem:[%s878_s7 + $0x60] sm:$0xff] }
  0x2c   :  { %v298_v34 = vmax.f32 %v266_v23, %v282_v8  ;;  %v204_v35 = vmax.f32 %v172_v26, %v188_v15  ;;  %v110_v36 = vmax.f32 %v78_v28, %v94_v22  ;;  %v95_v39 = vld [vmem:[%s873_s2 + $0x78] sm:$0xff]  ;;  %v267_v40 = vmax.f32 %v235_v29, %v251_v24  ;;  %v158_v43 = vld [vmem:[%s875_s4 + $0x70] sm:$0xff]  ;;  %v221_v46 = vld [vmem:[%s877_s6 + $0x68] sm:$0xff] }
  0x2d   :  { %v173_v42 = vmax.f32 %v141_v31, %v157_v27  ;;  %v79_v44 = vmax.f32 %v47_v37, %v63_v38  ;;  %v127_v48 = vld [vmem:[%s874_s3 + $0x78] sm:$0xff]  ;;  %v284_v50 = vld [vmem:[%s879_s8 + $0x60] sm:$0xff]  ;;  %v190_v52 = vld [vmem:[%s876_s5 + $0x70] sm:$0xff] }
  0x2e   :  { %315 = vst.msk [vmem:[%s880_s9 + $0x50] sm:$0xff] %vm304_vm0, %v298_v34  ;;  %v236_v45 = vmax.f32 %v204_v35, %v220_v30  ;;  %v142_v47 = vmax.f32 %v110_v36, %v126_v33  ;;  %v299_v49 = vmax.f32 %v267_v40, %v283_v25  ;;  %v253_v55 = vld [vmem:[%s878_s7 + $0x68] sm:$0xff]  ;;  %v159_v57 = vld [vmem:[%s875_s4 + $0x78] sm:$0xff]  ;;  %v222_v59 = vld [vmem:[%s877_s6 + $0x70] sm:$0xff] }
  0x2f   :  { %v205_v51 = vmax.f32 %v173_v42, %v189_v32  ;;  %v111_v53 = vmax.f32 %v79_v44, %v95_v39  ;;  %v285_v62 = vld [vmem:[%s879_s8 + $0x68] sm:$0xff]  ;;  %v191_v0 = vld [vmem:[%s876_s5 + $0x78] sm:$0xff]  ;;  %v254_v2 = vld [vmem:[%s878_s7 + $0x70] sm:$0xff] }
  0x30   :  { %v268_v54 = vmax.f32 %v236_v45, %v252_v41  ;;  %v174_v56 = vmax.f32 %v142_v47, %v158_v43  ;;  %316 = vst.msk [vmem:[%s880_s9 + $0x58] sm:$0xff] %vm304_vm0, %v299_v49  ;;  %v223_v5 = vld [vmem:[%s877_s6 + $0x78] sm:$0xff]  ;;  %v286_v7 = vld [vmem:[%s879_s8 + $0x70] sm:$0xff] }
  0x31   :  { %v237_v58 = vmax.f32 %v205_v51, %v221_v46  ;;  %v143_v60 = vmax.f32 %v111_v53, %v127_v48  ;;  %v255_v10 = vld [vmem:[%s878_s7 + $0x78] sm:$0xff] }
  0x32   :  { %v300_v61 = vmax.f32 %v268_v54, %v284_v50  ;;  %v206_v63 = vmax.f32 %v174_v56, %v190_v52  ;;  %v287_v13 = vld [vmem:[%s879_s8 + $0x78] sm:$0xff] }
  0x33   :  { %v269_v1 = vmax.f32 %v237_v58, %v253_v55  ;;  %v175_v3 = vmax.f32 %v143_v60, %v159_v57 }
  0x34   :  { %317 = vst.msk [vmem:[%s880_s9 + $0x60] sm:$0xff] %vm304_vm0, %v300_v61  ;;  %v238_v4 = vmax.f32 %v206_v63, %v222_v59 }
  0x35   :  { %v301_v6 = vmax.f32 %v269_v1, %v285_v62  ;;  %v207_v8 = vmax.f32 %v175_v3, %v191_v0 }
  0x36   :  { %v270_v9 = vmax.f32 %v238_v4, %v254_v2 }
  0x37   :  { %318 = vst.msk [vmem:[%s880_s9 + $0x68] sm:$0xff] %vm304_vm0, %v301_v6  ;;  %v239_v11 = vmax.f32 %v207_v8, %v223_v5 }
  0x38   :  { %v302_v12 = vmax.f32 %v270_v9, %v286_v7 }
  0x39   :  { %v271_v14 = vmax.f32 %v239_v11, %v255_v10 }
  0x3a   :  { %319 = vst.msk [vmem:[%s880_s9 + $0x70] sm:$0xff] %vm304_vm0, %v302_v12 }
  0x3b   :  { %v303_v15 = vmax.f32 %v271_v14, %v287_v13 }
  0x3d   :  { %320 = vst.msk [vmem:[%s880_s9 + $0x78] sm:$0xff] %vm304_vm0, %v303_v15 }

// kernel: resnet18_forward.23
= control target key start
LH: loop header
LB: loop body
LE: loop exit
PB: predicated region body
PF: predicated region fallthrough
CT: control target
= control target key end

     0   :  { %s1461_s12 = smov 0   ;;  %s1463_s13 = smov 0   ;;  %s1878_s0 = inlined_call_operand.vmem [shape: bf16[512,256], index: 0, kind: input, shape index: {}]   ;;  %s1879_s1 = inlined_call_operand.vmem [shape: bf16[256,64], index: 1, kind: input, shape index: {}]   ;;  %s1880_s2 = inlined_call_operand.vmem [shape: f32[1,64], index: 2, kind: input, shape index: {}]   ;;  %s1881_s3 = inlined_call_operand.vmem [shape: f32[512,64], index: 3, kind: output, shape index: {}]  }
   0x1   :  { %s1465_s14 = smov 0  }
   0x2 LB: > { %s32_s15 = sadd.s32 1, %s1434_s13  ;;  %p1141_p0 = scmp.ge.s32.totalorder %s1438_s14, 1  ;;  %s1438_s14 = sphi %s1465_s14, %s13_s14   ;;  %s1434_s13 = sphi %s1463_s13, %s1883_s13   ;;  %s1430_s12 = sphi %s1461_s12, %s1882_s12  }
   0x3   : > { %p34_p1 = scmp.ge.s32.totalorder %s32_s15, 2  ;;  %p191_p2 = scmp.lt.s32.totalorder %s1438_s14, 3 }
   0x5   : > { %s1885_s15 = smov (%p34_p1, %s32_s15), 0  ;;  %p192_p3 = pnand %p1141_p0, %p191_p2 }
   0x6   : > { %v1352_v0 = vld [vmem:[%s1879_s1 + $0x40] sm:$0xff] (!%p192_p3)   ;;  %s1142_s18 = sshll.u32 (!%p192_p3), %s1430_s12, 5  ;;  %v1354_v2 = vld [vmem:[%s1879_s1 + $0x48] sm:$0xff] (!%p192_p3)   ;;  %v1356_v4 = vld [vmem:[%s1879_s1 + $0x50] sm:$0xff] (!%p192_p3)   ;;  %vm272_vm0 = vcmask (!%p192_p3), 523264   ;;  %v1440_v48 = vmov (!%p192_p3), 0.0  }
   0x7   : > { %195 = sbr.rel (%p192_p3) target bundleno = 328 (0x148), region = 32  ;;  %v1353_v1 = vld [vmem:[%s1879_s1] sm:$0xff] (!%p192_p3)   ;;  %1199 = vmatprep.subr.bf16.mxu0 (!%p192_p3), %v1352_v0  ;;  %1311 = vmatprep.subr.bf16.mxu1 (!%p192_p3), %v1352_v0  ;;  %v1355_v3 = vld [vmem:[%s1879_s1 + $0x8] sm:$0xff] (!%p192_p3)   ;;  %p236_p4 = scmp.lt.s32.totalorder (!%p192_p3), %s1142_s18, 63  ;;  %v1357_v5 = vld [vmem:[%s1879_s1 + $0x10] sm:$0xff] (!%p192_p3)  }
   0x8   : > { %1200 = vmatpush3.bf16.msra.mxu0 (!%p192_p3), %v1353_v1  ;;  %1319 = vmatpush3.bf16.msra.mxu1 (!%p192_p3), %v1353_v1  ;;  %v1358_v6 = vld [vmem:[%s1879_s1 + $0x58] sm:$0xff] (!%p192_p3)   ;;  %v1360_v8 = vld [vmem:[%s1879_s1 + $0x60] sm:$0xff] (!%p192_p3)   ;;  %v1362_v10 = vld [vmem:[%s1879_s1 + $0x68] sm:$0xff] (!%p192_p3)  }
   0x9   : > { %1201 = vmatprep.subr.bf16.mxu0 (!%p192_p3), %v1354_v2  ;;  %1312 = vmatprep.subr.bf16.mxu1 (!%p192_p3), %v1354_v2  ;;  %v1359_v7 = vld [vmem:[%s1879_s1 + $0x18] sm:$0xff] (!%p192_p3)   ;;  %v1361_v9 = vld [vmem:[%s1879_s1 + $0x20] sm:$0xff] (!%p192_p3)   ;;  %v1363_v13 = vld [vmem:[%s1879_s1 + $0x28] sm:$0xff] (!%p192_p3)  }
   0xa   : > { %v1364_v14 = vld [vmem:[%s1879_s1 + $0x70] sm:$0xff] (!%p192_p3)   ;;  %v1366_v16 = vld [vmem:[%s1879_s1 + $0x78] sm:$0xff] (!%p192_p3)  }
   0xb   : > { %v1365_v15 = vld [vmem:[%s1879_s1 + $0x30] sm:$0xff] (!%p192_p3)   ;;  %v1367_v17 = vld [vmem:[%s1879_s1 + $0x38] sm:$0xff] (!%p192_p3)  }
   0xc   : > { %1202 = vmatpush3.bf16.msra.mxu0 (!%p192_p3), %v1355_v3  ;;  %1320 = vmatpush3.bf16.msra.mxu1 (!%p192_p3), %v1355_v3 }
   0xd   : > { %1203 = vmatprep.subr.bf16.mxu0 (!%p192_p3), %v1356_v4  ;;  %1313 = vmatprep.subr.bf16.mxu1 (!%p192_p3), %v1356_v4 }
   0xe   : > { %s1887_s18 = smov (!%p236_p4, %s1142_s18), 63 }
   0xf   : > { %s1198_s6 = sshll.u32 %s1887_s18, 3 }
  0x10   : > { %1204 = vmatpush3.bf16.msra.mxu0 %v1357_v5  ;;  %1321 = vmatpush3.bf16.msra.mxu1 %v1357_v5  ;;  %s1514_s11 = scalar_lea.vmem %s1878_s0, %s1198_s6  ;;  %s1574_s5 = scalar_lea.vmem %s1881_s3, %s1198_s6 }
  0x11   : > { %1205 = vmatprep.subr.bf16.mxu0 %v1358_v6  ;;  %1314 = vmatprep.subr.bf16.mxu1 %v1358_v6  ;;  %v1370_v11 = vld [vmem:[%s1514_s11 + $0x4] ss:$8 sps:$4 sm:$0xff]   ;;  %v1368_v18 = vld [vmem:[%s1514_s11] ss:$8 sps:$4 sm:$0xff]   ;;  %v1374_v20 = vld [vmem:[%s1514_s11 + $0x14] ss:$8 sps:$4 sm:$0xff]  }
  0x12   : > { %v1373_v12 = vld [vmem:[%s1514_s11 + $0x84] ss:$8 sps:$4 sm:$0xff]   ;;  %689 = vmatprep.mubr.bf16.mxu0 %v1370_v11  ;;  %v1371_v19 = vld [vmem:[%s1514_s11 + $0x80] ss:$8 sps:$4 sm:$0xff]   ;;  %v1376_v21 = vld [vmem:[%s1514_s11 + $0x94] ss:$8 sps:$4 sm:$0xff]  }
  0x13   : > { %753 = vmatprep.mubr.bf16.mxu1 %v1373_v12  ;;  %v1378_v22 = vld [vmem:[%s1514_s11 + $0x10] ss:$8 sps:$4 sm:$0xff]   ;;  %v1380_v24 = vld [vmem:[%s1514_s11 + $0x24] ss:$8 sps:$4 sm:$0xff]   ;;  %v1384_v26 = vld [vmem:[%s1514_s11 + $0x20] ss:$8 sps:$4 sm:$0xff]  }
  0x14   : > { %1206 = vmatpush3.bf16.msra.mxu0 %v1359_v7  ;;  %1322 = vmatpush3.bf16.msra.mxu1 %v1359_v7  ;;  %v1379_v23 = vld [vmem:[%s1514_s11 + $0x90] ss:$8 sps:$4 sm:$0xff]   ;;  %v1382_v25 = vld [vmem:[%s1514_s11 + $0xa4] ss:$8 sps:$4 sm:$0xff]   ;;  %v1385_v27 = vld [vmem:[%s1514_s11 + $0xa0] ss:$8 sps:$4 sm:$0xff]  }
  0x15   : > { %1207 = vmatprep.subr.bf16.mxu0 %v1360_v8  ;;  %1315 = vmatprep.subr.bf16.mxu1 %v1360_v8  ;;  %v1386_v28 = vld [vmem:[%s1514_s11 + $0x34] ss:$8 sps:$4 sm:$0xff]   ;;  %v1390_v30 = vld [vmem:[%s1514_s11 + $0x30] ss:$8 sps:$4 sm:$0xff]   ;;  %v1392_v32 = vld [vmem:[%s1514_s11 + $0x44] ss:$8 sps:$4 sm:$0xff]  }
  0x16   : > { %v1388_v29 = vld [vmem:[%s1514_s11 + $0xb4] ss:$8 sps:$4 sm:$0xff]   ;;  %v1391_v31 = vld [vmem:[%s1514_s11 + $0xb0] ss:$8 sps:$4 sm:$0xff]   ;;  %v1394_v33 = vld [vmem:[%s1514_s11 + $0xc4] ss:$8 sps:$4 sm:$0xff]  }
  0x17   : > { %v1396_v34 = vld [vmem:[%s1514_s11 + $0x40] ss:$8 sps:$4 sm:$0xff]   ;;  %v1398_v36 = vld [vmem:[%s1514_s11 + $0x54] ss:$8 sps:$4 sm:$0xff]   ;;  %v1402_v38 = vld [vmem:[%s1514_s11 + $0x50] ss:$8 sps:$4 sm:$0xff]  }
  0x18   : > { %1208 = vmatpush3.bf16.msra.mxu0 %v1361_v9  ;;  %1323 = vmatpush3.bf16.msra.mxu1 %v1361_v9  ;;  %v1397_v35 = vld [vmem:[%s1514_s11 + $0xc0] ss:$8 sps:$4 sm:$0xff]   ;;  %v1400_v37 = vld [vmem:[%s1514_s11 + $0xd4] ss:$8 sps:$4 sm:$0xff]   ;;  %v1403_v39 = vld [vmem:[%s1514_s11 + $0xd0] ss:$8 sps:$4 sm:$0xff]  }
  0x19   : > { %1209 = vmatprep.subr.bf16.mxu0 %v1362_v10  ;;  %1316 = vmatprep.subr.bf16.mxu1 %v1362_v10  ;;  %v1404_v40 = vld [vmem:[%s1514_s11 + $0x64] ss:$8 sps:$4 sm:$0xff]   ;;  %v1408_v42 = vld [vmem:[%s1514_s11 + $0x60] ss:$8 sps:$4 sm:$0xff]   ;;  %v1410_v44 = vld [vmem:[%s1514_s11 + $0x74] ss:$8 sps:$4 sm:$0xff]  }
  0x1a   : > { %v1406_v41 = vld [vmem:[%s1514_s11 + $0xe4] ss:$8 sps:$4 sm:$0xff]   ;;  %v1409_v43 = vld [vmem:[%s1514_s11 + $0xe0] ss:$8 sps:$4 sm:$0xff]   ;;  %v1412_v45 = vld [vmem:[%s1514_s11 + $0xf4] ss:$8 sps:$4 sm:$0xff]  }
  0x1b   : > { %v1414_v46 = vld [vmem:[%s1514_s11 + $0x70] ss:$8 sps:$4 sm:$0xff]   ;;  %273 = vst.msk [vmem:[%s1574_s5] sm:$0xff] %vm272_vm0, %v1440_v48  ;;  %274 = vst.msk [vmem:[%s1574_s5 + $0x8] sm:$0xff] %vm272_vm0, %v1440_v48 }
  0x1c   : > { %1210 = vmatpush3.bf16.msra.mxu0 %v1363_v13  ;;  %1324 = vmatpush3.bf16.msra.mxu1 %v1363_v13  ;;  %v1415_v47 = vld [vmem:[%s1514_s11 + $0xf0] ss:$8 sps:$4 sm:$0xff]   ;;  %275 = vst.msk [vmem:[%s1574_s5 + $0x10] sm:$0xff] %vm272_vm0, %v1440_v48  ;;  %276 = vst.msk [vmem:[%s1574_s5 + $0x18] sm:$0xff] %vm272_vm0, %v1440_v48 }
  0x1d   : > { %1211 = vmatprep.subr.bf16.mxu0 %v1364_v14  ;;  %1317 = vmatprep.subr.bf16.mxu1 %v1364_v14  ;;  %277 = vst.msk [vmem:[%s1574_s5 + $0x20] sm:$0xff] %vm272_vm0, %v1440_v48  ;;  %278 = vst.msk [vmem:[%s1574_s5 + $0x28] sm:$0xff] %vm272_vm0, %v1440_v48 }
  0x1e   : > { %279 = vst.msk [vmem:[%s1574_s5 + $0x30] sm:$0xff] %vm272_vm0, %v1440_v48  ;;  %280 = vst.msk [vmem:[%s1574_s5 + $0x38] sm:$0xff] %vm272_vm0, %v1440_v48 }
  0x1f   : > { %281 = vst.msk [vmem:[%s1574_s5 + $0x40] sm:$0xff] %vm272_vm0, %v1440_v48  ;;  %282 = vst.msk [vmem:[%s1574_s5 + $0x48] sm:$0xff] %vm272_vm0, %v1440_v48 }
  0x20   : > { %1212 = vmatpush3.bf16.msra.mxu0 %v1365_v15  ;;  %1325 = vmatpush3.bf16.msra.mxu1 %v1365_v15  ;;  %283 = vst.msk [vmem:[%s1574_s5 + $0x50] sm:$0xff] %vm272_vm0, %v1440_v48  ;;  %284 = vst.msk [vmem:[%s1574_s5 + $0x58] sm:$0xff] %vm272_vm0, %v1440_v48  ;;  %v1657_v15 = vld [vmem:[%s1880_s2] ss:$0 sm:$0xff] }
  0x21   : > { %1213 = vmatprep.subr.bf16.mxu0 %v1366_v16  ;;  %1318 = vmatprep.subr.bf16.mxu1 %v1366_v16  ;;  %285 = vst.msk [vmem:[%s1574_s5 + $0x60] sm:$0xff] %vm272_vm0, %v1440_v48  ;;  %286 = vst.msk [vmem:[%s1574_s5 + $0x68] sm:$0xff] %vm272_vm0, %v1440_v48 }
  0x22   : > { %287 = vst.msk [vmem:[%s1574_s5 + $0x70] sm:$0xff] %vm272_vm0, %v1440_v48  ;;  %288 = vst.msk [vmem:[%s1574_s5 + $0x78] sm:$0xff] %vm272_vm0, %v1440_v48  ;;  %v305_v51 = vld [vmem:[%s1574_s5] sm:$0xff]  ;;  %v306_v59 = vld [vmem:[%s1574_s5 + $0x8] sm:$0xff] }
  0x23   : > { %289 = vst.msk [vmem:[%s1574_s5 + $0x80] sm:$0xff] %vm272_vm0, %v1440_v48  ;;  %290 = vst.msk [vmem:[%s1574_s5 + $0x88] sm:$0xff] %vm272_vm0, %v1440_v48  ;;  %v307_v7 = vld [vmem:[%s1574_s5 + $0x10] sm:$0xff]  ;;  %v308_v16 = vld [vmem:[%s1574_s5 + $0x18] sm:$0xff] }
  0x24   : > { %1214 = vmatpush3.bf16.msra.mxu0 %v1367_v17  ;;  %1326 = vmatpush3.bf16.msra.mxu1 %v1367_v17  ;;  %291 = vst.msk [vmem:[%s1574_s5 + $0x90] sm:$0xff] %vm272_vm0, %v1440_v48  ;;  %292 = vst.msk [vmem:[%s1574_s5 + $0x98] sm:$0xff] %vm272_vm0, %v1440_v48 }
  0x25   : > { %293 = vst.msk [vmem:[%s1574_s5 + $0xa0] sm:$0xff] %vm272_vm0, %v1440_v48  ;;  %294 = vst.msk [vmem:[%s1574_s5 + $0xa8] sm:$0xff] %vm272_vm0, %v1440_v48 }
  0x26   : > { %295 = vst.msk [vmem:[%s1574_s5 + $0xb0] sm:$0xff] %vm272_vm0, %v1440_v48  ;;  %296 = vst.msk [vmem:[%s1574_s5 + $0xb8] sm:$0xff] %vm272_vm0, %v1440_v48 }
  0x27   : > { %690 = vmatmul.mubr.bf16.vlgmr.msra.gmra.mrb[0].mxu0 %v1368_v18  ;;  %754 = vmatmul.mubr.bf16.vlgmr.msra.gmra.mrb[0].mxu1 %v1371_v19  ;;  %297 = vst.msk [vmem:[%s1574_s5 + $0xc0] sm:$0xff] %vm272_vm0, %v1440_v48  ;;  %298 = vst.msk [vmem:[%s1574_s5 + $0xc8] sm:$0xff] %vm272_vm0, %v1440_v48 }
  0x28   : > { %697 = vmatprep.mubr.bf16.mxu0 %v1374_v20  ;;  %761 = vmatprep.mubr.bf16.mxu1 %v1376_v21  ;;  %299 = vst.msk [vmem:[%s1574_s5 + $0xd0] sm:$0xff] %vm272_vm0, %v1440_v48  ;;  %300 = vst.msk [vmem:[%s1574_s5 + $0xd8] sm:$0xff] %vm272_vm0, %v1440_v48 }
  0x29   : > { %301 = vst.msk [vmem:[%s1574_s5 + $0xe0] sm:$0xff] %vm272_vm0, %v1440_v48  ;;  %302 = vst.msk [vmem:[%s1574_s5 + $0xe8] sm:$0xff] %vm272_vm0, %v1440_v48 }
  0x2a   : > { %303 = vst.msk [vmem:[%s1574_s5 + $0xf0] sm:$0xff] %vm272_vm0, %v1440_v48  ;;  %304 = vst.msk [vmem:[%s1574_s5 + $0xf8] sm:$0xff] %vm272_vm0, %v1440_v48  ;;  %v321_v53 = vld [vmem:[%s1574_s5 + $0x80] sm:$0xff]  ;;  %v322_v61 = vld [vmem:[%s1574_s5 + $0x88] sm:$0xff] }
  0x2b   : > { %v323_v9 = vld [vmem:[%s1574_s5 + $0x90] sm:$0xff]  ;;  %v324_v18 = vld [vmem:[%s1574_s5 + $0x98] sm:$0xff]  ;;  %v310_v48 = vld [vmem:[%s1574_s5 + $0x28] sm:$0xff] }
  0x2f   : > { %698 = vmatmul.mubr.bf16.gmra.mrb[4].mxu0 %v1378_v22  ;;  %762 = vmatmul.mubr.bf16.gmra.mrb[4].mxu1 %v1379_v23 }
  0x30   : > { %705 = vmatprep.mubr.bf16.mxu0 %v1380_v24  ;;  %769 = vmatprep.mubr.bf16.mxu1 %v1382_v25 }
  0x37   : > { %706 = vmatmul.mubr.bf16.gmra.mrb[8].mxu0 %v1384_v26  ;;  %770 = vmatmul.mubr.bf16.gmra.mrb[8].mxu1 %v1385_v27 }
  0x38   : > { %713 = vmatprep.mubr.bf16.mxu0 %v1386_v28  ;;  %777 = vmatprep.mubr.bf16.mxu1 %v1388_v29 }
  0x3f   : > { %714 = vmatmul.mubr.bf16.gmra.mrb[12].mxu0 %v1390_v30  ;;  %778 = vmatmul.mubr.bf16.gmra.mrb[12].mxu1 %v1391_v31 }
  0x40   : > { %721 = vmatprep.mubr.bf16.mxu0 %v1392_v32  ;;  %785 = vmatprep.mubr.bf16.mxu1 %v1394_v33 }
  0x47   : > { %722 = vmatmul.mubr.bf16.gmra.mrb[16].mxu0 %v1396_v34  ;;  %786 = vmatmul.mubr.bf16.gmra.mrb[16].mxu1 %v1397_v35 }
  0x48   : > { %729 = vmatprep.mubr.bf16.mxu0 %v1398_v36  ;;  %793 = vmatprep.mubr.bf16.mxu1 %v1400_v37 }
  0x4f   : > { %730 = vmatmul.mubr.bf16.gmra.mrb[20].mxu0 %v1402_v38  ;;  %794 = vmatmul.mubr.bf16.gmra.mrb[20].mxu1 %v1403_v39  ;;  %v309_v38 = vld [vmem:[%s1574_s5 + $0x20] sm:$0xff] }
  0x50   : > { %737 = vmatprep.mubr.bf16.mxu0 %v1404_v40  ;;  %801 = vmatprep.mubr.bf16.mxu1 %v1406_v41  ;;  %v325_v40 = vld [vmem:[%s1574_s5 + $0xa0] sm:$0xff] }
  0x57   : > { %738 = vmatmul.mubr.bf16.gmra.mrb[24].mxu0 %v1408_v42  ;;  %802 = vmatmul.mubr.bf16.gmra.mrb[24].mxu1 %v1409_v43 }
  0x58   : > { %745 = vmatprep.mubr.bf16.mxu0 %v1410_v44  ;;  %809 = vmatprep.mubr.bf16.mxu1 %v1412_v45 }
  0x5f   : > { %746 = vmatmul.mubr.bf16.gmra.mrb[28].mxu0 %v1414_v46  ;;  %810 = vmatmul.mubr.bf16.gmra.mrb[28].mxu1 %v1415_v47 }
  0xfa   : > { %v1215_v49 = vpop.f32.mrb[0].mxu0  ;;  %v1263_v50 = vpop.f32.mrb[0].mxu1 }
  0xfb   : > { %v1216_v52 = vpop.f32.mrb[1].mxu0  ;;  %v1264_v54 = vpop.f32.mrb[1].mxu1 }
  0xfc   : > { %v1217_v55 = vadd.f32 %v1216_v52, %v1215_v49  ;;  %v1265_v56 = vadd.f32 %v1264_v54, %v1263_v50  ;;  %v1218_v57 = vpop.f32.mrb[2].mxu0  ;;  %v1266_v58 = vpop.f32.mrb[2].mxu1  ;;  %v326_v50 = vld [vmem:[%s1574_s5 + $0xa8] sm:$0xff] }
  0xfd   : > { %v1219_v60 = vpop.f32.mrb[3].mxu0  ;;  %v1267_v62 = vpop.f32.mrb[3].mxu1 }
  0xfe   : > { %v818_v63 = vadd.f32 %v1217_v55, %v305_v51  ;;  %v834_v0 = vadd.f32 %v1265_v56, %v321_v53  ;;  %v1220_v1 = vadd.f32 %v1219_v60, %v1218_v57  ;;  %v1268_v2 = vadd.f32 %v1267_v62, %v1266_v58 }
 0x100   : > { %851 = vst.msk [vmem:[%s1574_s5] sm:$0xff] %vm272_vm0, %v818_v63  ;;  %867 = vst.msk [vmem:[%s1574_s5 + $0x80] sm:$0xff] %vm272_vm0, %v834_v0  ;;  %v819_v3 = vadd.f32 %v1220_v1, %v306_v59  ;;  %v835_v4 = vadd.f32 %v1268_v2, %v322_v61 }
 0x102   : > { %852 = vst.msk [vmem:[%s1574_s5 + $0x8] sm:$0xff] %vm272_vm0, %v819_v3  ;;  %868 = vst.msk [vmem:[%s1574_s5 + $0x88] sm:$0xff] %vm272_vm0, %v835_v4  ;;  %v1221_v5 = vpop.f32.mrb[4].mxu0  ;;  %v1269_v6 = vpop.f32.mrb[4].mxu1 }
 0x103   : > { %v1222_v8 = vpop.f32.mrb[5].mxu0  ;;  %v1270_v10 = vpop.f32.mrb[5].mxu1 }
 0x104   : > { %v1223_v11 = vadd.f32 %v1222_v8, %v1221_v5  ;;  %v1271_v12 = vadd.f32 %v1270_v10, %v1269_v6  ;;  %v1224_v13 = vpop.f32.mrb[6].mxu0  ;;  %v1272_v14 = vpop.f32.mrb[6].mxu1  ;;  %v311_v6 = vld [vmem:[%s1574_s5 + $0x30] sm:$0xff] }
 0x105   : > { %v1225_v17 = vpop.f32.mrb[7].mxu0  ;;  %v1273_v19 = vpop.f32.mrb[7].mxu1  ;;  %v327_v8 = vld [vmem:[%s1574_s5 + $0xb0] sm:$0xff] }
 0x106   : > { %v820_v20 = vadd.f32 %v1223_v11, %v307_v7  ;;  %v836_v21 = vadd.f32 %v1271_v12, %v323_v9  ;;  %v1226_v22 = vadd.f32 %v1225_v17, %v1224_v13  ;;  %v1274_v23 = vadd.f32 %v1273_v19, %v1272_v14  ;;  %v312_v17 = vld [vmem:[%s1574_s5 + $0x38] sm:$0xff] }
 0x107   : > { %v886_v24 = vld [vmem:[%s1574_s5] sm:$0xff]  ;;  %v328_v19 = vld [vmem:[%s1574_s5 + $0xb8] sm:$0xff] }
 0x108   : > { %v902_v25 = vld [vmem:[%s1574_s5 + $0x80] sm:$0xff]  ;;  %v925_v26 = vadd.f32 %v1657_v15, %v886_v24  ;;  %853 = vst.msk [vmem:[%s1574_s5 + $0x10] sm:$0xff] %vm272_vm0, %v820_v20  ;;  %869 = vst.msk [vmem:[%s1574_s5 + $0x90] sm:$0xff] %vm272_vm0, %v836_v21  ;;  %v821_v28 = vadd.f32 %v1226_v22, %v308_v16  ;;  %v837_v29 = vadd.f32 %v1274_v23, %v324_v18 }
 0x109   : > { %v941_v27 = vadd.f32 %v1657_v15, %v902_v25  ;;  %v887_v30 = vld [vmem:[%s1574_s5 + $0x8] sm:$0xff] }
 0x10a   : > { %v903_v31 = vld [vmem:[%s1574_s5 + $0x88] sm:$0xff]  ;;  %v957_v32 = vmax.f32 %v925_v26, 0.0  ;;  %v926_v34 = vadd.f32 %v1657_v15, %v887_v30  ;;  %854 = vst.msk [vmem:[%s1574_s5 + $0x18] sm:$0xff] %vm272_vm0, %v821_v28  ;;  %870 = vst.msk [vmem:[%s1574_s5 + $0x98] sm:$0xff] %vm272_vm0, %v837_v29  ;;  %v1227_v36 = vpop.f32.mrb[8].mxu0  ;;  %v1275_v37 = vpop.f32.mrb[8].mxu1 }
 0x10b   : > { %v973_v33 = vmax.f32 %v941_v27, 0.0  ;;  %v942_v35 = vadd.f32 %v1657_v15, %v903_v31  ;;  %v1228_v39 = vpop.f32.mrb[9].mxu0  ;;  %v1276_v41 = vpop.f32.mrb[9].mxu1 }
 0x10c   : > { %989 = vst.msk [vmem:[%s1574_s5] sm:$0xff] %vm272_vm0, %v957_v32  ;;  %v958_v42 = vmax.f32 %v926_v34, 0.0  ;;  %v1229_v44 = vadd.f32 %v1228_v39, %v1227_v36  ;;  %v1277_v45 = vadd.f32 %v1276_v41, %v1275_v37  ;;  %v1230_v46 = vpop.f32.mrb[10].mxu0  ;;  %v1278_v47 = vpop.f32.mrb[10].mxu1  ;;  %v313_v39 = vld [vmem:[%s1574_s5 + $0x40] sm:$0xff] }
 0x10d   : > { %1005 = vst.msk [vmem:[%s1574_s5 + $0x80] sm:$0xff] %vm272_vm0, %v973_v33  ;;  %v974_v43 = vmax.f32 %v942_v35, 0.0  ;;  %v1231_v49 = vpop.f32.mrb[11].mxu0  ;;  %v1279_v51 = vpop.f32.mrb[11].mxu1  ;;  %v329_v41 = vld [vmem:[%s1574_s5 + $0xc0] sm:$0xff] }
 0x10e   : > { %990 = vst.msk [vmem:[%s1574_s5 + $0x8] sm:$0xff] %vm272_vm0, %v958_v42  ;;  %v822_v52 = vadd.f32 %v1229_v44, %v309_v38  ;;  %v838_v53 = vadd.f32 %v1277_v45, %v325_v40  ;;  %v1232_v54 = vadd.f32 %v1231_v49, %v1230_v46  ;;  %v1280_v55 = vadd.f32 %v1279_v51, %v1278_v47  ;;  %v314_v49 = vld [vmem:[%s1574_s5 + $0x48] sm:$0xff] }
 0x10f   : > { %1006 = vst.msk [vmem:[%s1574_s5 + $0x88] sm:$0xff] %vm272_vm0, %v974_v43  ;;  %v888_v56 = vld [vmem:[%s1574_s5 + $0x10] sm:$0xff]  ;;  %v330_v51 = vld [vmem:[%s1574_s5 + $0xc8] sm:$0xff] }
 0x110   : > { %v904_v57 = vld [vmem:[%s1574_s5 + $0x90] sm:$0xff]  ;;  %v927_v58 = vadd.f32 %v1657_v15, %v888_v56  ;;  %855 = vst.msk [vmem:[%s1574_s5 + $0x20] sm:$0xff] %vm272_vm0, %v822_v52  ;;  %871 = vst.msk [vmem:[%s1574_s5 + $0xa0] sm:$0xff] %vm272_vm0, %v838_v53  ;;  %v823_v60 = vadd.f32 %v1232_v54, %v310_v48  ;;  %v839_v61 = vadd.f32 %v1280_v55, %v326_v50 }
 0x111   : > { %v943_v59 = vadd.f32 %v1657_v15, %v904_v57  ;;  %v889_v62 = vld [vmem:[%s1574_s5 + $0x18] sm:$0xff] }
 0x112   : > { %v905_v63 = vld [vmem:[%s1574_s5 + $0x98] sm:$0xff]  ;;  %v959_v0 = vmax.f32 %v927_v58, 0.0  ;;  %v928_v2 = vadd.f32 %v1657_v15, %v889_v62  ;;  %856 = vst.msk [vmem:[%s1574_s5 + $0x28] sm:$0xff] %vm272_vm0, %v823_v60  ;;  %872 = vst.msk [vmem:[%s1574_s5 + $0xa8] sm:$0xff] %vm272_vm0, %v839_v61  ;;  %v1233_v4 = vpop.f32.mrb[12].mxu0  ;;  %v1281_v5 = vpop.f32.mrb[12].mxu1 }
 0x113   : > { %v975_v1 = vmax.f32 %v943_v59, 0.0  ;;  %v944_v3 = vadd.f32 %v1657_v15, %v905_v63  ;;  %v1234_v7 = vpop.f32.mrb[13].mxu0  ;;  %v1282_v9 = vpop.f32.mrb[13].mxu1 }
 0x114   : > { %991 = vst.msk [vmem:[%s1574_s5 + $0x10] sm:$0xff] %vm272_vm0, %v959_v0  ;;  %v960_v10 = vmax.f32 %v928_v2, 0.0  ;;  %v1235_v12 = vadd.f32 %v1234_v7, %v1233_v4  ;;  %v1283_v13 = vadd.f32 %v1282_v9, %v1281_v5  ;;  %v1236_v14 = vpop.f32.mrb[14].mxu0  ;;  %v1284_v16 = vpop.f32.mrb[14].mxu1  ;;  %v315_v7 = vld [vmem:[%s1574_s5 + $0x50] sm:$0xff] }
 0x115   : > { %1007 = vst.msk [vmem:[%s1574_s5 + $0x90] sm:$0xff] %vm272_vm0, %v975_v1  ;;  %v976_v11 = vmax.f32 %v944_v3, 0.0  ;;  %v1237_v18 = vpop.f32.mrb[15].mxu0  ;;  %v1285_v20 = vpop.f32.mrb[15].mxu1  ;;  %v331_v9 = vld [vmem:[%s1574_s5 + $0xd0] sm:$0xff] }
 0x116   : > { %992 = vst.msk [vmem:[%s1574_s5 + $0x18] sm:$0xff] %vm272_vm0, %v960_v10  ;;  %v824_v21 = vadd.f32 %v1235_v12, %v311_v6  ;;  %v840_v22 = vadd.f32 %v1283_v13, %v327_v8  ;;  %v1238_v23 = vadd.f32 %v1237_v18, %v1236_v14  ;;  %v1286_v24 = vadd.f32 %v1285_v20, %v1284_v16  ;;  %v316_v18 = vld [vmem:[%s1574_s5 + $0x58] sm:$0xff] }
 0x117   : > { %1008 = vst.msk [vmem:[%s1574_s5 + $0x98] sm:$0xff] %vm272_vm0, %v976_v11  ;;  %v890_v25 = vld [vmem:[%s1574_s5 + $0x20] sm:$0xff]  ;;  %v332_v20 = vld [vmem:[%s1574_s5 + $0xd8] sm:$0xff] }
 0x118   : > { %v906_v26 = vld [vmem:[%s1574_s5 + $0xa0] sm:$0xff]  ;;  %v929_v27 = vadd.f32 %v1657_v15, %v890_v25  ;;  %857 = vst.msk [vmem:[%s1574_s5 + $0x30] sm:$0xff] %vm272_vm0, %v824_v21  ;;  %873 = vst.msk [vmem:[%s1574_s5 + $0xb0] sm:$0xff] %vm272_vm0, %v840_v22  ;;  %v825_v29 = vadd.f32 %v1238_v23, %v312_v17  ;;  %v841_v30 = vadd.f32 %v1286_v24, %v328_v19 }
 0x119   : > { %v945_v28 = vadd.f32 %v1657_v15, %v906_v26  ;;  %v891_v31 = vld [vmem:[%s1574_s5 + $0x28] sm:$0xff] }
 0x11a   : > { %v907_v32 = vld [vmem:[%s1574_s5 + $0xa8] sm:$0xff]  ;;  %v961_v33 = vmax.f32 %v929_v27, 0.0  ;;  %v930_v35 = vadd.f32 %v1657_v15, %v891_v31  ;;  %858 = vst.msk [vmem:[%s1574_s5 + $0x38] sm:$0xff] %vm272_vm0, %v825_v29  ;;  %874 = vst.msk [vmem:[%s1574_s5 + $0xb8] sm:$0xff] %vm272_vm0, %v841_v30  ;;  %v1239_v37 = vpop.f32.mrb[16].mxu0  ;;  %v1287_v38 = vpop.f32.mrb[16].mxu1 }
 0x11b   : > { %v977_v34 = vmax.f32 %v945_v28, 0.0  ;;  %v946_v36 = vadd.f32 %v1657_v15, %v907_v32  ;;  %v1240_v40 = vpop.f32.mrb[17].mxu0  ;;  %v1288_v42 = vpop.f32.mrb[17].mxu1 }
 0x11c   : > { %993 = vst.msk [vmem:[%s1574_s5 + $0x20] sm:$0xff] %vm272_vm0, %v961_v33  ;;  %v962_v43 = vmax.f32 %v930_v35, 0.0  ;;  %v1241_v45 = vadd.f32 %v1240_v40, %v1239_v37  ;;  %v1289_v46 = vadd.f32 %v1288_v42, %v1287_v38  ;;  %v1242_v47 = vpop.f32.mrb[18].mxu0  ;;  %v1290_v48 = vpop.f32.mrb[18].mxu1  ;;  %v317_v40 = vld [vmem:[%s1574_s5 + $0x60] sm:$0xff] }
 0x11d   : > { %1009 = vst.msk [vmem:[%s1574_s5 + $0xa0] sm:$0xff] %vm272_vm0, %v977_v34  ;;  %v978_v44 = vmax.f32 %v946_v36, 0.0  ;;  %v1243_v50 = vpop.f32.mrb[19].mxu0  ;;  %v1291_v52 = vpop.f32.mrb[19].mxu1  ;;  %v333_v42 = vld [vmem:[%s1574_s5 + $0xe0] sm:$0xff] }
 0x11e   : > { %994 = vst.msk [vmem:[%s1574_s5 + $0x28] sm:$0xff] %vm272_vm0, %v962_v43  ;;  %v826_v53 = vadd.f32 %v1241_v45, %v313_v39  ;;  %v842_v54 = vadd.f32 %v1289_v46, %v329_v41  ;;  %v1244_v55 = vadd.f32 %v1243_v50, %v1242_v47  ;;  %v1292_v56 = vadd.f32 %v1291_v52, %v1290_v48  ;;  %v318_v50 = vld [vmem:[%s1574_s5 + $0x68] sm:$0xff] }
 0x11f   : > { %1010 = vst.msk [vmem:[%s1574_s5 + $0xa8] sm:$0xff] %vm272_vm0, %v978_v44  ;;  %v892_v57 = vld [vmem:[%s1574_s5 + $0x30] sm:$0xff]  ;;  %v334_v52 = vld [vmem:[%s1574_s5 + $0xe8] sm:$0xff] }
 0x120   : > { %v908_v58 = vld [vmem:[%s1574_s5 + $0xb0] sm:$0xff]  ;;  %v931_v59 = vadd.f32 %v1657_v15, %v892_v57  ;;  %859 = vst.msk [vmem:[%s1574_s5 + $0x40] sm:$0xff] %vm272_vm0, %v826_v53  ;;  %875 = vst.msk [vmem:[%s1574_s5 + $0xc0] sm:$0xff] %vm272_vm0, %v842_v54  ;;  %v827_v61 = vadd.f32 %v1244_v55, %v314_v49  ;;  %v843_v62 = vadd.f32 %v1292_v56, %v330_v51 }
 0x121   : > { %v947_v60 = vadd.f32 %v1657_v15, %v908_v58  ;;  %v893_v63 = vld [vmem:[%s1574_s5 + $0x38] sm:$0xff] }
 0x122   : > { %v909_v0 = vld [vmem:[%s1574_s5 + $0xb8] sm:$0xff]  ;;  %v963_v1 = vmax.f32 %v931_v59, 0.0  ;;  %v932_v3 = vadd.f32 %v1657_v15, %v893_v63  ;;  %860 = vst.msk [vmem:[%s1574_s5 + $0x48] sm:$0xff] %vm272_vm0, %v827_v61  ;;  %876 = vst.msk [vmem:[%s1574_s5 + $0xc8] sm:$0xff] %vm272_vm0, %v843_v62  ;;  %v1245_v5 = vpop.f32.mrb[20].mxu0  ;;  %v1293_v6 = vpop.f32.mrb[20].mxu1 }
 0x123   : > { %v979_v2 = vmax.f32 %v947_v60, 0.0  ;;  %v948_v4 = vadd.f32 %v1657_v15, %v909_v0  ;;  %v1246_v8 = vpop.f32.mrb[21].mxu0  ;;  %v1294_v10 = vpop.f32.mrb[21].mxu1 }
 0x124   : > { %995 = vst.msk [vmem:[%s1574_s5 + $0x30] sm:$0xff] %vm272_vm0, %v963_v1  ;;  %v964_v11 = vmax.f32 %v932_v3, 0.0  ;;  %v1247_v13 = vadd.f32 %v1246_v8, %v1245_v5  ;;  %v1295_v14 = vadd.f32 %v1294_v10, %v1293_v6  ;;  %v1248_v16 = vpop.f32.mrb[22].mxu0  ;;  %v1296_v17 = vpop.f32.mrb[22].mxu1  ;;  %v319_v8 = vld [vmem:[%s1574_s5 + $0x70] sm:$0xff] }
 0x125   : > { %1011 = vst.msk [vmem:[%s1574_s5 + $0xb0] sm:$0xff] %vm272_vm0, %v979_v2  ;;  %v980_v12 = vmax.f32 %v948_v4, 0.0  ;;  %v1249_v19 = vpop.f32.mrb[23].mxu0  ;;  %v1297_v21 = vpop.f32.mrb[23].mxu1  ;;  %v335_v10 = vld [vmem:[%s1574_s5 + $0xf0] sm:$0xff] }
 0x126   : > { %996 = vst.msk [vmem:[%s1574_s5 + $0x38] sm:$0xff] %vm272_vm0, %v964_v11  ;;  %v828_v22 = vadd.f32 %v1247_v13, %v315_v7  ;;  %v844_v23 = vadd.f32 %v1295_v14, %v331_v9  ;;  %v1250_v24 = vadd.f32 %v1249_v19, %v1248_v16  ;;  %v1298_v25 = vadd.f32 %v1297_v21, %v1296_v17  ;;  %v320_v19 = vld [vmem:[%s1574_s5 + $0x78] sm:$0xff] }
 0x127   : > { %1012 = vst.msk [vmem:[%s1574_s5 + $0xb8] sm:$0xff] %vm272_vm0, %v980_v12  ;;  %v894_v26 = vld [vmem:[%s1574_s5 + $0x40] sm:$0xff]  ;;  %v336_v21 = vld [vmem:[%s1574_s5 + $0xf8] sm:$0xff] }
 0x128   : > { %v910_v27 = vld [vmem:[%s1574_s5 + $0xc0] sm:$0xff]  ;;  %v933_v28 = vadd.f32 %v1657_v15, %v894_v26  ;;  %861 = vst.msk [vmem:[%s1574_s5 + $0x50] sm:$0xff] %vm272_vm0, %v828_v22  ;;  %877 = vst.msk [vmem:[%s1574_s5 + $0xd0] sm:$0xff] %vm272_vm0, %v844_v23  ;;  %v829_v30 = vadd.f32 %v1250_v24, %v316_v18  ;;  %v845_v31 = vadd.f32 %v1298_v25, %v332_v20 }
 0x129   : > { %v949_v29 = vadd.f32 %v1657_v15, %v910_v27  ;;  %v895_v32 = vld [vmem:[%s1574_s5 + $0x48] sm:$0xff] }
 0x12a   : > { %v911_v33 = vld [vmem:[%s1574_s5 + $0xc8] sm:$0xff]  ;;  %v965_v34 = vmax.f32 %v933_v28, 0.0  ;;  %v934_v36 = vadd.f32 %v1657_v15, %v895_v32  ;;  %862 = vst.msk [vmem:[%s1574_s5 + $0x58] sm:$0xff] %vm272_vm0, %v829_v30  ;;  %878 = vst.msk [vmem:[%s1574_s5 + $0xd8] sm:$0xff] %vm272_vm0, %v845_v31  ;;  %v1251_v38 = vpop.f32.mrb[24].mxu0  ;;  %v1299_v39 = vpop.f32.mrb[24].mxu1 }
 0x12b   : > { %v981_v35 = vmax.f32 %v949_v29, 0.0  ;;  %v950_v37 = vadd.f32 %v1657_v15, %v911_v33  ;;  %v1252_v41 = vpop.f32.mrb[25].mxu0  ;;  %v1300_v43 = vpop.f32.mrb[25].mxu1 }
 0x12c   : > { %997 = vst.msk [vmem:[%s1574_s5 + $0x40] sm:$0xff] %vm272_vm0, %v965_v34  ;;  %v966_v44 = vmax.f32 %v934_v36, 0.0  ;;  %v1253_v46 = vadd.f32 %v1252_v41, %v1251_v38  ;;  %v1301_v47 = vadd.f32 %v1300_v43, %v1299_v39  ;;  %v1254_v48 = vpop.f32.mrb[26].mxu0  ;;  %v1302_v49 = vpop.f32.mrb[26].mxu1 }
 0x12d   : > { %1013 = vst.msk [vmem:[%s1574_s5 + $0xc0] sm:$0xff] %vm272_vm0, %v981_v35  ;;  %v982_v45 = vmax.f32 %v950_v37, 0.0  ;;  %v1255_v51 = vpop.f32.mrb[27].mxu0  ;;  %v1303_v53 = vpop.f32.mrb[27].mxu1 }
 0x12e   : > { %998 = vst.msk [vmem:[%s1574_s5 + $0x48] sm:$0xff] %vm272_vm0, %v966_v44  ;;  %v830_v54 = vadd.f32 %v1253_v46, %v317_v40  ;;  %v846_v55 = vadd.f32 %v1301_v47, %v333_v42  ;;  %v1256_v56 = vadd.f32 %v1255_v51, %v1254_v48  ;;  %v1304_v57 = vadd.f32 %v1303_v53, %v1302_v49 }
 0x12f   : > { %1014 = vst.msk [vmem:[%s1574_s5 + $0xc8] sm:$0xff] %vm272_vm0, %v982_v45  ;;  %v896_v58 = vld [vmem:[%s1574_s5 + $0x50] sm:$0xff] }
 0x130   : > { %v912_v59 = vld [vmem:[%s1574_s5 + $0xd0] sm:$0xff]  ;;  %v935_v60 = vadd.f32 %v1657_v15, %v896_v58  ;;  %863 = vst.msk [vmem:[%s1574_s5 + $0x60] sm:$0xff] %vm272_vm0, %v830_v54  ;;  %879 = vst.msk [vmem:[%s1574_s5 + $0xe0] sm:$0xff] %vm272_vm0, %v846_v55  ;;  %v831_v62 = vadd.f32 %v1256_v56, %v318_v50  ;;  %v847_v63 = vadd.f32 %v1304_v57, %v334_v52 }
 0x131   : > { %v951_v61 = vadd.f32 %v1657_v15, %v912_v59  ;;  %v897_v0 = vld [vmem:[%s1574_s5 + $0x58] sm:$0xff] }
 0x132   : > { %v913_v1 = vld [vmem:[%s1574_s5 + $0xd8] sm:$0xff]  ;;  %v967_v2 = vmax.f32 %v935_v60, 0.0  ;;  %v936_v4 = vadd.f32 %v1657_v15, %v897_v0  ;;  %864 = vst.msk [vmem:[%s1574_s5 + $0x68] sm:$0xff] %vm272_vm0, %v831_v62  ;;  %880 = vst.msk [vmem:[%s1574_s5 + $0xe8] sm:$0xff] %vm272_vm0, %v847_v63  ;;  %v1257_v6 = vpop.f32.mrb[28].mxu0  ;;  %v1305_v7 = vpop.f32.mrb[28].mxu1 }
 0x133   : > { %v983_v3 = vmax.f32 %v951_v61, 0.0  ;;  %v952_v5 = vadd.f32 %v1657_v15, %v913_v1  ;;  %v1258_v9 = vpop.f32.mrb[29].mxu0  ;;  %v1306_v11 = vpop.f32.mrb[29].mxu1 }
 0x134   : > { %999 = vst.msk [vmem:[%s1574_s5 + $0x50] sm:$0xff] %vm272_vm0, %v967_v2  ;;  %v968_v12 = vmax.f32 %v936_v4, 0.0  ;;  %v1259_v14 = vadd.f32 %v1258_v9, %v1257_v6  ;;  %v1307_v16 = vadd.f32 %v1306_v11, %v1305_v7  ;;  %v1260_v17 = vpop.f32.mrb[30].mxu0  ;;  %v1308_v18 = vpop.f32.mrb[30].mxu1 }
 0x135   : > { %1015 = vst.msk [vmem:[%s1574_s5 + $0xd0] sm:$0xff] %vm272_vm0, %v983_v3  ;;  %v984_v13 = vmax.f32 %v952_v5, 0.0  ;;  %v1261_v20 = vpop.f32.mrb[31].mxu0  ;;  %v1309_v22 = vpop.f32.mrb[31].mxu1 }
 0x136   : > { %1000 = vst.msk [vmem:[%s1574_s5 + $0x58] sm:$0xff] %vm272_vm0, %v968_v12  ;;  %v832_v23 = vadd.f32 %v1259_v14, %v319_v8  ;;  %v848_v24 = vadd.f32 %v1307_v16, %v335_v10  ;;  %v1262_v25 = vadd.f32 %v1261_v20, %v1260_v17  ;;  %v1310_v26 = vadd.f32 %v1309_v22, %v1308_v18 }
 0x137   : > { %1016 = vst.msk [vmem:[%s1574_s5 + $0xd8] sm:$0xff] %vm272_vm0, %v984_v13  ;;  %v898_v27 = vld [vmem:[%s1574_s5 + $0x60] sm:$0xff] }
 0x138   : > { %v914_v28 = vld [vmem:[%s1574_s5 + $0xe0] sm:$0xff]  ;;  %v937_v29 = vadd.f32 %v1657_v15, %v898_v27  ;;  %865 = vst.msk [vmem:[%s1574_s5 + $0x70] sm:$0xff] %vm272_vm0, %v832_v23  ;;  %881 = vst.msk [vmem:[%s1574_s5 + $0xf0] sm:$0xff] %vm272_vm0, %v848_v24  ;;  %v833_v31 = vadd.f32 %v1262_v25, %v320_v19  ;;  %v849_v32 = vadd.f32 %v1310_v26, %v336_v21 }
 0x139   : > { %v953_v30 = vadd.f32 %v1657_v15, %v914_v28  ;;  %v899_v33 = vld [vmem:[%s1574_s5 + $0x68] sm:$0xff] }
 0x13a   : > { %v915_v34 = vld [vmem:[%s1574_s5 + $0xe8] sm:$0xff]  ;;  %v969_v35 = vmax.f32 %v937_v29, 0.0  ;;  %v938_v37 = vadd.f32 %v1657_v15, %v899_v33  ;;  %866 = vst.msk [vmem:[%s1574_s5 + $0x78] sm:$0xff] %vm272_vm0, %v833_v31  ;;  %882 = vst.msk [vmem:[%s1574_s5 + $0xf8] sm:$0xff] %vm272_vm0, %v849_v32 }
 0x13b   : > { %v985_v36 = vmax.f32 %v953_v30, 0.0  ;;  %v954_v38 = vadd.f32 %v1657_v15, %v915_v34 }
 0x13c   : > { %1001 = vst.msk [vmem:[%s1574_s5 + $0x60] sm:$0xff] %vm272_vm0, %v969_v35  ;;  %v970_v39 = vmax.f32 %v938_v37, 0.0 }
 0x13d   : > { %1017 = vst.msk [vmem:[%s1574_s5 + $0xe0] sm:$0xff] %vm272_vm0, %v985_v36  ;;  %v986_v40 = vmax.f32 %v954_v38, 0.0 }
 0x13e   : > { %1002 = vst.msk [vmem:[%s1574_s5 + $0x68] sm:$0xff] %vm272_vm0, %v970_v39 }
 0x13f   : > { %1018 = vst.msk [vmem:[%s1574_s5 + $0xe8] sm:$0xff] %vm272_vm0, %v986_v40  ;;  %v900_v41 = vld [vmem:[%s1574_s5 + $0x70] sm:$0xff] }
 0x140   : > { %v916_v42 = vld [vmem:[%s1574_s5 + $0xf0] sm:$0xff]  ;;  %v939_v43 = vadd.f32 %v1657_v15, %v900_v41 }
 0x141   : > { %v955_v44 = vadd.f32 %v1657_v15, %v916_v42  ;;  %v901_v45 = vld [vmem:[%s1574_s5 + $0x78] sm:$0xff] }
 0x142   : > { %v917_v46 = vld [vmem:[%s1574_s5 + $0xf8] sm:$0xff]  ;;  %v971_v47 = vmax.f32 %v939_v43, 0.0  ;;  %v940_v49 = vadd.f32 %v1657_v15, %v901_v45 }
 0x143   : > { %v987_v48 = vmax.f32 %v955_v44, 0.0  ;;  %v956_v50 = vadd.f32 %v1657_v15, %v917_v46 }
 0x144   : > { %1003 = vst.msk [vmem:[%s1574_s5 + $0x70] sm:$0xff] %vm272_vm0, %v971_v47  ;;  %v972_v51 = vmax.f32 %v940_v49, 0.0 }
 0x145   : > { %1019 = vst.msk [vmem:[%s1574_s5 + $0xf0] sm:$0xff] %vm272_vm0, %v987_v48  ;;  %v988_v52 = vmax.f32 %v956_v50, 0.0 }
 0x146   : > { %1004 = vst.msk [vmem:[%s1574_s5 + $0x78] sm:$0xff] %vm272_vm0, %v972_v51 }
 0x147   : > { %1020 = vst.msk [vmem:[%s1574_s5 + $0xf8] sm:$0xff] %vm272_vm0, %v988_v52 }
 0x148 PF: > { %s13_s14 = sadd.s32 1, %s1438_s14   ;;  %s1882_s12 = smov %s1434_s13 }
 0x149   : > { %p10_p5 = scmp.ge.s32.totalorder %s13_s14, 4   ;;  %s1883_s13 = smov %s1885_s15 }
 0x14b   :  { %12 = sbr.rel (!%p10_p5) target bundleno = 2 (0x2), region = 76 }

// kernel: resnet18_forward.25
= control target key start
LH: loop header
LB: loop body
LE: loop exit
PB: predicated region body
PF: predicated region fallthrough
CT: control target
= control target key end

     0   :  { %s1049_s12 = smov 0   ;;  %s1051_s13 = smov 0   ;;  %s1445_s0 = inlined_call_operand.vmem [shape: bf16[128,640], index: 0, kind: input, shape index: {}]   ;;  %s1446_s1 = inlined_call_operand.vmem [shape: bf16[640,64], index: 1, kind: input, shape index: {}]   ;;  %s1447_s2 = inlined_call_operand.vmem [shape: f32[1,64], index: 2, kind: input, shape index: {}]   ;;  %s1448_s3 = inlined_call_operand.vmem [shape: f32[128,64], index: 3, kind: output, shape index: {}]  }
   0x1   :  { %s1053_s14 = smov 0   ;;  %s1055_s15 = smov 0  }
   0x2   :  { %s1057_s16 = smov 0  }
   0x3 LB: > { %s25_s17 = sadd.s32 1, %s1022_s15  ;;  %p48_p1 = scmp.ne.s32.totalorder %s1014_s13, %s1010_s12  ;;  %s1026_s16 = sphi %s1057_s16, %s13_s16   ;;  %s1022_s15 = sphi %s1055_s15, %s1452_s15   ;;  %s1018_s14 = sphi %s1053_s14, %s1451_s14   ;;  %s1014_s13 = sphi %s1051_s13, %s1450_s13   ;;  %s1010_s12 = sphi %s1049_s12, %s1449_s12  }
   0x4   : > { %p26_p0 = scmp.ge.s32.totalorder %s25_s17, 5  ;;  %p49_p2 = scmp.eq.s32.totalorder %s1026_s16, 0 }
   0x5   : > { %s41_s19 = sadd.s32 1, %s1014_s13  ;;  %p837_p5 = scmp.ge.s32.totalorder %s1026_s16, 5 }
   0x6   : > { %s1454_s17 = smov (%p26_p0, %s25_s17), 0  ;;  %p50_p3 = por %p49_p2, %p48_p1 }
   0x7   : > { %s37_s18 = ssub.s32 %s1022_s15, %s1454_s17  ;;  %162 = sbr.rel (%p837_p5) target bundleno = 28 (0x1c), region = 20 }
   0x8   : > { %p39_p4 = scmp.eq.s32.totalorder %s37_s18, 0 }
   0xa   : > { %s1084_s20 = scalar_select %p39_p4, %s1014_s13, %s41_s19  }
   0xe   : > { %165 = sbr.rel (!%p50_p3) target bundleno = 28 (0x1c), region = 24  ;;  %s167_s21 = sand.u32 (%p50_p3), 1, %s1014_s13  }
   0xf   : > { %s839_s22 = sshll.u32 (%p50_p3), %s1022_s15, 2  ;;  %s838_s23 = sshll.u32 (%p50_p3), %s167_s21, 6 }
  0x10   : > { %s1092_s26 = scalar_lea.vmem (%p50_p3), %s1445_s0, %s839_s22  ;;  %s169_s27 = scalar_lea.vmem (%p50_p3), [#allocation2], %s838_s23 }
  0x11   : > { %v190_v0 = vld [vmem:[%s1092_s26] sm:$0xf] (%p50_p3)  ;;  %v192_v1 = vld [vmem:[%s1092_s26 + $0x14] sm:$0xf] (%p50_p3)  ;;  %v194_v2 = vld [vmem:[%s1092_s26 + $0x28] sm:$0xf] (%p50_p3) }
  0x12   : > { %191 = vst [vmem:[%s169_s27] sm:$0xf] (%p50_p3), %v190_v0  ;;  %193 = vst [vmem:[%s169_s27 + $0x4] sm:$0xf] (%p50_p3), %v192_v1  ;;  %v196_v3 = vld [vmem:[%s1092_s26 + $0x3c] sm:$0xf] (%p50_p3) }
  0x13   : > { %v198_v4 = vld [vmem:[%s1092_s26 + $0x50] sm:$0xf] (%p50_p3)  ;;  %195 = vst [vmem:[%s169_s27 + $0x8] sm:$0xf] (%p50_p3), %v194_v2  ;;  %197 = vst [vmem:[%s169_s27 + $0xc] sm:$0xf] (%p50_p3), %v196_v3 }
  0x14   : > { %199 = vst [vmem:[%s169_s27 + $0x10] sm:$0xf] (%p50_p3), %v198_v4  ;;  %v200_v5 = vld [vmem:[%s1092_s26 + $0x64] sm:$0xf] (%p50_p3)  ;;  %v202_v6 = vld [vmem:[%s1092_s26 + $0x78] sm:$0xf] (%p50_p3) }
  0x15   : > { %v204_v7 = vld [vmem:[%s1092_s26 + $0x8c] sm:$0xf]  ;;  %201 = vst [vmem:[%s169_s27 + $0x14] sm:$0xf] %v200_v5  ;;  %203 = vst [vmem:[%s169_s27 + $0x18] sm:$0xf] %v202_v6 }
  0x16   : > { %205 = vst [vmem:[%s169_s27 + $0x1c] sm:$0xf] %v204_v7  ;;  %v206_v8 = vld [vmem:[%s1092_s26 + $0xa0] sm:$0xf]  ;;  %v208_v9 = vld [vmem:[%s1092_s26 + $0xb4] sm:$0xf] }
  0x17   : > { %v210_v10 = vld [vmem:[%s1092_s26 + $0xc8] sm:$0xf]  ;;  %207 = vst [vmem:[%s169_s27 + $0x20] sm:$0xf] %v206_v8  ;;  %209 = vst [vmem:[%s169_s27 + $0x24] sm:$0xf] %v208_v9 }
  0x18   : > { %211 = vst [vmem:[%s169_s27 + $0x28] sm:$0xf] %v210_v10  ;;  %v212_v11 = vld [vmem:[%s1092_s26 + $0xdc] sm:$0xf]  ;;  %v214_v12 = vld [vmem:[%s1092_s26 + $0xf0] sm:$0xf] }
  0x19   : > { %v216_v13 = vld [vmem:[%s1092_s26 + $0x104] sm:$0xf]  ;;  %213 = vst [vmem:[%s169_s27 + $0x2c] sm:$0xf] %v212_v11  ;;  %215 = vst [vmem:[%s169_s27 + $0x30] sm:$0xf] %v214_v12 }
  0x1a   : > { %217 = vst [vmem:[%s169_s27 + $0x34] sm:$0xf] %v216_v13  ;;  %v218_v14 = vld [vmem:[%s1092_s26 + $0x118] sm:$0xf]  ;;  %v220_v15 = vld [vmem:[%s1092_s26 + $0x12c] sm:$0xf] }
  0x1b   : > { %219 = vst [vmem:[%s169_s27 + $0x38] sm:$0xf] %v218_v14  ;;  %221 = vst [vmem:[%s169_s27 + $0x3c] sm:$0xf] %v220_v15 }
  0x1c PF: > { %p840_p6 = scmp.ge.s32.totalorder %s1026_s16, 1  ;;  %p287_p7 = scmp.lt.s32.totalorder %s1026_s16, 6 }
  0x1e   : > { %p288_p8 = pnand %p840_p6, %p287_p7 }
  0x1f   : > { %s294_s28 = sand.u32 (!%p288_p8), 1, %s1010_s12   ;;  %s842_s29 = sshll.u32 (!%p288_p8), %s1018_s14, 4 }
  0x20   : > { %291 = sbr.rel (%p288_p8) target bundleno = 321 (0x141), region = 69  ;;  %s841_s30 = sshll.u32 (!%p288_p8), %s294_s28, 6 }
  0x21   : > { %p333_p9 = scmp.lt.s32.totalorder (!%p288_p8), %s842_s29, 79  ;;  %s1119_s8 = scalar_lea.vmem (!%p288_p8), [#allocation2], %s841_s30 }
  0x22   : > { %p844_p10 = scmp.ne.s32.totalorder (!%p288_p8), %s1018_s14, 0 }
  0x27   : > { %s1456_s29 = smov (!%p333_p9, %s842_s29), 79  ;;  %357 = sbr.rel (%p844_p10) target bundleno = 49 (0x31), region = 77 }
  0x28   : > { %s843_s4 = sshll.u32 %s1456_s29, 2  ;;  %vm358_vm0 = vcmask (!%p844_p10), 523264   ;;  %v1028_v16 = vmov (!%p844_p10), 0.0  }
  0x29   : > { %s1117_s7 = scalar_lea.vmem %s1446_s1, %s843_s4  ;;  %359 = vst.msk [vmem:[%s1448_s3] sm:$0xff] (!%p844_p10), %vm358_vm0, %v1028_v16  ;;  %360 = vst.msk [vmem:[%s1448_s3 + $0x8] sm:$0xff] (!%p844_p10), %vm358_vm0, %v1028_v16 }
  0x2a   : > { %361 = vst.msk [vmem:[%s1448_s3 + $0x10] sm:$0xff] (!%p844_p10), %vm358_vm0, %v1028_v16  ;;  %362 = vst.msk [vmem:[%s1448_s3 + $0x18] sm:$0xff] (!%p844_p10), %vm358_vm0, %v1028_v16 }
  0x2b   : > { %363 = vst.msk [vmem:[%s1448_s3 + $0x20] sm:$0xff] (!%p844_p10), %vm358_vm0, %v1028_v16  ;;  %364 = vst.msk [vmem:[%s1448_s3 + $0x28] sm:$0xff] (!%p844_p10), %vm358_vm0, %v1028_v16 }
  0x2c   : > { %365 = vst.msk [vmem:[%s1448_s3 + $0x30] sm:$0xff] (!%p844_p10), %vm358_vm0, %v1028_v16  ;;  %366 = vst.msk [vmem:[%s1448_s3 + $0x38] sm:$0xff] (!%p844_p10), %vm358_vm0, %v1028_v16 }
  0x2d   : > { %367 = vst.msk [vmem:[%s1448_s3 + $0x40] sm:$0xff] (!%p844_p10), %vm358_vm0, %v1028_v16  ;;  %368 = vst.msk [vmem:[%s1448_s3 + $0x48] sm:$0xff] (!%p844_p10), %vm358_vm0, %v1028_v16 }
  0x2e   : > { %369 = vst.msk [vmem:[%s1448_s3 + $0x50] sm:$0xff] %vm358_vm0, %v1028_v16  ;;  %370 = vst.msk [vmem:[%s1448_s3 + $0x58] sm:$0xff] %vm358_vm0, %v1028_v16 }
  0x2f   : > { %371 = vst.msk [vmem:[%s1448_s3 + $0x60] sm:$0xff] %vm358_vm0, %v1028_v16  ;;  %372 = vst.msk [vmem:[%s1448_s3 + $0x68] sm:$0xff] %vm358_vm0, %v1028_v16 }
  0x30   : > { %373 = vst.msk [vmem:[%s1448_s3 + $0x70] sm:$0xff] %vm358_vm0, %v1028_v16  ;;  %374 = vst.msk [vmem:[%s1448_s3 + $0x78] sm:$0xff] %vm358_vm0, %v1028_v16 }
  0x31 PF: > { %v972_v17 = vld [vmem:[%s1117_s7] sm:$0xff]   ;;  %v973_v18 = vld [vmem:[%s1117_s7 + $0x8] sm:$0xff]   ;;  %v974_v19 = vld [vmem:[%s1117_s7 + $0x10] sm:$0xff]   ;;  %vm632_vm1 = vcmask 523264   ;;  %p861_p11 = scmp.ne.s32.totalorder %s1018_s14, 4 }
  0x32   : > { %883 = vmatprep.subr.bf16.mxu0 %v972_v17  ;;  %915 = vmatprep.subr.bf16.mxu1 %v972_v17  ;;  %v975_v20 = vld [vmem:[%s1117_s7 + $0x18] sm:$0xff]   ;;  %v980_v21 = vld [vmem:[%s1119_s8] sm:$0xff]   ;;  %v977_v24 = vld [vmem:[%s1117_s7 + $0x28] sm:$0xff]  }
  0x33   : > { %884 = vmatpush3.bf16.msra.mxu0 %v972_v17  ;;  %923 = vmatpush3.bf16.msra.mxu1 %v972_v17  ;;  %v981_v22 = vld [vmem:[%s1119_s8 + $0x20] sm:$0xff]   ;;  %v978_v25 = vld [vmem:[%s1117_s7 + $0x30] sm:$0xff]   ;;  %v979_v26 = vld [vmem:[%s1117_s7 + $0x38] sm:$0xff]  }
  0x34   : > { %885 = vmatprep.subr.bf16.mxu0 %v973_v18  ;;  %916 = vmatprep.subr.bf16.mxu1 %v973_v18  ;;  %v976_v23 = vld [vmem:[%s1117_s7 + $0x20] sm:$0xff]   ;;  %v982_v27 = vld [vmem:[%s1119_s8 + $0x8] sm:$0xff]   ;;  %v984_v29 = vld [vmem:[%s1119_s8 + $0x10] sm:$0xff]  }
  0x35   : > { %899 = vmatprep.mubr.bf16.mxu0 %v980_v21  ;;  %907 = vmatprep.mubr.bf16.mxu1 %v981_v22  ;;  %v983_v28 = vld [vmem:[%s1119_s8 + $0x28] sm:$0xff]   ;;  %v985_v30 = vld [vmem:[%s1119_s8 + $0x30] sm:$0xff]   ;;  %v986_v31 = vld [vmem:[%s1119_s8 + $0x18] sm:$0xff]  }
  0x36   : > { %v987_v32 = vld [vmem:[%s1119_s8 + $0x38] sm:$0xff]   ;;  %v377_v33 = vld [vmem:[%s1448_s3 + $0x10] sm:$0xff]  ;;  %v375_v35 = vld [vmem:[%s1448_s3] sm:$0xff] }
  0x37   : > { %886 = vmatpush3.bf16.msra.mxu0 %v973_v18  ;;  %924 = vmatpush3.bf16.msra.mxu1 %v973_v18  ;;  %v385_v34 = vld [vmem:[%s1448_s3 + $0x50] sm:$0xff]  ;;  %v383_v36 = vld [vmem:[%s1448_s3 + $0x40] sm:$0xff]  ;;  %v378_v39 = vld [vmem:[%s1448_s3 + $0x18] sm:$0xff] }
  0x38   : > { %887 = vmatprep.subr.bf16.mxu0 %v974_v19  ;;  %917 = vmatprep.subr.bf16.mxu1 %v974_v19  ;;  %v386_v40 = vld [vmem:[%s1448_s3 + $0x58] sm:$0xff]  ;;  %v376_v45 = vld [vmem:[%s1448_s3 + $0x8] sm:$0xff]  ;;  %v381_v57 = vld [vmem:[%s1448_s3 + $0x30] sm:$0xff] }
  0x39   : > { %v384_v46 = vld [vmem:[%s1448_s3 + $0x48] sm:$0xff]  ;;  %v389_v58 = vld [vmem:[%s1448_s3 + $0x70] sm:$0xff]  ;;  %v379_v59 = vld [vmem:[%s1448_s3 + $0x20] sm:$0xff] }
  0x3a   : > { %v387_v60 = vld [vmem:[%s1448_s3 + $0x60] sm:$0xff]  ;;  %v382_v63 = vld [vmem:[%s1448_s3 + $0x38] sm:$0xff]  ;;  %v380_v5 = vld [vmem:[%s1448_s3 + $0x28] sm:$0xff] }
  0x3b   : > { %888 = vmatpush3.bf16.msra.mxu0 %v974_v19  ;;  %925 = vmatpush3.bf16.msra.mxu1 %v974_v19  ;;  %v390_v0 = vld [vmem:[%s1448_s3 + $0x78] sm:$0xff]  ;;  %v388_v6 = vld [vmem:[%s1448_s3 + $0x68] sm:$0xff]  ;;  %v862_v18 = vld [vmem:[%s1447_s2] ss:$0 sm:$0xff] (!%p861_p11) }
  0x3c   : > { %889 = vmatprep.subr.bf16.mxu0 %v975_v20  ;;  %918 = vmatprep.subr.bf16.mxu1 %v975_v20 }
  0x3f   : > { %890 = vmatpush3.bf16.msra.mxu0 %v975_v20  ;;  %926 = vmatpush3.bf16.msra.mxu1 %v975_v20 }
  0x40   : > { %891 = vmatprep.subr.bf16.mxu0 %v976_v23  ;;  %919 = vmatprep.subr.bf16.mxu1 %v976_v23 }
  0x43   : > { %892 = vmatpush3.bf16.msra.mxu0 %v976_v23  ;;  %927 = vmatpush3.bf16.msra.mxu1 %v976_v23 }
  0x44   : > { %893 = vmatprep.subr.bf16.mxu0 %v977_v24  ;;  %920 = vmatprep.subr.bf16.mxu1 %v977_v24 }
  0x47   : > { %894 = vmatpush3.bf16.msra.mxu0 %v977_v24  ;;  %928 = vmatpush3.bf16.msra.mxu1 %v977_v24 }
  0x48   : > { %895 = vmatprep.subr.bf16.mxu0 %v978_v25  ;;  %921 = vmatprep.subr.bf16.mxu1 %v978_v25 }
  0x4b   : > { %896 = vmatpush3.bf16.msra.mxu0 %v978_v25  ;;  %929 = vmatpush3.bf16.msra.mxu1 %v978_v25 }
  0x4c   : > { %897 = vmatprep.subr.bf16.mxu0 %v979_v26  ;;  %922 = vmatprep.subr.bf16.mxu1 %v979_v26 }
  0x4f   : > { %898 = vmatpush3.bf16.msra.mxu0 %v979_v26  ;;  %930 = vmatpush3.bf16.msra.mxu1 %v979_v26 }
  0x52   : > { %900 = vmatmul.mubr.bf16.vlgmr.msra.gmra.mrb[0].mxu0 %v982_v27  ;;  %908 = vmatmul.mubr.bf16.vlgmr.msra.gmra.mrb[0].mxu1 %v983_v28 }
  0x53   : > { %903 = vmatprep.mubr.bf16.mxu0 %v984_v29  ;;  %911 = vmatprep.mubr.bf16.mxu1 %v985_v30 }
  0x5a   : > { %904 = vmatmul.mubr.bf16.gmra.mrb[4].mxu0 %v986_v31  ;;  %912 = vmatmul.mubr.bf16.gmra.mrb[4].mxu1 %v987_v32 }
 0x125   : > { %v901_v37 = vpop.f32.mrb[0].mxu0  ;;  %v909_v38 = vpop.f32.mrb[0].mxu1 }
 0x126   : > { %v618_v41 = vadd.f32 %v901_v37, %v377_v33  ;;  %v626_v42 = vadd.f32 %v909_v38, %v385_v34  ;;  %v553_v43 = vpop.f32.mrb[1].mxu0  ;;  %v585_v44 = vpop.f32.mrb[1].mxu1 }
 0x127   : > { %v616_v47 = vadd.f32 %v553_v43, %v375_v35  ;;  %v624_v48 = vadd.f32 %v585_v44, %v383_v36  ;;  %v902_v49 = vpop.f32.mrb[2].mxu0  ;;  %v910_v50 = vpop.f32.mrb[2].mxu1 }
 0x128   : > { %635 = vst.msk [vmem:[%s1448_s3 + $0x10] sm:$0xff] %vm632_vm1, %v618_v41  ;;  %643 = vst.msk [vmem:[%s1448_s3 + $0x50] sm:$0xff] %vm632_vm1, %v626_v42  ;;  %v619_v51 = vadd.f32 %v902_v49, %v378_v39  ;;  %v627_v52 = vadd.f32 %v910_v50, %v386_v40  ;;  %v556_v53 = vpop.f32.mrb[3].mxu0  ;;  %v588_v54 = vpop.f32.mrb[3].mxu1 }
 0x129   : > { %633 = vst.msk [vmem:[%s1448_s3] sm:$0xff] %vm632_vm1, %v616_v47  ;;  %641 = vst.msk [vmem:[%s1448_s3 + $0x40] sm:$0xff] %vm632_vm1, %v624_v48  ;;  %v617_v55 = vadd.f32 %v556_v53, %v376_v45  ;;  %v625_v56 = vadd.f32 %v588_v54, %v384_v46 }
 0x12a   : > { %636 = vst.msk [vmem:[%s1448_s3 + $0x18] sm:$0xff] %vm632_vm1, %v619_v51  ;;  %644 = vst.msk [vmem:[%s1448_s3 + $0x58] sm:$0xff] %vm632_vm1, %v627_v52 }
 0x12b   : > { %634 = vst.msk [vmem:[%s1448_s3 + $0x8] sm:$0xff] %vm632_vm1, %v617_v55  ;;  %642 = vst.msk [vmem:[%s1448_s3 + $0x48] sm:$0xff] %vm632_vm1, %v625_v56 }
 0x12d   : > { %v905_v61 = vpop.f32.mrb[4].mxu0  ;;  %v913_v62 = vpop.f32.mrb[4].mxu1  ;;  %652 = sbr.rel (%p861_p11) target bundleno = 321 (0x141), region = 81 }
 0x12e   : > { %v622_v1 = vadd.f32 %v905_v61, %v381_v57  ;;  %v630_v2 = vadd.f32 %v913_v62, %v389_v58  ;;  %v569_v3 = vpop.f32.mrb[5].mxu0  ;;  %v601_v4 = vpop.f32.mrb[5].mxu1 }
 0x12f   : > { %v620_v7 = vadd.f32 %v569_v3, %v379_v59  ;;  %v628_v8 = vadd.f32 %v601_v4, %v387_v60  ;;  %v906_v9 = vpop.f32.mrb[6].mxu0  ;;  %v914_v10 = vpop.f32.mrb[6].mxu1  ;;  %v655_v22 = vld [vmem:[%s1448_s3 + $0x10] sm:$0xff] (!%p861_p11) }
 0x130   : > { %639 = vst.msk [vmem:[%s1448_s3 + $0x30] sm:$0xff] %vm632_vm1, %v622_v1  ;;  %647 = vst.msk [vmem:[%s1448_s3 + $0x70] sm:$0xff] %vm632_vm1, %v630_v2  ;;  %v623_v11 = vadd.f32 %v906_v9, %v382_v63  ;;  %v631_v12 = vadd.f32 %v914_v10, %v390_v0  ;;  %v572_v13 = vpop.f32.mrb[7].mxu0  ;;  %v604_v14 = vpop.f32.mrb[7].mxu1  ;;  %v653_v17 = vld [vmem:[%s1448_s3] sm:$0xff] (!%p861_p11)  ;;  %v678_v25 = vadd.f32 (!%p861_p11), %v862_v18, %v655_v22  ;;  %v663_v37 = vld [vmem:[%s1448_s3 + $0x50] sm:$0xff] (!%p861_p11) }
 0x131   : > { %637 = vst.msk [vmem:[%s1448_s3 + $0x20] sm:$0xff] %vm632_vm1, %v620_v7  ;;  %645 = vst.msk [vmem:[%s1448_s3 + $0x60] sm:$0xff] %vm632_vm1, %v628_v8  ;;  %v621_v15 = vadd.f32 %v572_v13, %v380_v5  ;;  %v629_v16 = vadd.f32 %v604_v14, %v388_v6  ;;  %v676_v20 = vadd.f32 (!%p861_p11), %v862_v18, %v653_v17  ;;  %v656_v23 = vld [vmem:[%s1448_s3 + $0x18] sm:$0xff] (!%p861_p11)  ;;  %v661_v35 = vld [vmem:[%s1448_s3 + $0x40] sm:$0xff] (!%p861_p11) }
 0x132   : > { %640 = vst.msk [vmem:[%s1448_s3 + $0x38] sm:$0xff] %vm632_vm1, %v623_v11  ;;  %648 = vst.msk [vmem:[%s1448_s3 + $0x78] sm:$0xff] %vm632_vm1, %v631_v12  ;;  %v654_v19 = vld [vmem:[%s1448_s3 + $0x8] sm:$0xff] (!%p861_p11)  ;;  %v679_v26 = vadd.f32 (!%p861_p11), %v862_v18, %v656_v23  ;;  %v694_v38 = vmax.f32 (!%p861_p11), %v678_v25, 0.0  ;;  %v664_v42 = vld [vmem:[%s1448_s3 + $0x58] sm:$0xff] (!%p861_p11)  ;;  %v684_v47 = vadd.f32 (!%p861_p11), %v862_v18, %v661_v35  ;;  %v686_v52 = vadd.f32 (!%p861_p11), %v862_v18, %v663_v37 }
 0x133   : > { %638 = vst.msk [vmem:[%s1448_s3 + $0x28] sm:$0xff] %vm632_vm1, %v621_v15  ;;  %646 = vst.msk [vmem:[%s1448_s3 + $0x68] sm:$0xff] %vm632_vm1, %v629_v16  ;;  %v677_v21 = vadd.f32 (!%p861_p11), %v862_v18, %v654_v19  ;;  %v692_v31 = vmax.f32 (!%p861_p11), %v676_v20, 0.0  ;;  %v662_v36 = vld [vmem:[%s1448_s3 + $0x48] sm:$0xff] (!%p861_p11)  ;;  %v687_v53 = vadd.f32 (!%p861_p11), %v862_v18, %v664_v42 }
 0x134   : > { %v695_v39 = vmax.f32 %v679_v26, 0.0  ;;  %v685_v48 = vadd.f32 %v862_v18, %v662_v36  ;;  %710 = vst.msk [vmem:[%s1448_s3 + $0x10] sm:$0xff] %vm632_vm1, %v694_v38  ;;  %v700_v55 = vmax.f32 %v684_v47, 0.0  ;;  %v702_v59 = vmax.f32 %v686_v52, 0.0 }
 0x135   : > { %v693_v32 = vmax.f32 %v677_v21, 0.0  ;;  %708 = vst.msk [vmem:[%s1448_s3] sm:$0xff] %vm632_vm1, %v692_v31  ;;  %v703_v60 = vmax.f32 %v687_v53, 0.0 }
 0x136   : > { %711 = vst.msk [vmem:[%s1448_s3 + $0x18] sm:$0xff] %vm632_vm1, %v695_v39  ;;  %v701_v56 = vmax.f32 %v685_v48, 0.0  ;;  %716 = vst.msk [vmem:[%s1448_s3 + $0x40] sm:$0xff] %vm632_vm1, %v700_v55 }
 0x137   : > { %v659_v29 = vld [vmem:[%s1448_s3 + $0x30] sm:$0xff]  ;;  %709 = vst.msk [vmem:[%s1448_s3 + $0x8] sm:$0xff] %vm632_vm1, %v693_v32  ;;  %718 = vst.msk [vmem:[%s1448_s3 + $0x50] sm:$0xff] %vm632_vm1, %v702_v59 }
 0x138   : > { %v657_v24 = vld [vmem:[%s1448_s3 + $0x20] sm:$0xff]  ;;  %v682_v34 = vadd.f32 %v862_v18, %v659_v29  ;;  %v667_v49 = vld [vmem:[%s1448_s3 + $0x70] sm:$0xff]  ;;  %717 = vst.msk [vmem:[%s1448_s3 + $0x48] sm:$0xff] %vm632_vm1, %v701_v56  ;;  %719 = vst.msk [vmem:[%s1448_s3 + $0x58] sm:$0xff] %vm632_vm1, %v703_v60 }
 0x139   : > { %v680_v27 = vadd.f32 %v862_v18, %v657_v24  ;;  %v660_v30 = vld [vmem:[%s1448_s3 + $0x38] sm:$0xff]  ;;  %v665_v43 = vld [vmem:[%s1448_s3 + $0x60] sm:$0xff]  ;;  %v690_v58 = vadd.f32 %v862_v18, %v667_v49 }
 0x13a   : > { %v658_v28 = vld [vmem:[%s1448_s3 + $0x28] sm:$0xff]  ;;  %v683_v41 = vadd.f32 %v862_v18, %v660_v30  ;;  %v698_v46 = vmax.f32 %v682_v34, 0.0  ;;  %v668_v50 = vld [vmem:[%s1448_s3 + $0x78] sm:$0xff]  ;;  %v688_v54 = vadd.f32 %v862_v18, %v665_v43 }
 0x13b   : > { %v681_v33 = vadd.f32 %v862_v18, %v658_v28  ;;  %v696_v40 = vmax.f32 %v680_v27, 0.0  ;;  %v666_v44 = vld [vmem:[%s1448_s3 + $0x68] sm:$0xff]  ;;  %v691_v62 = vadd.f32 %v862_v18, %v668_v50  ;;  %v706_v0 = vmax.f32 %v690_v58, 0.0 }
 0x13c   : > { %v699_v51 = vmax.f32 %v683_v41, 0.0  ;;  %714 = vst.msk [vmem:[%s1448_s3 + $0x30] sm:$0xff] %vm632_vm1, %v698_v46  ;;  %v689_v57 = vadd.f32 %v862_v18, %v666_v44  ;;  %v704_v61 = vmax.f32 %v688_v54, 0.0 }
 0x13d   : > { %v697_v45 = vmax.f32 %v681_v33, 0.0  ;;  %712 = vst.msk [vmem:[%s1448_s3 + $0x20] sm:$0xff] %vm632_vm1, %v696_v40  ;;  %v707_v1 = vmax.f32 %v691_v62, 0.0  ;;  %722 = vst.msk [vmem:[%s1448_s3 + $0x70] sm:$0xff] %vm632_vm1, %v706_v0 }
 0x13e   : > { %715 = vst.msk [vmem:[%s1448_s3 + $0x38] sm:$0xff] %vm632_vm1, %v699_v51  ;;  %v705_v63 = vmax.f32 %v689_v57, 0.0  ;;  %720 = vst.msk [vmem:[%s1448_s3 + $0x60] sm:$0xff] %vm632_vm1, %v704_v61 }
 0x13f   : > { %713 = vst.msk [vmem:[%s1448_s3 + $0x28] sm:$0xff] %vm632_vm1, %v697_v45  ;;  %723 = vst.msk [vmem:[%s1448_s3 + $0x78] sm:$0xff] %vm632_vm1, %v707_v1 }
 0x140   : > { %721 = vst.msk [vmem:[%s1448_s3 + $0x68] sm:$0xff] %vm632_vm1, %v705_v63 }
 0x141 PF: > { %s13_s16 = sadd.s32 1, %s1026_s16   ;;  %s1449_s12 = smov %s1014_s13 }
 0x142   : > { %p10_p12 = scmp.ge.s32.totalorder %s13_s16, 7   ;;  %s1450_s13 = smov %s1084_s20 }
 0x143   : > { %s1451_s14 = smov %s1022_s15  ;;  %s1452_s15 = smov %s1454_s17 }
 0x144   :  { %12 = sbr.rel (!%p10_p12) target bundleno = 3 (0x3), region = 122 }

// kernel: resnet18_forward.26
= control target key start
LH: loop header
LB: loop body
LE: loop exit
PB: predicated region body
PF: predicated region fallthrough
CT: control target
= control target key end

     0   :  { %s1165_s15 = smov 0   ;;  %s1167_s16 = smov 0   ;;  %s1627_s0 = inlined_call_operand.vmem [shape: bf16[128,640], index: 0, kind: input, shape index: {}]   ;;  %s1628_s1 = inlined_call_operand.vmem [shape: bf16[640,64], index: 1, kind: input, shape index: {}]   ;;  %s1629_s2 = inlined_call_operand.vmem [shape: f32[1,64], index: 2, kind: input, shape index: {}]   ;;  %s1630_s3 = inlined_call_operand.vmem [shape: f32[128,64], index: 3, kind: input, shape index: {}]   ;;  %s1631_s4 = inlined_call_operand.vmem [shape: f32[128,64], index: 4, kind: output, shape index: {}]  }
   0x1   :  { %s1169_s17 = smov 0   ;;  %s1171_s18 = smov 0  }
   0x2   :  { %s1173_s19 = smov 0  }
   0x3 LB: > { %s26_s20 = sadd.s32 1, %s1133_s18  ;;  %p49_p1 = scmp.ne.s32.totalorder %s1125_s16, %s1121_s15  ;;  %s1137_s19 = sphi %s1173_s19, %s14_s19   ;;  %s1133_s18 = sphi %s1171_s18, %s1635_s18   ;;  %s1129_s17 = sphi %s1169_s17, %s1634_s17   ;;  %s1125_s16 = sphi %s1167_s16, %s1633_s16   ;;  %s1121_s15 = sphi %s1165_s15, %s1632_s15  }
   0x4   : > { %p27_p0 = scmp.ge.s32.totalorder %s26_s20, 5  ;;  %p50_p2 = scmp.eq.s32.totalorder %s1137_s19, 0 }
   0x5   : > { %s42_s22 = sadd.s32 1, %s1125_s16  ;;  %p948_p5 = scmp.ge.s32.totalorder %s1137_s19, 5 }
   0x6   : > { %s1637_s20 = smov (%p27_p0, %s26_s20), 0  ;;  %p51_p3 = por %p50_p2, %p49_p1 }
   0x7   : > { %s38_s21 = ssub.s32 %s1133_s18, %s1637_s20  ;;  %203 = sbr.rel (%p948_p5) target bundleno = 28 (0x1c), region = 24 }
   0x8   : > { %p40_p4 = scmp.eq.s32.totalorder %s38_s21, 0 }
   0xa   : > { %s1200_s23 = scalar_select %p40_p4, %s1125_s16, %s42_s22  }
   0xe   : > { %206 = sbr.rel (!%p51_p3) target bundleno = 28 (0x1c), region = 28  ;;  %s208_s24 = sand.u32 (%p51_p3), 1, %s1125_s16  }
   0xf   : > { %s950_s25 = sshll.u32 (%p51_p3), %s1133_s18, 2  ;;  %s949_s26 = sshll.u32 (%p51_p3), %s208_s24, 6 }
  0x10   : > { %s1208_s29 = scalar_lea.vmem (%p51_p3), %s1627_s0, %s950_s25  ;;  %s210_s30 = scalar_lea.vmem (%p51_p3), [#allocation2], %s949_s26 }
  0x11   : > { %v231_v0 = vld [vmem:[%s1208_s29] sm:$0xf] (%p51_p3)  ;;  %v233_v1 = vld [vmem:[%s1208_s29 + $0x14] sm:$0xf] (%p51_p3)  ;;  %v235_v2 = vld [vmem:[%s1208_s29 + $0x28] sm:$0xf] (%p51_p3) }
  0x12   : > { %232 = vst [vmem:[%s210_s30] sm:$0xf] (%p51_p3), %v231_v0  ;;  %234 = vst [vmem:[%s210_s30 + $0x4] sm:$0xf] (%p51_p3), %v233_v1  ;;  %v237_v3 = vld [vmem:[%s1208_s29 + $0x3c] sm:$0xf] (%p51_p3) }
  0x13   : > { %v239_v4 = vld [vmem:[%s1208_s29 + $0x50] sm:$0xf] (%p51_p3)  ;;  %236 = vst [vmem:[%s210_s30 + $0x8] sm:$0xf] (%p51_p3), %v235_v2  ;;  %238 = vst [vmem:[%s210_s30 + $0xc] sm:$0xf] (%p51_p3), %v237_v3 }
  0x14   : > { %240 = vst [vmem:[%s210_s30 + $0x10] sm:$0xf] (%p51_p3), %v239_v4  ;;  %v241_v5 = vld [vmem:[%s1208_s29 + $0x64] sm:$0xf] (%p51_p3)  ;;  %v243_v6 = vld [vmem:[%s1208_s29 + $0x78] sm:$0xf] (%p51_p3) }
  0x15   : > { %v245_v7 = vld [vmem:[%s1208_s29 + $0x8c] sm:$0xf]  ;;  %242 = vst [vmem:[%s210_s30 + $0x14] sm:$0xf] %v241_v5  ;;  %244 = vst [vmem:[%s210_s30 + $0x18] sm:$0xf] %v243_v6 }
  0x16   : > { %246 = vst [vmem:[%s210_s30 + $0x1c] sm:$0xf] %v245_v7  ;;  %v247_v8 = vld [vmem:[%s1208_s29 + $0xa0] sm:$0xf]  ;;  %v249_v9 = vld [vmem:[%s1208_s29 + $0xb4] sm:$0xf] }
  0x17   : > { %v251_v10 = vld [vmem:[%s1208_s29 + $0xc8] sm:$0xf]  ;;  %248 = vst [vmem:[%s210_s30 + $0x20] sm:$0xf] %v247_v8  ;;  %250 = vst [vmem:[%s210_s30 + $0x24] sm:$0xf] %v249_v9 }
  0x18   : > { %252 = vst [vmem:[%s210_s30 + $0x28] sm:$0xf] %v251_v10  ;;  %v253_v11 = vld [vmem:[%s1208_s29 + $0xdc] sm:$0xf]  ;;  %v255_v12 = vld [vmem:[%s1208_s29 + $0xf0] sm:$0xf] }
  0x19   : > { %v257_v13 = vld [vmem:[%s1208_s29 + $0x104] sm:$0xf]  ;;  %254 = vst [vmem:[%s210_s30 + $0x2c] sm:$0xf] %v253_v11  ;;  %256 = vst [vmem:[%s210_s30 + $0x30] sm:$0xf] %v255_v12 }
  0x1a   : > { %258 = vst [vmem:[%s210_s30 + $0x34] sm:$0xf] %v257_v13  ;;  %v259_v14 = vld [vmem:[%s1208_s29 + $0x118] sm:$0xf]  ;;  %v261_v15 = vld [vmem:[%s1208_s29 + $0x12c] sm:$0xf] }
  0x1b   : > { %260 = vst [vmem:[%s210_s30 + $0x38] sm:$0xf] %v259_v14  ;;  %262 = vst [vmem:[%s210_s30 + $0x3c] sm:$0xf] %v261_v15 }
  0x1c PF: > { %p951_p6 = scmp.ge.s32.totalorder %s1137_s19, 1  ;;  %p328_p7 = scmp.lt.s32.totalorder %s1137_s19, 6 }
  0x1e   : > { %p329_p8 = pnand %p951_p6, %p328_p7 }
  0x1f   : > { %s335_s5 = sand.u32 (!%p329_p8), 1, %s1121_s15   ;;  %s953_s6 = sshll.u32 (!%p329_p8), %s1129_s17, 4 }
  0x20   : > { %332 = sbr.rel (%p329_p8) target bundleno = 323 (0x143), region = 73  ;;  %s952_s7 = sshll.u32 (!%p329_p8), %s335_s5, 6 }
  0x21   : > { %p384_p9 = scmp.lt.s32.totalorder (!%p329_p8), %s953_s6, 79  ;;  %s1235_s12 = scalar_lea.vmem (!%p329_p8), [#allocation2], %s952_s7 }
  0x22   : > { %p955_p10 = scmp.ne.s32.totalorder (!%p329_p8), %s1129_s17, 0 }
  0x27   : > { %s1639_s6 = smov (!%p384_p9, %s953_s6), 79  ;;  %417 = sbr.rel (%p955_p10) target bundleno = 49 (0x31), region = 81 }
  0x28   : > { %s954_s8 = sshll.u32 %s1639_s6, 2  ;;  %vm418_vm0 = vcmask (!%p955_p10), 523264   ;;  %v1139_v16 = vmov (!%p955_p10), 0.0  }
  0x29   : > { %s1233_s11 = scalar_lea.vmem %s1628_s1, %s954_s8  ;;  %419 = vst.msk [vmem:[%s1631_s4] sm:$0xff] (!%p955_p10), %vm418_vm0, %v1139_v16  ;;  %420 = vst.msk [vmem:[%s1631_s4 + $0x8] sm:$0xff] (!%p955_p10), %vm418_vm0, %v1139_v16 }
  0x2a   : > { %421 = vst.msk [vmem:[%s1631_s4 + $0x10] sm:$0xff] (!%p955_p10), %vm418_vm0, %v1139_v16  ;;  %422 = vst.msk [vmem:[%s1631_s4 + $0x18] sm:$0xff] (!%p955_p10), %vm418_vm0, %v1139_v16 }
  0x2b   : > { %423 = vst.msk [vmem:[%s1631_s4 + $0x20] sm:$0xff] (!%p955_p10), %vm418_vm0, %v1139_v16  ;;  %424 = vst.msk [vmem:[%s1631_s4 + $0x28] sm:$0xff] (!%p955_p10), %vm418_vm0, %v1139_v16 }
  0x2c   : > { %425 = vst.msk [vmem:[%s1631_s4 + $0x30] sm:$0xff] (!%p955_p10), %vm418_vm0, %v1139_v16  ;;  %426 = vst.msk [vmem:[%s1631_s4 + $0x38] sm:$0xff] (!%p955_p10), %vm418_vm0, %v1139_v16 }
  0x2d   : > { %427 = vst.msk [vmem:[%s1631_s4 + $0x40] sm:$0xff] (!%p955_p10), %vm418_vm0, %v1139_v16  ;;  %428 = vst.msk [vmem:[%s1631_s4 + $0x48] sm:$0xff] (!%p955_p10), %vm418_vm0, %v1139_v16 }
  0x2e   : > { %429 = vst.msk [vmem:[%s1631_s4 + $0x50] sm:$0xff] %vm418_vm0, %v1139_v16  ;;  %430 = vst.msk [vmem:[%s1631_s4 + $0x58] sm:$0xff] %vm418_vm0, %v1139_v16 }
  0x2f   : > { %431 = vst.msk [vmem:[%s1631_s4 + $0x60] sm:$0xff] %vm418_vm0, %v1139_v16  ;;  %432 = vst.msk [vmem:[%s1631_s4 + $0x68] sm:$0xff] %vm418_vm0, %v1139_v16 }
  0x30   : > { %433 = vst.msk [vmem:[%s1631_s4 + $0x70] sm:$0xff] %vm418_vm0, %v1139_v16  ;;  %434 = vst.msk [vmem:[%s1631_s4 + $0x78] sm:$0xff] %vm418_vm0, %v1139_v16 }
  0x31 PF: > { %v1083_v17 = vld [vmem:[%s1233_s11] sm:$0xff]   ;;  %v1084_v18 = vld [vmem:[%s1233_s11 + $0x8] sm:$0xff]   ;;  %v1085_v19 = vld [vmem:[%s1233_s11 + $0x10] sm:$0xff]   ;;  %vm692_vm1 = vcmask 523264   ;;  %p972_p11 = scmp.ne.s32.totalorder %s1129_s17, 4 }
  0x32   : > { %994 = vmatprep.subr.bf16.mxu0 %v1083_v17  ;;  %1026 = vmatprep.subr.bf16.mxu1 %v1083_v17  ;;  %v1086_v20 = vld [vmem:[%s1233_s11 + $0x18] sm:$0xff]   ;;  %v1091_v21 = vld [vmem:[%s1235_s12] sm:$0xff]   ;;  %v1088_v24 = vld [vmem:[%s1233_s11 + $0x28] sm:$0xff]  }
  0x33   : > { %995 = vmatpush3.bf16.msra.mxu0 %v1083_v17  ;;  %1034 = vmatpush3.bf16.msra.mxu1 %v1083_v17  ;;  %v1092_v22 = vld [vmem:[%s1235_s12 + $0x20] sm:$0xff]   ;;  %v1089_v25 = vld [vmem:[%s1233_s11 + $0x30] sm:$0xff]   ;;  %v1090_v26 = vld [vmem:[%s1233_s11 + $0x38] sm:$0xff]  }
  0x34   : > { %996 = vmatprep.subr.bf16.mxu0 %v1084_v18  ;;  %1027 = vmatprep.subr.bf16.mxu1 %v1084_v18  ;;  %v1087_v23 = vld [vmem:[%s1233_s11 + $0x20] sm:$0xff]   ;;  %v1093_v27 = vld [vmem:[%s1235_s12 + $0x8] sm:$0xff]   ;;  %v1095_v29 = vld [vmem:[%s1235_s12 + $0x10] sm:$0xff]  }
  0x35   : > { %1010 = vmatprep.mubr.bf16.mxu0 %v1091_v21  ;;  %1018 = vmatprep.mubr.bf16.mxu1 %v1092_v22  ;;  %v1094_v28 = vld [vmem:[%s1235_s12 + $0x28] sm:$0xff]   ;;  %v1096_v30 = vld [vmem:[%s1235_s12 + $0x30] sm:$0xff]   ;;  %v1097_v31 = vld [vmem:[%s1235_s12 + $0x18] sm:$0xff]  }
  0x36   : > { %v1098_v32 = vld [vmem:[%s1235_s12 + $0x38] sm:$0xff]   ;;  %v437_v33 = vld [vmem:[%s1631_s4 + $0x10] sm:$0xff]  ;;  %v435_v35 = vld [vmem:[%s1631_s4] sm:$0xff] }
  0x37   : > { %997 = vmatpush3.bf16.msra.mxu0 %v1084_v18  ;;  %1035 = vmatpush3.bf16.msra.mxu1 %v1084_v18  ;;  %v445_v34 = vld [vmem:[%s1631_s4 + $0x50] sm:$0xff]  ;;  %v443_v36 = vld [vmem:[%s1631_s4 + $0x40] sm:$0xff]  ;;  %v438_v39 = vld [vmem:[%s1631_s4 + $0x18] sm:$0xff] }
  0x38   : > { %998 = vmatprep.subr.bf16.mxu0 %v1085_v19  ;;  %1028 = vmatprep.subr.bf16.mxu1 %v1085_v19  ;;  %v446_v40 = vld [vmem:[%s1631_s4 + $0x58] sm:$0xff]  ;;  %v436_v45 = vld [vmem:[%s1631_s4 + $0x8] sm:$0xff]  ;;  %v441_v57 = vld [vmem:[%s1631_s4 + $0x30] sm:$0xff] }
  0x39   : > { %v444_v46 = vld [vmem:[%s1631_s4 + $0x48] sm:$0xff]  ;;  %v449_v58 = vld [vmem:[%s1631_s4 + $0x70] sm:$0xff]  ;;  %v439_v59 = vld [vmem:[%s1631_s4 + $0x20] sm:$0xff] }
  0x3a   : > { %v447_v60 = vld [vmem:[%s1631_s4 + $0x60] sm:$0xff]  ;;  %v442_v63 = vld [vmem:[%s1631_s4 + $0x38] sm:$0xff]  ;;  %v440_v5 = vld [vmem:[%s1631_s4 + $0x28] sm:$0xff] }
  0x3b   : > { %999 = vmatpush3.bf16.msra.mxu0 %v1085_v19  ;;  %1036 = vmatpush3.bf16.msra.mxu1 %v1085_v19  ;;  %v450_v0 = vld [vmem:[%s1631_s4 + $0x78] sm:$0xff]  ;;  %v448_v6 = vld [vmem:[%s1631_s4 + $0x68] sm:$0xff]  ;;  %v1437_v18 = vld [vmem:[%s1629_s2] ss:$0 sm:$0xff] (!%p972_p11) }
  0x3c   : > { %1000 = vmatprep.subr.bf16.mxu0 %v1086_v20  ;;  %1029 = vmatprep.subr.bf16.mxu1 %v1086_v20  ;;  %v752_v19 = vld [vmem:[%s1630_s3] sm:$0xff] (!%p972_p11)  ;;  %v753_v22 = vld [vmem:[%s1630_s3 + $0x8] sm:$0xff] (!%p972_p11) }
  0x3f   : > { %1001 = vmatpush3.bf16.msra.mxu0 %v1086_v20  ;;  %1037 = vmatpush3.bf16.msra.mxu1 %v1086_v20 }
  0x40   : > { %1002 = vmatprep.subr.bf16.mxu0 %v1087_v23  ;;  %1030 = vmatprep.subr.bf16.mxu1 %v1087_v23 }
  0x43   : > { %1003 = vmatpush3.bf16.msra.mxu0 %v1087_v23  ;;  %1038 = vmatpush3.bf16.msra.mxu1 %v1087_v23 }
  0x44   : > { %1004 = vmatprep.subr.bf16.mxu0 %v1088_v24  ;;  %1031 = vmatprep.subr.bf16.mxu1 %v1088_v24 }
  0x47   : > { %1005 = vmatpush3.bf16.msra.mxu0 %v1088_v24  ;;  %1039 = vmatpush3.bf16.msra.mxu1 %v1088_v24 }
  0x48   : > { %1006 = vmatprep.subr.bf16.mxu0 %v1089_v25  ;;  %1032 = vmatprep.subr.bf16.mxu1 %v1089_v25 }
  0x4b   : > { %1007 = vmatpush3.bf16.msra.mxu0 %v1089_v25  ;;  %1040 = vmatpush3.bf16.msra.mxu1 %v1089_v25 }
  0x4c   : > { %1008 = vmatprep.subr.bf16.mxu0 %v1090_v26  ;;  %1033 = vmatprep.subr.bf16.mxu1 %v1090_v26 }
  0x4f   : > { %1009 = vmatpush3.bf16.msra.mxu0 %v1090_v26  ;;  %1041 = vmatpush3.bf16.msra.mxu1 %v1090_v26  ;;  %v754_v26 = vld [vmem:[%s1630_s3 + $0x10] sm:$0xff] (!%p972_p11) }
  0x52   : > { %1011 = vmatmul.mubr.bf16.vlgmr.msra.gmra.mrb[0].mxu0 %v1093_v27  ;;  %1019 = vmatmul.mubr.bf16.vlgmr.msra.gmra.mrb[0].mxu1 %v1094_v28  ;;  %v755_v28 = vld [vmem:[%s1630_s3 + $0x18] sm:$0xff] (!%p972_p11) }
  0x53   : > { %1014 = vmatprep.mubr.bf16.mxu0 %v1095_v29  ;;  %1022 = vmatprep.mubr.bf16.mxu1 %v1096_v30 }
  0x5a   : > { %1015 = vmatmul.mubr.bf16.gmra.mrb[4].mxu0 %v1097_v31  ;;  %1023 = vmatmul.mubr.bf16.gmra.mrb[4].mxu1 %v1098_v32  ;;  %v756_v32 = vld [vmem:[%s1630_s3 + $0x20] sm:$0xff] (!%p972_p11) }
 0x125   : > { %v1012_v37 = vpop.f32.mrb[0].mxu0  ;;  %v1020_v38 = vpop.f32.mrb[0].mxu1 }
 0x126   : > { %v678_v41 = vadd.f32 %v1012_v37, %v437_v33  ;;  %v686_v42 = vadd.f32 %v1020_v38, %v445_v34  ;;  %v613_v43 = vpop.f32.mrb[1].mxu0  ;;  %v645_v44 = vpop.f32.mrb[1].mxu1  ;;  %v757_v38 = vld [vmem:[%s1630_s3 + $0x28] sm:$0xff] (!%p972_p11) }
 0x127   : > { %v676_v47 = vadd.f32 %v613_v43, %v435_v35  ;;  %v684_v48 = vadd.f32 %v645_v44, %v443_v36  ;;  %v1013_v49 = vpop.f32.mrb[2].mxu0  ;;  %v1021_v50 = vpop.f32.mrb[2].mxu1 }
 0x128   : > { %695 = vst.msk [vmem:[%s1631_s4 + $0x10] sm:$0xff] %vm692_vm1, %v678_v41  ;;  %703 = vst.msk [vmem:[%s1631_s4 + $0x50] sm:$0xff] %vm692_vm1, %v686_v42  ;;  %v679_v51 = vadd.f32 %v1013_v49, %v438_v39  ;;  %v687_v52 = vadd.f32 %v1021_v50, %v446_v40  ;;  %v616_v53 = vpop.f32.mrb[3].mxu0  ;;  %v648_v54 = vpop.f32.mrb[3].mxu1  ;;  %v758_v40 = vld [vmem:[%s1630_s3 + $0x30] sm:$0xff] (!%p972_p11) }
 0x129   : > { %693 = vst.msk [vmem:[%s1631_s4] sm:$0xff] %vm692_vm1, %v676_v47  ;;  %701 = vst.msk [vmem:[%s1631_s4 + $0x40] sm:$0xff] %vm692_vm1, %v684_v48  ;;  %v677_v55 = vadd.f32 %v616_v53, %v436_v45  ;;  %v685_v56 = vadd.f32 %v648_v54, %v444_v46  ;;  %v759_v45 = vld [vmem:[%s1630_s3 + $0x38] sm:$0xff] (!%p972_p11)  ;;  %v761_v53 = vld [vmem:[%s1630_s3 + $0x48] sm:$0xff] (!%p972_p11) }
 0x12a   : > { %696 = vst.msk [vmem:[%s1631_s4 + $0x18] sm:$0xff] %vm692_vm1, %v679_v51  ;;  %704 = vst.msk [vmem:[%s1631_s4 + $0x58] sm:$0xff] %vm692_vm1, %v687_v52  ;;  %v760_v51 = vld [vmem:[%s1630_s3 + $0x40] sm:$0xff] (!%p972_p11) }
 0x12b   : > { %694 = vst.msk [vmem:[%s1631_s4 + $0x8] sm:$0xff] %vm692_vm1, %v677_v55  ;;  %702 = vst.msk [vmem:[%s1631_s4 + $0x48] sm:$0xff] %vm692_vm1, %v685_v56 }
 0x12d   : > { %v1016_v61 = vpop.f32.mrb[4].mxu0  ;;  %v1024_v62 = vpop.f32.mrb[4].mxu1  ;;  %712 = sbr.rel (%p972_p11) target bundleno = 323 (0x143), region = 85 }
 0x12e   : > { %v682_v1 = vadd.f32 %v1016_v61, %v441_v57  ;;  %v690_v2 = vadd.f32 %v1024_v62, %v449_v58  ;;  %v629_v3 = vpop.f32.mrb[5].mxu0  ;;  %v661_v4 = vpop.f32.mrb[5].mxu1 }
 0x12f   : > { %v680_v7 = vadd.f32 %v629_v3, %v439_v59  ;;  %v688_v8 = vadd.f32 %v661_v4, %v447_v60  ;;  %v1017_v9 = vpop.f32.mrb[6].mxu0  ;;  %v1025_v10 = vpop.f32.mrb[6].mxu1  ;;  %v715_v23 = vld [vmem:[%s1631_s4 + $0x10] sm:$0xff] (!%p972_p11)  ;;  %v764_v3 = vld [vmem:[%s1630_s3 + $0x60] sm:$0xff] (!%p972_p11) }
 0x130   : > { %699 = vst.msk [vmem:[%s1631_s4 + $0x30] sm:$0xff] %vm692_vm1, %v682_v1  ;;  %707 = vst.msk [vmem:[%s1631_s4 + $0x70] sm:$0xff] %vm692_vm1, %v690_v2  ;;  %v683_v11 = vadd.f32 %v1017_v9, %v442_v63  ;;  %v691_v12 = vadd.f32 %v1025_v10, %v450_v0  ;;  %v632_v13 = vpop.f32.mrb[7].mxu0  ;;  %v664_v14 = vpop.f32.mrb[7].mxu1  ;;  %v713_v17 = vld [vmem:[%s1631_s4] sm:$0xff] (!%p972_p11)  ;;  %v738_v25 = vadd.f32 (!%p972_p11), %v1437_v18, %v715_v23  ;;  %v723_v58 = vld [vmem:[%s1631_s4 + $0x50] sm:$0xff] (!%p972_p11) }
 0x131   : > { %697 = vst.msk [vmem:[%s1631_s4 + $0x20] sm:$0xff] %vm692_vm1, %v680_v7  ;;  %705 = vst.msk [vmem:[%s1631_s4 + $0x60] sm:$0xff] %vm692_vm1, %v688_v8  ;;  %v681_v15 = vadd.f32 %v632_v13, %v440_v5  ;;  %v689_v16 = vadd.f32 %v664_v14, %v448_v6  ;;  %v736_v20 = vadd.f32 (!%p972_p11), %v1437_v18, %v713_v17  ;;  %v716_v27 = vld [vmem:[%s1631_s4 + $0x18] sm:$0xff] (!%p972_p11)  ;;  %v721_v46 = vld [vmem:[%s1631_s4 + $0x40] sm:$0xff] (!%p972_p11) }
 0x132   : > { %700 = vst.msk [vmem:[%s1631_s4 + $0x38] sm:$0xff] %vm692_vm1, %v683_v11  ;;  %708 = vst.msk [vmem:[%s1631_s4 + $0x78] sm:$0xff] %vm692_vm1, %v691_v12  ;;  %v714_v21 = vld [vmem:[%s1631_s4 + $0x8] sm:$0xff] (!%p972_p11)  ;;  %v739_v30 = vadd.f32 (!%p972_p11), %v1437_v18, %v716_v27  ;;  %v770_v35 = vadd.f32 (!%p972_p11), %v754_v26, %v738_v25  ;;  %v744_v57 = vadd.f32 (!%p972_p11), %v1437_v18, %v721_v46  ;;  %v762_v59 = vld [vmem:[%s1630_s3 + $0x50] sm:$0xff] (!%p972_p11) }
 0x133   : > { %698 = vst.msk [vmem:[%s1631_s4 + $0x28] sm:$0xff] %vm692_vm1, %v681_v15  ;;  %706 = vst.msk [vmem:[%s1631_s4 + $0x68] sm:$0xff] %vm692_vm1, %v689_v16  ;;  %v737_v24 = vadd.f32 (!%p972_p11), %v1437_v18, %v714_v21  ;;  %v768_v29 = vadd.f32 (!%p972_p11), %v752_v19, %v736_v20  ;;  %v722_v52 = vld [vmem:[%s1631_s4 + $0x48] sm:$0xff] (!%p972_p11)  ;;  %v724_v60 = vld [vmem:[%s1631_s4 + $0x58] sm:$0xff] (!%p972_p11)  ;;  %v746_v0 = vadd.f32 (!%p972_p11), %v1437_v18, %v723_v58 }
 0x134   : > { %v771_v42 = vadd.f32 %v755_v28, %v739_v30  ;;  %v786_v48 = vmax.f32 %v770_v35, 0.0  ;;  %v745_v63 = vadd.f32 %v1437_v18, %v722_v52  ;;  %v763_v1 = vld [vmem:[%s1630_s3 + $0x58] sm:$0xff]  ;;  %v776_v6 = vadd.f32 %v760_v51, %v744_v57  ;;  %v765_v9 = vld [vmem:[%s1630_s3 + $0x68] sm:$0xff]  ;;  %v766_v15 = vld [vmem:[%s1630_s3 + $0x70] sm:$0xff] }
 0x135   : > { %v769_v34 = vadd.f32 %v753_v22, %v737_v24  ;;  %v784_v41 = vmax.f32 %v768_v29, 0.0  ;;  %v747_v7 = vadd.f32 %v1437_v18, %v724_v60  ;;  %v778_v12 = vadd.f32 %v762_v59, %v746_v0  ;;  %v767_v26 = vld [vmem:[%s1630_s3 + $0x78] sm:$0xff] }
 0x136   : > { %v787_v54 = vmax.f32 %v771_v42, 0.0  ;;  %802 = vst.msk [vmem:[%s1631_s4 + $0x10] sm:$0xff] %vm692_vm1, %v786_v48  ;;  %v777_v11 = vadd.f32 %v761_v53, %v745_v63  ;;  %v792_v19 = vmax.f32 %v776_v6, 0.0 }
 0x137   : > { %v719_v39 = vld [vmem:[%s1631_s4 + $0x30] sm:$0xff]  ;;  %v785_v47 = vmax.f32 %v769_v34, 0.0  ;;  %800 = vst.msk [vmem:[%s1631_s4] sm:$0xff] %vm692_vm1, %v784_v41  ;;  %v779_v20 = vadd.f32 %v763_v1, %v747_v7  ;;  %v794_v23 = vmax.f32 %v778_v12, 0.0 }
 0x138   : > { %v717_v31 = vld [vmem:[%s1631_s4 + $0x20] sm:$0xff]  ;;  %v742_v43 = vadd.f32 %v1437_v18, %v719_v39  ;;  %803 = vst.msk [vmem:[%s1631_s4 + $0x18] sm:$0xff] %vm692_vm1, %v787_v54  ;;  %v727_v10 = vld [vmem:[%s1631_s4 + $0x70] sm:$0xff]  ;;  %v793_v22 = vmax.f32 %v777_v11, 0.0  ;;  %808 = vst.msk [vmem:[%s1631_s4 + $0x40] sm:$0xff] %vm692_vm1, %v792_v19 }
 0x139   : > { %v740_v36 = vadd.f32 %v1437_v18, %v717_v31  ;;  %v720_v44 = vld [vmem:[%s1631_s4 + $0x38] sm:$0xff]  ;;  %801 = vst.msk [vmem:[%s1631_s4 + $0x8] sm:$0xff] %vm692_vm1, %v785_v47  ;;  %v725_v2 = vld [vmem:[%s1631_s4 + $0x60] sm:$0xff]  ;;  %v750_v21 = vadd.f32 %v1437_v18, %v727_v10  ;;  %v795_v27 = vmax.f32 %v779_v20, 0.0  ;;  %810 = vst.msk [vmem:[%s1631_s4 + $0x50] sm:$0xff] %vm692_vm1, %v794_v23 }
 0x13a   : > { %v718_v33 = vld [vmem:[%s1631_s4 + $0x28] sm:$0xff]  ;;  %v774_v55 = vadd.f32 %v758_v40, %v742_v43  ;;  %v743_v56 = vadd.f32 %v1437_v18, %v720_v44  ;;  %v748_v13 = vadd.f32 %v1437_v18, %v725_v2  ;;  %v728_v16 = vld [vmem:[%s1631_s4 + $0x78] sm:$0xff]  ;;  %809 = vst.msk [vmem:[%s1631_s4 + $0x48] sm:$0xff] %vm692_vm1, %v793_v22 }
 0x13b   : > { %v741_v37 = vadd.f32 %v1437_v18, %v718_v33  ;;  %v772_v49 = vadd.f32 %v756_v32, %v740_v36  ;;  %v726_v8 = vld [vmem:[%s1631_s4 + $0x68] sm:$0xff]  ;;  %v782_v28 = vadd.f32 %v766_v15, %v750_v21  ;;  %v751_v29 = vadd.f32 %v1437_v18, %v728_v16  ;;  %811 = vst.msk [vmem:[%s1631_s4 + $0x58] sm:$0xff] %vm692_vm1, %v795_v27 }
 0x13c   : > { %v790_v4 = vmax.f32 %v774_v55, 0.0  ;;  %v775_v5 = vadd.f32 %v759_v45, %v743_v56  ;;  %v749_v14 = vadd.f32 %v1437_v18, %v726_v8  ;;  %v780_v24 = vadd.f32 %v764_v3, %v748_v13 }
 0x13d   : > { %v773_v50 = vadd.f32 %v757_v38, %v741_v37  ;;  %v788_v61 = vmax.f32 %v772_v49, 0.0  ;;  %v798_v32 = vmax.f32 %v782_v28, 0.0  ;;  %v783_v33 = vadd.f32 %v767_v26, %v751_v29 }
 0x13e   : > { %806 = vst.msk [vmem:[%s1631_s4 + $0x30] sm:$0xff] %vm692_vm1, %v790_v4  ;;  %v791_v17 = vmax.f32 %v775_v5, 0.0  ;;  %v781_v25 = vadd.f32 %v765_v9, %v749_v14  ;;  %v796_v30 = vmax.f32 %v780_v24, 0.0 }
 0x13f   : > { %v789_v62 = vmax.f32 %v773_v50, 0.0  ;;  %804 = vst.msk [vmem:[%s1631_s4 + $0x20] sm:$0xff] %vm692_vm1, %v788_v61  ;;  %814 = vst.msk [vmem:[%s1631_s4 + $0x70] sm:$0xff] %vm692_vm1, %v798_v32  ;;  %v799_v18 = vmax.f32 %v783_v33, 0.0 }
 0x140   : > { %807 = vst.msk [vmem:[%s1631_s4 + $0x38] sm:$0xff] %vm692_vm1, %v791_v17  ;;  %v797_v31 = vmax.f32 %v781_v25, 0.0  ;;  %812 = vst.msk [vmem:[%s1631_s4 + $0x60] sm:$0xff] %vm692_vm1, %v796_v30 }
 0x141   : > { %805 = vst.msk [vmem:[%s1631_s4 + $0x28] sm:$0xff] %vm692_vm1, %v789_v62  ;;  %815 = vst.msk [vmem:[%s1631_s4 + $0x78] sm:$0xff] %vm692_vm1, %v799_v18 }
 0x142   : > { %813 = vst.msk [vmem:[%s1631_s4 + $0x68] sm:$0xff] %vm692_vm1, %v797_v31 }
 0x143 PF: > { %s14_s19 = sadd.s32 1, %s1137_s19   ;;  %s1632_s15 = smov %s1125_s16 }
 0x144   : > { %p11_p12 = scmp.ge.s32.totalorder %s14_s19, 7   ;;  %s1633_s16 = smov %s1200_s23 }
 0x145   : > { %s1634_s17 = smov %s1133_s18  ;;  %s1635_s18 = smov %s1637_s20 }
 0x146   :  { %13 = sbr.rel (!%p11_p12) target bundleno = 3 (0x3), region = 129 }

// kernel: resnet18_forward.29
= control target key start
LH: loop header
LB: loop body
LE: loop exit
PB: predicated region body
PF: predicated region fallthrough
CT: control target
= control target key end

     0   :  { %s761_s12 = smov 0   ;;  %s763_s13 = smov 0   ;;  %s908_s0 = inlined_call_operand.vmem [shape: bf16[32,640], index: 0, kind: input, shape index: {}]   ;;  %s909_s1 = inlined_call_operand.vmem [shape: bf16[640,128], index: 1, kind: input, shape index: {}]   ;;  %s910_s2 = inlined_call_operand.vmem [shape: f32[1,128], index: 2, kind: input, shape index: {}]   ;;  %s911_s3 = inlined_call_operand.vmem [shape: f32[32,128], index: 3, kind: output, shape index: {}]  }
   0x1   :  { %s765_s14 = smov 0   ;;  %s767_s15 = smov 0  }
   0x2   :  { %s769_s16 = smov 0  }
   0x3 LB: > { %s25_s17 = sadd.s32 1, %s734_s15  ;;  %p48_p1 = scmp.ne.s32.totalorder %s726_s13, %s722_s12  ;;  %s738_s16 = sphi %s769_s16, %s13_s16   ;;  %s734_s15 = sphi %s767_s15, %s915_s15   ;;  %s730_s14 = sphi %s765_s14, %s914_s14   ;;  %s726_s13 = sphi %s763_s13, %s913_s13   ;;  %s722_s12 = sphi %s761_s12, %s912_s12  }
   0x4   : > { %p26_p0 = scmp.ge.s32.totalorder %s25_s17, 5  ;;  %p49_p2 = scmp.eq.s32.totalorder %s738_s16, 0 }
   0x5   : > { %s41_s19 = sadd.s32 1, %s726_s13  ;;  %p595_p5 = scmp.ge.s32.totalorder %s738_s16, 5 }
   0x6   : > { %s917_s17 = smov (%p26_p0, %s25_s17), 0  ;;  %p50_p3 = por %p49_p2, %p48_p1 }
   0x7   : > { %s37_s18 = ssub.s32 %s734_s15, %s917_s17  ;;  %162 = sbr.rel (%p595_p5) target bundleno = 21 (0x15), region = 20 }
   0x8   : > { %p39_p4 = scmp.eq.s32.totalorder %s37_s18, 0 }
   0xa   : > { %s796_s20 = scalar_select %p39_p4, %s726_s13, %s41_s19  }
   0xe   : > { %165 = sbr.rel (!%p50_p3) target bundleno = 21 (0x15), region = 24  ;;  %s167_s21 = sand.u32 (%p50_p3), 1, %s726_s13  }
   0xf   : > { %s597_s22 = sshll.u32 (%p50_p3), %s734_s15, 2  ;;  %s596_s23 = sshll.u32 (%p50_p3), %s167_s21, 4 }
  0x10   : > { %s174_s26 = scalar_lea.vmem (%p50_p3), %s908_s0, %s597_s22  ;;  %s169_s27 = scalar_lea.vmem (%p50_p3), [#allocation2], %s596_s23 }
  0x11   : > { %v190_v0 = vld [vmem:[%s174_s26] sm:$0xf] (%p50_p3)  ;;  %v192_v1 = vld [vmem:[%s174_s26 + $0x14] sm:$0xf] (%p50_p3)  ;;  %v194_v2 = vld [vmem:[%s174_s26 + $0x28] sm:$0xf] (%p50_p3) }
  0x12   : > { %191 = vst [vmem:[%s169_s27] sm:$0xf] (%p50_p3), %v190_v0  ;;  %193 = vst [vmem:[%s169_s27 + $0x4] sm:$0xf] (%p50_p3), %v192_v1  ;;  %v196_v3 = vld [vmem:[%s174_s26 + $0x3c] sm:$0xf] (%p50_p3) }
  0x13   : > { %195 = vst [vmem:[%s169_s27 + $0x8] sm:$0xf] (%p50_p3), %v194_v2  ;;  %197 = vst [vmem:[%s169_s27 + $0xc] sm:$0xf] (%p50_p3), %v196_v3 }
  0x15 PF: > { %p598_p6 = scmp.ge.s32.totalorder %s738_s16, 1  ;;  %p239_p7 = scmp.lt.s32.totalorder %s738_s16, 6 }
  0x17   : > { %p240_p8 = pnand %p598_p6, %p239_p7 }
  0x18   : > { %s246_s28 = sand.u32 (!%p240_p8), 1, %s722_s12   ;;  %s600_s29 = sshll.u32 (!%p240_p8), %s730_s14, 4 }
  0x19   : > { %243 = sbr.rel (%p240_p8) target bundleno = 302 (0x12e), region = 69  ;;  %s808_s30 = sshll.u32 (!%p240_p8), %s246_s28, 4 }
  0x1a   : > { %p285_p9 = scmp.lt.s32.totalorder (!%p240_p8), %s600_s29, 79  ;;  %s248_s8 = scalar_lea.vmem (!%p240_p8), [#allocation2], %s808_s30 }
  0x1b   : > { %p602_p10 = scmp.ne.s32.totalorder (!%p240_p8), %s730_s14, 0 }
  0x20   : > { %s919_s29 = smov (!%p285_p9, %s600_s29), 79  ;;  %309 = sbr.rel (%p602_p10) target bundleno = 39 (0x27), region = 77 }
  0x21   : > { %s601_s4 = sshll.u32 %s919_s29, 2  ;;  %v740_v4 = vmov (!%p602_p10), 0.0  }
  0x22   : > { %s813_s7 = scalar_lea.vmem %s909_s1, %s601_s4  ;;  %310 = vst [vmem:[%s911_s3] sm:$0xff] (!%p602_p10), %v740_v4  ;;  %311 = vst [vmem:[%s911_s3 + $0x8] sm:$0xff] (!%p602_p10), %v740_v4 }
  0x23   : > { %312 = vst [vmem:[%s911_s3 + $0x10] sm:$0xff] (!%p602_p10), %v740_v4  ;;  %313 = vst [vmem:[%s911_s3 + $0x18] sm:$0xff] (!%p602_p10), %v740_v4 }
  0x27 PF: > { %v690_v5 = vld [vmem:[%s813_s7] sm:$0xff]   ;;  %v691_v6 = vld [vmem:[%s813_s7 + $0x8] sm:$0xff]   ;;  %v692_v7 = vld [vmem:[%s813_s7 + $0x10] sm:$0xff]   ;;  %p613_p11 = scmp.ne.s32.totalorder %s730_s14, 4 }
  0x28   : > { %629 = vmatprep.subr.bf16.mxu0 %v690_v5  ;;  %v693_v8 = vld [vmem:[%s813_s7 + $0x18] sm:$0xff]   ;;  %v698_v9 = vld [vmem:[%s248_s8] sm:$0xff]   ;;  %v695_v11 = vld [vmem:[%s813_s7 + $0x28] sm:$0xff]  }
  0x29   : > { %630 = vmatpush3.bf16.msra.mxu0 %v690_v5  ;;  %645 = vmatprep.mubr.bf16.mxu0 %v698_v9  ;;  %v694_v10 = vld [vmem:[%s813_s7 + $0x20] sm:$0xff]   ;;  %v696_v12 = vld [vmem:[%s813_s7 + $0x30] sm:$0xff]   ;;  %v697_v13 = vld [vmem:[%s813_s7 + $0x38] sm:$0xff]  }
  0x2a   : > { %631 = vmatprep.subr.bf16.mxu0 %v691_v6  ;;  %v699_v14 = vld [vmem:[%s248_s8 + $0x8] sm:$0xff]   ;;  %v316_v15 = vld [vmem:[%s911_s3 + $0x10] sm:$0xff]  ;;  %v314_v16 = vld [vmem:[%s911_s3] sm:$0xff] }
  0x2b   : > { %v317_v18 = vld [vmem:[%s911_s3 + $0x18] sm:$0xff]  ;;  %v315_v21 = vld [vmem:[%s911_s3 + $0x8] sm:$0xff]  ;;  %v614_v28 = vld [vmem:[%s910_s2] ss:$0 sm:$0xff] (!%p613_p11) }
  0x2d   : > { %632 = vmatpush3.bf16.msra.mxu0 %v691_v6 }
  0x2e   : > { %633 = vmatprep.subr.bf16.mxu0 %v692_v7 }
  0x31   : > { %634 = vmatpush3.bf16.msra.mxu0 %v692_v7 }
  0x32   : > { %635 = vmatprep.subr.bf16.mxu0 %v693_v8 }
  0x35   : > { %636 = vmatpush3.bf16.msra.mxu0 %v693_v8 }
  0x36   : > { %637 = vmatprep.subr.bf16.mxu0 %v694_v10 }
  0x39   : > { %638 = vmatpush3.bf16.msra.mxu0 %v694_v10 }
  0x3a   : > { %639 = vmatprep.subr.bf16.mxu0 %v695_v11 }
  0x3d   : > { %640 = vmatpush3.bf16.msra.mxu0 %v695_v11 }
  0x3e   : > { %641 = vmatprep.subr.bf16.mxu0 %v696_v12 }
  0x41   : > { %642 = vmatpush3.bf16.msra.mxu0 %v696_v12 }
  0x42   : > { %643 = vmatprep.subr.bf16.mxu0 %v697_v13 }
  0x45   : > { %644 = vmatpush3.bf16.msra.mxu0 %v697_v13 }
  0x48   : > { %646 = vmatmul.mubr.bf16.vlgmr.msra.gmra.mrb[0].mxu0 %v699_v14 }
 0x11b   : > { %v647_v17 = vpop.f32.mrb[0].mxu0  ;;  %458 = sbr.rel (%p613_p11) target bundleno = 302 (0x12e), region = 81 }
 0x11c   : > { %v449_v19 = vadd.f32 %v647_v17, %v316_v15  ;;  %v432_v20 = vpop.f32.mrb[1].mxu0 }
 0x11d   : > { %v447_v22 = vadd.f32 %v432_v20, %v314_v16  ;;  %v648_v23 = vpop.f32.mrb[2].mxu0 }
 0x11e   : > { %453 = vst [vmem:[%s911_s3 + $0x10] sm:$0xff] %v449_v19  ;;  %v450_v24 = vadd.f32 %v648_v23, %v317_v18  ;;  %v435_v25 = vpop.f32.mrb[3].mxu0 }
 0x11f   : > { %451 = vst [vmem:[%s911_s3] sm:$0xff] %v447_v22  ;;  %v448_v26 = vadd.f32 %v435_v25, %v315_v21 }
 0x120   : > { %454 = vst [vmem:[%s911_s3 + $0x18] sm:$0xff] %v450_v24 }
 0x121   : > { %452 = vst [vmem:[%s911_s3 + $0x8] sm:$0xff] %v448_v26 }
 0x125   : > { %v461_v32 = vld [vmem:[%s911_s3 + $0x10] sm:$0xff] }
 0x126   : > { %v459_v27 = vld [vmem:[%s911_s3] sm:$0xff]  ;;  %v472_v34 = vadd.f32 %v614_v28, %v461_v32 }
 0x127   : > { %v470_v30 = vadd.f32 %v614_v28, %v459_v27  ;;  %v462_v33 = vld [vmem:[%s911_s3 + $0x18] sm:$0xff] }
 0x128   : > { %v460_v29 = vld [vmem:[%s911_s3 + $0x8] sm:$0xff]  ;;  %v473_v35 = vadd.f32 %v614_v28, %v462_v33  ;;  %v476_v38 = vmax.f32 %v472_v34, 0.0 }
 0x129   : > { %v471_v31 = vadd.f32 %v614_v28, %v460_v29  ;;  %v474_v36 = vmax.f32 %v470_v30, 0.0 }
 0x12a   : > { %v477_v39 = vmax.f32 %v473_v35, 0.0  ;;  %480 = vst [vmem:[%s911_s3 + $0x10] sm:$0xff] %v476_v38 }
 0x12b   : > { %v475_v37 = vmax.f32 %v471_v31, 0.0  ;;  %478 = vst [vmem:[%s911_s3] sm:$0xff] %v474_v36 }
 0x12c   : > { %481 = vst [vmem:[%s911_s3 + $0x18] sm:$0xff] %v477_v39 }
 0x12d   : > { %479 = vst [vmem:[%s911_s3 + $0x8] sm:$0xff] %v475_v37 }
 0x12e PF: > { %s13_s16 = sadd.s32 1, %s738_s16   ;;  %s912_s12 = smov %s726_s13 }
 0x12f   : > { %p10_p12 = scmp.ge.s32.totalorder %s13_s16, 7   ;;  %s913_s13 = smov %s796_s20 }
 0x130   : > { %s914_s14 = smov %s734_s15  ;;  %s915_s15 = smov %s917_s17 }
 0x131   :  { %12 = sbr.rel (!%p10_p12) target bundleno = 3 (0x3), region = 122 }

// kernel: resnet18_forward.30
= control target key start
LH: loop header
LB: loop body
LE: loop exit
PB: predicated region body
PF: predicated region fallthrough
CT: control target
= control target key end

     0   :  { %s307_s1 = inlined_call_operand.vmem [shape: bf16[128,128], index: 1, kind: input, shape index: {}]   ;;  %s308_s0 = inlined_call_operand.vmem [shape: bf16[32,128], index: 0, kind: input, shape index: {}]   ;;  %s309_s2 = inlined_call_operand.vmem [shape: f32[1,128], index: 2, kind: input, shape index: {}]   ;;  %s310_s3 = inlined_call_operand.vmem [shape: f32[32,128], index: 3, kind: output, shape index: {}]  }
   0x1   :  { %v232_v0 = vld [vmem:[%s307_s1] sm:$0xff]   ;;  %v233_v1 = vld [vmem:[%s307_s1 + $0x8] sm:$0xff]   ;;  %v234_v2 = vld [vmem:[%s307_s1 + $0x10] sm:$0xff]  }
   0x2   :  { %211 = vmatprep.subr.bf16.mxu0 %v232_v0  ;;  %v235_v3 = vld [vmem:[%s307_s1 + $0x18] sm:$0xff]   ;;  %v240_v4 = vld [vmem:[%s308_s0] sm:$0xff]   ;;  %v237_v6 = vld [vmem:[%s307_s1 + $0x28] sm:$0xff]  }
   0x3   :  { %212 = vmatpush3.bf16.msra.mxu0 %v232_v0  ;;  %227 = vmatprep.mubr.bf16.mxu0 %v240_v4  ;;  %v236_v5 = vld [vmem:[%s307_s1 + $0x20] sm:$0xff]   ;;  %v238_v7 = vld [vmem:[%s307_s1 + $0x30] sm:$0xff]   ;;  %v239_v8 = vld [vmem:[%s307_s1 + $0x38] sm:$0xff]  }
   0x4   :  { %213 = vmatprep.subr.bf16.mxu0 %v233_v1  ;;  %v241_v9 = vld [vmem:[%s308_s0 + $0x8] sm:$0xff]   ;;  %v200_v11 = vld [vmem:[%s309_s2] ss:$0 sm:$0xff] }
   0x7   :  { %214 = vmatpush3.bf16.msra.mxu0 %v233_v1 }
   0x8   :  { %215 = vmatprep.subr.bf16.mxu0 %v234_v2 }
   0xb   :  { %216 = vmatpush3.bf16.msra.mxu0 %v234_v2 }
   0xc   :  { %217 = vmatprep.subr.bf16.mxu0 %v235_v3 }
   0xf   :  { %218 = vmatpush3.bf16.msra.mxu0 %v235_v3 }
  0x10   :  { %219 = vmatprep.subr.bf16.mxu0 %v236_v5 }
  0x13   :  { %220 = vmatpush3.bf16.msra.mxu0 %v236_v5 }
  0x14   :  { %221 = vmatprep.subr.bf16.mxu0 %v237_v6 }
  0x17   :  { %222 = vmatpush3.bf16.msra.mxu0 %v237_v6 }
  0x18   :  { %223 = vmatprep.subr.bf16.mxu0 %v238_v7 }
  0x1b   :  { %224 = vmatpush3.bf16.msra.mxu0 %v238_v7 }
  0x1c   :  { %225 = vmatprep.subr.bf16.mxu0 %v239_v8 }
  0x1f   :  { %226 = vmatpush3.bf16.msra.mxu0 %v239_v8 }
  0x22   :  { %228 = vmatmul.mubr.bf16.vlgmr.msra.gmra.mrb[0].mxu0 %v241_v9 }
  0xf5   :  { %v229_v10 = vpop.f32.mrb[0].mxu0 }
  0xf6   :  { %v141_v12 = vpop.f32.mrb[1].mxu0  ;;  %v180_v14 = vadd.f32 %v229_v10, %v200_v11 }
  0xf7   :  { %v230_v13 = vpop.f32.mrb[2].mxu0  ;;  %v178_v16 = vadd.f32 %v200_v11, %v141_v12 }
  0xf8   :  { %v144_v15 = vpop.f32.mrb[3].mxu0  ;;  %184 = vst [vmem:[%s310_s3 + $0x10] sm:$0xff] %v180_v14  ;;  %v181_v17 = vadd.f32 %v230_v13, %v200_v11 }
  0xf9   :  { %182 = vst [vmem:[%s310_s3] sm:$0xff] %v178_v16  ;;  %v179_v18 = vadd.f32 %v200_v11, %v144_v15 }
  0xfa   :  { %185 = vst [vmem:[%s310_s3 + $0x18] sm:$0xff] %v181_v17 }
  0xfb   :  { %183 = vst [vmem:[%s310_s3 + $0x8] sm:$0xff] %v179_v18 }

// kernel: resnet18_forward.31
= control target key start
LH: loop header
LB: loop body
LE: loop exit
PB: predicated region body
PF: predicated region fallthrough
CT: control target
= control target key end

     0   :  { %s1128_s15 = smov 0   ;;  %s1130_s16 = smov 0   ;;  %s1304_s0 = inlined_call_operand.vmem [shape: bf16[32,1152], index: 0, kind: input, shape index: {}]   ;;  %s1305_s1 = inlined_call_operand.vmem [shape: bf16[1152,128], index: 1, kind: input, shape index: {}]   ;;  %s1306_s2 = inlined_call_operand.vmem [shape: f32[1,128], index: 2, kind: input, shape index: {}]   ;;  %s1307_s3 = inlined_call_operand.vmem [shape: f32[32,128], index: 3, kind: input, shape index: {}]   ;;  %s1308_s4 = inlined_call_operand.vmem [shape: f32[32,128], index: 4, kind: output, shape index: {}]  }
   0x1   :  { %s1132_s17 = smov 0   ;;  %s1134_s18 = smov 0  }
   0x2   :  { %s1136_s19 = smov 0  }
   0x3 LB: > { %s26_s20 = sadd.s32 1, %s1096_s18  ;;  %p49_p1 = scmp.ne.s32.totalorder %s1088_s16, %s1084_s15  ;;  %s1100_s19 = sphi %s1136_s19, %s14_s19   ;;  %s1096_s18 = sphi %s1134_s18, %s1312_s18   ;;  %s1092_s17 = sphi %s1132_s17, %s1311_s17   ;;  %s1088_s16 = sphi %s1130_s16, %s1310_s16   ;;  %s1084_s15 = sphi %s1128_s15, %s1309_s15  }
   0x4   : > { %p27_p0 = scmp.ge.s32.totalorder %s26_s20, 3  ;;  %p50_p2 = scmp.eq.s32.totalorder %s1100_s19, 0 }
   0x5   : > { %s42_s22 = sadd.s32 1, %s1088_s16  ;;  %p879_p5 = scmp.ge.s32.totalorder %s1100_s19, 3 }
   0x6   : > { %s1314_s20 = smov (%p27_p0, %s26_s20), 0  ;;  %p51_p3 = por %p50_p2, %p49_p1 }
   0x7   : > { %s38_s21 = ssub.s32 %s1096_s18, %s1314_s20  ;;  %203 = sbr.rel (%p879_p5) target bundleno = 23 (0x17), region = 24 }
   0x8   : > { %p40_p4 = scmp.eq.s32.totalorder %s38_s21, 0 }
   0xa   : > { %s1163_s23 = scalar_select %p40_p4, %s1088_s16, %s42_s22  }
   0xe   : > { %206 = sbr.rel (!%p51_p3) target bundleno = 23 (0x17), region = 28  ;;  %s208_s24 = sand.u32 (%p51_p3), 1, %s1088_s16  }
   0xf   : > { %s928_s25 = smul.u32 (%p51_p3), 12, %s1096_s18 }
  0x10   : > { %s987_s26 = smul.u32 (%p51_p3), 48, %s208_s24 }
  0x11   : > { %s216_s29 = scalar_lea.vmem (%p51_p3), %s1304_s0, %s928_s25 }
  0x12   : > { %v231_v0 = vld [vmem:[%s216_s29] sm:$0xff] (%p51_p3)  ;;  %v235_v2 = vld [vmem:[%s216_s29 + $0x48] sm:$0xff] (%p51_p3)  ;;  %s210_s30 = scalar_lea.vmem (%p51_p3), [#allocation2], %s987_s26  ;;  %v885_v6 = vld [vmem:[%s216_s29 + $0x50] sm:$0xf] (%p51_p3) }
  0x13   : > { %v233_v1 = vld [vmem:[%s216_s29 + $0x24] sm:$0xff] (%p51_p3)  ;;  %232 = vst [vmem:[%s210_s30] sm:$0xff] (%p51_p3), %v231_v0  ;;  %236 = vst [vmem:[%s210_s30 + $0x18] sm:$0xff] (%p51_p3), %v235_v2  ;;  %v237_v3 = vld [vmem:[%s216_s29 + $0x6c] sm:$0xff] (%p51_p3) }
  0x14   : > { %234 = vst [vmem:[%s210_s30 + $0xc] sm:$0xff] (%p51_p3), %v233_v1  ;;  %v881_v4 = vld [vmem:[%s216_s29 + $0x8] sm:$0xf] (%p51_p3)  ;;  %v883_v5 = vld [vmem:[%s216_s29 + $0x2c] sm:$0xf] (%p51_p3)  ;;  %238 = vst [vmem:[%s210_s30 + $0x24] sm:$0xff] (%p51_p3), %v237_v3 }
  0x15   : > { %882 = vst [vmem:[%s210_s30 + $0x8] sm:$0xf] %v881_v4  ;;  %884 = vst [vmem:[%s210_s30 + $0x14] sm:$0xf] %v883_v5  ;;  %v887_v7 = vld [vmem:[%s216_s29 + $0x74] sm:$0xf] }
  0x16   : > { %886 = vst [vmem:[%s210_s30 + $0x20] sm:$0xf] %v885_v6  ;;  %888 = vst [vmem:[%s210_s30 + $0x2c] sm:$0xf] %v887_v7 }
  0x17 PF: > { %p889_p6 = scmp.ge.s32.totalorder %s1100_s19, 1  ;;  %p270_p7 = scmp.lt.s32.totalorder %s1100_s19, 4 }
  0x19   : > { %p271_p8 = pnand %p889_p6, %p270_p7 }
  0x1a   : > { %s277_s5 = sand.u32 (!%p271_p8), 1, %s1084_s15   ;;  %s326_s6 = smul.u32 (!%p271_p8), 48, %s1092_s17 }
  0x1b   : > { %274 = sbr.rel (%p271_p8) target bundleno = 318 (0x13e), region = 58  ;;  %p891_p10 = scmp.ne.s32.totalorder (!%p271_p8), %s1092_s17, 0 }
  0x1c   : > { %s988_s7 = smul.u32 (!%p271_p8), 48, %s277_s5  ;;  %p327_p9 = scmp.lt.s32.totalorder (!%p271_p8), %s326_s6, 143 }
  0x1e   : > { %s1180_s12 = scalar_lea.vmem (!%p271_p8), [#allocation2], %s988_s7 }
  0x22   : > { %s1316_s6 = smov (!%p327_p9, %s326_s6), 143  ;;  %360 = sbr.rel (%p891_p10) target bundleno = 41 (0x29), region = 66 }
  0x23   : > { %s890_s8 = sshll.u32 %s1316_s6, 2  ;;  %v1102_v8 = vmov (!%p891_p10), 0.0  }
  0x24   : > { %s1178_s11 = scalar_lea.vmem %s1305_s1, %s890_s8  ;;  %361 = vst [vmem:[%s1308_s4] sm:$0xff] (!%p891_p10), %v1102_v8  ;;  %362 = vst [vmem:[%s1308_s4 + $0x8] sm:$0xff] (!%p891_p10), %v1102_v8 }
  0x25   : > { %363 = vst [vmem:[%s1308_s4 + $0x10] sm:$0xff] (!%p891_p10), %v1102_v8  ;;  %364 = vst [vmem:[%s1308_s4 + $0x18] sm:$0xff] (!%p891_p10), %v1102_v8 }
  0x29 PF: > { %v1030_v9 = vld [vmem:[%s1178_s11 + $0x40] sm:$0xff]   ;;  %v1033_v12 = vld [vmem:[%s1178_s11 + $0x48] sm:$0xff]   ;;  %v1036_v15 = vld [vmem:[%s1178_s11 + $0x50] sm:$0xff]   ;;  %p922_p11 = scmp.ne.s32.totalorder %s1092_s17, 2 }
  0x2a   : > { %v1031_v10 = vld [vmem:[%s1178_s11] sm:$0xff]   ;;  %929 = vmatprep.subr.bf16.mxu0 %v1030_v9  ;;  %v1034_v13 = vld [vmem:[%s1178_s11 + $0x8] sm:$0xff]   ;;  %v1037_v16 = vld [vmem:[%s1178_s11 + $0x10] sm:$0xff]  }
  0x2b   : > { %v1032_v11 = vld [vmem:[%s1178_s11 + $0x80] sm:$0xff]   ;;  %930 = vmatpush3.bf16.msra.mxu0 %v1031_v10  ;;  %v1035_v14 = vld [vmem:[%s1178_s11 + $0x88] sm:$0xff]   ;;  %v1038_v17 = vld [vmem:[%s1178_s11 + $0x90] sm:$0xff]  }
  0x2c   : > { %967 = vmatprep.subr.bf16.mxu1 %v1032_v11  ;;  %931 = vmatprep.subr.bf16.mxu0 %v1033_v12  ;;  %v1039_v18 = vld [vmem:[%s1178_s11 + $0x58] sm:$0xff]   ;;  %v1042_v21 = vld [vmem:[%s1178_s11 + $0x60] sm:$0xff]   ;;  %v1045_v24 = vld [vmem:[%s1178_s11 + $0x68] sm:$0xff]  }
  0x2d   : > { %968 = vmatpush3.bf16.msra.mxu1 %v1032_v11  ;;  %v1040_v19 = vld [vmem:[%s1178_s11 + $0x18] sm:$0xff]   ;;  %v1044_v22 = vld [vmem:[%s1178_s11 + $0xa0] sm:$0xff]   ;;  %v1047_v25 = vld [vmem:[%s1178_s11 + $0xa8] sm:$0xff]  }
  0x2e   : > { %969 = vmatprep.subr.bf16.mxu1 %v1035_v14  ;;  %v1041_v20 = vld [vmem:[%s1178_s11 + $0x98] sm:$0xff]   ;;  %v1043_v23 = vld [vmem:[%s1178_s11 + $0x20] sm:$0xff]   ;;  %v1046_v26 = vld [vmem:[%s1178_s11 + $0x28] sm:$0xff]  }
  0x2f   : > { %932 = vmatpush3.bf16.msra.mxu0 %v1034_v13  ;;  %v1048_v27 = vld [vmem:[%s1178_s11 + $0x70] sm:$0xff]   ;;  %v1051_v30 = vld [vmem:[%s1178_s11 + $0x78] sm:$0xff]   ;;  %v365_v45 = vld [vmem:[%s1308_s4] sm:$0xff] }
  0x30   : > { %933 = vmatprep.subr.bf16.mxu0 %v1036_v15  ;;  %v1049_v28 = vld [vmem:[%s1178_s11 + $0x30] sm:$0xff]   ;;  %v1053_v31 = vld [vmem:[%s1178_s11 + $0xb8] sm:$0xff]   ;;  %v366_v50 = vld [vmem:[%s1308_s4 + $0x8] sm:$0xff] }
  0x31   : > { %970 = vmatpush3.bf16.msra.mxu1 %v1035_v14  ;;  %v1050_v29 = vld [vmem:[%s1178_s11 + $0xb0] sm:$0xff]   ;;  %v1052_v34 = vld [vmem:[%s1178_s11 + $0x38] sm:$0xff]   ;;  %v923_v4 = vld [vmem:[%s1306_s2] ss:$0 sm:$0xff] (!%p922_p11) }
  0x32   : > { %971 = vmatprep.subr.bf16.mxu1 %v1038_v17  ;;  %v1056_v32 = vld [vmem:[%s1180_s12 + $0x4] ss:$12 sps:$4 sm:$0xff]   ;;  %v1057_v33 = vld [vmem:[%s1180_s12 + $0x8] ss:$12 sps:$4 sm:$0xff]   ;;  %v1054_v35 = vld [vmem:[%s1180_s12] ss:$12 sps:$4 sm:$0xff]  }
  0x33   : > { %934 = vmatpush3.bf16.msra.mxu0 %v1037_v16  ;;  %633 = vmatprep.mubr.bf16.mxu0 %v1056_v32  ;;  %v1059_v36 = vld [vmem:[%s1180_s12 + $0x1c] ss:$12 sps:$4 sm:$0xff]   ;;  %v1058_v37 = vld [vmem:[%s1180_s12 + $0x20] ss:$12 sps:$4 sm:$0xff]   ;;  %v1061_v38 = vld [vmem:[%s1180_s12 + $0x18] ss:$12 sps:$4 sm:$0xff]  }
  0x34   : > { %935 = vmatprep.subr.bf16.mxu0 %v1039_v18  ;;  %983 = vmatprep.mubr.bf16.mxu1 %v1057_v33  ;;  %v367_v59 = vld [vmem:[%s1308_s4 + $0x10] sm:$0xff]  ;;  %v368_v63 = vld [vmem:[%s1308_s4 + $0x18] sm:$0xff]  ;;  %v726_v5 = vld [vmem:[%s1307_s3] sm:$0xff] (!%p922_p11) }
  0x35   : > { %972 = vmatpush3.bf16.msra.mxu1 %v1038_v17  ;;  %v727_v8 = vld [vmem:[%s1307_s3 + $0x8] sm:$0xff] (!%p922_p11)  ;;  %v728_v12 = vld [vmem:[%s1307_s3 + $0x10] sm:$0xff] (!%p922_p11)  ;;  %v729_v14 = vld [vmem:[%s1307_s3 + $0x18] sm:$0xff] (!%p922_p11) }
  0x36   : > { %973 = vmatprep.subr.bf16.mxu1 %v1041_v20 }
  0x37   : > { %936 = vmatpush3.bf16.msra.mxu0 %v1040_v19 }
  0x38   : > { %937 = vmatprep.subr.bf16.mxu0 %v1042_v21 }
  0x39   : > { %974 = vmatpush3.bf16.msra.mxu1 %v1041_v20 }
  0x3a   : > { %975 = vmatprep.subr.bf16.mxu1 %v1044_v22 }
  0x3b   : > { %938 = vmatpush3.bf16.msra.mxu0 %v1043_v23 }
  0x3c   : > { %939 = vmatprep.subr.bf16.mxu0 %v1045_v24 }
  0x3d   : > { %976 = vmatpush3.bf16.msra.mxu1 %v1044_v22 }
  0x3e   : > { %977 = vmatprep.subr.bf16.mxu1 %v1047_v25 }
  0x3f   : > { %940 = vmatpush3.bf16.msra.mxu0 %v1046_v26 }
  0x40   : > { %941 = vmatprep.subr.bf16.mxu0 %v1048_v27 }
  0x41   : > { %978 = vmatpush3.bf16.msra.mxu1 %v1047_v25 }
  0x42   : > { %979 = vmatprep.subr.bf16.mxu1 %v1050_v29 }
  0x43   : > { %942 = vmatpush3.bf16.msra.mxu0 %v1049_v28 }
  0x44   : > { %943 = vmatprep.subr.bf16.mxu0 %v1051_v30 }
  0x45   : > { %980 = vmatpush3.bf16.msra.mxu1 %v1050_v29 }
  0x46   : > { %981 = vmatprep.subr.bf16.mxu1 %v1053_v31 }
  0x47   : > { %944 = vmatpush3.bf16.msra.mxu0 %v1052_v34 }
  0x49   : > { %982 = vmatpush3.bf16.msra.mxu1 %v1053_v31 }
  0x4a   : > { %634 = vmatmul.mubr.bf16.vlgmr.msra.gmra.mrb[0].mxu0 %v1054_v35 }
  0x4b   : > { %641 = vmatprep.mubr.bf16.mxu0 %v1059_v36 }
  0x4c   : > { %984 = vmatmul.mubr.bf16.vlgmr.msra.gmra.mrb[0].mxu1 %v1058_v37 }
  0x52   : > { %642 = vmatmul.mubr.bf16.gmra.mrb[4].mxu0 %v1061_v38 }
 0x11d   : > { %v945_v39 = vpop.f32.mrb[0].mxu0 }
 0x11e   : > { %v946_v40 = vpop.f32.mrb[1].mxu0 }
 0x11f   : > { %v947_v41 = vadd.f32 %v946_v40, %v945_v39  ;;  %v948_v42 = vpop.f32.mrb[2].mxu0  ;;  %v985_v43 = vpop.f32.mrb[0].mxu1 }
 0x120   : > { %v949_v44 = vpop.f32.mrb[3].mxu0  ;;  %v684_v46 = vpop.f32.mrb[1].mxu1 }
 0x121   : > { %v950_v47 = vadd.f32 %v949_v44, %v948_v42  ;;  %v685_v48 = vadd.f32 %v947_v41, %v684_v46  ;;  %v986_v49 = vpop.f32.mrb[2].mxu1 }
 0x122   : > { %v687_v51 = vpop.f32.mrb[3].mxu1 }
 0x123   : > { %v699_v52 = vadd.f32 %v685_v48, %v365_v45  ;;  %v688_v53 = vadd.f32 %v950_v47, %v687_v51 }
 0x125   : > { %703 = vst [vmem:[%s1308_s4] sm:$0xff] %v699_v52  ;;  %v700_v54 = vadd.f32 %v688_v53, %v366_v50  ;;  %v951_v55 = vpop.f32.mrb[4].mxu0 }
 0x126   : > { %v952_v56 = vpop.f32.mrb[5].mxu0 }
 0x127   : > { %704 = vst [vmem:[%s1308_s4 + $0x8] sm:$0xff] %v700_v54  ;;  %v953_v57 = vadd.f32 %v952_v56, %v951_v55  ;;  %v954_v58 = vpop.f32.mrb[6].mxu0 }
 0x128   : > { %v955_v60 = vpop.f32.mrb[7].mxu0 }
 0x129   : > { %v693_v61 = vadd.f32 %v985_v43, %v953_v57  ;;  %v956_v62 = vadd.f32 %v955_v60, %v954_v58  ;;  %710 = sbr.rel (%p922_p11) target bundleno = 318 (0x13e), region = 70 }
 0x12b   : > { %v701_v0 = vadd.f32 %v693_v61, %v367_v59  ;;  %v696_v1 = vadd.f32 %v986_v49, %v956_v62 }
 0x12c   : > { %v711_v3 = vld [vmem:[%s1308_s4] sm:$0xff] (!%p922_p11) }
 0x12d   : > { %705 = vst [vmem:[%s1308_s4 + $0x10] sm:$0xff] %v701_v0  ;;  %v702_v2 = vadd.f32 %v696_v1, %v368_v63  ;;  %v722_v6 = vadd.f32 (!%p922_p11), %v923_v4, %v711_v3 }
 0x12e   : > { %v712_v7 = vld [vmem:[%s1308_s4 + $0x8] sm:$0xff] (!%p922_p11) }
 0x12f   : > { %706 = vst [vmem:[%s1308_s4 + $0x18] sm:$0xff] %v702_v2  ;;  %v723_v10 = vadd.f32 (!%p922_p11), %v923_v4, %v712_v7  ;;  %v730_v15 = vadd.f32 (!%p922_p11), %v726_v5, %v722_v6 }
 0x131   : > { %v731_v17 = vadd.f32 %v727_v8, %v723_v10  ;;  %v734_v19 = vmax.f32 %v730_v15, 0.0 }
 0x133   : > { %v735_v21 = vmax.f32 %v731_v17, 0.0  ;;  %738 = vst [vmem:[%s1308_s4] sm:$0xff] %v734_v19 }
 0x134   : > { %v713_v9 = vld [vmem:[%s1308_s4 + $0x10] sm:$0xff] }
 0x135   : > { %v724_v11 = vadd.f32 %v923_v4, %v713_v9  ;;  %739 = vst [vmem:[%s1308_s4 + $0x8] sm:$0xff] %v735_v21 }
 0x136   : > { %v714_v13 = vld [vmem:[%s1308_s4 + $0x18] sm:$0xff] }
 0x137   : > { %v725_v16 = vadd.f32 %v923_v4, %v714_v13  ;;  %v732_v18 = vadd.f32 %v728_v12, %v724_v11 }
 0x139   : > { %v733_v20 = vadd.f32 %v729_v14, %v725_v16  ;;  %v736_v22 = vmax.f32 %v732_v18, 0.0 }
 0x13b   : > { %v737_v23 = vmax.f32 %v733_v20, 0.0  ;;  %740 = vst [vmem:[%s1308_s4 + $0x10] sm:$0xff] %v736_v22 }
 0x13d   : > { %741 = vst [vmem:[%s1308_s4 + $0x18] sm:$0xff] %v737_v23 }
 0x13e PF: > { %s14_s19 = sadd.s32 1, %s1100_s19   ;;  %s1309_s15 = smov %s1088_s16 }
 0x13f   : > { %p11_p12 = scmp.ge.s32.totalorder %s14_s19, 5   ;;  %s1310_s16 = smov %s1163_s23 }
 0x140   : > { %s1311_s17 = smov %s1096_s18  ;;  %s1312_s18 = smov %s1314_s20 }
 0x141   :  { %13 = sbr.rel (!%p11_p12) target bundleno = 3 (0x3), region = 120 }

// kernel: resnet18_forward.32
= control target key start
LH: loop header
LB: loop body
LE: loop exit
PB: predicated region body
PF: predicated region fallthrough
CT: control target
= control target key end

     0   :  { %s1036_s12 = smov 0   ;;  %s1038_s13 = smov 0   ;;  %s1200_s0 = inlined_call_operand.vmem [shape: bf16[32,1152], index: 0, kind: input, shape index: {}]   ;;  %s1201_s1 = inlined_call_operand.vmem [shape: bf16[1152,128], index: 1, kind: input, shape index: {}]   ;;  %s1202_s2 = inlined_call_operand.vmem [shape: f32[1,128], index: 2, kind: input, shape index: {}]   ;;  %s1203_s3 = inlined_call_operand.vmem [shape: f32[32,128], index: 3, kind: output, shape index: {}]  }
   0x1   :  { %s1040_s14 = smov 0   ;;  %s1042_s15 = smov 0  }
   0x2   :  { %s1044_s16 = smov 0  }
   0x3 LB: > { %s25_s17 = sadd.s32 1, %s1009_s15  ;;  %p48_p1 = scmp.ne.s32.totalorder %s1001_s13, %s997_s12  ;;  %s1013_s16 = sphi %s1044_s16, %s13_s16   ;;  %s1009_s15 = sphi %s1042_s15, %s1207_s15   ;;  %s1005_s14 = sphi %s1040_s14, %s1206_s14   ;;  %s1001_s13 = sphi %s1038_s13, %s1205_s13   ;;  %s997_s12 = sphi %s1036_s12, %s1204_s12  }
   0x4   : > { %p26_p0 = scmp.ge.s32.totalorder %s25_s17, 3  ;;  %p49_p2 = scmp.eq.s32.totalorder %s1013_s16, 0 }
   0x5   : > { %s41_s19 = sadd.s32 1, %s1001_s13  ;;  %p792_p5 = scmp.ge.s32.totalorder %s1013_s16, 3 }
   0x6   : > { %s1209_s17 = smov (%p26_p0, %s25_s17), 0  ;;  %p50_p3 = por %p49_p2, %p48_p1 }
   0x7   : > { %s37_s18 = ssub.s32 %s1009_s15, %s1209_s17  ;;  %162 = sbr.rel (%p792_p5) target bundleno = 23 (0x17), region = 20 }
   0x8   : > { %p39_p4 = scmp.eq.s32.totalorder %s37_s18, 0 }
   0xa   : > { %s1071_s20 = scalar_select %p39_p4, %s1001_s13, %s41_s19  }
   0xe   : > { %165 = sbr.rel (!%p50_p3) target bundleno = 23 (0x17), region = 24  ;;  %s167_s21 = sand.u32 (%p50_p3), 1, %s1001_s13  }
   0xf   : > { %s841_s22 = smul.u32 (%p50_p3), 12, %s1009_s15 }
  0x10   : > { %s900_s23 = smul.u32 (%p50_p3), 48, %s167_s21 }
  0x11   : > { %s175_s26 = scalar_lea.vmem (%p50_p3), %s1200_s0, %s841_s22 }
  0x12   : > { %v190_v0 = vld [vmem:[%s175_s26] sm:$0xff] (%p50_p3)  ;;  %v194_v2 = vld [vmem:[%s175_s26 + $0x48] sm:$0xff] (%p50_p3)  ;;  %s169_s27 = scalar_lea.vmem (%p50_p3), [#allocation2], %s900_s23  ;;  %v798_v6 = vld [vmem:[%s175_s26 + $0x50] sm:$0xf] (%p50_p3) }
  0x13   : > { %v192_v1 = vld [vmem:[%s175_s26 + $0x24] sm:$0xff] (%p50_p3)  ;;  %191 = vst [vmem:[%s169_s27] sm:$0xff] (%p50_p3), %v190_v0  ;;  %195 = vst [vmem:[%s169_s27 + $0x18] sm:$0xff] (%p50_p3), %v194_v2  ;;  %v196_v3 = vld [vmem:[%s175_s26 + $0x6c] sm:$0xff] (%p50_p3) }
  0x14   : > { %193 = vst [vmem:[%s169_s27 + $0xc] sm:$0xff] (%p50_p3), %v192_v1  ;;  %v794_v4 = vld [vmem:[%s175_s26 + $0x8] sm:$0xf] (%p50_p3)  ;;  %v796_v5 = vld [vmem:[%s175_s26 + $0x2c] sm:$0xf] (%p50_p3)  ;;  %197 = vst [vmem:[%s169_s27 + $0x24] sm:$0xff] (%p50_p3), %v196_v3 }
  0x15   : > { %795 = vst [vmem:[%s169_s27 + $0x8] sm:$0xf] %v794_v4  ;;  %797 = vst [vmem:[%s169_s27 + $0x14] sm:$0xf] %v796_v5  ;;  %v800_v7 = vld [vmem:[%s175_s26 + $0x74] sm:$0xf] }
  0x16   : > { %799 = vst [vmem:[%s169_s27 + $0x20] sm:$0xf] %v798_v6  ;;  %801 = vst [vmem:[%s169_s27 + $0x2c] sm:$0xf] %v800_v7 }
  0x17 PF: > { %p802_p6 = scmp.ge.s32.totalorder %s1013_s16, 1  ;;  %p229_p7 = scmp.lt.s32.totalorder %s1013_s16, 4 }
  0x19   : > { %p230_p8 = pnand %p802_p6, %p229_p7 }
  0x1a   : > { %s236_s28 = sand.u32 (!%p230_p8), 1, %s997_s12   ;;  %s275_s29 = smul.u32 (!%p230_p8), 48, %s1005_s14 }
  0x1b   : > { %233 = sbr.rel (%p230_p8) target bundleno = 316 (0x13c), region = 54  ;;  %p804_p10 = scmp.ne.s32.totalorder (!%p230_p8), %s1005_s14, 0 }
  0x1c   : > { %s901_s30 = smul.u32 (!%p230_p8), 48, %s236_s28  ;;  %p276_p9 = scmp.lt.s32.totalorder (!%p230_p8), %s275_s29, 143 }
  0x1e   : > { %s1088_s8 = scalar_lea.vmem (!%p230_p8), [#allocation2], %s901_s30 }
  0x22   : > { %s1211_s29 = smov (!%p276_p9, %s275_s29), 143  ;;  %300 = sbr.rel (%p804_p10) target bundleno = 41 (0x29), region = 62 }
  0x23   : > { %s803_s4 = sshll.u32 %s1211_s29, 2  ;;  %v1015_v8 = vmov (!%p804_p10), 0.0  }
  0x24   : > { %s1086_s7 = scalar_lea.vmem %s1201_s1, %s803_s4  ;;  %301 = vst [vmem:[%s1203_s3] sm:$0xff] (!%p804_p10), %v1015_v8  ;;  %302 = vst [vmem:[%s1203_s3 + $0x8] sm:$0xff] (!%p804_p10), %v1015_v8 }
  0x25   : > { %303 = vst [vmem:[%s1203_s3 + $0x10] sm:$0xff] (!%p804_p10), %v1015_v8  ;;  %304 = vst [vmem:[%s1203_s3 + $0x18] sm:$0xff] (!%p804_p10), %v1015_v8 }
  0x29 PF: > { %v943_v9 = vld [vmem:[%s1086_s7 + $0x40] sm:$0xff]   ;;  %v946_v12 = vld [vmem:[%s1086_s7 + $0x48] sm:$0xff]   ;;  %v949_v15 = vld [vmem:[%s1086_s7 + $0x50] sm:$0xff]   ;;  %p835_p11 = scmp.ne.s32.totalorder %s1005_s14, 2 }
  0x2a   : > { %v944_v10 = vld [vmem:[%s1086_s7] sm:$0xff]   ;;  %842 = vmatprep.subr.bf16.mxu0 %v943_v9  ;;  %v947_v13 = vld [vmem:[%s1086_s7 + $0x8] sm:$0xff]   ;;  %v950_v16 = vld [vmem:[%s1086_s7 + $0x10] sm:$0xff]  }
  0x2b   : > { %v945_v11 = vld [vmem:[%s1086_s7 + $0x80] sm:$0xff]   ;;  %843 = vmatpush3.bf16.msra.mxu0 %v944_v10  ;;  %v948_v14 = vld [vmem:[%s1086_s7 + $0x88] sm:$0xff]   ;;  %v951_v17 = vld [vmem:[%s1086_s7 + $0x90] sm:$0xff]  }
  0x2c   : > { %880 = vmatprep.subr.bf16.mxu1 %v945_v11  ;;  %844 = vmatprep.subr.bf16.mxu0 %v946_v12  ;;  %v952_v18 = vld [vmem:[%s1086_s7 + $0x58] sm:$0xff]   ;;  %v955_v21 = vld [vmem:[%s1086_s7 + $0x60] sm:$0xff]   ;;  %v958_v24 = vld [vmem:[%s1086_s7 + $0x68] sm:$0xff]  }
  0x2d   : > { %881 = vmatpush3.bf16.msra.mxu1 %v945_v11  ;;  %v953_v19 = vld [vmem:[%s1086_s7 + $0x18] sm:$0xff]   ;;  %v957_v22 = vld [vmem:[%s1086_s7 + $0xa0] sm:$0xff]   ;;  %v960_v25 = vld [vmem:[%s1086_s7 + $0xa8] sm:$0xff]  }
  0x2e   : > { %882 = vmatprep.subr.bf16.mxu1 %v948_v14  ;;  %v954_v20 = vld [vmem:[%s1086_s7 + $0x98] sm:$0xff]   ;;  %v956_v23 = vld [vmem:[%s1086_s7 + $0x20] sm:$0xff]   ;;  %v959_v26 = vld [vmem:[%s1086_s7 + $0x28] sm:$0xff]  }
  0x2f   : > { %845 = vmatpush3.bf16.msra.mxu0 %v947_v13  ;;  %v961_v27 = vld [vmem:[%s1086_s7 + $0x70] sm:$0xff]   ;;  %v964_v30 = vld [vmem:[%s1086_s7 + $0x78] sm:$0xff]   ;;  %v305_v45 = vld [vmem:[%s1203_s3] sm:$0xff] }
  0x30   : > { %846 = vmatprep.subr.bf16.mxu0 %v949_v15  ;;  %v962_v28 = vld [vmem:[%s1086_s7 + $0x30] sm:$0xff]   ;;  %v966_v31 = vld [vmem:[%s1086_s7 + $0xb8] sm:$0xff]   ;;  %v306_v50 = vld [vmem:[%s1203_s3 + $0x8] sm:$0xff] }
  0x31   : > { %883 = vmatpush3.bf16.msra.mxu1 %v948_v14  ;;  %v963_v29 = vld [vmem:[%s1086_s7 + $0xb0] sm:$0xff]   ;;  %v965_v34 = vld [vmem:[%s1086_s7 + $0x38] sm:$0xff]   ;;  %v836_v4 = vld [vmem:[%s1202_s2] ss:$0 sm:$0xff] (!%p835_p11) }
  0x32   : > { %884 = vmatprep.subr.bf16.mxu1 %v951_v17  ;;  %v969_v32 = vld [vmem:[%s1088_s8 + $0x4] ss:$12 sps:$4 sm:$0xff]   ;;  %v970_v33 = vld [vmem:[%s1088_s8 + $0x8] ss:$12 sps:$4 sm:$0xff]   ;;  %v967_v35 = vld [vmem:[%s1088_s8] ss:$12 sps:$4 sm:$0xff]  }
  0x33   : > { %847 = vmatpush3.bf16.msra.mxu0 %v950_v16  ;;  %573 = vmatprep.mubr.bf16.mxu0 %v969_v32  ;;  %v972_v36 = vld [vmem:[%s1088_s8 + $0x1c] ss:$12 sps:$4 sm:$0xff]   ;;  %v971_v37 = vld [vmem:[%s1088_s8 + $0x20] ss:$12 sps:$4 sm:$0xff]   ;;  %v974_v38 = vld [vmem:[%s1088_s8 + $0x18] ss:$12 sps:$4 sm:$0xff]  }
  0x34   : > { %848 = vmatprep.subr.bf16.mxu0 %v952_v18  ;;  %896 = vmatprep.mubr.bf16.mxu1 %v970_v33  ;;  %v307_v59 = vld [vmem:[%s1203_s3 + $0x10] sm:$0xff]  ;;  %v308_v63 = vld [vmem:[%s1203_s3 + $0x18] sm:$0xff] }
  0x35   : > { %885 = vmatpush3.bf16.msra.mxu1 %v951_v17 }
  0x36   : > { %886 = vmatprep.subr.bf16.mxu1 %v954_v20 }
  0x37   : > { %849 = vmatpush3.bf16.msra.mxu0 %v953_v19 }
  0x38   : > { %850 = vmatprep.subr.bf16.mxu0 %v955_v21 }
  0x39   : > { %887 = vmatpush3.bf16.msra.mxu1 %v954_v20 }
  0x3a   : > { %888 = vmatprep.subr.bf16.mxu1 %v957_v22 }
  0x3b   : > { %851 = vmatpush3.bf16.msra.mxu0 %v956_v23 }
  0x3c   : > { %852 = vmatprep.subr.bf16.mxu0 %v958_v24 }
  0x3d   : > { %889 = vmatpush3.bf16.msra.mxu1 %v957_v22 }
  0x3e   : > { %890 = vmatprep.subr.bf16.mxu1 %v960_v25 }
  0x3f   : > { %853 = vmatpush3.bf16.msra.mxu0 %v959_v26 }
  0x40   : > { %854 = vmatprep.subr.bf16.mxu0 %v961_v27 }
  0x41   : > { %891 = vmatpush3.bf16.msra.mxu1 %v960_v25 }
  0x42   : > { %892 = vmatprep.subr.bf16.mxu1 %v963_v29 }
  0x43   : > { %855 = vmatpush3.bf16.msra.mxu0 %v962_v28 }
  0x44   : > { %856 = vmatprep.subr.bf16.mxu0 %v964_v30 }
  0x45   : > { %893 = vmatpush3.bf16.msra.mxu1 %v963_v29 }
  0x46   : > { %894 = vmatprep.subr.bf16.mxu1 %v966_v31 }
  0x47   : > { %857 = vmatpush3.bf16.msra.mxu0 %v965_v34 }
  0x49   : > { %895 = vmatpush3.bf16.msra.mxu1 %v966_v31 }
  0x4a   : > { %574 = vmatmul.mubr.bf16.vlgmr.msra.gmra.mrb[0].mxu0 %v967_v35 }
  0x4b   : > { %581 = vmatprep.mubr.bf16.mxu0 %v972_v36 }
  0x4c   : > { %897 = vmatmul.mubr.bf16.vlgmr.msra.gmra.mrb[0].mxu1 %v971_v37 }
  0x52   : > { %582 = vmatmul.mubr.bf16.gmra.mrb[4].mxu0 %v974_v38 }
 0x11d   : > { %v858_v39 = vpop.f32.mrb[0].mxu0 }
 0x11e   : > { %v859_v40 = vpop.f32.mrb[1].mxu0 }
 0x11f   : > { %v860_v41 = vadd.f32 %v859_v40, %v858_v39  ;;  %v861_v42 = vpop.f32.mrb[2].mxu0  ;;  %v898_v43 = vpop.f32.mrb[0].mxu1 }
 0x120   : > { %v862_v44 = vpop.f32.mrb[3].mxu0  ;;  %v624_v46 = vpop.f32.mrb[1].mxu1 }
 0x121   : > { %v863_v47 = vadd.f32 %v862_v44, %v861_v42  ;;  %v625_v48 = vadd.f32 %v860_v41, %v624_v46  ;;  %v899_v49 = vpop.f32.mrb[2].mxu1 }
 0x122   : > { %v627_v51 = vpop.f32.mrb[3].mxu1 }
 0x123   : > { %v639_v52 = vadd.f32 %v625_v48, %v305_v45  ;;  %v628_v53 = vadd.f32 %v863_v47, %v627_v51 }
 0x125   : > { %643 = vst [vmem:[%s1203_s3] sm:$0xff] %v639_v52  ;;  %v640_v54 = vadd.f32 %v628_v53, %v306_v50  ;;  %v864_v55 = vpop.f32.mrb[4].mxu0 }
 0x126   : > { %v865_v56 = vpop.f32.mrb[5].mxu0 }
 0x127   : > { %644 = vst [vmem:[%s1203_s3 + $0x8] sm:$0xff] %v640_v54  ;;  %v866_v57 = vadd.f32 %v865_v56, %v864_v55  ;;  %v867_v58 = vpop.f32.mrb[6].mxu0 }
 0x128   : > { %v868_v60 = vpop.f32.mrb[7].mxu0 }
 0x129   : > { %v633_v61 = vadd.f32 %v898_v43, %v866_v57  ;;  %v869_v62 = vadd.f32 %v868_v60, %v867_v58  ;;  %650 = sbr.rel (%p835_p11) target bundleno = 316 (0x13c), region = 66 }
 0x12b   : > { %v641_v0 = vadd.f32 %v633_v61, %v307_v59  ;;  %v636_v1 = vadd.f32 %v899_v49, %v869_v62 }
 0x12c   : > { %v651_v3 = vld [vmem:[%s1203_s3] sm:$0xff] (!%p835_p11) }
 0x12d   : > { %645 = vst [vmem:[%s1203_s3 + $0x10] sm:$0xff] %v641_v0  ;;  %v642_v2 = vadd.f32 %v636_v1, %v308_v63  ;;  %v662_v6 = vadd.f32 (!%p835_p11), %v836_v4, %v651_v3 }
 0x12e   : > { %v652_v5 = vld [vmem:[%s1203_s3 + $0x8] sm:$0xff] (!%p835_p11) }
 0x12f   : > { %646 = vst [vmem:[%s1203_s3 + $0x18] sm:$0xff] %v642_v2  ;;  %v663_v7 = vadd.f32 (!%p835_p11), %v836_v4, %v652_v5  ;;  %v666_v12 = vmax.f32 (!%p835_p11), %v662_v6, 0.0 }
 0x131   : > { %v667_v13 = vmax.f32 %v663_v7, 0.0  ;;  %670 = vst [vmem:[%s1203_s3] sm:$0xff] %v666_v12 }
 0x133   : > { %671 = vst [vmem:[%s1203_s3 + $0x8] sm:$0xff] %v667_v13 }
 0x134   : > { %v653_v8 = vld [vmem:[%s1203_s3 + $0x10] sm:$0xff] }
 0x135   : > { %v664_v10 = vadd.f32 %v836_v4, %v653_v8 }
 0x136   : > { %v654_v9 = vld [vmem:[%s1203_s3 + $0x18] sm:$0xff] }
 0x137   : > { %v665_v11 = vadd.f32 %v836_v4, %v654_v9  ;;  %v668_v14 = vmax.f32 %v664_v10, 0.0 }
 0x139   : > { %v669_v15 = vmax.f32 %v665_v11, 0.0  ;;  %672 = vst [vmem:[%s1203_s3 + $0x10] sm:$0xff] %v668_v14 }
 0x13b   : > { %673 = vst [vmem:[%s1203_s3 + $0x18] sm:$0xff] %v669_v15 }
 0x13c PF: > { %s13_s16 = sadd.s32 1, %s1013_s16   ;;  %s1204_s12 = smov %s1001_s13 }
 0x13d   : > { %p10_p12 = scmp.ge.s32.totalorder %s13_s16, 5   ;;  %s1205_s13 = smov %s1071_s20 }
 0x13e   : > { %s1206_s14 = smov %s1009_s15  ;;  %s1207_s15 = smov %s1209_s17 }
 0x13f   :  { %12 = sbr.rel (!%p10_p12) target bundleno = 3 (0x3), region = 113 }

// kernel: resnet18_forward.34
= control target key start
LH: loop header
LB: loop body
LE: loop exit
PB: predicated region body
PF: predicated region fallthrough
CT: control target
= control target key end

     0   :  { %s1027_s12 = smov 0   ;;  %s1029_s13 = smov 0   ;;  %s1153_s0 = inlined_call_operand.vmem [shape: bf16[8,1152], index: 0, kind: input, shape index: {}]   ;;  %s1154_s1 = inlined_call_operand.vmem [shape: bf16[1152,256], index: 1, kind: input, shape index: {}]   ;;  %s1155_s2 = inlined_call_operand.vmem [shape: f32[1,256], index: 2, kind: input, shape index: {}]   ;;  %s1156_s3 = inlined_call_operand.vmem [shape: f32[8,256], index: 3, kind: output, shape index: {}]  }
   0x1   :  { %s1031_s14 = smov 0  }
   0x2 LB: > { %s25_s15 = sadd.s32 1, %s999_s13  ;;  %p818_p0 = scmp.ge.s32.totalorder %s1003_s14, 1  ;;  %s1003_s14 = sphi %s1031_s14, %s13_s14   ;;  %s999_s13 = sphi %s1029_s13, %s1158_s13   ;;  %s995_s12 = sphi %s1027_s12, %s1157_s12  }
   0x3   : > { %p26_p1 = scmp.ge.s32.totalorder %s25_s15, 3  ;;  %p194_p2 = scmp.lt.s32.totalorder %s1003_s14, 4 }
   0x5   : > { %s1160_s15 = smov (%p26_p1, %s25_s15), 0  ;;  %p195_p3 = pnand %p818_p0, %p194_p2 }
   0x6   : > { %s240_s16 = smul.u32 (!%p195_p3), 3, %s995_s12  ;;  %p822_p6 = scmp.ne.s32.totalorder (!%p195_p3), %s995_s12, 0 }
   0x7   : > { %198 = sbr.rel (%p195_p3) target bundleno = 319 (0x13f), region = 32 }
   0x8   : > { %s250_s17 = smul.u32 (!%p195_p3), 48, %s995_s12  ;;  %p243_p4 = scmp.lt.s32.totalorder (!%p195_p3), %s240_s16, 8 }
   0xa   : > { %p252_p5 = scmp.lt.s32.totalorder (!%p195_p3), %s250_s17, 143 }
   0xe   : > { %s1162_s16 = smov (!%p243_p4, %s240_s16), 8  ;;  %s1164_s17 = smov (!%p252_p5, %s250_s17), 143 }
   0xf   : > { %s819_s18 = sshll.u32 %s1162_s16, 2  ;;  %s879_s22 = sshll.u32 %s1164_s17, 3  ;;  %v1005_v0 = vmov (!%p822_p6), 0.0  }
  0x10   : > { %s1052_s21 = scalar_lea.vmem %s1153_s0, %s819_s18  ;;  %s1057_s25 = scalar_lea.vmem %s1154_s1, %s879_s22  ;;  %282 = vst [vmem:[%s1156_s3] sm:$0xff] (!%p822_p6), %v1005_v0  ;;  %283 = vst [vmem:[%s1156_s3 + $0x8] sm:$0xff] (!%p822_p6), %v1005_v0 }
  0x11   : > { %281 = sbr.rel (%p822_p6) target bundleno = 24 (0x18), region = 36 }
  0x18 PF: > { %v906_v1 = vld [vmem:[%s1057_s25 + $0x4] ss:$8 sps:$4 sm:$0xff]   ;;  %v908_v2 = vld [vmem:[%s1057_s25] ss:$8 sps:$4 sm:$0xff]   ;;  %v1006_v3 = vmov 0   ;;  %p874_p7 = scmp.ne.s32.totalorder %s995_s12, 2 }
  0x19   : > { %660 = vmatprep.mubr.bf16.mxu1 %v1006_v3  ;;  %587 = vmatprep.subr.bf16.mxu0 %v906_v1  ;;  %v909_v4 = vld [vmem:[%s1057_s25 + $0x14] ss:$8 sps:$4 sm:$0xff]   ;;  %v911_v5 = vld [vmem:[%s1057_s25 + $0x10] ss:$8 sps:$4 sm:$0xff]   ;;  %v912_v6 = vld [vmem:[%s1057_s25 + $0x24] ss:$8 sps:$4 sm:$0xff]  }
  0x1a   : > { %588 = vmatpush1.bf16.msra.mxu0 %v908_v2  ;;  %v914_v7 = vld [vmem:[%s1057_s25 + $0x20] ss:$8 sps:$4 sm:$0xff]   ;;  %v915_v8 = vld [vmem:[%s1057_s25 + $0x34] ss:$8 sps:$4 sm:$0xff]   ;;  %v917_v9 = vld [vmem:[%s1057_s25 + $0x30] ss:$8 sps:$4 sm:$0xff]  }
  0x1b   : > { %589 = vmatprep.subr.bf16.mxu0 %v909_v4  ;;  %v930_v10 = vld [vmem:[%s1057_s25 + $0x104] ss:$8 sps:$4 sm:$0xff]   ;;  %v932_v11 = vld [vmem:[%s1057_s25 + $0x100] ss:$8 sps:$4 sm:$0xff]   ;;  %v936_v13 = vld [vmem:[%s1057_s25 + $0x114] ss:$8 sps:$4 sm:$0xff]   ;;  %v681_v4 = vlaneseq (!%p874_p7) }
  0x1c   : > { %v918_v12 = vld [vmem:[%s1057_s25 + $0x44] ss:$8 sps:$4 sm:$0xff]   ;;  %628 = vmatprep.subr.bf16.mxu1 %v930_v10  ;;  %v938_v14 = vld [vmem:[%s1057_s25 + $0x110] ss:$8 sps:$4 sm:$0xff]   ;;  %v920_v15 = vld [vmem:[%s1057_s25 + $0x40] ss:$8 sps:$4 sm:$0xff]  }
  0x1d   : > { %629 = vmatpush1.bf16.msra.mxu1 %v932_v11  ;;  %v921_v16 = vld [vmem:[%s1057_s25 + $0x54] ss:$8 sps:$4 sm:$0xff]   ;;  %v942_v17 = vld [vmem:[%s1057_s25 + $0x124] ss:$8 sps:$4 sm:$0xff]   ;;  %v944_v18 = vld [vmem:[%s1057_s25 + $0x120] ss:$8 sps:$4 sm:$0xff]  }
  0x1e   : > { %590 = vmatpush1.bf16.msra.mxu0 %v911_v5  ;;  %630 = vmatprep.subr.bf16.mxu1 %v936_v13  ;;  %v923_v19 = vld [vmem:[%s1057_s25 + $0x50] ss:$8 sps:$4 sm:$0xff]   ;;  %v948_v20 = vld [vmem:[%s1057_s25 + $0x134] ss:$8 sps:$4 sm:$0xff]   ;;  %v924_v21 = vld [vmem:[%s1057_s25 + $0x64] ss:$8 sps:$4 sm:$0xff]  }
  0x1f   : > { %591 = vmatprep.subr.bf16.mxu0 %v912_v6  ;;  %v950_v22 = vld [vmem:[%s1057_s25 + $0x130] ss:$8 sps:$4 sm:$0xff]   ;;  %v926_v23 = vld [vmem:[%s1057_s25 + $0x60] ss:$8 sps:$4 sm:$0xff]   ;;  %v954_v24 = vld [vmem:[%s1057_s25 + $0x144] ss:$8 sps:$4 sm:$0xff]  }
  0x20   : > { %v927_v25 = vld [vmem:[%s1057_s25 + $0x74] ss:$8 sps:$4 sm:$0xff]   ;;  %v956_v26 = vld [vmem:[%s1057_s25 + $0x140] ss:$8 sps:$4 sm:$0xff]   ;;  %v929_v27 = vld [vmem:[%s1057_s25 + $0x70] ss:$8 sps:$4 sm:$0xff]  }
  0x21   : > { %631 = vmatpush1.bf16.msra.mxu1 %v938_v14  ;;  %v960_v28 = vld [vmem:[%s1057_s25 + $0x154] ss:$8 sps:$4 sm:$0xff]   ;;  %v933_v29 = vld [vmem:[%s1057_s25 + $0x84] ss:$8 sps:$4 sm:$0xff]   ;;  %v962_v30 = vld [vmem:[%s1057_s25 + $0x150] ss:$8 sps:$4 sm:$0xff]  }
  0x22   : > { %592 = vmatpush1.bf16.msra.mxu0 %v914_v7  ;;  %632 = vmatprep.subr.bf16.mxu1 %v942_v17  ;;  %v935_v31 = vld [vmem:[%s1057_s25 + $0x80] ss:$8 sps:$4 sm:$0xff]   ;;  %v966_v32 = vld [vmem:[%s1057_s25 + $0x164] ss:$8 sps:$4 sm:$0xff]   ;;  %v939_v33 = vld [vmem:[%s1057_s25 + $0x94] ss:$8 sps:$4 sm:$0xff]  }
  0x23   : > { %593 = vmatprep.subr.bf16.mxu0 %v915_v8  ;;  %v286_v34 = vld [vmem:[%s1052_s21] sm:$0xff]  ;;  %v941_v37 = vld [vmem:[%s1057_s25 + $0x90] ss:$8 sps:$4 sm:$0xff]   ;;  %v972_v38 = vld [vmem:[%s1057_s25 + $0x174] ss:$8 sps:$4 sm:$0xff]   ;;  %v682_v5 = vshrl.u32 (!%p874_p7), %v681_v4, 7 }
  0x24   : > { %v824_v35 = vcombine.high %v286_v34, %v286_v34  ;;  %v968_v36 = vld [vmem:[%s1057_s25 + $0x160] ss:$8 sps:$4 sm:$0xff]   ;;  %v945_v39 = vld [vmem:[%s1057_s25 + $0xa4] ss:$8 sps:$4 sm:$0xff]   ;;  %v974_v40 = vld [vmem:[%s1057_s25 + $0x170] ss:$8 sps:$4 sm:$0xff]   ;;  %v823_v53 = vcombine.low %v286_v34, %v286_v34 }
  0x25   : > { %633 = vmatpush1.bf16.msra.mxu1 %v944_v18  ;;  %v947_v41 = vld [vmem:[%s1057_s25 + $0xa0] ss:$8 sps:$4 sm:$0xff]   ;;  %v951_v42 = vld [vmem:[%s1057_s25 + $0xb4] ss:$8 sps:$4 sm:$0xff]   ;;  %v953_v44 = vld [vmem:[%s1057_s25 + $0xb0] ss:$8 sps:$4 sm:$0xff]  }
  0x26   : > { %594 = vmatpush1.bf16.msra.mxu0 %v917_v9  ;;  %634 = vmatprep.subr.bf16.mxu1 %v948_v20  ;;  %v978_v43 = vld [vmem:[%s1052_s21 + $0x8] ss:$0 sps:$4 sm:$0xff]   ;;  %v957_v45 = vld [vmem:[%s1057_s25 + $0xc4] ss:$8 sps:$4 sm:$0xff]   ;;  %v963_v47 = vld [vmem:[%s1057_s25 + $0xd4] ss:$8 sps:$4 sm:$0xff]  }
  0x27   : > { %595 = vmatprep.subr.bf16.mxu0 %v918_v12  ;;  %619 = vmatprep.mubr.bf16.mxu0 %v824_v35  ;;  %v959_v46 = vld [vmem:[%s1057_s25 + $0xc0] ss:$8 sps:$4 sm:$0xff]   ;;  %v965_v48 = vld [vmem:[%s1057_s25 + $0xd0] ss:$8 sps:$4 sm:$0xff]   ;;  %v969_v49 = vld [vmem:[%s1057_s25 + $0xe4] ss:$8 sps:$4 sm:$0xff]  }
  0x28   : > { %v971_v50 = vld [vmem:[%s1057_s25 + $0xe0] ss:$8 sps:$4 sm:$0xff]   ;;  %v975_v51 = vld [vmem:[%s1057_s25 + $0xf4] ss:$8 sps:$4 sm:$0xff]   ;;  %v977_v52 = vld [vmem:[%s1057_s25 + $0xf0] ss:$8 sps:$4 sm:$0xff]  }
  0x29   : > { %635 = vmatpush1.bf16.msra.mxu1 %v950_v22  ;;  %v284_v58 = vld [vmem:[%s1156_s3] sm:$0xff]  ;;  %v285_v61 = vld [vmem:[%s1156_s3 + $0x8] sm:$0xff]  ;;  %v683_v7 = vsub.s32 (!%p874_p7), 0, %v682_v5  ;;  %v687_v8 = vsub.s32 (!%p874_p7), 1, %v682_v5 }
  0x2a   : > { %596 = vmatpush1.bf16.msra.mxu0 %v920_v15  ;;  %636 = vmatprep.subr.bf16.mxu1 %v954_v24  ;;  %v679_v6 = vld [vmem:[%s1155_s2] sm:$0x3] (!%p874_p7) }
  0x2b   : > { %597 = vmatprep.subr.bf16.mxu0 %v921_v16  ;;  %v684_v11 = vrot.slane (!%p874_p7), %v679_v6, %v683_v7  ;;  %v688_v12 = vrot.slane (!%p874_p7), %v679_v6, %v687_v8 }
  0x2d   : > { %637 = vmatpush1.bf16.msra.mxu1 %v956_v26 }
  0x2e   : > { %598 = vmatpush1.bf16.msra.mxu0 %v923_v19  ;;  %638 = vmatprep.subr.bf16.mxu1 %v960_v28 }
  0x2f   : > { %599 = vmatprep.subr.bf16.mxu0 %v924_v21 }
  0x31   : > { %639 = vmatpush1.bf16.msra.mxu1 %v962_v30 }
  0x32   : > { %600 = vmatpush1.bf16.msra.mxu0 %v926_v23  ;;  %640 = vmatprep.subr.bf16.mxu1 %v966_v32 }
  0x33   : > { %601 = vmatprep.subr.bf16.mxu0 %v927_v25 }
  0x35   : > { %641 = vmatpush1.bf16.msra.mxu1 %v968_v36 }
  0x36   : > { %602 = vmatpush1.bf16.msra.mxu0 %v929_v27  ;;  %642 = vmatprep.subr.bf16.mxu1 %v972_v38 }
  0x37   : > { %603 = vmatprep.subr.bf16.mxu0 %v933_v29 }
  0x39   : > { %643 = vmatpush1.bf16.msra.mxu1 %v974_v40 }
  0x3a   : > { %604 = vmatpush1.bf16.msra.mxu0 %v935_v31 }
  0x3b   : > { %605 = vmatprep.subr.bf16.mxu0 %v939_v33 }
  0x3c   : > { %661 = vmatmul.mubr.bf16.vlgmr.msra.gmra.mrb[0].mxu1 %v978_v43 }
  0x3e   : > { %606 = vmatpush1.bf16.msra.mxu0 %v941_v37 }
  0x3f   : > { %607 = vmatprep.subr.bf16.mxu0 %v945_v39 }
  0x42   : > { %608 = vmatpush1.bf16.msra.mxu0 %v947_v41 }
  0x43   : > { %609 = vmatprep.subr.bf16.mxu0 %v951_v42 }
  0x46   : > { %610 = vmatpush1.bf16.msra.mxu0 %v953_v44 }
  0x47   : > { %611 = vmatprep.subr.bf16.mxu0 %v957_v45 }
  0x4a   : > { %612 = vmatpush1.bf16.msra.mxu0 %v959_v46 }
  0x4b   : > { %613 = vmatprep.subr.bf16.mxu0 %v963_v47 }
  0x4e   : > { %614 = vmatpush1.bf16.msra.mxu0 %v965_v48 }
  0x4f   : > { %615 = vmatprep.subr.bf16.mxu0 %v969_v49 }
  0x52   : > { %616 = vmatpush1.bf16.msra.mxu0 %v971_v50 }
  0x53   : > { %617 = vmatprep.subr.bf16.mxu0 %v975_v51 }
  0x56   : > { %618 = vmatpush1.bf16.msra.mxu0 %v977_v52 }
  0x59   : > { %620 = vmatmul.mubr.bf16.vlgmr.msra.gmra.mrb[0].mxu0 %v823_v53 }
 0x10f   : > { %v662_v54 = vpop.f32.mrb[0].mxu1 }
 0x110   : > { %v664_v55 = vpop.f32.mrb[1].mxu1 }
 0x111   : > { %v666_v56 = vpop.f32.mrb[2].mxu1 }
 0x112   : > { %v667_v57 = vpop.f32.mrb[3].mxu1 }
 0x12c   : > { %v621_v59 = vpop.f32.mrb[0].mxu0  ;;  %676 = sbr.rel (%p874_p7) target bundleno = 319 (0x13f), region = 40 }
 0x12d   : > { %v663_v60 = vadd.f32 %v662_v54, %v621_v59  ;;  %v623_v62 = vpop.f32.mrb[1].mxu0 }
 0x12e   : > { %v665_v63 = vadd.f32 %v664_v55, %v623_v62  ;;  %v625_v0 = vpop.f32.mrb[2].mxu0 }
 0x12f   : > { %v669_v1 = vadd.f32 %v663_v60, %v284_v58  ;;  %v626_v2 = vpop.f32.mrb[3].mxu0 }
 0x130   : > { %v670_v3 = vadd.f32 %v665_v63, %v285_v61 }
 0x131   : > { %671 = vst [vmem:[%s1156_s3] sm:$0xff] %v669_v1 }
 0x132   : > { %672 = vst [vmem:[%s1156_s3 + $0x8] sm:$0xff] %v670_v3 }
 0x138   : > { %v677_v9 = vld [vmem:[%s1156_s3] sm:$0xff] }
 0x139   : > { %v678_v10 = vld [vmem:[%s1156_s3 + $0x8] sm:$0xff]  ;;  %v691_v13 = vadd.f32 %v684_v11, %v677_v9 }
 0x13a   : > { %v692_v14 = vadd.f32 %v688_v12, %v678_v10 }
 0x13b   : > { %v693_v15 = vmax.f32 %v691_v13, 0.0 }
 0x13c   : > { %v694_v16 = vmax.f32 %v692_v14, 0.0 }
 0x13d   : > { %695 = vst [vmem:[%s1156_s3] sm:$0xff] %v693_v15 }
 0x13e   : > { %696 = vst [vmem:[%s1156_s3 + $0x8] sm:$0xff] %v694_v16 }
 0x13f PF: > { %s13_s14 = sadd.s32 1, %s1003_s14   ;;  %s1157_s12 = smov %s999_s13 }
 0x140   : > { %p10_p8 = scmp.ge.s32.totalorder %s13_s14, 5   ;;  %s1158_s13 = smov %s1160_s15 }
 0x142   :  { %12 = sbr.rel (!%p10_p8) target bundleno = 2 (0x2), region = 76 }

// kernel: resnet18_forward.35
= control target key start
LH: loop header
LB: loop body
LE: loop exit
PB: predicated region body
PF: predicated region fallthrough
CT: control target
= control target key end

     0   :  { %v232_v1 = vmov 0   ;;  %v172_v18 = vlaneseq  ;;  %s313_s1 = inlined_call_operand.vmem [shape: bf16[128,256], index: 1, kind: input, shape index: {}]   ;;  %s314_s0 = inlined_call_operand.vmem [shape: bf16[8,128], index: 0, kind: input, shape index: {}]   ;;  %s315_s2 = inlined_call_operand.vmem [shape: f32[1,256], index: 2, kind: input, shape index: {}]   ;;  %s316_s3 = inlined_call_operand.vmem [shape: f32[8,256], index: 3, kind: output, shape index: {}]  }
   0x1   :  { %v208_v0 = vld [vmem:[%s313_s1 + $0x4] ss:$8 sps:$4 sm:$0xff]   ;;  %152 = vmatprep.mubr.bf16.mxu0 %v232_v1  ;;  %v210_v2 = vld [vmem:[%s313_s1] ss:$8 sps:$4 sm:$0xff]   ;;  %v211_v3 = vld [vmem:[%s313_s1 + $0x14] ss:$8 sps:$4 sm:$0xff]  }
   0x2   :  { %120 = vmatprep.subr.bf16.mxu0 %v208_v0  ;;  %v213_v4 = vld [vmem:[%s313_s1 + $0x10] ss:$8 sps:$4 sm:$0xff]   ;;  %v214_v5 = vld [vmem:[%s313_s1 + $0x24] ss:$8 sps:$4 sm:$0xff]   ;;  %v216_v6 = vld [vmem:[%s313_s1 + $0x20] ss:$8 sps:$4 sm:$0xff]  }
   0x3   :  { %121 = vmatpush1.bf16.msra.mxu0 %v210_v2  ;;  %v217_v7 = vld [vmem:[%s313_s1 + $0x34] ss:$8 sps:$4 sm:$0xff]   ;;  %v219_v8 = vld [vmem:[%s313_s1 + $0x30] ss:$8 sps:$4 sm:$0xff]   ;;  %v220_v9 = vld [vmem:[%s313_s1 + $0x44] ss:$8 sps:$4 sm:$0xff]  }
   0x4   :  { %122 = vmatprep.subr.bf16.mxu0 %v211_v3  ;;  %v222_v10 = vld [vmem:[%s313_s1 + $0x40] ss:$8 sps:$4 sm:$0xff]   ;;  %v223_v11 = vld [vmem:[%s313_s1 + $0x54] ss:$8 sps:$4 sm:$0xff]   ;;  %v225_v12 = vld [vmem:[%s313_s1 + $0x50] ss:$8 sps:$4 sm:$0xff]  }
   0x5   :  { %v226_v13 = vld [vmem:[%s313_s1 + $0x64] ss:$8 sps:$4 sm:$0xff]   ;;  %v228_v14 = vld [vmem:[%s313_s1 + $0x60] ss:$8 sps:$4 sm:$0xff]   ;;  %v229_v15 = vld [vmem:[%s313_s1 + $0x74] ss:$8 sps:$4 sm:$0xff]  }
   0x6   :  { %v231_v16 = vld [vmem:[%s313_s1 + $0x70] ss:$8 sps:$4 sm:$0xff]   ;;  %v23_v17 = vld [vmem:[%s314_s0] sm:$0xf]  ;;  %v173_v19 = vshrl.u32 %v172_v18, 7 }
   0x7   :  { %123 = vmatpush1.bf16.msra.mxu0 %v213_v4  ;;  %v170_v21 = vld [vmem:[%s315_s2] sm:$0x3] }
   0x8   :  { %124 = vmatprep.subr.bf16.mxu0 %v214_v5  ;;  %v174_v20 = vsub.s32 0, %v173_v19  ;;  %v178_v22 = vsub.s32 1, %v173_v19 }
   0xa   :  { %v175_v23 = vrot.slane %v170_v21, %v174_v20  ;;  %v179_v25 = vrot.slane %v170_v21, %v178_v22 }
   0xb   :  { %125 = vmatpush1.bf16.msra.mxu0 %v216_v6 }
   0xc   :  { %126 = vmatprep.subr.bf16.mxu0 %v217_v7 }
   0xf   :  { %127 = vmatpush1.bf16.msra.mxu0 %v219_v8 }
  0x10   :  { %128 = vmatprep.subr.bf16.mxu0 %v220_v9 }
  0x13   :  { %129 = vmatpush1.bf16.msra.mxu0 %v222_v10 }
  0x14   :  { %130 = vmatprep.subr.bf16.mxu0 %v223_v11 }
  0x17   :  { %131 = vmatpush1.bf16.msra.mxu0 %v225_v12 }
  0x18   :  { %132 = vmatprep.subr.bf16.mxu0 %v226_v13 }
  0x1b   :  { %133 = vmatpush1.bf16.msra.mxu0 %v228_v14 }
  0x1c   :  { %134 = vmatprep.subr.bf16.mxu0 %v229_v15 }
  0x1f   :  { %135 = vmatpush1.bf16.msra.mxu0 %v231_v16 }
  0x22   :  { %153 = vmatmul.mubr.bf16.vlgmr.msra.gmra.mrb[0].mxu0 %v23_v17 }
  0xf5   :  { %v154_v24 = vpop.f32.mrb[0].mxu0 }
  0xf6   :  { %v156_v26 = vpop.f32.mrb[1].mxu0  ;;  %v182_v28 = vadd.f32 %v175_v23, %v154_v24 }
  0xf7   :  { %v158_v27 = vpop.f32.mrb[2].mxu0  ;;  %v183_v30 = vadd.f32 %v179_v25, %v156_v26 }
  0xf8   :  { %v159_v29 = vpop.f32.mrb[3].mxu0  ;;  %184 = vst [vmem:[%s316_s3] sm:$0xff] %v182_v28 }
  0xf9   :  { %185 = vst [vmem:[%s316_s3 + $0x8] sm:$0xff] %v183_v30 }

// kernel: resnet18_forward.36
= control target key start
LH: loop header
LB: loop body
LE: loop exit
PB: predicated region body
PF: predicated region fallthrough
CT: control target
= control target key end

     0   :  { %s1121_s15 = smov 0   ;;  %s1123_s16 = smov 0   ;;  %s1253_s0 = inlined_call_operand.vmem [shape: bf16[8,2304], index: 0, kind: input, shape index: {}]   ;;  %s1254_s1 = inlined_call_operand.vmem [shape: bf16[2304,256], index: 1, kind: input, shape index: {}]   ;;  %s1255_s2 = inlined_call_operand.vmem [shape: f32[1,256], index: 2, kind: input, shape index: {}]   ;;  %s1256_s3 = inlined_call_operand.vmem [shape: f32[8,256], index: 3, kind: input, shape index: {}]   ;;  %s1257_s4 = inlined_call_operand.vmem [shape: f32[8,256], index: 4, kind: output, shape index: {}]  }
   0x1   :  { %s1125_s17 = smov 0  }
   0x2 LB: > { %s26_s18 = sadd.s32 1, %s1088_s16  ;;  %p907_p0 = scmp.ge.s32.totalorder %s1092_s17, 1  ;;  %s1092_s17 = sphi %s1125_s17, %s14_s17   ;;  %s1088_s16 = sphi %s1123_s16, %s1259_s16   ;;  %s1084_s15 = sphi %s1121_s15, %s1258_s15  }
   0x3   : > { %p27_p1 = scmp.ge.s32.totalorder %s26_s18, 6  ;;  %p236_p2 = scmp.lt.s32.totalorder %s1092_s17, 7 }
   0x5   : > { %s1261_s18 = smov (%p27_p1, %s26_s18), 0  ;;  %p237_p3 = pnand %p907_p0, %p236_p2 }
   0x6   : > { %s293_s19 = smul.u32 (!%p237_p3), 3, %s1084_s15  ;;  %p911_p6 = scmp.ne.s32.totalorder (!%p237_p3), %s1084_s15, 0 }
   0x7   : > { %240 = sbr.rel (%p237_p3) target bundleno = 321 (0x141), region = 36 }
   0x8   : > { %s303_s20 = smul.u32 (!%p237_p3), 48, %s1084_s15  ;;  %p296_p4 = scmp.lt.s32.totalorder (!%p237_p3), %s293_s19, 17 }
   0xa   : > { %p305_p5 = scmp.lt.s32.totalorder (!%p237_p3), %s303_s20, 287 }
   0xe   : > { %s1263_s19 = smov (!%p296_p4, %s293_s19), 17  ;;  %s1265_s20 = smov (!%p305_p5, %s303_s20), 287 }
   0xf   : > { %s908_s21 = sshll.u32 %s1263_s19, 2  ;;  %s968_s25 = sshll.u32 %s1265_s20, 3  ;;  %v1094_v0 = vmov (!%p911_p6), 0.0  }
  0x10   : > { %s1146_s24 = scalar_lea.vmem %s1253_s0, %s908_s21  ;;  %s1151_s28 = scalar_lea.vmem %s1254_s1, %s968_s25  ;;  %345 = vst [vmem:[%s1257_s4] sm:$0xff] (!%p911_p6), %v1094_v0  ;;  %346 = vst [vmem:[%s1257_s4 + $0x8] sm:$0xff] (!%p911_p6), %v1094_v0 }
  0x11   : > { %344 = sbr.rel (%p911_p6) target bundleno = 24 (0x18), region = 40 }
  0x18 PF: > { %v995_v1 = vld [vmem:[%s1151_s28 + $0x4] ss:$8 sps:$4 sm:$0xff]   ;;  %v997_v2 = vld [vmem:[%s1151_s28] ss:$8 sps:$4 sm:$0xff]   ;;  %v1095_v3 = vmov 0   ;;  %p963_p7 = scmp.ne.s32.totalorder %s1084_s15, 5 }
  0x19   : > { %723 = vmatprep.mubr.bf16.mxu1 %v1095_v3  ;;  %650 = vmatprep.subr.bf16.mxu0 %v995_v1  ;;  %v998_v4 = vld [vmem:[%s1151_s28 + $0x14] ss:$8 sps:$4 sm:$0xff]   ;;  %v1000_v5 = vld [vmem:[%s1151_s28 + $0x10] ss:$8 sps:$4 sm:$0xff]   ;;  %v1001_v6 = vld [vmem:[%s1151_s28 + $0x24] ss:$8 sps:$4 sm:$0xff]  }
  0x1a   : > { %651 = vmatpush1.bf16.msra.mxu0 %v997_v2  ;;  %v1003_v7 = vld [vmem:[%s1151_s28 + $0x20] ss:$8 sps:$4 sm:$0xff]   ;;  %v1004_v8 = vld [vmem:[%s1151_s28 + $0x34] ss:$8 sps:$4 sm:$0xff]   ;;  %v1006_v9 = vld [vmem:[%s1151_s28 + $0x30] ss:$8 sps:$4 sm:$0xff]  }
  0x1b   : > { %652 = vmatprep.subr.bf16.mxu0 %v998_v4  ;;  %v1019_v10 = vld [vmem:[%s1151_s28 + $0x104] ss:$8 sps:$4 sm:$0xff]   ;;  %v1021_v11 = vld [vmem:[%s1151_s28 + $0x100] ss:$8 sps:$4 sm:$0xff]   ;;  %v1025_v13 = vld [vmem:[%s1151_s28 + $0x114] ss:$8 sps:$4 sm:$0xff]   ;;  %v744_v4 = vlaneseq (!%p963_p7) }
  0x1c   : > { %v1007_v12 = vld [vmem:[%s1151_s28 + $0x44] ss:$8 sps:$4 sm:$0xff]   ;;  %691 = vmatprep.subr.bf16.mxu1 %v1019_v10  ;;  %v1027_v14 = vld [vmem:[%s1151_s28 + $0x110] ss:$8 sps:$4 sm:$0xff]   ;;  %v1009_v15 = vld [vmem:[%s1151_s28 + $0x40] ss:$8 sps:$4 sm:$0xff]  }
  0x1d   : > { %692 = vmatpush1.bf16.msra.mxu1 %v1021_v11  ;;  %v1010_v16 = vld [vmem:[%s1151_s28 + $0x54] ss:$8 sps:$4 sm:$0xff]   ;;  %v1031_v17 = vld [vmem:[%s1151_s28 + $0x124] ss:$8 sps:$4 sm:$0xff]   ;;  %v1033_v18 = vld [vmem:[%s1151_s28 + $0x120] ss:$8 sps:$4 sm:$0xff]  }
  0x1e   : > { %653 = vmatpush1.bf16.msra.mxu0 %v1000_v5  ;;  %693 = vmatprep.subr.bf16.mxu1 %v1025_v13  ;;  %v1012_v19 = vld [vmem:[%s1151_s28 + $0x50] ss:$8 sps:$4 sm:$0xff]   ;;  %v1037_v20 = vld [vmem:[%s1151_s28 + $0x134] ss:$8 sps:$4 sm:$0xff]   ;;  %v1013_v21 = vld [vmem:[%s1151_s28 + $0x64] ss:$8 sps:$4 sm:$0xff]  }
  0x1f   : > { %654 = vmatprep.subr.bf16.mxu0 %v1001_v6  ;;  %v1039_v22 = vld [vmem:[%s1151_s28 + $0x130] ss:$8 sps:$4 sm:$0xff]   ;;  %v1015_v23 = vld [vmem:[%s1151_s28 + $0x60] ss:$8 sps:$4 sm:$0xff]   ;;  %v1043_v24 = vld [vmem:[%s1151_s28 + $0x144] ss:$8 sps:$4 sm:$0xff]  }
  0x20   : > { %v1016_v25 = vld [vmem:[%s1151_s28 + $0x74] ss:$8 sps:$4 sm:$0xff]   ;;  %v1045_v26 = vld [vmem:[%s1151_s28 + $0x140] ss:$8 sps:$4 sm:$0xff]   ;;  %v1018_v27 = vld [vmem:[%s1151_s28 + $0x70] ss:$8 sps:$4 sm:$0xff]  }
  0x21   : > { %694 = vmatpush1.bf16.msra.mxu1 %v1027_v14  ;;  %v1049_v28 = vld [vmem:[%s1151_s28 + $0x154] ss:$8 sps:$4 sm:$0xff]   ;;  %v1022_v29 = vld [vmem:[%s1151_s28 + $0x84] ss:$8 sps:$4 sm:$0xff]   ;;  %v1051_v30 = vld [vmem:[%s1151_s28 + $0x150] ss:$8 sps:$4 sm:$0xff]  }
  0x22   : > { %655 = vmatpush1.bf16.msra.mxu0 %v1003_v7  ;;  %695 = vmatprep.subr.bf16.mxu1 %v1031_v17  ;;  %v1024_v31 = vld [vmem:[%s1151_s28 + $0x80] ss:$8 sps:$4 sm:$0xff]   ;;  %v1055_v32 = vld [vmem:[%s1151_s28 + $0x164] ss:$8 sps:$4 sm:$0xff]   ;;  %v1028_v33 = vld [vmem:[%s1151_s28 + $0x94] ss:$8 sps:$4 sm:$0xff]  }
  0x23   : > { %656 = vmatprep.subr.bf16.mxu0 %v1004_v8  ;;  %v349_v34 = vld [vmem:[%s1146_s24] sm:$0xff]  ;;  %v1030_v37 = vld [vmem:[%s1151_s28 + $0x90] ss:$8 sps:$4 sm:$0xff]   ;;  %v1061_v38 = vld [vmem:[%s1151_s28 + $0x174] ss:$8 sps:$4 sm:$0xff]   ;;  %v745_v5 = vshrl.u32 (!%p963_p7), %v744_v4, 7 }
  0x24   : > { %v913_v35 = vcombine.high %v349_v34, %v349_v34  ;;  %v1057_v36 = vld [vmem:[%s1151_s28 + $0x160] ss:$8 sps:$4 sm:$0xff]   ;;  %v1034_v39 = vld [vmem:[%s1151_s28 + $0xa4] ss:$8 sps:$4 sm:$0xff]   ;;  %v1063_v40 = vld [vmem:[%s1151_s28 + $0x170] ss:$8 sps:$4 sm:$0xff]   ;;  %v912_v53 = vcombine.low %v349_v34, %v349_v34 }
  0x25   : > { %696 = vmatpush1.bf16.msra.mxu1 %v1033_v18  ;;  %v1036_v41 = vld [vmem:[%s1151_s28 + $0xa0] ss:$8 sps:$4 sm:$0xff]   ;;  %v1040_v42 = vld [vmem:[%s1151_s28 + $0xb4] ss:$8 sps:$4 sm:$0xff]   ;;  %v1042_v44 = vld [vmem:[%s1151_s28 + $0xb0] ss:$8 sps:$4 sm:$0xff]  }
  0x26   : > { %657 = vmatpush1.bf16.msra.mxu0 %v1006_v9  ;;  %697 = vmatprep.subr.bf16.mxu1 %v1037_v20  ;;  %v1067_v43 = vld [vmem:[%s1146_s24 + $0x8] ss:$0 sps:$4 sm:$0xff]   ;;  %v1046_v45 = vld [vmem:[%s1151_s28 + $0xc4] ss:$8 sps:$4 sm:$0xff]   ;;  %v1052_v47 = vld [vmem:[%s1151_s28 + $0xd4] ss:$8 sps:$4 sm:$0xff]  }
  0x27   : > { %658 = vmatprep.subr.bf16.mxu0 %v1007_v12  ;;  %682 = vmatprep.mubr.bf16.mxu0 %v913_v35  ;;  %v1048_v46 = vld [vmem:[%s1151_s28 + $0xc0] ss:$8 sps:$4 sm:$0xff]   ;;  %v1054_v48 = vld [vmem:[%s1151_s28 + $0xd0] ss:$8 sps:$4 sm:$0xff]   ;;  %v1058_v49 = vld [vmem:[%s1151_s28 + $0xe4] ss:$8 sps:$4 sm:$0xff]  }
  0x28   : > { %v1060_v50 = vld [vmem:[%s1151_s28 + $0xe0] ss:$8 sps:$4 sm:$0xff]   ;;  %v1064_v51 = vld [vmem:[%s1151_s28 + $0xf4] ss:$8 sps:$4 sm:$0xff]   ;;  %v1066_v52 = vld [vmem:[%s1151_s28 + $0xf0] ss:$8 sps:$4 sm:$0xff]  }
  0x29   : > { %698 = vmatpush1.bf16.msra.mxu1 %v1039_v22  ;;  %v347_v58 = vld [vmem:[%s1257_s4] sm:$0xff]  ;;  %v348_v61 = vld [vmem:[%s1257_s4 + $0x8] sm:$0xff]  ;;  %v746_v7 = vsub.s32 (!%p963_p7), 0, %v745_v5  ;;  %v750_v8 = vsub.s32 (!%p963_p7), 1, %v745_v5 }
  0x2a   : > { %659 = vmatpush1.bf16.msra.mxu0 %v1009_v15  ;;  %699 = vmatprep.subr.bf16.mxu1 %v1043_v24  ;;  %v742_v6 = vld [vmem:[%s1255_s2] sm:$0x3] (!%p963_p7)  ;;  %v757_v14 = vld [vmem:[%s1256_s3 + $0x8] sm:$0xff] (!%p963_p7) }
  0x2b   : > { %660 = vmatprep.subr.bf16.mxu0 %v1010_v16  ;;  %v747_v11 = vrot.slane (!%p963_p7), %v742_v6, %v746_v7  ;;  %v751_v12 = vrot.slane (!%p963_p7), %v742_v6, %v750_v8  ;;  %v756_v13 = vld [vmem:[%s1256_s3] sm:$0xff] (!%p963_p7) }
  0x2d   : > { %700 = vmatpush1.bf16.msra.mxu1 %v1045_v26 }
  0x2e   : > { %661 = vmatpush1.bf16.msra.mxu0 %v1012_v19  ;;  %701 = vmatprep.subr.bf16.mxu1 %v1049_v28 }
  0x2f   : > { %662 = vmatprep.subr.bf16.mxu0 %v1013_v21 }
  0x31   : > { %702 = vmatpush1.bf16.msra.mxu1 %v1051_v30 }
  0x32   : > { %663 = vmatpush1.bf16.msra.mxu0 %v1015_v23  ;;  %703 = vmatprep.subr.bf16.mxu1 %v1055_v32 }
  0x33   : > { %664 = vmatprep.subr.bf16.mxu0 %v1016_v25 }
  0x35   : > { %704 = vmatpush1.bf16.msra.mxu1 %v1057_v36 }
  0x36   : > { %665 = vmatpush1.bf16.msra.mxu0 %v1018_v27  ;;  %705 = vmatprep.subr.bf16.mxu1 %v1061_v38 }
  0x37   : > { %666 = vmatprep.subr.bf16.mxu0 %v1022_v29 }
  0x39   : > { %706 = vmatpush1.bf16.msra.mxu1 %v1063_v40 }
  0x3a   : > { %667 = vmatpush1.bf16.msra.mxu0 %v1024_v31 }
  0x3b   : > { %668 = vmatprep.subr.bf16.mxu0 %v1028_v33 }
  0x3c   : > { %724 = vmatmul.mubr.bf16.vlgmr.msra.gmra.mrb[0].mxu1 %v1067_v43 }
  0x3e   : > { %669 = vmatpush1.bf16.msra.mxu0 %v1030_v37 }
  0x3f   : > { %670 = vmatprep.subr.bf16.mxu0 %v1034_v39 }
  0x42   : > { %671 = vmatpush1.bf16.msra.mxu0 %v1036_v41 }
  0x43   : > { %672 = vmatprep.subr.bf16.mxu0 %v1040_v42 }
  0x46   : > { %673 = vmatpush1.bf16.msra.mxu0 %v1042_v44 }
  0x47   : > { %674 = vmatprep.subr.bf16.mxu0 %v1046_v45 }
  0x4a   : > { %675 = vmatpush1.bf16.msra.mxu0 %v1048_v46 }
  0x4b   : > { %676 = vmatprep.subr.bf16.mxu0 %v1052_v47 }
  0x4e   : > { %677 = vmatpush1.bf16.msra.mxu0 %v1054_v48 }
  0x4f   : > { %678 = vmatprep.subr.bf16.mxu0 %v1058_v49 }
  0x52   : > { %679 = vmatpush1.bf16.msra.mxu0 %v1060_v50 }
  0x53   : > { %680 = vmatprep.subr.bf16.mxu0 %v1064_v51 }
  0x56   : > { %681 = vmatpush1.bf16.msra.mxu0 %v1066_v52 }
  0x59   : > { %683 = vmatmul.mubr.bf16.vlgmr.msra.gmra.mrb[0].mxu0 %v912_v53 }
 0x10f   : > { %v725_v54 = vpop.f32.mrb[0].mxu1 }
 0x110   : > { %v727_v55 = vpop.f32.mrb[1].mxu1 }
 0x111   : > { %v729_v56 = vpop.f32.mrb[2].mxu1 }
 0x112   : > { %v730_v57 = vpop.f32.mrb[3].mxu1 }
 0x12c   : > { %v684_v59 = vpop.f32.mrb[0].mxu0  ;;  %739 = sbr.rel (%p963_p7) target bundleno = 321 (0x141), region = 44 }
 0x12d   : > { %v726_v60 = vadd.f32 %v725_v54, %v684_v59  ;;  %v686_v62 = vpop.f32.mrb[1].mxu0 }
 0x12e   : > { %v728_v63 = vadd.f32 %v727_v55, %v686_v62  ;;  %v688_v0 = vpop.f32.mrb[2].mxu0 }
 0x12f   : > { %v732_v1 = vadd.f32 %v726_v60, %v347_v58  ;;  %v689_v2 = vpop.f32.mrb[3].mxu0 }
 0x130   : > { %v733_v3 = vadd.f32 %v728_v63, %v348_v61 }
 0x131   : > { %734 = vst [vmem:[%s1257_s4] sm:$0xff] %v732_v1 }
 0x132   : > { %735 = vst [vmem:[%s1257_s4 + $0x8] sm:$0xff] %v733_v3 }
 0x138   : > { %v740_v9 = vld [vmem:[%s1257_s4] sm:$0xff] }
 0x139   : > { %v741_v10 = vld [vmem:[%s1257_s4 + $0x8] sm:$0xff]  ;;  %v754_v15 = vadd.f32 %v747_v11, %v740_v9 }
 0x13a   : > { %v755_v16 = vadd.f32 %v751_v12, %v741_v10 }
 0x13b   : > { %v758_v17 = vadd.f32 %v756_v13, %v754_v15 }
 0x13c   : > { %v759_v18 = vadd.f32 %v757_v14, %v755_v16 }
 0x13d   : > { %v760_v19 = vmax.f32 %v758_v17, 0.0 }
 0x13e   : > { %v761_v20 = vmax.f32 %v759_v18, 0.0 }
 0x13f   : > { %762 = vst [vmem:[%s1257_s4] sm:$0xff] %v760_v19 }
 0x140   : > { %763 = vst [vmem:[%s1257_s4 + $0x8] sm:$0xff] %v761_v20 }
 0x141 PF: > { %s14_s17 = sadd.s32 1, %s1092_s17   ;;  %s1258_s15 = smov %s1088_s16 }
 0x142   : > { %p11_p8 = scmp.ge.s32.totalorder %s14_s17, 8   ;;  %s1259_s16 = smov %s1261_s18 }
 0x144   :  { %13 = sbr.rel (!%p11_p8) target bundleno = 2 (0x2), region = 83 }

// kernel: resnet18_forward.37
= control target key start
LH: loop header
LB: loop body
LE: loop exit
PB: predicated region body
PF: predicated region fallthrough
CT: control target
= control target key end

     0   :  { %s1027_s12 = smov 0   ;;  %s1029_s13 = smov 0   ;;  %s1153_s0 = inlined_call_operand.vmem [shape: bf16[8,2304], index: 0, kind: input, shape index: {}]   ;;  %s1154_s1 = inlined_call_operand.vmem [shape: bf16[2304,256], index: 1, kind: input, shape index: {}]   ;;  %s1155_s2 = inlined_call_operand.vmem [shape: f32[1,256], index: 2, kind: input, shape index: {}]   ;;  %s1156_s3 = inlined_call_operand.vmem [shape: f32[8,256], index: 3, kind: output, shape index: {}]  }
   0x1   :  { %s1031_s14 = smov 0  }
   0x2 LB: > { %s25_s15 = sadd.s32 1, %s999_s13  ;;  %p818_p0 = scmp.ge.s32.totalorder %s1003_s14, 1  ;;  %s1003_s14 = sphi %s1031_s14, %s13_s14   ;;  %s999_s13 = sphi %s1029_s13, %s1158_s13   ;;  %s995_s12 = sphi %s1027_s12, %s1157_s12  }
   0x3   : > { %p26_p1 = scmp.ge.s32.totalorder %s25_s15, 6  ;;  %p194_p2 = scmp.lt.s32.totalorder %s1003_s14, 7 }
   0x5   : > { %s1160_s15 = smov (%p26_p1, %s25_s15), 0  ;;  %p195_p3 = pnand %p818_p0, %p194_p2 }
   0x6   : > { %s240_s16 = smul.u32 (!%p195_p3), 3, %s995_s12  ;;  %p822_p6 = scmp.ne.s32.totalorder (!%p195_p3), %s995_s12, 0 }
   0x7   : > { %198 = sbr.rel (%p195_p3) target bundleno = 319 (0x13f), region = 32 }
   0x8   : > { %s250_s17 = smul.u32 (!%p195_p3), 48, %s995_s12  ;;  %p243_p4 = scmp.lt.s32.totalorder (!%p195_p3), %s240_s16, 17 }
   0xa   : > { %p252_p5 = scmp.lt.s32.totalorder (!%p195_p3), %s250_s17, 287 }
   0xe   : > { %s1162_s16 = smov (!%p243_p4, %s240_s16), 17  ;;  %s1164_s17 = smov (!%p252_p5, %s250_s17), 287 }
   0xf   : > { %s819_s18 = sshll.u32 %s1162_s16, 2  ;;  %s879_s22 = sshll.u32 %s1164_s17, 3  ;;  %v1005_v0 = vmov (!%p822_p6), 0.0  }
  0x10   : > { %s1052_s21 = scalar_lea.vmem %s1153_s0, %s819_s18  ;;  %s1057_s25 = scalar_lea.vmem %s1154_s1, %s879_s22  ;;  %282 = vst [vmem:[%s1156_s3] sm:$0xff] (!%p822_p6), %v1005_v0  ;;  %283 = vst [vmem:[%s1156_s3 + $0x8] sm:$0xff] (!%p822_p6), %v1005_v0 }
  0x11   : > { %281 = sbr.rel (%p822_p6) target bundleno = 24 (0x18), region = 36 }
  0x18 PF: > { %v906_v1 = vld [vmem:[%s1057_s25 + $0x4] ss:$8 sps:$4 sm:$0xff]   ;;  %v908_v2 = vld [vmem:[%s1057_s25] ss:$8 sps:$4 sm:$0xff]   ;;  %v1006_v3 = vmov 0   ;;  %p874_p7 = scmp.ne.s32.totalorder %s995_s12, 5 }
  0x19   : > { %660 = vmatprep.mubr.bf16.mxu1 %v1006_v3  ;;  %587 = vmatprep.subr.bf16.mxu0 %v906_v1  ;;  %v909_v4 = vld [vmem:[%s1057_s25 + $0x14] ss:$8 sps:$4 sm:$0xff]   ;;  %v911_v5 = vld [vmem:[%s1057_s25 + $0x10] ss:$8 sps:$4 sm:$0xff]   ;;  %v912_v6 = vld [vmem:[%s1057_s25 + $0x24] ss:$8 sps:$4 sm:$0xff]  }
  0x1a   : > { %588 = vmatpush1.bf16.msra.mxu0 %v908_v2  ;;  %v914_v7 = vld [vmem:[%s1057_s25 + $0x20] ss:$8 sps:$4 sm:$0xff]   ;;  %v915_v8 = vld [vmem:[%s1057_s25 + $0x34] ss:$8 sps:$4 sm:$0xff]   ;;  %v917_v9 = vld [vmem:[%s1057_s25 + $0x30] ss:$8 sps:$4 sm:$0xff]  }
  0x1b   : > { %589 = vmatprep.subr.bf16.mxu0 %v909_v4  ;;  %v930_v10 = vld [vmem:[%s1057_s25 + $0x104] ss:$8 sps:$4 sm:$0xff]   ;;  %v932_v11 = vld [vmem:[%s1057_s25 + $0x100] ss:$8 sps:$4 sm:$0xff]   ;;  %v936_v13 = vld [vmem:[%s1057_s25 + $0x114] ss:$8 sps:$4 sm:$0xff]   ;;  %v681_v4 = vlaneseq (!%p874_p7) }
  0x1c   : > { %v918_v12 = vld [vmem:[%s1057_s25 + $0x44] ss:$8 sps:$4 sm:$0xff]   ;;  %628 = vmatprep.subr.bf16.mxu1 %v930_v10  ;;  %v938_v14 = vld [vmem:[%s1057_s25 + $0x110] ss:$8 sps:$4 sm:$0xff]   ;;  %v920_v15 = vld [vmem:[%s1057_s25 + $0x40] ss:$8 sps:$4 sm:$0xff]  }
  0x1d   : > { %629 = vmatpush1.bf16.msra.mxu1 %v932_v11  ;;  %v921_v16 = vld [vmem:[%s1057_s25 + $0x54] ss:$8 sps:$4 sm:$0xff]   ;;  %v942_v17 = vld [vmem:[%s1057_s25 + $0x124] ss:$8 sps:$4 sm:$0xff]   ;;  %v944_v18 = vld [vmem:[%s1057_s25 + $0x120] ss:$8 sps:$4 sm:$0xff]  }
  0x1e   : > { %590 = vmatpush1.bf16.msra.mxu0 %v911_v5  ;;  %630 = vmatprep.subr.bf16.mxu1 %v936_v13  ;;  %v923_v19 = vld [vmem:[%s1057_s25 + $0x50] ss:$8 sps:$4 sm:$0xff]   ;;  %v948_v20 = vld [vmem:[%s1057_s25 + $0x134] ss:$8 sps:$4 sm:$0xff]   ;;  %v924_v21 = vld [vmem:[%s1057_s25 + $0x64] ss:$8 sps:$4 sm:$0xff]  }
  0x1f   : > { %591 = vmatprep.subr.bf16.mxu0 %v912_v6  ;;  %v950_v22 = vld [vmem:[%s1057_s25 + $0x130] ss:$8 sps:$4 sm:$0xff]   ;;  %v926_v23 = vld [vmem:[%s1057_s25 + $0x60] ss:$8 sps:$4 sm:$0xff]   ;;  %v954_v24 = vld [vmem:[%s1057_s25 + $0x144] ss:$8 sps:$4 sm:$0xff]  }
  0x20   : > { %v927_v25 = vld [vmem:[%s1057_s25 + $0x74] ss:$8 sps:$4 sm:$0xff]   ;;  %v956_v26 = vld [vmem:[%s1057_s25 + $0x140] ss:$8 sps:$4 sm:$0xff]   ;;  %v929_v27 = vld [vmem:[%s1057_s25 + $0x70] ss:$8 sps:$4 sm:$0xff]  }
  0x21   : > { %631 = vmatpush1.bf16.msra.mxu1 %v938_v14  ;;  %v960_v28 = vld [vmem:[%s1057_s25 + $0x154] ss:$8 sps:$4 sm:$0xff]   ;;  %v933_v29 = vld [vmem:[%s1057_s25 + $0x84] ss:$8 sps:$4 sm:$0xff]   ;;  %v962_v30 = vld [vmem:[%s1057_s25 + $0x150] ss:$8 sps:$4 sm:$0xff]  }
  0x22   : > { %592 = vmatpush1.bf16.msra.mxu0 %v914_v7  ;;  %632 = vmatprep.subr.bf16.mxu1 %v942_v17  ;;  %v935_v31 = vld [vmem:[%s1057_s25 + $0x80] ss:$8 sps:$4 sm:$0xff]   ;;  %v966_v32 = vld [vmem:[%s1057_s25 + $0x164] ss:$8 sps:$4 sm:$0xff]   ;;  %v939_v33 = vld [vmem:[%s1057_s25 + $0x94] ss:$8 sps:$4 sm:$0xff]  }
  0x23   : > { %593 = vmatprep.subr.bf16.mxu0 %v915_v8  ;;  %v286_v34 = vld [vmem:[%s1052_s21] sm:$0xff]  ;;  %v941_v37 = vld [vmem:[%s1057_s25 + $0x90] ss:$8 sps:$4 sm:$0xff]   ;;  %v972_v38 = vld [vmem:[%s1057_s25 + $0x174] ss:$8 sps:$4 sm:$0xff]   ;;  %v682_v5 = vshrl.u32 (!%p874_p7), %v681_v4, 7 }
  0x24   : > { %v824_v35 = vcombine.high %v286_v34, %v286_v34  ;;  %v968_v36 = vld [vmem:[%s1057_s25 + $0x160] ss:$8 sps:$4 sm:$0xff]   ;;  %v945_v39 = vld [vmem:[%s1057_s25 + $0xa4] ss:$8 sps:$4 sm:$0xff]   ;;  %v974_v40 = vld [vmem:[%s1057_s25 + $0x170] ss:$8 sps:$4 sm:$0xff]   ;;  %v823_v53 = vcombine.low %v286_v34, %v286_v34 }
  0x25   : > { %633 = vmatpush1.bf16.msra.mxu1 %v944_v18  ;;  %v947_v41 = vld [vmem:[%s1057_s25 + $0xa0] ss:$8 sps:$4 sm:$0xff]   ;;  %v951_v42 = vld [vmem:[%s1057_s25 + $0xb4] ss:$8 sps:$4 sm:$0xff]   ;;  %v953_v44 = vld [vmem:[%s1057_s25 + $0xb0] ss:$8 sps:$4 sm:$0xff]  }
  0x26   : > { %594 = vmatpush1.bf16.msra.mxu0 %v917_v9  ;;  %634 = vmatprep.subr.bf16.mxu1 %v948_v20  ;;  %v978_v43 = vld [vmem:[%s1052_s21 + $0x8] ss:$0 sps:$4 sm:$0xff]   ;;  %v957_v45 = vld [vmem:[%s1057_s25 + $0xc4] ss:$8 sps:$4 sm:$0xff]   ;;  %v963_v47 = vld [vmem:[%s1057_s25 + $0xd4] ss:$8 sps:$4 sm:$0xff]  }
  0x27   : > { %595 = vmatprep.subr.bf16.mxu0 %v918_v12  ;;  %619 = vmatprep.mubr.bf16.mxu0 %v824_v35  ;;  %v959_v46 = vld [vmem:[%s1057_s25 + $0xc0] ss:$8 sps:$4 sm:$0xff]   ;;  %v965_v48 = vld [vmem:[%s1057_s25 + $0xd0] ss:$8 sps:$4 sm:$0xff]   ;;  %v969_v49 = vld [vmem:[%s1057_s25 + $0xe4] ss:$8 sps:$4 sm:$0xff]  }
  0x28   : > { %v971_v50 = vld [vmem:[%s1057_s25 + $0xe0] ss:$8 sps:$4 sm:$0xff]   ;;  %v975_v51 = vld [vmem:[%s1057_s25 + $0xf4] ss:$8 sps:$4 sm:$0xff]   ;;  %v977_v52 = vld [vmem:[%s1057_s25 + $0xf0] ss:$8 sps:$4 sm:$0xff]  }
  0x29   : > { %635 = vmatpush1.bf16.msra.mxu1 %v950_v22  ;;  %v284_v58 = vld [vmem:[%s1156_s3] sm:$0xff]  ;;  %v285_v61 = vld [vmem:[%s1156_s3 + $0x8] sm:$0xff]  ;;  %v683_v7 = vsub.s32 (!%p874_p7), 0, %v682_v5  ;;  %v687_v8 = vsub.s32 (!%p874_p7), 1, %v682_v5 }
  0x2a   : > { %596 = vmatpush1.bf16.msra.mxu0 %v920_v15  ;;  %636 = vmatprep.subr.bf16.mxu1 %v954_v24  ;;  %v679_v6 = vld [vmem:[%s1155_s2] sm:$0x3] (!%p874_p7) }
  0x2b   : > { %597 = vmatprep.subr.bf16.mxu0 %v921_v16  ;;  %v684_v11 = vrot.slane (!%p874_p7), %v679_v6, %v683_v7  ;;  %v688_v12 = vrot.slane (!%p874_p7), %v679_v6, %v687_v8 }
  0x2d   : > { %637 = vmatpush1.bf16.msra.mxu1 %v956_v26 }
  0x2e   : > { %598 = vmatpush1.bf16.msra.mxu0 %v923_v19  ;;  %638 = vmatprep.subr.bf16.mxu1 %v960_v28 }
  0x2f   : > { %599 = vmatprep.subr.bf16.mxu0 %v924_v21 }
  0x31   : > { %639 = vmatpush1.bf16.msra.mxu1 %v962_v30 }
  0x32   : > { %600 = vmatpush1.bf16.msra.mxu0 %v926_v23  ;;  %640 = vmatprep.subr.bf16.mxu1 %v966_v32 }
  0x33   : > { %601 = vmatprep.subr.bf16.mxu0 %v927_v25 }
  0x35   : > { %641 = vmatpush1.bf16.msra.mxu1 %v968_v36 }
  0x36   : > { %602 = vmatpush1.bf16.msra.mxu0 %v929_v27  ;;  %642 = vmatprep.subr.bf16.mxu1 %v972_v38 }
  0x37   : > { %603 = vmatprep.subr.bf16.mxu0 %v933_v29 }
  0x39   : > { %643 = vmatpush1.bf16.msra.mxu1 %v974_v40 }
  0x3a   : > { %604 = vmatpush1.bf16.msra.mxu0 %v935_v31 }
  0x3b   : > { %605 = vmatprep.subr.bf16.mxu0 %v939_v33 }
  0x3c   : > { %661 = vmatmul.mubr.bf16.vlgmr.msra.gmra.mrb[0].mxu1 %v978_v43 }
  0x3e   : > { %606 = vmatpush1.bf16.msra.mxu0 %v941_v37 }
  0x3f   : > { %607 = vmatprep.subr.bf16.mxu0 %v945_v39 }
  0x42   : > { %608 = vmatpush1.bf16.msra.mxu0 %v947_v41 }
  0x43   : > { %609 = vmatprep.subr.bf16.mxu0 %v951_v42 }
  0x46   : > { %610 = vmatpush1.bf16.msra.mxu0 %v953_v44 }
  0x47   : > { %611 = vmatprep.subr.bf16.mxu0 %v957_v45 }
  0x4a   : > { %612 = vmatpush1.bf16.msra.mxu0 %v959_v46 }
  0x4b   : > { %613 = vmatprep.subr.bf16.mxu0 %v963_v47 }
  0x4e   : > { %614 = vmatpush1.bf16.msra.mxu0 %v965_v48 }
  0x4f   : > { %615 = vmatprep.subr.bf16.mxu0 %v969_v49 }
  0x52   : > { %616 = vmatpush1.bf16.msra.mxu0 %v971_v50 }
  0x53   : > { %617 = vmatprep.subr.bf16.mxu0 %v975_v51 }
  0x56   : > { %618 = vmatpush1.bf16.msra.mxu0 %v977_v52 }
  0x59   : > { %620 = vmatmul.mubr.bf16.vlgmr.msra.gmra.mrb[0].mxu0 %v823_v53 }
 0x10f   : > { %v662_v54 = vpop.f32.mrb[0].mxu1 }
 0x110   : > { %v664_v55 = vpop.f32.mrb[1].mxu1 }
 0x111   : > { %v666_v56 = vpop.f32.mrb[2].mxu1 }
 0x112   : > { %v667_v57 = vpop.f32.mrb[3].mxu1 }
 0x12c   : > { %v621_v59 = vpop.f32.mrb[0].mxu0  ;;  %676 = sbr.rel (%p874_p7) target bundleno = 319 (0x13f), region = 40 }
 0x12d   : > { %v663_v60 = vadd.f32 %v662_v54, %v621_v59  ;;  %v623_v62 = vpop.f32.mrb[1].mxu0 }
 0x12e   : > { %v665_v63 = vadd.f32 %v664_v55, %v623_v62  ;;  %v625_v0 = vpop.f32.mrb[2].mxu0 }
 0x12f   : > { %v669_v1 = vadd.f32 %v663_v60, %v284_v58  ;;  %v626_v2 = vpop.f32.mrb[3].mxu0 }
 0x130   : > { %v670_v3 = vadd.f32 %v665_v63, %v285_v61 }
 0x131   : > { %671 = vst [vmem:[%s1156_s3] sm:$0xff] %v669_v1 }
 0x132   : > { %672 = vst [vmem:[%s1156_s3 + $0x8] sm:$0xff] %v670_v3 }
 0x138   : > { %v677_v9 = vld [vmem:[%s1156_s3] sm:$0xff] }
 0x139   : > { %v678_v10 = vld [vmem:[%s1156_s3 + $0x8] sm:$0xff]  ;;  %v691_v13 = vadd.f32 %v684_v11, %v677_v9 }
 0x13a   : > { %v692_v14 = vadd.f32 %v688_v12, %v678_v10 }
 0x13b   : > { %v693_v15 = vmax.f32 %v691_v13, 0.0 }
 0x13c   : > { %v694_v16 = vmax.f32 %v692_v14, 0.0 }
 0x13d   : > { %695 = vst [vmem:[%s1156_s3] sm:$0xff] %v693_v15 }
 0x13e   : > { %696 = vst [vmem:[%s1156_s3 + $0x8] sm:$0xff] %v694_v16 }
 0x13f PF: > { %s13_s14 = sadd.s32 1, %s1003_s14   ;;  %s1157_s12 = smov %s999_s13 }
 0x140   : > { %p10_p8 = scmp.ge.s32.totalorder %s13_s14, 8   ;;  %s1158_s13 = smov %s1160_s15 }
 0x142   :  { %12 = sbr.rel (!%p10_p8) target bundleno = 2 (0x2), region = 76 }

// kernel: resnet18_forward.39
= control target key start
LH: loop header
LB: loop body
LE: loop exit
PB: predicated region body
PF: predicated region fallthrough
CT: control target
= control target key end

     0   :  { %s1310_s12 = smov 0   ;;  %s1312_s13 = smov 0   ;;  %s1582_s0 = inlined_call_operand.vmem [shape: bf16[8,2304], index: 0, kind: input, shape index: {}]   ;;  %s1583_s1 = inlined_call_operand.vmem [shape: bf16[2304,512], index: 1, kind: input, shape index: {}]   ;;  %s1584_s2 = inlined_call_operand.vmem [shape: f32[1,512], index: 2, kind: input, shape index: {}]   ;;  %s1585_s3 = inlined_call_operand.vmem [shape: f32[8,512], index: 3, kind: output, shape index: {}]  }
   0x1   :  { %s1314_s14 = smov 0   ;;  %s1316_s15 = smov 0  }
   0x2   :  { %s1318_s16 = smov 0   ;;  %s1320_s17 = smov 0  }
   0x3   :  { %s1322_s18 = smov 0  }
   0x4 LB: > { %s25_s19 = sadd.s32 1, %s1278_s16  ;;  %s28_s20 = sadd.s32 1, %s1282_s17  ;;  %s1286_s18 = sphi %s1322_s18, %s13_s18   ;;  %s1282_s17 = sphi %s1320_s17, %s1591_s17   ;;  %s1278_s16 = sphi %s1318_s16, %s1590_s16   ;;  %s1274_s15 = sphi %s1316_s15, %s1589_s15   ;;  %s1270_s14 = sphi %s1314_s14, %s1588_s14   ;;  %s1266_s13 = sphi %s1312_s13, %s1587_s13   ;;  %s1262_s12 = sphi %s1310_s12, %s1586_s12  }
   0x5   : > { %p26_p0 = scmp.ge.s32.totalorder %s25_s19, 6  ;;  %p76_p1 = scmp.ne.s32.totalorder %s1266_s13, %s1262_s12 }
   0x6   : > { %p77_p2 = scmp.eq.s32.totalorder %s1286_s18, 0  ;;  %s69_s24 = sadd.s32 1, %s1266_s13 }
   0x7   : > { %s1593_s19 = smov (%p26_p0, %s25_s19), 0  ;;  %s1595_s20 = smov (!%p26_p0, %s28_s20), %s1282_s17 }
   0x8   : > { %p78_p3 = por %p77_p2, %p76_p1  ;;  %p30_p4 = scmp.ge.s32.totalorder %s1595_s20, 2 }
   0x9   : > { %s64_s21 = ssub.s32 %s1278_s16, %s1593_s19  ;;  %p1032_p6 = scmp.ge.s32.totalorder %s1286_s18, 12 }
   0xa   : > { %s1597_s20 = smov (%p30_p4, %s1595_s20), 0 }
   0xb   : > { %s65_s22 = ssub.s32 %s1282_s17, %s1597_s20  ;;  %156 = sbr.rel (%p1032_p6) target bundleno = 50 (0x32), region = 16 }
   0xc   : > { %s66_s23 = sor.u32 %s65_s22, %s64_s21 }
   0xd   : > { %p67_p5 = scmp.eq.s32.totalorder %s66_s23, 0 }
   0xf   : > { %s1361_s25 = scalar_select %p67_p5, %s1266_s13, %s69_s24  }
  0x12   : > { %172 = sbr.rel (!%p78_p3) target bundleno = 50 (0x32), region = 24  ;;  %s174_s26 = sand.u32 (%p78_p3), 1, %s1266_s13  }
  0x13   : > { %s1097_s27 = smul.u32 (%p78_p3), 384, %s174_s26  ;;  %s1033_s28 = sshll.u32 (%p78_p3), %s1282_s17, 1 }
  0x14   : > { %s1096_s29 = smul.u32 (%p78_p3), 192, %s1278_s16 }
  0x15   : > { %s1375_s8 = scalar_lea.vmem (%p78_p3), [#allocation2], %s1097_s27 }
  0x16   : > { %s180_s30 = sadd.s32 (%p78_p3), %s1096_s29, %s1033_s28 }
  0x17   : > { %s1035_s4 = sshll.u32 (%p78_p3), %s180_s30, 2 }
  0x18   : > { %s1370_s7 = scalar_lea.vmem (%p78_p3), %s1583_s1, %s1035_s4 }
  0x19   : > { %v304_v0 = vld [vmem:[%s1370_s7] sm:$0xff]  ;;  %v306_v1 = vld [vmem:[%s1370_s7 + $0x10] sm:$0xff] }
  0x1a   : > { %v308_v2 = vld [vmem:[%s1370_s7 + $0x20] sm:$0xff]  ;;  %305 = vst [vmem:[%s1375_s8] sm:$0xff] %v304_v0  ;;  %307 = vst [vmem:[%s1375_s8 + $0x8] sm:$0xff] %v306_v1  ;;  %v310_v3 = vld [vmem:[%s1370_s7 + $0x30] sm:$0xff] }
  0x1b   : > { %309 = vst [vmem:[%s1375_s8 + $0x10] sm:$0xff] %v308_v2  ;;  %v312_v4 = vld [vmem:[%s1370_s7 + $0x40] sm:$0xff]  ;;  %v314_v5 = vld [vmem:[%s1370_s7 + $0x50] sm:$0xff]  ;;  %311 = vst [vmem:[%s1375_s8 + $0x18] sm:$0xff] %v310_v3 }
  0x1c   : > { %313 = vst [vmem:[%s1375_s8 + $0x20] sm:$0xff] %v312_v4  ;;  %315 = vst [vmem:[%s1375_s8 + $0x28] sm:$0xff] %v314_v5  ;;  %v316_v6 = vld [vmem:[%s1370_s7 + $0x60] sm:$0xff]  ;;  %v318_v7 = vld [vmem:[%s1370_s7 + $0x70] sm:$0xff] }
  0x1d   : > { %v320_v8 = vld [vmem:[%s1370_s7 + $0x80] sm:$0xff]  ;;  %317 = vst [vmem:[%s1375_s8 + $0x30] sm:$0xff] %v316_v6  ;;  %319 = vst [vmem:[%s1375_s8 + $0x38] sm:$0xff] %v318_v7  ;;  %v322_v9 = vld [vmem:[%s1370_s7 + $0x90] sm:$0xff] }
  0x1e   : > { %321 = vst [vmem:[%s1375_s8 + $0x40] sm:$0xff] %v320_v8  ;;  %v324_v10 = vld [vmem:[%s1370_s7 + $0xa0] sm:$0xff]  ;;  %v326_v11 = vld [vmem:[%s1370_s7 + $0xb0] sm:$0xff]  ;;  %323 = vst [vmem:[%s1375_s8 + $0x48] sm:$0xff] %v322_v9 }
  0x1f   : > { %325 = vst [vmem:[%s1375_s8 + $0x50] sm:$0xff] %v324_v10  ;;  %327 = vst [vmem:[%s1375_s8 + $0x58] sm:$0xff] %v326_v11  ;;  %v328_v12 = vld [vmem:[%s1370_s7 + $0xc0] sm:$0xff]  ;;  %v330_v13 = vld [vmem:[%s1370_s7 + $0xd0] sm:$0xff] }
  0x20   : > { %v332_v14 = vld [vmem:[%s1370_s7 + $0xe0] sm:$0xff]  ;;  %329 = vst [vmem:[%s1375_s8 + $0x60] sm:$0xff] %v328_v12  ;;  %331 = vst [vmem:[%s1375_s8 + $0x68] sm:$0xff] %v330_v13  ;;  %v334_v15 = vld [vmem:[%s1370_s7 + $0xf0] sm:$0xff] }
  0x21   : > { %333 = vst [vmem:[%s1375_s8 + $0x70] sm:$0xff] %v332_v14  ;;  %v336_v16 = vld [vmem:[%s1370_s7 + $0x100] sm:$0xff]  ;;  %v338_v17 = vld [vmem:[%s1370_s7 + $0x110] sm:$0xff]  ;;  %335 = vst [vmem:[%s1375_s8 + $0x78] sm:$0xff] %v334_v15 }
  0x22   : > { %337 = vst [vmem:[%s1375_s8 + $0x80] sm:$0xff] %v336_v16  ;;  %339 = vst [vmem:[%s1375_s8 + $0x88] sm:$0xff] %v338_v17  ;;  %v340_v18 = vld [vmem:[%s1370_s7 + $0x120] sm:$0xff]  ;;  %v342_v19 = vld [vmem:[%s1370_s7 + $0x130] sm:$0xff] }
  0x23   : > { %v344_v20 = vld [vmem:[%s1370_s7 + $0x140] sm:$0xff]  ;;  %341 = vst [vmem:[%s1375_s8 + $0x90] sm:$0xff] %v340_v18  ;;  %343 = vst [vmem:[%s1375_s8 + $0x98] sm:$0xff] %v342_v19  ;;  %v346_v21 = vld [vmem:[%s1370_s7 + $0x150] sm:$0xff] }
  0x24   : > { %345 = vst [vmem:[%s1375_s8 + $0xa0] sm:$0xff] %v344_v20  ;;  %v348_v22 = vld [vmem:[%s1370_s7 + $0x160] sm:$0xff]  ;;  %v350_v23 = vld [vmem:[%s1370_s7 + $0x170] sm:$0xff]  ;;  %347 = vst [vmem:[%s1375_s8 + $0xa8] sm:$0xff] %v346_v21 }
  0x25   : > { %349 = vst [vmem:[%s1375_s8 + $0xb0] sm:$0xff] %v348_v22  ;;  %351 = vst [vmem:[%s1375_s8 + $0xb8] sm:$0xff] %v350_v23  ;;  %v352_v24 = vld [vmem:[%s1370_s7 + $0x180] sm:$0xff]  ;;  %v354_v25 = vld [vmem:[%s1370_s7 + $0x190] sm:$0xff] }
  0x26   : > { %v356_v26 = vld [vmem:[%s1370_s7 + $0x1a0] sm:$0xff]  ;;  %353 = vst [vmem:[%s1375_s8 + $0xc0] sm:$0xff] %v352_v24  ;;  %355 = vst [vmem:[%s1375_s8 + $0xc8] sm:$0xff] %v354_v25  ;;  %v358_v27 = vld [vmem:[%s1370_s7 + $0x1b0] sm:$0xff] }
  0x27   : > { %357 = vst [vmem:[%s1375_s8 + $0xd0] sm:$0xff] %v356_v26  ;;  %v360_v28 = vld [vmem:[%s1370_s7 + $0x1c0] sm:$0xff]  ;;  %v362_v29 = vld [vmem:[%s1370_s7 + $0x1d0] sm:$0xff]  ;;  %359 = vst [vmem:[%s1375_s8 + $0xd8] sm:$0xff] %v358_v27 }
  0x28   : > { %361 = vst [vmem:[%s1375_s8 + $0xe0] sm:$0xff] %v360_v28  ;;  %363 = vst [vmem:[%s1375_s8 + $0xe8] sm:$0xff] %v362_v29  ;;  %v364_v30 = vld [vmem:[%s1370_s7 + $0x1e0] sm:$0xff]  ;;  %v366_v31 = vld [vmem:[%s1370_s7 + $0x1f0] sm:$0xff] }
  0x29   : > { %v368_v32 = vld [vmem:[%s1370_s7 + $0x200] sm:$0xff]  ;;  %365 = vst [vmem:[%s1375_s8 + $0xf0] sm:$0xff] %v364_v30  ;;  %367 = vst [vmem:[%s1375_s8 + $0xf8] sm:$0xff] %v366_v31  ;;  %v370_v33 = vld [vmem:[%s1370_s7 + $0x210] sm:$0xff] }
  0x2a   : > { %369 = vst [vmem:[%s1375_s8 + $0x100] sm:$0xff] %v368_v32  ;;  %v372_v34 = vld [vmem:[%s1370_s7 + $0x220] sm:$0xff]  ;;  %v374_v35 = vld [vmem:[%s1370_s7 + $0x230] sm:$0xff]  ;;  %371 = vst [vmem:[%s1375_s8 + $0x108] sm:$0xff] %v370_v33 }
  0x2b   : > { %373 = vst [vmem:[%s1375_s8 + $0x110] sm:$0xff] %v372_v34  ;;  %375 = vst [vmem:[%s1375_s8 + $0x118] sm:$0xff] %v374_v35  ;;  %v376_v36 = vld [vmem:[%s1370_s7 + $0x240] sm:$0xff]  ;;  %v378_v37 = vld [vmem:[%s1370_s7 + $0x250] sm:$0xff] }
  0x2c   : > { %v380_v38 = vld [vmem:[%s1370_s7 + $0x260] sm:$0xff]  ;;  %377 = vst [vmem:[%s1375_s8 + $0x120] sm:$0xff] %v376_v36  ;;  %379 = vst [vmem:[%s1375_s8 + $0x128] sm:$0xff] %v378_v37  ;;  %v382_v39 = vld [vmem:[%s1370_s7 + $0x270] sm:$0xff] }
  0x2d   : > { %381 = vst [vmem:[%s1375_s8 + $0x130] sm:$0xff] %v380_v38  ;;  %v384_v40 = vld [vmem:[%s1370_s7 + $0x280] sm:$0xff]  ;;  %v386_v41 = vld [vmem:[%s1370_s7 + $0x290] sm:$0xff]  ;;  %383 = vst [vmem:[%s1375_s8 + $0x138] sm:$0xff] %v382_v39 }
  0x2e   : > { %385 = vst [vmem:[%s1375_s8 + $0x140] sm:$0xff] %v384_v40  ;;  %387 = vst [vmem:[%s1375_s8 + $0x148] sm:$0xff] %v386_v41  ;;  %v388_v42 = vld [vmem:[%s1370_s7 + $0x2a0] sm:$0xff]  ;;  %v390_v43 = vld [vmem:[%s1370_s7 + $0x2b0] sm:$0xff] }
  0x2f   : > { %v392_v44 = vld [vmem:[%s1370_s7 + $0x2c0] sm:$0xff]  ;;  %389 = vst [vmem:[%s1375_s8 + $0x150] sm:$0xff] %v388_v42  ;;  %391 = vst [vmem:[%s1375_s8 + $0x158] sm:$0xff] %v390_v43  ;;  %v394_v45 = vld [vmem:[%s1370_s7 + $0x2d0] sm:$0xff] }
  0x30   : > { %393 = vst [vmem:[%s1375_s8 + $0x160] sm:$0xff] %v392_v44  ;;  %v396_v46 = vld [vmem:[%s1370_s7 + $0x2e0] sm:$0xff]  ;;  %v398_v47 = vld [vmem:[%s1370_s7 + $0x2f0] sm:$0xff]  ;;  %395 = vst [vmem:[%s1375_s8 + $0x168] sm:$0xff] %v394_v45 }
  0x31   : > { %397 = vst [vmem:[%s1375_s8 + $0x170] sm:$0xff] %v396_v46  ;;  %399 = vst [vmem:[%s1375_s8 + $0x178] sm:$0xff] %v398_v47 }
  0x32 PF: > { %p1036_p7 = scmp.ge.s32.totalorder %s1286_s18, 1  ;;  %p412_p8 = scmp.lt.s32.totalorder %s1286_s18, 13 }
  0x34   : > { %p413_p9 = pnand %p1036_p7, %p412_p8 }
  0x35   : > { %s419_s9 = sand.u32 (!%p413_p9), 1, %s1262_s12   ;;  %s459_s10 = smul.u32 (!%p413_p9), 3, %s1270_s14 }
  0x36   : > { %416 = sbr.rel (%p413_p9) target bundleno = 366 (0x16e), region = 66  ;;  %s1038_s21 = sshll.u32 (!%p413_p9), %s1274_s15, 1 }
  0x37   : > { %s1098_s11 = smul.u32 (!%p413_p9), 384, %s419_s9  ;;  %p462_p10 = scmp.lt.s32.totalorder (!%p413_p9), %s459_s10, 17 }
  0x38   : > { %p472_p11 = scmp.lt.s32.totalorder (!%p413_p9), %s1038_s21, 3  ;;  %p1041_p12 = scmp.ne.s32.totalorder (!%p413_p9), %s1270_s14, 0 }
  0x39   : > { %s1492_s5 = scalar_lea.vmem (!%p413_p9), [#allocation2], %s1098_s11 }
  0x3d   : > { %s1599_s10 = smov (!%p462_p10, %s459_s10), 17  ;;  %s1601_s21 = smov (!%p472_p11, %s1038_s21), 3 }
  0x3e   : > { %s1037_s22 = sshll.u32 %s1599_s10, 2  ;;  %s474_s12 = scalar_lea.vmem %s1584_s2, %s1601_s21  ;;  %v1288_v48 = vmov (!%p1041_p12), 0.0  }
  0x3f   : > { %s1480_s26 = scalar_lea.vmem %s1582_s0, %s1037_s22  ;;  %s1040_s29 = sshll.u32 %s1601_s21, 3 }
  0x40   : > { %s1490_s4 = scalar_lea.vmem %s1585_s3, %s1040_s29  ;;  %490 = sbr.rel (%p1041_p12) target bundleno = 71 (0x47), region = 74 }
  0x41   : > { %491 = vst [vmem:[%s1490_s4] sm:$0xff] (!%p1041_p12), %v1288_v48  ;;  %492 = vst [vmem:[%s1490_s4 + $0x8] sm:$0xff] (!%p1041_p12), %v1288_v48 }
  0x47 PF: > { %v1157_v49 = vld [vmem:[%s1492_s5 + $0x4] ss:$8 sps:$4 sm:$0xff]   ;;  %v1159_v50 = vld [vmem:[%s1492_s5] ss:$8 sps:$4 sm:$0xff]   ;;  %v1289_v51 = vmov 0   ;;  %p1093_p13 = scmp.ne.s32.totalorder %s1270_s14, 5 }
  0x48   : > { %869 = vmatprep.mubr.bf16.mxu1 %v1289_v51  ;;  %796 = vmatprep.subr.bf16.mxu0 %v1157_v49  ;;  %v1160_v52 = vld [vmem:[%s1492_s5 + $0x14] ss:$8 sps:$4 sm:$0xff]   ;;  %v1162_v53 = vld [vmem:[%s1492_s5 + $0x10] ss:$8 sps:$4 sm:$0xff]   ;;  %v1163_v54 = vld [vmem:[%s1492_s5 + $0x24] ss:$8 sps:$4 sm:$0xff]  }
  0x49   : > { %797 = vmatpush1.bf16.msra.mxu0 %v1159_v50  ;;  %v1165_v55 = vld [vmem:[%s1492_s5 + $0x20] ss:$8 sps:$4 sm:$0xff]   ;;  %v1166_v56 = vld [vmem:[%s1492_s5 + $0x34] ss:$8 sps:$4 sm:$0xff]   ;;  %v1168_v57 = vld [vmem:[%s1492_s5 + $0x30] ss:$8 sps:$4 sm:$0xff]  }
  0x4a   : > { %798 = vmatprep.subr.bf16.mxu0 %v1160_v52  ;;  %v1181_v58 = vld [vmem:[%s1492_s5 + $0x104] ss:$8 sps:$4 sm:$0xff]   ;;  %v1183_v59 = vld [vmem:[%s1492_s5 + $0x100] ss:$8 sps:$4 sm:$0xff]   ;;  %v1187_v61 = vld [vmem:[%s1492_s5 + $0x114] ss:$8 sps:$4 sm:$0xff]   ;;  %v890_v52 = vlaneseq (!%p1093_p13) }
  0x4b   : > { %v1169_v60 = vld [vmem:[%s1492_s5 + $0x44] ss:$8 sps:$4 sm:$0xff]   ;;  %837 = vmatprep.subr.bf16.mxu1 %v1181_v58  ;;  %v1189_v62 = vld [vmem:[%s1492_s5 + $0x110] ss:$8 sps:$4 sm:$0xff]   ;;  %v1171_v63 = vld [vmem:[%s1492_s5 + $0x40] ss:$8 sps:$4 sm:$0xff]  }
  0x4c   : > { %838 = vmatpush1.bf16.msra.mxu1 %v1183_v59  ;;  %v1172_v0 = vld [vmem:[%s1492_s5 + $0x54] ss:$8 sps:$4 sm:$0xff]   ;;  %v1193_v1 = vld [vmem:[%s1492_s5 + $0x124] ss:$8 sps:$4 sm:$0xff]   ;;  %v1195_v2 = vld [vmem:[%s1492_s5 + $0x120] ss:$8 sps:$4 sm:$0xff]  }
  0x4d   : > { %799 = vmatpush1.bf16.msra.mxu0 %v1162_v53  ;;  %839 = vmatprep.subr.bf16.mxu1 %v1187_v61  ;;  %v1174_v3 = vld [vmem:[%s1492_s5 + $0x50] ss:$8 sps:$4 sm:$0xff]   ;;  %v1199_v4 = vld [vmem:[%s1492_s5 + $0x134] ss:$8 sps:$4 sm:$0xff]   ;;  %v1175_v5 = vld [vmem:[%s1492_s5 + $0x64] ss:$8 sps:$4 sm:$0xff]  }
  0x4e   : > { %800 = vmatprep.subr.bf16.mxu0 %v1163_v54  ;;  %v1201_v6 = vld [vmem:[%s1492_s5 + $0x130] ss:$8 sps:$4 sm:$0xff]   ;;  %v1177_v7 = vld [vmem:[%s1492_s5 + $0x60] ss:$8 sps:$4 sm:$0xff]   ;;  %v1205_v8 = vld [vmem:[%s1492_s5 + $0x144] ss:$8 sps:$4 sm:$0xff]  }
  0x4f   : > { %v1178_v9 = vld [vmem:[%s1492_s5 + $0x74] ss:$8 sps:$4 sm:$0xff]   ;;  %v1207_v10 = vld [vmem:[%s1492_s5 + $0x140] ss:$8 sps:$4 sm:$0xff]   ;;  %v1180_v11 = vld [vmem:[%s1492_s5 + $0x70] ss:$8 sps:$4 sm:$0xff]  }
  0x50   : > { %840 = vmatpush1.bf16.msra.mxu1 %v1189_v62  ;;  %v1211_v12 = vld [vmem:[%s1492_s5 + $0x154] ss:$8 sps:$4 sm:$0xff]   ;;  %v1184_v13 = vld [vmem:[%s1492_s5 + $0x84] ss:$8 sps:$4 sm:$0xff]   ;;  %v1213_v14 = vld [vmem:[%s1492_s5 + $0x150] ss:$8 sps:$4 sm:$0xff]  }
  0x51   : > { %801 = vmatpush1.bf16.msra.mxu0 %v1165_v55  ;;  %841 = vmatprep.subr.bf16.mxu1 %v1193_v1  ;;  %v1186_v15 = vld [vmem:[%s1492_s5 + $0x80] ss:$8 sps:$4 sm:$0xff]   ;;  %v1217_v16 = vld [vmem:[%s1492_s5 + $0x164] ss:$8 sps:$4 sm:$0xff]   ;;  %v1190_v17 = vld [vmem:[%s1492_s5 + $0x94] ss:$8 sps:$4 sm:$0xff]  }
  0x52   : > { %802 = vmatprep.subr.bf16.mxu0 %v1166_v56  ;;  %v495_v18 = vld [vmem:[%s1480_s26] sm:$0xff]  ;;  %v1192_v21 = vld [vmem:[%s1492_s5 + $0x90] ss:$8 sps:$4 sm:$0xff]   ;;  %v1223_v22 = vld [vmem:[%s1492_s5 + $0x174] ss:$8 sps:$4 sm:$0xff]   ;;  %v891_v53 = vshrl.u32 (!%p1093_p13), %v890_v52, 7 }
  0x53   : > { %v1043_v19 = vcombine.high %v495_v18, %v495_v18  ;;  %v1219_v20 = vld [vmem:[%s1492_s5 + $0x160] ss:$8 sps:$4 sm:$0xff]   ;;  %v1196_v23 = vld [vmem:[%s1492_s5 + $0xa4] ss:$8 sps:$4 sm:$0xff]   ;;  %v1225_v24 = vld [vmem:[%s1492_s5 + $0x170] ss:$8 sps:$4 sm:$0xff]   ;;  %v1042_v37 = vcombine.low %v495_v18, %v495_v18 }
  0x54   : > { %842 = vmatpush1.bf16.msra.mxu1 %v1195_v2  ;;  %v1198_v25 = vld [vmem:[%s1492_s5 + $0xa0] ss:$8 sps:$4 sm:$0xff]   ;;  %v1202_v26 = vld [vmem:[%s1492_s5 + $0xb4] ss:$8 sps:$4 sm:$0xff]   ;;  %v1204_v28 = vld [vmem:[%s1492_s5 + $0xb0] ss:$8 sps:$4 sm:$0xff]  }
  0x55   : > { %803 = vmatpush1.bf16.msra.mxu0 %v1168_v57  ;;  %843 = vmatprep.subr.bf16.mxu1 %v1199_v4  ;;  %v1229_v27 = vld [vmem:[%s1480_s26 + $0x8] ss:$0 sps:$4 sm:$0xff]   ;;  %v1208_v29 = vld [vmem:[%s1492_s5 + $0xc4] ss:$8 sps:$4 sm:$0xff]   ;;  %v1214_v31 = vld [vmem:[%s1492_s5 + $0xd4] ss:$8 sps:$4 sm:$0xff]  }
  0x56   : > { %804 = vmatprep.subr.bf16.mxu0 %v1169_v60  ;;  %828 = vmatprep.mubr.bf16.mxu0 %v1043_v19  ;;  %v1210_v30 = vld [vmem:[%s1492_s5 + $0xc0] ss:$8 sps:$4 sm:$0xff]   ;;  %v1216_v32 = vld [vmem:[%s1492_s5 + $0xd0] ss:$8 sps:$4 sm:$0xff]   ;;  %v1220_v33 = vld [vmem:[%s1492_s5 + $0xe4] ss:$8 sps:$4 sm:$0xff]  }
  0x57   : > { %v1222_v34 = vld [vmem:[%s1492_s5 + $0xe0] ss:$8 sps:$4 sm:$0xff]   ;;  %v1226_v35 = vld [vmem:[%s1492_s5 + $0xf4] ss:$8 sps:$4 sm:$0xff]   ;;  %v1228_v36 = vld [vmem:[%s1492_s5 + $0xf0] ss:$8 sps:$4 sm:$0xff]  }
  0x58   : > { %844 = vmatpush1.bf16.msra.mxu1 %v1201_v6  ;;  %v493_v42 = vld [vmem:[%s1490_s4] sm:$0xff]  ;;  %v494_v45 = vld [vmem:[%s1490_s4 + $0x8] sm:$0xff]  ;;  %v892_v55 = vsub.s32 (!%p1093_p13), 0, %v891_v53  ;;  %v896_v56 = vsub.s32 (!%p1093_p13), 1, %v891_v53 }
  0x59   : > { %805 = vmatpush1.bf16.msra.mxu0 %v1171_v63  ;;  %845 = vmatprep.subr.bf16.mxu1 %v1205_v8  ;;  %v888_v54 = vld [vmem:[%s474_s12] sm:$0x3] (!%p1093_p13) }
  0x5a   : > { %806 = vmatprep.subr.bf16.mxu0 %v1172_v0  ;;  %v893_v59 = vrot.slane (!%p1093_p13), %v888_v54, %v892_v55  ;;  %v897_v60 = vrot.slane (!%p1093_p13), %v888_v54, %v896_v56 }
  0x5c   : > { %846 = vmatpush1.bf16.msra.mxu1 %v1207_v10 }
  0x5d   : > { %807 = vmatpush1.bf16.msra.mxu0 %v1174_v3  ;;  %847 = vmatprep.subr.bf16.mxu1 %v1211_v12 }
  0x5e   : > { %808 = vmatprep.subr.bf16.mxu0 %v1175_v5 }
  0x60   : > { %848 = vmatpush1.bf16.msra.mxu1 %v1213_v14 }
  0x61   : > { %809 = vmatpush1.bf16.msra.mxu0 %v1177_v7  ;;  %849 = vmatprep.subr.bf16.mxu1 %v1217_v16 }
  0x62   : > { %810 = vmatprep.subr.bf16.mxu0 %v1178_v9 }
  0x64   : > { %850 = vmatpush1.bf16.msra.mxu1 %v1219_v20 }
  0x65   : > { %811 = vmatpush1.bf16.msra.mxu0 %v1180_v11  ;;  %851 = vmatprep.subr.bf16.mxu1 %v1223_v22 }
  0x66   : > { %812 = vmatprep.subr.bf16.mxu0 %v1184_v13 }
  0x68   : > { %852 = vmatpush1.bf16.msra.mxu1 %v1225_v24 }
  0x69   : > { %813 = vmatpush1.bf16.msra.mxu0 %v1186_v15 }
  0x6a   : > { %814 = vmatprep.subr.bf16.mxu0 %v1190_v17 }
  0x6b   : > { %870 = vmatmul.mubr.bf16.vlgmr.msra.gmra.mrb[0].mxu1 %v1229_v27 }
  0x6d   : > { %815 = vmatpush1.bf16.msra.mxu0 %v1192_v21 }
  0x6e   : > { %816 = vmatprep.subr.bf16.mxu0 %v1196_v23 }
  0x71   : > { %817 = vmatpush1.bf16.msra.mxu0 %v1198_v25 }
  0x72   : > { %818 = vmatprep.subr.bf16.mxu0 %v1202_v26 }
  0x75   : > { %819 = vmatpush1.bf16.msra.mxu0 %v1204_v28 }
  0x76   : > { %820 = vmatprep.subr.bf16.mxu0 %v1208_v29 }
  0x79   : > { %821 = vmatpush1.bf16.msra.mxu0 %v1210_v30 }
  0x7a   : > { %822 = vmatprep.subr.bf16.mxu0 %v1214_v31 }
  0x7d   : > { %823 = vmatpush1.bf16.msra.mxu0 %v1216_v32 }
  0x7e   : > { %824 = vmatprep.subr.bf16.mxu0 %v1220_v33 }
  0x81   : > { %825 = vmatpush1.bf16.msra.mxu0 %v1222_v34 }
  0x82   : > { %826 = vmatprep.subr.bf16.mxu0 %v1226_v35 }
  0x85   : > { %827 = vmatpush1.bf16.msra.mxu0 %v1228_v36 }
  0x88   : > { %829 = vmatmul.mubr.bf16.vlgmr.msra.gmra.mrb[0].mxu0 %v1042_v37 }
 0x13e   : > { %v871_v38 = vpop.f32.mrb[0].mxu1 }
 0x13f   : > { %v873_v39 = vpop.f32.mrb[1].mxu1 }
 0x140   : > { %v875_v40 = vpop.f32.mrb[2].mxu1 }
 0x141   : > { %v876_v41 = vpop.f32.mrb[3].mxu1 }
 0x15b   : > { %v830_v43 = vpop.f32.mrb[0].mxu0  ;;  %885 = sbr.rel (%p1093_p13) target bundleno = 366 (0x16e), region = 78 }
 0x15c   : > { %v872_v44 = vadd.f32 %v871_v38, %v830_v43  ;;  %v832_v46 = vpop.f32.mrb[1].mxu0 }
 0x15d   : > { %v874_v47 = vadd.f32 %v873_v39, %v832_v46  ;;  %v834_v48 = vpop.f32.mrb[2].mxu0 }
 0x15e   : > { %v878_v49 = vadd.f32 %v872_v44, %v493_v42  ;;  %v835_v50 = vpop.f32.mrb[3].mxu0 }
 0x15f   : > { %v879_v51 = vadd.f32 %v874_v47, %v494_v45 }
 0x160   : > { %880 = vst [vmem:[%s1490_s4] sm:$0xff] %v878_v49 }
 0x161   : > { %881 = vst [vmem:[%s1490_s4 + $0x8] sm:$0xff] %v879_v51 }
 0x167   : > { %v886_v57 = vld [vmem:[%s1490_s4] sm:$0xff] }
 0x168   : > { %v887_v58 = vld [vmem:[%s1490_s4 + $0x8] sm:$0xff]  ;;  %v900_v61 = vadd.f32 %v893_v59, %v886_v57 }
 0x169   : > { %v901_v62 = vadd.f32 %v897_v60, %v887_v58 }
 0x16a   : > { %v902_v63 = vmax.f32 %v900_v61, 0.0 }
 0x16b   : > { %v903_v0 = vmax.f32 %v901_v62, 0.0 }
 0x16c   : > { %904 = vst [vmem:[%s1490_s4] sm:$0xff] %v902_v63 }
 0x16d   : > { %905 = vst [vmem:[%s1490_s4 + $0x8] sm:$0xff] %v903_v0 }
 0x16e PF: > { %s13_s18 = sadd.s32 1, %s1286_s18   ;;  %s1586_s12 = smov %s1266_s13 }
 0x16f   : > { %p10_p0 = scmp.ge.s32.totalorder %s13_s18, 14   ;;  %s1587_s13 = smov %s1361_s25 }
 0x170   : > { %s1588_s14 = smov %s1278_s16  ;;  %s1589_s15 = smov %s1282_s17 }
 0x171   : > { %s1590_s16 = smov %s1593_s19  ;;  %s1591_s17 = smov %s1597_s20 }
 0x172   :  { %12 = sbr.rel (!%p10_p0) target bundleno = 4 (0x4), region = 119 }

// kernel: resnet18_forward.40
= control target key start
LH: loop header
LB: loop body
LE: loop exit
PB: predicated region body
PF: predicated region fallthrough
CT: control target
= control target key end

     0   :  { %s1021_s12 = smov 0   ;;  %s1023_s13 = smov 0   ;;  %s1214_s0 = inlined_call_operand.vmem [shape: bf16[8,256], index: 0, kind: input, shape index: {}]   ;;  %s1215_s1 = inlined_call_operand.vmem [shape: bf16[256,512], index: 1, kind: input, shape index: {}]   ;;  %s1216_s2 = inlined_call_operand.vmem [shape: f32[1,512], index: 2, kind: input, shape index: {}]   ;;  %s1217_s3 = inlined_call_operand.vmem [shape: f32[8,512], index: 3, kind: output, shape index: {}]  }
   0x1   :  { %s1025_s14 = smov 0   ;;  %s1027_s15 = smov 0  }
   0x2   :  { %s1029_s16 = smov 0  }
   0x3 LB: > { %s28_s17 = sadd.s32 1, %s994_s15  ;;  %p76_p1 = scmp.ne.s32.totalorder %s986_s13, %s982_s12  ;;  %s998_s16 = sphi %s1029_s16, %s13_s16   ;;  %s994_s15 = sphi %s1027_s15, %s1221_s15   ;;  %s990_s14 = sphi %s1025_s14, %s1220_s14   ;;  %s986_s13 = sphi %s1023_s13, %s1219_s13   ;;  %s982_s12 = sphi %s1021_s12, %s1218_s12  }
   0x4   : > { %p30_p0 = scmp.ge.s32.totalorder %s28_s17, 2  ;;  %p77_p2 = scmp.eq.s32.totalorder %s998_s16, 0 }
   0x5   : > { %s69_s19 = sadd.s32 1, %s986_s13  ;;  %p823_p5 = scmp.ge.s32.totalorder %s998_s16, 2 }
   0x6   : > { %s1223_s17 = smov (%p30_p0, %s28_s17), 0  ;;  %p78_p3 = por %p77_p2, %p76_p1 }
   0x7   : > { %s65_s18 = ssub.s32 %s994_s15, %s1223_s17  ;;  %169 = sbr.rel (%p823_p5) target bundleno = 34 (0x22), region = 20 }
   0x8   : > { %p67_p4 = scmp.eq.s32.totalorder %s65_s18, 0 }
   0xa   : > { %s1056_s20 = scalar_select %p67_p4, %s986_s13, %s69_s19  }
   0xe   : > { %172 = sbr.rel (!%p78_p3) target bundleno = 34 (0x22), region = 24  ;;  %s174_s21 = sand.u32 (%p78_p3), 1, %s986_s13  }
   0xf   : > { %s868_s22 = sshll.u32 (%p78_p3), %s994_s15, 3  ;;  %s824_s23 = sshll.u32 (%p78_p3), %s174_s21, 8 }
  0x10   : > { %s1064_s26 = scalar_lea.vmem (%p78_p3), %s1215_s1, %s868_s22  ;;  %s1069_s27 = scalar_lea.vmem (%p78_p3), [#allocation2], %s824_s23 }
  0x11   : > { %v272_v0 = vld [vmem:[%s1064_s26] sm:$0xff] (%p78_p3)  ;;  %v274_v1 = vld [vmem:[%s1064_s26 + $0x10] sm:$0xff] (%p78_p3) }
  0x12   : > { %v276_v2 = vld [vmem:[%s1064_s26 + $0x20] sm:$0xff] (%p78_p3)  ;;  %273 = vst [vmem:[%s1069_s27] sm:$0xff] (%p78_p3), %v272_v0  ;;  %275 = vst [vmem:[%s1069_s27 + $0x8] sm:$0xff] (%p78_p3), %v274_v1  ;;  %v278_v3 = vld [vmem:[%s1064_s26 + $0x30] sm:$0xff] (%p78_p3) }
  0x13   : > { %277 = vst [vmem:[%s1069_s27 + $0x10] sm:$0xff] (%p78_p3), %v276_v2  ;;  %v280_v4 = vld [vmem:[%s1064_s26 + $0x40] sm:$0xff] (%p78_p3)  ;;  %v282_v5 = vld [vmem:[%s1064_s26 + $0x50] sm:$0xff] (%p78_p3)  ;;  %279 = vst [vmem:[%s1069_s27 + $0x18] sm:$0xff] (%p78_p3), %v278_v3 }
  0x14   : > { %281 = vst [vmem:[%s1069_s27 + $0x20] sm:$0xff] (%p78_p3), %v280_v4  ;;  %283 = vst [vmem:[%s1069_s27 + $0x28] sm:$0xff] (%p78_p3), %v282_v5  ;;  %v284_v6 = vld [vmem:[%s1064_s26 + $0x60] sm:$0xff] (%p78_p3)  ;;  %v286_v7 = vld [vmem:[%s1064_s26 + $0x70] sm:$0xff] (%p78_p3) }
  0x15   : > { %v288_v8 = vld [vmem:[%s1064_s26 + $0x80] sm:$0xff]  ;;  %285 = vst [vmem:[%s1069_s27 + $0x30] sm:$0xff] %v284_v6  ;;  %287 = vst [vmem:[%s1069_s27 + $0x38] sm:$0xff] %v286_v7  ;;  %v290_v9 = vld [vmem:[%s1064_s26 + $0x90] sm:$0xff] }
  0x16   : > { %289 = vst [vmem:[%s1069_s27 + $0x40] sm:$0xff] %v288_v8  ;;  %v292_v10 = vld [vmem:[%s1064_s26 + $0xa0] sm:$0xff]  ;;  %v294_v11 = vld [vmem:[%s1064_s26 + $0xb0] sm:$0xff]  ;;  %291 = vst [vmem:[%s1069_s27 + $0x48] sm:$0xff] %v290_v9 }
  0x17   : > { %293 = vst [vmem:[%s1069_s27 + $0x50] sm:$0xff] %v292_v10  ;;  %295 = vst [vmem:[%s1069_s27 + $0x58] sm:$0xff] %v294_v11  ;;  %v296_v12 = vld [vmem:[%s1064_s26 + $0xc0] sm:$0xff]  ;;  %v298_v13 = vld [vmem:[%s1064_s26 + $0xd0] sm:$0xff] }
  0x18   : > { %v300_v14 = vld [vmem:[%s1064_s26 + $0xe0] sm:$0xff]  ;;  %297 = vst [vmem:[%s1069_s27 + $0x60] sm:$0xff] %v296_v12  ;;  %299 = vst [vmem:[%s1069_s27 + $0x68] sm:$0xff] %v298_v13  ;;  %v302_v15 = vld [vmem:[%s1064_s26 + $0xf0] sm:$0xff] }
  0x19   : > { %301 = vst [vmem:[%s1069_s27 + $0x70] sm:$0xff] %v300_v14  ;;  %v304_v16 = vld [vmem:[%s1064_s26 + $0x100] sm:$0xff]  ;;  %v306_v17 = vld [vmem:[%s1064_s26 + $0x110] sm:$0xff]  ;;  %303 = vst [vmem:[%s1069_s27 + $0x78] sm:$0xff] %v302_v15 }
  0x1a   : > { %305 = vst [vmem:[%s1069_s27 + $0x80] sm:$0xff] %v304_v16  ;;  %307 = vst [vmem:[%s1069_s27 + $0x88] sm:$0xff] %v306_v17  ;;  %v308_v18 = vld [vmem:[%s1064_s26 + $0x120] sm:$0xff]  ;;  %v310_v19 = vld [vmem:[%s1064_s26 + $0x130] sm:$0xff] }
  0x1b   : > { %v312_v20 = vld [vmem:[%s1064_s26 + $0x140] sm:$0xff]  ;;  %309 = vst [vmem:[%s1069_s27 + $0x90] sm:$0xff] %v308_v18  ;;  %311 = vst [vmem:[%s1069_s27 + $0x98] sm:$0xff] %v310_v19  ;;  %v314_v21 = vld [vmem:[%s1064_s26 + $0x150] sm:$0xff] }
  0x1c   : > { %313 = vst [vmem:[%s1069_s27 + $0xa0] sm:$0xff] %v312_v20  ;;  %v316_v22 = vld [vmem:[%s1064_s26 + $0x160] sm:$0xff]  ;;  %v318_v23 = vld [vmem:[%s1064_s26 + $0x170] sm:$0xff]  ;;  %315 = vst [vmem:[%s1069_s27 + $0xa8] sm:$0xff] %v314_v21 }
  0x1d   : > { %317 = vst [vmem:[%s1069_s27 + $0xb0] sm:$0xff] %v316_v22  ;;  %319 = vst [vmem:[%s1069_s27 + $0xb8] sm:$0xff] %v318_v23  ;;  %v320_v24 = vld [vmem:[%s1064_s26 + $0x180] sm:$0xff]  ;;  %v322_v25 = vld [vmem:[%s1064_s26 + $0x190] sm:$0xff] }
  0x1e   : > { %v324_v26 = vld [vmem:[%s1064_s26 + $0x1a0] sm:$0xff]  ;;  %321 = vst [vmem:[%s1069_s27 + $0xc0] sm:$0xff] %v320_v24  ;;  %323 = vst [vmem:[%s1069_s27 + $0xc8] sm:$0xff] %v322_v25  ;;  %v326_v27 = vld [vmem:[%s1064_s26 + $0x1b0] sm:$0xff] }
  0x1f   : > { %325 = vst [vmem:[%s1069_s27 + $0xd0] sm:$0xff] %v324_v26  ;;  %v328_v28 = vld [vmem:[%s1064_s26 + $0x1c0] sm:$0xff]  ;;  %v330_v29 = vld [vmem:[%s1064_s26 + $0x1d0] sm:$0xff]  ;;  %327 = vst [vmem:[%s1069_s27 + $0xd8] sm:$0xff] %v326_v27 }
  0x20   : > { %329 = vst [vmem:[%s1069_s27 + $0xe0] sm:$0xff] %v328_v28  ;;  %331 = vst [vmem:[%s1069_s27 + $0xe8] sm:$0xff] %v330_v29  ;;  %v332_v30 = vld [vmem:[%s1064_s26 + $0x1e0] sm:$0xff]  ;;  %v334_v31 = vld [vmem:[%s1064_s26 + $0x1f0] sm:$0xff] }
  0x21   : > { %333 = vst [vmem:[%s1069_s27 + $0xf0] sm:$0xff] %v332_v30  ;;  %335 = vst [vmem:[%s1069_s27 + $0xf8] sm:$0xff] %v334_v31 }
  0x22 PF: > { %p827_p6 = scmp.ge.s32.totalorder %s998_s16, 1  ;;  %p348_p7 = scmp.lt.s32.totalorder %s998_s16, 3 }
  0x24   : > { %p349_p8 = pnand %p827_p6, %p348_p7 }
  0x25   : > { %s355_s28 = sand.u32 (!%p349_p8), 1, %s982_s12   ;;  %v1138_v32 = vld [vmem:[%s1214_s0] sm:$0xff] (!%p349_p8)  ;;  %s829_s4 = sshll.u32 (!%p349_p8), %s990_s14, 1  ;;  %v1000_v39 = vmov (!%p349_p8), 0.0   ;;  %v682_v4 = vlaneseq (!%p349_p8) }
  0x26   : > { %352 = sbr.rel (%p349_p8) target bundleno = 330 (0x14a), region = 66  ;;  %s828_s5 = sshll.u32 (!%p349_p8), %s355_s28, 8  ;;  %v833_v33 = vcombine.high (!%p349_p8), %v1138_v32, %v1138_v32  ;;  %v832_v3 = vcombine.low (!%p349_p8), %v1138_v32, %v1138_v32 }
  0x27   : > { %p408_p9 = scmp.lt.s32.totalorder (!%p349_p8), %s829_s4, 3  ;;  %s1143_s6 = scalar_lea.vmem (!%p349_p8), [#allocation2], %s828_s5  ;;  %v683_v9 = vshrl.u32 (!%p349_p8), %v682_v4, 7 }
  0x28   : > { %v910_v34 = vld [vmem:[%s1143_s6 + $0x4] ss:$8 sps:$4 sm:$0xff] (!%p349_p8)   ;;  %662 = vmatprep.mubr.bf16.mxu0 (!%p349_p8), %v833_v33  ;;  %v912_v35 = vld [vmem:[%s1143_s6] ss:$8 sps:$4 sm:$0xff] (!%p349_p8)   ;;  %v913_v36 = vld [vmem:[%s1143_s6 + $0x14] ss:$8 sps:$4 sm:$0xff] (!%p349_p8)  }
  0x29   : > { %630 = vmatprep.subr.bf16.mxu0 (!%p349_p8), %v910_v34  ;;  %v915_v37 = vld [vmem:[%s1143_s6 + $0x10] ss:$8 sps:$4 sm:$0xff] (!%p349_p8)   ;;  %v916_v38 = vld [vmem:[%s1143_s6 + $0x24] ss:$8 sps:$4 sm:$0xff] (!%p349_p8)   ;;  %v918_v40 = vld [vmem:[%s1143_s6 + $0x20] ss:$8 sps:$4 sm:$0xff] (!%p349_p8)  }
  0x2a   : > { %631 = vmatpush1.bf16.msra.mxu0 (!%p349_p8), %v912_v35  ;;  %v919_v41 = vld [vmem:[%s1143_s6 + $0x34] ss:$8 sps:$4 sm:$0xff] (!%p349_p8)   ;;  %v921_v42 = vld [vmem:[%s1143_s6 + $0x30] ss:$8 sps:$4 sm:$0xff] (!%p349_p8)   ;;  %v922_v43 = vld [vmem:[%s1143_s6 + $0x44] ss:$8 sps:$4 sm:$0xff] (!%p349_p8)  }
  0x2b   : > { %632 = vmatprep.subr.bf16.mxu0 (!%p349_p8), %v913_v36  ;;  %v924_v44 = vld [vmem:[%s1143_s6 + $0x40] ss:$8 sps:$4 sm:$0xff] (!%p349_p8)   ;;  %v925_v45 = vld [vmem:[%s1143_s6 + $0x54] ss:$8 sps:$4 sm:$0xff] (!%p349_p8)   ;;  %v927_v46 = vld [vmem:[%s1143_s6 + $0x50] ss:$8 sps:$4 sm:$0xff] (!%p349_p8)  }
  0x2c   : > { %v928_v47 = vld [vmem:[%s1143_s6 + $0x64] ss:$8 sps:$4 sm:$0xff] (!%p349_p8)   ;;  %v930_v48 = vld [vmem:[%s1143_s6 + $0x60] ss:$8 sps:$4 sm:$0xff] (!%p349_p8)   ;;  %v931_v49 = vld [vmem:[%s1143_s6 + $0x74] ss:$8 sps:$4 sm:$0xff] (!%p349_p8)  }
  0x2d   : > { %s1225_s4 = smov (!%p408_p9, %s829_s4), 3  ;;  %v933_v50 = vld [vmem:[%s1143_s6 + $0x70] ss:$8 sps:$4 sm:$0xff]   ;;  %v934_v51 = vld [vmem:[%s1143_s6 + $0x84] ss:$8 sps:$4 sm:$0xff]   ;;  %v684_v12 = vsub.s32 0, %v683_v9 }
  0x2e   : > { %s831_s7 = sshll.u32 %s1225_s4, 3  ;;  %633 = vmatpush1.bf16.msra.mxu0 %v915_v37  ;;  %v936_v52 = vld [vmem:[%s1143_s6 + $0x80] ss:$8 sps:$4 sm:$0xff]   ;;  %v937_v53 = vld [vmem:[%s1143_s6 + $0x94] ss:$8 sps:$4 sm:$0xff]   ;;  %s410_s14 = scalar_lea.vmem %s1216_s2, %s1225_s4  ;;  %v688_v13 = vsub.s32 1, %v683_v9 }
  0x2f   : > { %s1155_s10 = scalar_lea.vmem %s1217_s3, %s831_s7  ;;  %634 = vmatprep.subr.bf16.mxu0 %v916_v38  ;;  %v939_v54 = vld [vmem:[%s1143_s6 + $0x90] ss:$8 sps:$4 sm:$0xff]   ;;  %v940_v55 = vld [vmem:[%s1143_s6 + $0xa4] ss:$8 sps:$4 sm:$0xff]   ;;  %v942_v56 = vld [vmem:[%s1143_s6 + $0xa0] ss:$8 sps:$4 sm:$0xff]  }
  0x30   : > { %426 = vst [vmem:[%s1155_s10] sm:$0xff] %v1000_v39  ;;  %427 = vst [vmem:[%s1155_s10 + $0x8] sm:$0xff] %v1000_v39  ;;  %v943_v57 = vld [vmem:[%s1143_s6 + $0xb4] ss:$8 sps:$4 sm:$0xff]   ;;  %v945_v58 = vld [vmem:[%s1143_s6 + $0xb0] ss:$8 sps:$4 sm:$0xff]  }
  0x31   : > { %v946_v59 = vld [vmem:[%s1143_s6 + $0xc4] ss:$8 sps:$4 sm:$0xff]   ;;  %v948_v60 = vld [vmem:[%s1143_s6 + $0xc0] ss:$8 sps:$4 sm:$0xff]   ;;  %v949_v61 = vld [vmem:[%s1143_s6 + $0xd4] ss:$8 sps:$4 sm:$0xff]  }
  0x32   : > { %635 = vmatpush1.bf16.msra.mxu0 %v918_v40  ;;  %v951_v62 = vld [vmem:[%s1143_s6 + $0xd0] ss:$8 sps:$4 sm:$0xff]   ;;  %v952_v63 = vld [vmem:[%s1143_s6 + $0xe4] ss:$8 sps:$4 sm:$0xff]   ;;  %v954_v0 = vld [vmem:[%s1143_s6 + $0xe0] ss:$8 sps:$4 sm:$0xff]  }
  0x33   : > { %636 = vmatprep.subr.bf16.mxu0 %v919_v41  ;;  %v955_v1 = vld [vmem:[%s1143_s6 + $0xf4] ss:$8 sps:$4 sm:$0xff]   ;;  %v957_v2 = vld [vmem:[%s1143_s6 + $0xf0] ss:$8 sps:$4 sm:$0xff]   ;;  %v680_v14 = vld [vmem:[%s410_s14] sm:$0x3] }
  0x34   : > { %v685_v15 = vrot.slane %v680_v14, %v684_v12  ;;  %v689_v16 = vrot.slane %v680_v14, %v688_v13 }
  0x36   : > { %637 = vmatpush1.bf16.msra.mxu0 %v921_v42 }
  0x37   : > { %638 = vmatprep.subr.bf16.mxu0 %v922_v43  ;;  %v428_v5 = vld [vmem:[%s1155_s10] sm:$0xff] }
  0x3a   : > { %639 = vmatpush1.bf16.msra.mxu0 %v924_v44 }
  0x3b   : > { %640 = vmatprep.subr.bf16.mxu0 %v925_v45 }
  0x3e   : > { %641 = vmatpush1.bf16.msra.mxu0 %v927_v46 }
  0x3f   : > { %642 = vmatprep.subr.bf16.mxu0 %v928_v47 }
  0x42   : > { %643 = vmatpush1.bf16.msra.mxu0 %v930_v48 }
  0x43   : > { %644 = vmatprep.subr.bf16.mxu0 %v931_v49 }
  0x46   : > { %645 = vmatpush1.bf16.msra.mxu0 %v933_v50 }
  0x47   : > { %646 = vmatprep.subr.bf16.mxu0 %v934_v51 }
  0x4a   : > { %647 = vmatpush1.bf16.msra.mxu0 %v936_v52 }
  0x4b   : > { %648 = vmatprep.subr.bf16.mxu0 %v937_v53 }
  0x4e   : > { %649 = vmatpush1.bf16.msra.mxu0 %v939_v54 }
  0x4f   : > { %650 = vmatprep.subr.bf16.mxu0 %v940_v55 }
  0x52   : > { %651 = vmatpush1.bf16.msra.mxu0 %v942_v56 }
  0x53   : > { %652 = vmatprep.subr.bf16.mxu0 %v943_v57 }
  0x56   : > { %653 = vmatpush1.bf16.msra.mxu0 %v945_v58 }
  0x57   : > { %654 = vmatprep.subr.bf16.mxu0 %v946_v59 }
  0x5a   : > { %655 = vmatpush1.bf16.msra.mxu0 %v948_v60 }
  0x5b   : > { %656 = vmatprep.subr.bf16.mxu0 %v949_v61 }
  0x5e   : > { %657 = vmatpush1.bf16.msra.mxu0 %v951_v62 }
  0x5f   : > { %658 = vmatprep.subr.bf16.mxu0 %v952_v63 }
  0x62   : > { %659 = vmatpush1.bf16.msra.mxu0 %v954_v0 }
  0x63   : > { %660 = vmatprep.subr.bf16.mxu0 %v955_v1 }
  0x66   : > { %661 = vmatpush1.bf16.msra.mxu0 %v957_v2 }
  0x69   : > { %663 = vmatmul.mubr.bf16.vlgmr.msra.gmra.mrb[0].mxu0 %v832_v3 }
 0x13c   : > { %v664_v6 = vpop.f32.mrb[0].mxu0 }
 0x13d   : > { %v671_v7 = vadd.f32 %v664_v6, %v428_v5  ;;  %v666_v8 = vpop.f32.mrb[1].mxu0 }
 0x13e   : > { %v668_v10 = vpop.f32.mrb[2].mxu0  ;;  %674 = vst [vmem:[%s1155_s10 + $0x8] sm:$0xff] %v666_v8  ;;  %v693_v19 = vadd.f32 %v689_v16, %v666_v8 }
 0x13f   : > { %673 = vst [vmem:[%s1155_s10] sm:$0xff] %v671_v7  ;;  %v669_v11 = vpop.f32.mrb[3].mxu0 }
 0x140   : > { %695 = vst [vmem:[%s1155_s10 + $0x8] sm:$0xff] %v693_v19 }
 0x146   : > { %v678_v17 = vld [vmem:[%s1155_s10] sm:$0xff] }
 0x147   : > { %v692_v18 = vadd.f32 %v685_v15, %v678_v17 }
 0x149   : > { %694 = vst [vmem:[%s1155_s10] sm:$0xff] %v692_v18 }
 0x14a PF: > { %s13_s16 = sadd.s32 1, %s998_s16   ;;  %s1218_s12 = smov %s986_s13 }
 0x14b   : > { %p10_p10 = scmp.ge.s32.totalorder %s13_s16, 4   ;;  %s1219_s13 = smov %s1056_s20 }
 0x14c   : > { %s1220_s14 = smov %s994_s15  ;;  %s1221_s15 = smov %s1223_s17 }
 0x14d   :  { %12 = sbr.rel (!%p10_p10) target bundleno = 3 (0x3), region = 119 }

// kernel: resnet18_forward.41
= control target key start
LH: loop header
LB: loop body
LE: loop exit
PB: predicated region body
PF: predicated region fallthrough
CT: control target
= control target key end

     0   :  { %s1606_s15 = smov 0   ;;  %s1608_s16 = smov 0   ;;  %s1933_s0 = inlined_call_operand.vmem [shape: bf16[8,4608], index: 0, kind: input, shape index: {}]   ;;  %s1934_s1 = inlined_call_operand.vmem [shape: bf16[4608,512], index: 1, kind: input, shape index: {}]   ;;  %s1935_s2 = inlined_call_operand.vmem [shape: f32[1,512], index: 2, kind: input, shape index: {}]   ;;  %s1936_s3 = inlined_call_operand.vmem [shape: f32[8,512], index: 3, kind: input, shape index: {}]   ;;  %s1937_s4 = inlined_call_operand.vmem [shape: f32[8,512], index: 4, kind: output, shape index: {}]  }
   0x1   :  { %s1610_s17 = smov 0   ;;  %s1612_s18 = smov 0  }
   0x2   :  { %s1614_s19 = smov 0   ;;  %s1616_s20 = smov 0  }
   0x3   :  { %s1618_s21 = smov 0  }
   0x4 LB: > { %s26_s22 = sadd.s32 1, %s1570_s19  ;;  %s29_s23 = sadd.s32 1, %s1574_s20  ;;  %s1578_s21 = sphi %s1618_s21, %s14_s21   ;;  %s1574_s20 = sphi %s1616_s20, %s1943_s20   ;;  %s1570_s19 = sphi %s1614_s19, %s1942_s19   ;;  %s1566_s18 = sphi %s1612_s18, %s1941_s18   ;;  %s1562_s17 = sphi %s1610_s17, %s1940_s17   ;;  %s1558_s16 = sphi %s1608_s16, %s1939_s16   ;;  %s1554_s15 = sphi %s1606_s15, %s1938_s15  }
   0x5   : > { %p27_p0 = scmp.ge.s32.totalorder %s26_s22, 9  ;;  %p77_p1 = scmp.ne.s32.totalorder %s1558_s16, %s1554_s15 }
   0x6   : > { %p78_p2 = scmp.eq.s32.totalorder %s1578_s21, 0  ;;  %s70_s27 = sadd.s32 1, %s1558_s16 }
   0x7   : > { %s1945_s22 = smov (%p27_p0, %s26_s22), 0  ;;  %s1947_s23 = smov (!%p27_p0, %s29_s23), %s1574_s20 }
   0x8   : > { %p79_p3 = por %p78_p2, %p77_p1  ;;  %p31_p4 = scmp.ge.s32.totalorder %s1947_s23, 2 }
   0x9   : > { %s65_s24 = ssub.s32 %s1570_s19, %s1945_s22  ;;  %p1279_p6 = scmp.ge.s32.totalorder %s1578_s21, 18 }
   0xa   : > { %s1949_s23 = smov (%p31_p4, %s1947_s23), 0 }
   0xb   : > { %s66_s25 = ssub.s32 %s1574_s20, %s1949_s23  ;;  %185 = sbr.rel (%p1279_p6) target bundleno = 57 (0x39), region = 16 }
   0xc   : > { %s67_s26 = sor.u32 %s66_s25, %s65_s24 }
   0xd   : > { %p68_p5 = scmp.eq.s32.totalorder %s67_s26, 0 }
   0xf   : > { %s1657_s28 = scalar_select %p68_p5, %s1558_s16, %s70_s27  }
  0x12   : > { %201 = sbr.rel (!%p79_p3) target bundleno = 57 (0x39), region = 24  ;;  %s203_s29 = sand.u32 (%p79_p3), 1, %s1558_s16  }
  0x13   : > { %s1282_s30 = sshll.u32 (%p79_p3), %s1574_s20, 1  ;;  %s1280_s5 = sshll.u32 (%p79_p3), %s203_s29, 9 }
  0x14   : > { %s1366_s6 = sshll.u32 (%p79_p3), %s1570_s19, 8  ;;  %s1671_s12 = scalar_lea.vmem (%p79_p3), [#allocation2], %s1280_s5 }
  0x15   : > { %s209_s7 = sadd.s32 (%p79_p3), %s1366_s6, %s1282_s30 }
  0x16   : > { %s1284_s8 = sshll.u32 (%p79_p3), %s209_s7, 2 }
  0x17   : > { %s1666_s11 = scalar_lea.vmem (%p79_p3), %s1934_s1, %s1284_s8 }
  0x18   : > { %v365_v0 = vld [vmem:[%s1666_s11] sm:$0xff] (%p79_p3)  ;;  %v367_v1 = vld [vmem:[%s1666_s11 + $0x10] sm:$0xff] (%p79_p3) }
  0x19   : > { %v369_v2 = vld [vmem:[%s1666_s11 + $0x20] sm:$0xff]  ;;  %366 = vst [vmem:[%s1671_s12] sm:$0xff] %v365_v0  ;;  %368 = vst [vmem:[%s1671_s12 + $0x8] sm:$0xff] %v367_v1  ;;  %v371_v3 = vld [vmem:[%s1666_s11 + $0x30] sm:$0xff] }
  0x1a   : > { %370 = vst [vmem:[%s1671_s12 + $0x10] sm:$0xff] %v369_v2  ;;  %v373_v4 = vld [vmem:[%s1666_s11 + $0x40] sm:$0xff]  ;;  %v375_v5 = vld [vmem:[%s1666_s11 + $0x50] sm:$0xff]  ;;  %372 = vst [vmem:[%s1671_s12 + $0x18] sm:$0xff] %v371_v3 }
  0x1b   : > { %374 = vst [vmem:[%s1671_s12 + $0x20] sm:$0xff] %v373_v4  ;;  %376 = vst [vmem:[%s1671_s12 + $0x28] sm:$0xff] %v375_v5  ;;  %v377_v6 = vld [vmem:[%s1666_s11 + $0x60] sm:$0xff]  ;;  %v379_v7 = vld [vmem:[%s1666_s11 + $0x70] sm:$0xff] }
  0x1c   : > { %v381_v8 = vld [vmem:[%s1666_s11 + $0x80] sm:$0xff]  ;;  %378 = vst [vmem:[%s1671_s12 + $0x30] sm:$0xff] %v377_v6  ;;  %380 = vst [vmem:[%s1671_s12 + $0x38] sm:$0xff] %v379_v7  ;;  %v383_v9 = vld [vmem:[%s1666_s11 + $0x90] sm:$0xff] }
  0x1d   : > { %382 = vst [vmem:[%s1671_s12 + $0x40] sm:$0xff] %v381_v8  ;;  %v385_v10 = vld [vmem:[%s1666_s11 + $0xa0] sm:$0xff]  ;;  %v387_v11 = vld [vmem:[%s1666_s11 + $0xb0] sm:$0xff]  ;;  %384 = vst [vmem:[%s1671_s12 + $0x48] sm:$0xff] %v383_v9 }
  0x1e   : > { %386 = vst [vmem:[%s1671_s12 + $0x50] sm:$0xff] %v385_v10  ;;  %388 = vst [vmem:[%s1671_s12 + $0x58] sm:$0xff] %v387_v11  ;;  %v389_v12 = vld [vmem:[%s1666_s11 + $0xc0] sm:$0xff]  ;;  %v391_v13 = vld [vmem:[%s1666_s11 + $0xd0] sm:$0xff] }
  0x1f   : > { %v393_v14 = vld [vmem:[%s1666_s11 + $0xe0] sm:$0xff]  ;;  %390 = vst [vmem:[%s1671_s12 + $0x60] sm:$0xff] %v389_v12  ;;  %392 = vst [vmem:[%s1671_s12 + $0x68] sm:$0xff] %v391_v13  ;;  %v395_v15 = vld [vmem:[%s1666_s11 + $0xf0] sm:$0xff] }
  0x20   : > { %394 = vst [vmem:[%s1671_s12 + $0x70] sm:$0xff] %v393_v14  ;;  %v397_v16 = vld [vmem:[%s1666_s11 + $0x100] sm:$0xff]  ;;  %v399_v17 = vld [vmem:[%s1666_s11 + $0x110] sm:$0xff]  ;;  %396 = vst [vmem:[%s1671_s12 + $0x78] sm:$0xff] %v395_v15 }
  0x21   : > { %398 = vst [vmem:[%s1671_s12 + $0x80] sm:$0xff] %v397_v16  ;;  %400 = vst [vmem:[%s1671_s12 + $0x88] sm:$0xff] %v399_v17  ;;  %v401_v18 = vld [vmem:[%s1666_s11 + $0x120] sm:$0xff]  ;;  %v403_v19 = vld [vmem:[%s1666_s11 + $0x130] sm:$0xff] }
  0x22   : > { %v405_v20 = vld [vmem:[%s1666_s11 + $0x140] sm:$0xff]  ;;  %402 = vst [vmem:[%s1671_s12 + $0x90] sm:$0xff] %v401_v18  ;;  %404 = vst [vmem:[%s1671_s12 + $0x98] sm:$0xff] %v403_v19  ;;  %v407_v21 = vld [vmem:[%s1666_s11 + $0x150] sm:$0xff] }
  0x23   : > { %406 = vst [vmem:[%s1671_s12 + $0xa0] sm:$0xff] %v405_v20  ;;  %v409_v22 = vld [vmem:[%s1666_s11 + $0x160] sm:$0xff]  ;;  %v411_v23 = vld [vmem:[%s1666_s11 + $0x170] sm:$0xff]  ;;  %408 = vst [vmem:[%s1671_s12 + $0xa8] sm:$0xff] %v407_v21 }
  0x24   : > { %410 = vst [vmem:[%s1671_s12 + $0xb0] sm:$0xff] %v409_v22  ;;  %412 = vst [vmem:[%s1671_s12 + $0xb8] sm:$0xff] %v411_v23  ;;  %v413_v24 = vld [vmem:[%s1666_s11 + $0x180] sm:$0xff]  ;;  %v415_v25 = vld [vmem:[%s1666_s11 + $0x190] sm:$0xff] }
  0x25   : > { %v417_v26 = vld [vmem:[%s1666_s11 + $0x1a0] sm:$0xff]  ;;  %414 = vst [vmem:[%s1671_s12 + $0xc0] sm:$0xff] %v413_v24  ;;  %416 = vst [vmem:[%s1671_s12 + $0xc8] sm:$0xff] %v415_v25  ;;  %v419_v27 = vld [vmem:[%s1666_s11 + $0x1b0] sm:$0xff] }
  0x26   : > { %418 = vst [vmem:[%s1671_s12 + $0xd0] sm:$0xff] %v417_v26  ;;  %v421_v28 = vld [vmem:[%s1666_s11 + $0x1c0] sm:$0xff]  ;;  %v423_v29 = vld [vmem:[%s1666_s11 + $0x1d0] sm:$0xff]  ;;  %420 = vst [vmem:[%s1671_s12 + $0xd8] sm:$0xff] %v419_v27 }
  0x27   : > { %422 = vst [vmem:[%s1671_s12 + $0xe0] sm:$0xff] %v421_v28  ;;  %424 = vst [vmem:[%s1671_s12 + $0xe8] sm:$0xff] %v423_v29  ;;  %v425_v30 = vld [vmem:[%s1666_s11 + $0x1e0] sm:$0xff]  ;;  %v427_v31 = vld [vmem:[%s1666_s11 + $0x1f0] sm:$0xff] }
  0x28   : > { %v429_v32 = vld [vmem:[%s1666_s11 + $0x200] sm:$0xff]  ;;  %426 = vst [vmem:[%s1671_s12 + $0xf0] sm:$0xff] %v425_v30  ;;  %428 = vst [vmem:[%s1671_s12 + $0xf8] sm:$0xff] %v427_v31  ;;  %v431_v33 = vld [vmem:[%s1666_s11 + $0x210] sm:$0xff] }
  0x29   : > { %430 = vst [vmem:[%s1671_s12 + $0x100] sm:$0xff] %v429_v32  ;;  %v433_v34 = vld [vmem:[%s1666_s11 + $0x220] sm:$0xff]  ;;  %v435_v35 = vld [vmem:[%s1666_s11 + $0x230] sm:$0xff]  ;;  %432 = vst [vmem:[%s1671_s12 + $0x108] sm:$0xff] %v431_v33 }
  0x2a   : > { %434 = vst [vmem:[%s1671_s12 + $0x110] sm:$0xff] %v433_v34  ;;  %436 = vst [vmem:[%s1671_s12 + $0x118] sm:$0xff] %v435_v35  ;;  %v437_v36 = vld [vmem:[%s1666_s11 + $0x240] sm:$0xff]  ;;  %v439_v37 = vld [vmem:[%s1666_s11 + $0x250] sm:$0xff] }
  0x2b   : > { %v441_v38 = vld [vmem:[%s1666_s11 + $0x260] sm:$0xff]  ;;  %438 = vst [vmem:[%s1671_s12 + $0x120] sm:$0xff] %v437_v36  ;;  %440 = vst [vmem:[%s1671_s12 + $0x128] sm:$0xff] %v439_v37  ;;  %v443_v39 = vld [vmem:[%s1666_s11 + $0x270] sm:$0xff] }
  0x2c   : > { %442 = vst [vmem:[%s1671_s12 + $0x130] sm:$0xff] %v441_v38  ;;  %v445_v40 = vld [vmem:[%s1666_s11 + $0x280] sm:$0xff]  ;;  %v447_v41 = vld [vmem:[%s1666_s11 + $0x290] sm:$0xff]  ;;  %444 = vst [vmem:[%s1671_s12 + $0x138] sm:$0xff] %v443_v39 }
  0x2d   : > { %446 = vst [vmem:[%s1671_s12 + $0x140] sm:$0xff] %v445_v40  ;;  %448 = vst [vmem:[%s1671_s12 + $0x148] sm:$0xff] %v447_v41  ;;  %v449_v42 = vld [vmem:[%s1666_s11 + $0x2a0] sm:$0xff]  ;;  %v451_v43 = vld [vmem:[%s1666_s11 + $0x2b0] sm:$0xff] }
  0x2e   : > { %v453_v44 = vld [vmem:[%s1666_s11 + $0x2c0] sm:$0xff]  ;;  %450 = vst [vmem:[%s1671_s12 + $0x150] sm:$0xff] %v449_v42  ;;  %452 = vst [vmem:[%s1671_s12 + $0x158] sm:$0xff] %v451_v43  ;;  %v455_v45 = vld [vmem:[%s1666_s11 + $0x2d0] sm:$0xff] }
  0x2f   : > { %454 = vst [vmem:[%s1671_s12 + $0x160] sm:$0xff] %v453_v44  ;;  %v457_v46 = vld [vmem:[%s1666_s11 + $0x2e0] sm:$0xff]  ;;  %v459_v47 = vld [vmem:[%s1666_s11 + $0x2f0] sm:$0xff]  ;;  %456 = vst [vmem:[%s1671_s12 + $0x168] sm:$0xff] %v455_v45 }
  0x30   : > { %458 = vst [vmem:[%s1671_s12 + $0x170] sm:$0xff] %v457_v46  ;;  %460 = vst [vmem:[%s1671_s12 + $0x178] sm:$0xff] %v459_v47  ;;  %v461_v48 = vld [vmem:[%s1666_s11 + $0x300] sm:$0xff]  ;;  %v463_v49 = vld [vmem:[%s1666_s11 + $0x310] sm:$0xff] }
  0x31   : > { %v465_v50 = vld [vmem:[%s1666_s11 + $0x320] sm:$0xff]  ;;  %462 = vst [vmem:[%s1671_s12 + $0x180] sm:$0xff] %v461_v48  ;;  %464 = vst [vmem:[%s1671_s12 + $0x188] sm:$0xff] %v463_v49  ;;  %v467_v51 = vld [vmem:[%s1666_s11 + $0x330] sm:$0xff] }
  0x32   : > { %466 = vst [vmem:[%s1671_s12 + $0x190] sm:$0xff] %v465_v50  ;;  %v469_v52 = vld [vmem:[%s1666_s11 + $0x340] sm:$0xff]  ;;  %v471_v53 = vld [vmem:[%s1666_s11 + $0x350] sm:$0xff]  ;;  %468 = vst [vmem:[%s1671_s12 + $0x198] sm:$0xff] %v467_v51 }
  0x33   : > { %470 = vst [vmem:[%s1671_s12 + $0x1a0] sm:$0xff] %v469_v52  ;;  %472 = vst [vmem:[%s1671_s12 + $0x1a8] sm:$0xff] %v471_v53  ;;  %v473_v54 = vld [vmem:[%s1666_s11 + $0x360] sm:$0xff]  ;;  %v475_v55 = vld [vmem:[%s1666_s11 + $0x370] sm:$0xff] }
  0x34   : > { %v477_v56 = vld [vmem:[%s1666_s11 + $0x380] sm:$0xff]  ;;  %474 = vst [vmem:[%s1671_s12 + $0x1b0] sm:$0xff] %v473_v54  ;;  %476 = vst [vmem:[%s1671_s12 + $0x1b8] sm:$0xff] %v475_v55  ;;  %v479_v57 = vld [vmem:[%s1666_s11 + $0x390] sm:$0xff] }
  0x35   : > { %478 = vst [vmem:[%s1671_s12 + $0x1c0] sm:$0xff] %v477_v56  ;;  %v481_v58 = vld [vmem:[%s1666_s11 + $0x3a0] sm:$0xff]  ;;  %v483_v59 = vld [vmem:[%s1666_s11 + $0x3b0] sm:$0xff]  ;;  %480 = vst [vmem:[%s1671_s12 + $0x1c8] sm:$0xff] %v479_v57 }
  0x36   : > { %482 = vst [vmem:[%s1671_s12 + $0x1d0] sm:$0xff] %v481_v58  ;;  %484 = vst [vmem:[%s1671_s12 + $0x1d8] sm:$0xff] %v483_v59  ;;  %v485_v60 = vld [vmem:[%s1666_s11 + $0x3c0] sm:$0xff]  ;;  %v487_v61 = vld [vmem:[%s1666_s11 + $0x3d0] sm:$0xff] }
  0x37   : > { %v489_v62 = vld [vmem:[%s1666_s11 + $0x3e0] sm:$0xff]  ;;  %486 = vst [vmem:[%s1671_s12 + $0x1e0] sm:$0xff] %v485_v60  ;;  %488 = vst [vmem:[%s1671_s12 + $0x1e8] sm:$0xff] %v487_v61  ;;  %v491_v63 = vld [vmem:[%s1666_s11 + $0x3f0] sm:$0xff] }
  0x38   : > { %490 = vst [vmem:[%s1671_s12 + $0x1f0] sm:$0xff] %v489_v62  ;;  %492 = vst [vmem:[%s1671_s12 + $0x1f8] sm:$0xff] %v491_v63 }
  0x39 PF: > { %p1285_p7 = scmp.ge.s32.totalorder %s1578_s21, 1  ;;  %p518_p8 = scmp.lt.s32.totalorder %s1578_s21, 19 }
  0x3b   : > { %p519_p9 = pnand %p1285_p7, %p518_p8 }
  0x3c   : > { %s525_s13 = sand.u32 (!%p519_p9), 1, %s1554_s15   ;;  %s1287_s14 = sshll.u32 (!%p519_p9), %s1562_s17, 2 }
  0x3d   : > { %522 = sbr.rel (%p519_p9) target bundleno = 377 (0x179), region = 70  ;;  %s1286_s24 = sshll.u32 (!%p519_p9), %s525_s13, 9 }
  0x3e   : > { %p579_p10 = scmp.lt.s32.totalorder (!%p519_p9), %s1287_s14, 35  ;;  %s1289_s25 = sshll.u32 (!%p519_p9), %s1566_s18, 1 }
  0x3f   : > { %p589_p11 = scmp.lt.s32.totalorder (!%p519_p9), %s1289_s25, 3  ;;  %s1825_s13 = scalar_lea.vmem (!%p519_p9), [#allocation2], %s1286_s24 }
  0x40   : > { %p1294_p12 = scmp.ne.s32.totalorder (!%p519_p9), %s1562_s17, 0 }
  0x44   : > { %s1951_s14 = smov (!%p579_p10, %s1287_s14), 35  ;;  %s1953_s25 = smov (!%p589_p11, %s1289_s25), 3 }
  0x45   : > { %s1288_s26 = sshll.u32 %s1951_s14, 2  ;;  %s591_s15 = scalar_lea.vmem %s1935_s2, %s1953_s25  ;;  %v1580_v0 = vmov (!%p1294_p12), 0.0  }
  0x46   : > { %s1806_s30 = scalar_lea.vmem %s1933_s0, %s1288_s26  ;;  %s1291_s7 = sshll.u32 %s1953_s25, 3 }
  0x47   : > { %s1818_s18 = scalar_lea.vmem %s1936_s3, %s1291_s7  ;;  %s1823_s12 = scalar_lea.vmem %s1937_s4, %s1291_s7 }
  0x48   : > { %616 = sbr.rel (%p1294_p12) target bundleno = 79 (0x4f), region = 78  ;;  %617 = vst [vmem:[%s1823_s12] sm:$0xff] (!%p1294_p12), %v1580_v0  ;;  %618 = vst [vmem:[%s1823_s12 + $0x8] sm:$0xff] (!%p1294_p12), %v1580_v0 }
  0x4f PF: > { %v1424_v1 = vld [vmem:[%s1825_s13 + $0x4] ss:$8 sps:$4 sm:$0xff]   ;;  %v1428_v3 = vld [vmem:[%s1825_s13] ss:$8 sps:$4 sm:$0xff]   ;;  %v1430_v5 = vld [vmem:[%s1825_s13 + $0x14] ss:$8 sps:$4 sm:$0xff]  }
  0x50   : > { %v1426_v2 = vld [vmem:[%s1825_s13 + $0x104] ss:$8 sps:$4 sm:$0xff]   ;;  %1021 = vmatprep.subr.bf16.mxu0 %v1424_v1  ;;  %v1429_v4 = vld [vmem:[%s1825_s13 + $0x100] ss:$8 sps:$4 sm:$0xff]   ;;  %v1432_v6 = vld [vmem:[%s1825_s13 + $0x114] ss:$8 sps:$4 sm:$0xff]  }
  0x51   : > { %1062 = vmatprep.subr.bf16.mxu1 %v1426_v2  ;;  %1022 = vmatpush1.bf16.msra.mxu0 %v1428_v3  ;;  %v1434_v7 = vld [vmem:[%s1825_s13 + $0x10] ss:$8 sps:$4 sm:$0xff]   ;;  %v1436_v9 = vld [vmem:[%s1825_s13 + $0x24] ss:$8 sps:$4 sm:$0xff]   ;;  %v1440_v11 = vld [vmem:[%s1825_s13 + $0x20] ss:$8 sps:$4 sm:$0xff]  }
  0x52   : > { %1063 = vmatpush1.bf16.msra.mxu1 %v1429_v4  ;;  %1023 = vmatprep.subr.bf16.mxu0 %v1430_v5  ;;  %v1435_v8 = vld [vmem:[%s1825_s13 + $0x110] ss:$8 sps:$4 sm:$0xff]   ;;  %v1438_v10 = vld [vmem:[%s1825_s13 + $0x124] ss:$8 sps:$4 sm:$0xff]   ;;  %v1441_v12 = vld [vmem:[%s1825_s13 + $0x120] ss:$8 sps:$4 sm:$0xff]  }
  0x53   : > { %1064 = vmatprep.subr.bf16.mxu1 %v1432_v6  ;;  %v1442_v13 = vld [vmem:[%s1825_s13 + $0x34] ss:$8 sps:$4 sm:$0xff]   ;;  %v1446_v15 = vld [vmem:[%s1825_s13 + $0x30] ss:$8 sps:$4 sm:$0xff]   ;;  %v1448_v17 = vld [vmem:[%s1825_s13 + $0x44] ss:$8 sps:$4 sm:$0xff]  }
  0x54   : > { %v1444_v14 = vld [vmem:[%s1825_s13 + $0x134] ss:$8 sps:$4 sm:$0xff]   ;;  %v1447_v16 = vld [vmem:[%s1825_s13 + $0x130] ss:$8 sps:$4 sm:$0xff]   ;;  %v1450_v18 = vld [vmem:[%s1825_s13 + $0x144] ss:$8 sps:$4 sm:$0xff]  }
  0x55   : > { %1024 = vmatpush1.bf16.msra.mxu0 %v1434_v7  ;;  %v1452_v19 = vld [vmem:[%s1825_s13 + $0x40] ss:$8 sps:$4 sm:$0xff]   ;;  %v1454_v21 = vld [vmem:[%s1825_s13 + $0x54] ss:$8 sps:$4 sm:$0xff]   ;;  %v1458_v23 = vld [vmem:[%s1825_s13 + $0x50] ss:$8 sps:$4 sm:$0xff]  }
  0x56   : > { %1065 = vmatpush1.bf16.msra.mxu1 %v1435_v8  ;;  %1025 = vmatprep.subr.bf16.mxu0 %v1436_v9  ;;  %v1453_v20 = vld [vmem:[%s1825_s13 + $0x140] ss:$8 sps:$4 sm:$0xff]   ;;  %v1456_v22 = vld [vmem:[%s1825_s13 + $0x154] ss:$8 sps:$4 sm:$0xff]   ;;  %v1459_v24 = vld [vmem:[%s1825_s13 + $0x150] ss:$8 sps:$4 sm:$0xff]  }
  0x57   : > { %1066 = vmatprep.subr.bf16.mxu1 %v1438_v10  ;;  %v1460_v25 = vld [vmem:[%s1825_s13 + $0x64] ss:$8 sps:$4 sm:$0xff]   ;;  %v1464_v27 = vld [vmem:[%s1825_s13 + $0x60] ss:$8 sps:$4 sm:$0xff]   ;;  %v1466_v29 = vld [vmem:[%s1825_s13 + $0x74] ss:$8 sps:$4 sm:$0xff]  }
  0x58   : > { %v1462_v26 = vld [vmem:[%s1825_s13 + $0x164] ss:$8 sps:$4 sm:$0xff]   ;;  %v1465_v28 = vld [vmem:[%s1825_s13 + $0x160] ss:$8 sps:$4 sm:$0xff]   ;;  %v1468_v30 = vld [vmem:[%s1825_s13 + $0x174] ss:$8 sps:$4 sm:$0xff]  }
  0x59   : > { %1026 = vmatpush1.bf16.msra.mxu0 %v1440_v11  ;;  %v1470_v31 = vld [vmem:[%s1825_s13 + $0x70] ss:$8 sps:$4 sm:$0xff]   ;;  %v1472_v33 = vld [vmem:[%s1825_s13 + $0x84] ss:$8 sps:$4 sm:$0xff]   ;;  %v1476_v35 = vld [vmem:[%s1825_s13 + $0x80] ss:$8 sps:$4 sm:$0xff]  }
  0x5a   : > { %1067 = vmatpush1.bf16.msra.mxu1 %v1441_v12  ;;  %1027 = vmatprep.subr.bf16.mxu0 %v1442_v13  ;;  %v1471_v32 = vld [vmem:[%s1825_s13 + $0x170] ss:$8 sps:$4 sm:$0xff]   ;;  %v1474_v34 = vld [vmem:[%s1825_s13 + $0x184] ss:$8 sps:$4 sm:$0xff]   ;;  %v1477_v36 = vld [vmem:[%s1825_s13 + $0x180] ss:$8 sps:$4 sm:$0xff]  }
  0x5b   : > { %1068 = vmatprep.subr.bf16.mxu1 %v1444_v14  ;;  %v1478_v37 = vld [vmem:[%s1825_s13 + $0x94] ss:$8 sps:$4 sm:$0xff]   ;;  %v1482_v39 = vld [vmem:[%s1825_s13 + $0x90] ss:$8 sps:$4 sm:$0xff]   ;;  %v1484_v41 = vld [vmem:[%s1825_s13 + $0xa4] ss:$8 sps:$4 sm:$0xff]  }
  0x5c   : > { %v1480_v38 = vld [vmem:[%s1825_s13 + $0x194] ss:$8 sps:$4 sm:$0xff]   ;;  %v1483_v40 = vld [vmem:[%s1825_s13 + $0x190] ss:$8 sps:$4 sm:$0xff]   ;;  %v1486_v42 = vld [vmem:[%s1825_s13 + $0x1a4] ss:$8 sps:$4 sm:$0xff]  }
  0x5d   : > { %1028 = vmatpush1.bf16.msra.mxu0 %v1446_v15  ;;  %v1488_v43 = vld [vmem:[%s1825_s13 + $0xa0] ss:$8 sps:$4 sm:$0xff]   ;;  %v1490_v45 = vld [vmem:[%s1825_s13 + $0xb4] ss:$8 sps:$4 sm:$0xff]   ;;  %v1494_v50 = vld [vmem:[%s1825_s13 + $0xb0] ss:$8 sps:$4 sm:$0xff]  }
  0x5e   : > { %1069 = vmatpush1.bf16.msra.mxu1 %v1447_v16  ;;  %1029 = vmatprep.subr.bf16.mxu0 %v1448_v17  ;;  %v1489_v44 = vld [vmem:[%s1825_s13 + $0x1a0] ss:$8 sps:$4 sm:$0xff]   ;;  %v1492_v46 = vld [vmem:[%s1825_s13 + $0x1b4] ss:$8 sps:$4 sm:$0xff]   ;;  %v1495_v51 = vld [vmem:[%s1825_s13 + $0x1b0] ss:$8 sps:$4 sm:$0xff]  }
  0x5f   : > { %1070 = vmatprep.subr.bf16.mxu1 %v1450_v18  ;;  %v621_v47 = vld [vmem:[%s1806_s30] sm:$0xff]  ;;  %v622_v49 = vld [vmem:[%s1806_s30 + $0x8] sm:$0xff]  ;;  %v1502_v57 = vld [vmem:[%s1825_s13 + $0xd4] ss:$8 sps:$4 sm:$0xff]   ;;  %p1363_p13 = scmp.ne.s32.totalorder %s1562_s17, 8 }
  0x60   : > { %v1296_v48 = vcombine.high %v621_v47, %v621_v47  ;;  %v1298_v52 = vcombine.high %v622_v49, %v622_v49  ;;  %v1496_v53 = vld [vmem:[%s1825_s13 + $0xc4] ss:$8 sps:$4 sm:$0xff]   ;;  %v1500_v55 = vld [vmem:[%s1825_s13 + $0xc0] ss:$8 sps:$4 sm:$0xff]   ;;  %v1504_v58 = vld [vmem:[%s1825_s13 + $0x1d4] ss:$8 sps:$4 sm:$0xff]   ;;  %v1295_v5 = vcombine.low %v621_v47, %v621_v47  ;;  %v1297_v6 = vcombine.low %v622_v49, %v622_v49 }
  0x61   : > { %1030 = vmatpush1.bf16.msra.mxu0 %v1452_v19  ;;  %v1498_v54 = vld [vmem:[%s1825_s13 + $0x1c4] ss:$8 sps:$4 sm:$0xff]   ;;  %v1501_v56 = vld [vmem:[%s1825_s13 + $0x1c0] ss:$8 sps:$4 sm:$0xff]   ;;  %v1506_v59 = vld [vmem:[%s1825_s13 + $0xd0] ss:$8 sps:$4 sm:$0xff]  }
  0x62   : > { %1071 = vmatpush1.bf16.msra.mxu1 %v1453_v20  ;;  %1031 = vmatprep.subr.bf16.mxu0 %v1454_v21  ;;  %v1507_v60 = vld [vmem:[%s1825_s13 + $0x1d0] ss:$8 sps:$4 sm:$0xff]   ;;  %v1508_v61 = vld [vmem:[%s1825_s13 + $0xe4] ss:$8 sps:$4 sm:$0xff]   ;;  %v1512_v63 = vld [vmem:[%s1825_s13 + $0xe0] ss:$8 sps:$4 sm:$0xff]   ;;  %v1115_v21 = vlaneseq (!%p1363_p13) }
  0x63   : > { %1072 = vmatprep.subr.bf16.mxu1 %v1456_v22  ;;  %1053 = vmatprep.mubr.bf16.mxu0 %v1296_v48  ;;  %v1510_v62 = vld [vmem:[%s1825_s13 + $0x1e4] ss:$8 sps:$4 sm:$0xff]   ;;  %v1513_v0 = vld [vmem:[%s1825_s13 + $0x1e0] ss:$8 sps:$4 sm:$0xff]   ;;  %v1514_v1 = vld [vmem:[%s1825_s13 + $0xf4] ss:$8 sps:$4 sm:$0xff]  }
  0x64   : > { %1094 = vmatprep.mubr.bf16.mxu1 %v1298_v52  ;;  %v1516_v2 = vld [vmem:[%s1825_s13 + $0x1f4] ss:$8 sps:$4 sm:$0xff]   ;;  %v1518_v3 = vld [vmem:[%s1825_s13 + $0xf0] ss:$8 sps:$4 sm:$0xff]   ;;  %v619_v8 = vld [vmem:[%s1823_s12] sm:$0xff]  ;;  %v1116_v22 = vshrl.u32 (!%p1363_p13), %v1115_v21, 7 }
  0x65   : > { %1032 = vmatpush1.bf16.msra.mxu0 %v1458_v23  ;;  %v1519_v4 = vld [vmem:[%s1825_s13 + $0x1f0] ss:$8 sps:$4 sm:$0xff]   ;;  %v620_v12 = vld [vmem:[%s1823_s12 + $0x8] sm:$0xff]  ;;  %v1113_v23 = vld [vmem:[%s591_s15] sm:$0x3] (!%p1363_p13) }
  0x66   : > { %1073 = vmatpush1.bf16.msra.mxu1 %v1459_v24  ;;  %1033 = vmatprep.subr.bf16.mxu0 %v1460_v25  ;;  %v1117_v24 = vsub.s32 (!%p1363_p13), 0, %v1116_v22  ;;  %v1121_v25 = vsub.s32 (!%p1363_p13), 1, %v1116_v22 }
  0x67   : > { %1074 = vmatprep.subr.bf16.mxu1 %v1462_v26 }
  0x69   : > { %1034 = vmatpush1.bf16.msra.mxu0 %v1464_v27 }
  0x6a   : > { %1075 = vmatpush1.bf16.msra.mxu1 %v1465_v28  ;;  %1035 = vmatprep.subr.bf16.mxu0 %v1466_v29  ;;  %v1118_v28 = vrot.slane (!%p1363_p13), %v1113_v23, %v1117_v24  ;;  %v1122_v29 = vrot.slane (!%p1363_p13), %v1113_v23, %v1121_v25 }
  0x6b   : > { %1076 = vmatprep.subr.bf16.mxu1 %v1468_v30  ;;  %v1127_v30 = vld [vmem:[%s1818_s18] sm:$0xff] (!%p1363_p13) }
  0x6d   : > { %1036 = vmatpush1.bf16.msra.mxu0 %v1470_v31  ;;  %v1128_v31 = vld [vmem:[%s1818_s18 + $0x8] sm:$0xff] (!%p1363_p13) }
  0x6e   : > { %1077 = vmatpush1.bf16.msra.mxu1 %v1471_v32  ;;  %1037 = vmatprep.subr.bf16.mxu0 %v1472_v33 }
  0x6f   : > { %1078 = vmatprep.subr.bf16.mxu1 %v1474_v34 }
  0x71   : > { %1038 = vmatpush1.bf16.msra.mxu0 %v1476_v35 }
  0x72   : > { %1079 = vmatpush1.bf16.msra.mxu1 %v1477_v36  ;;  %1039 = vmatprep.subr.bf16.mxu0 %v1478_v37 }
  0x73   : > { %1080 = vmatprep.subr.bf16.mxu1 %v1480_v38 }
  0x75   : > { %1040 = vmatpush1.bf16.msra.mxu0 %v1482_v39 }
  0x76   : > { %1081 = vmatpush1.bf16.msra.mxu1 %v1483_v40  ;;  %1041 = vmatprep.subr.bf16.mxu0 %v1484_v41 }
  0x77   : > { %1082 = vmatprep.subr.bf16.mxu1 %v1486_v42 }
  0x79   : > { %1042 = vmatpush1.bf16.msra.mxu0 %v1488_v43 }
  0x7a   : > { %1083 = vmatpush1.bf16.msra.mxu1 %v1489_v44  ;;  %1043 = vmatprep.subr.bf16.mxu0 %v1490_v45 }
  0x7b   : > { %1084 = vmatprep.subr.bf16.mxu1 %v1492_v46 }
  0x7d   : > { %1044 = vmatpush1.bf16.msra.mxu0 %v1494_v50 }
  0x7e   : > { %1085 = vmatpush1.bf16.msra.mxu1 %v1495_v51  ;;  %1045 = vmatprep.subr.bf16.mxu0 %v1496_v53 }
  0x7f   : > { %1086 = vmatprep.subr.bf16.mxu1 %v1498_v54 }
  0x81   : > { %1046 = vmatpush1.bf16.msra.mxu0 %v1500_v55 }
  0x82   : > { %1087 = vmatpush1.bf16.msra.mxu1 %v1501_v56  ;;  %1047 = vmatprep.subr.bf16.mxu0 %v1502_v57 }
  0x83   : > { %1088 = vmatprep.subr.bf16.mxu1 %v1504_v58 }
  0x85   : > { %1048 = vmatpush1.bf16.msra.mxu0 %v1506_v59 }
  0x86   : > { %1089 = vmatpush1.bf16.msra.mxu1 %v1507_v60  ;;  %1049 = vmatprep.subr.bf16.mxu0 %v1508_v61 }
  0x87   : > { %1090 = vmatprep.subr.bf16.mxu1 %v1510_v62 }
  0x89   : > { %1050 = vmatpush1.bf16.msra.mxu0 %v1512_v63 }
  0x8a   : > { %1091 = vmatpush1.bf16.msra.mxu1 %v1513_v0  ;;  %1051 = vmatprep.subr.bf16.mxu0 %v1514_v1 }
  0x8b   : > { %1092 = vmatprep.subr.bf16.mxu1 %v1516_v2 }
  0x8d   : > { %1052 = vmatpush1.bf16.msra.mxu0 %v1518_v3 }
  0x8e   : > { %1093 = vmatpush1.bf16.msra.mxu1 %v1519_v4 }
  0x90   : > { %1054 = vmatmul.mubr.bf16.vlgmr.msra.gmra.mrb[0].mxu0 %v1295_v5 }
  0x91   : > { %1095 = vmatmul.mubr.bf16.vlgmr.msra.gmra.mrb[0].mxu1 %v1297_v6 }
 0x163   : > { %v1055_v7 = vpop.f32.mrb[0].mxu0 }
 0x164   : > { %v1096_v9 = vpop.f32.mrb[0].mxu1  ;;  %v1057_v11 = vpop.f32.mrb[1].mxu0  ;;  %1110 = sbr.rel (%p1363_p13) target bundleno = 377 (0x179), region = 82 }
 0x165   : > { %v1097_v10 = vadd.f32 %v1096_v9, %v1055_v7  ;;  %v1098_v13 = vpop.f32.mrb[1].mxu1  ;;  %v1059_v15 = vpop.f32.mrb[2].mxu0 }
 0x166   : > { %v1099_v14 = vadd.f32 %v1098_v13, %v1057_v11  ;;  %v1100_v16 = vpop.f32.mrb[2].mxu1  ;;  %v1060_v18 = vpop.f32.mrb[3].mxu0 }
 0x167   : > { %v1103_v17 = vadd.f32 %v1097_v10, %v619_v8  ;;  %v1101_v19 = vpop.f32.mrb[3].mxu1 }
 0x168   : > { %v1104_v20 = vadd.f32 %v1099_v14, %v620_v12 }
 0x169   : > { %1105 = vst [vmem:[%s1823_s12] sm:$0xff] %v1103_v17 }
 0x16a   : > { %1106 = vst [vmem:[%s1823_s12 + $0x8] sm:$0xff] %v1104_v20 }
 0x170   : > { %v1111_v26 = vld [vmem:[%s1823_s12] sm:$0xff] }
 0x171   : > { %v1112_v27 = vld [vmem:[%s1823_s12 + $0x8] sm:$0xff]  ;;  %v1125_v32 = vadd.f32 %v1118_v28, %v1111_v26 }
 0x172   : > { %v1126_v33 = vadd.f32 %v1122_v29, %v1112_v27 }
 0x173   : > { %v1129_v34 = vadd.f32 %v1127_v30, %v1125_v32 }
 0x174   : > { %v1130_v35 = vadd.f32 %v1128_v31, %v1126_v33 }
 0x175   : > { %v1131_v36 = vmax.f32 %v1129_v34, 0.0 }
 0x176   : > { %v1132_v37 = vmax.f32 %v1130_v35, 0.0 }
 0x177   : > { %1133 = vst [vmem:[%s1823_s12] sm:$0xff] %v1131_v36 }
 0x178   : > { %1134 = vst [vmem:[%s1823_s12 + $0x8] sm:$0xff] %v1132_v37 }
 0x179 PF: > { %s14_s21 = sadd.s32 1, %s1578_s21   ;;  %s1938_s15 = smov %s1558_s16 }
 0x17a   : > { %p11_p0 = scmp.ge.s32.totalorder %s14_s21, 20   ;;  %s1939_s16 = smov %s1657_s28 }
 0x17b   : > { %s1940_s17 = smov %s1570_s19  ;;  %s1941_s18 = smov %s1574_s20 }
 0x17c   : > { %s1942_s19 = smov %s1945_s22  ;;  %s1943_s20 = smov %s1949_s23 }
 0x17d   :  { %13 = sbr.rel (!%p11_p0) target bundleno = 4 (0x4), region = 126 }

// kernel: resnet18_forward.42
= control target key start
LH: loop header
LB: loop body
LE: loop exit
PB: predicated region body
PF: predicated region fallthrough
CT: control target
= control target key end

     0   :  { %s1514_s12 = smov 0   ;;  %s1516_s13 = smov 0   ;;  %s1834_s0 = inlined_call_operand.vmem [shape: bf16[8,4608], index: 0, kind: input, shape index: {}]   ;;  %s1835_s1 = inlined_call_operand.vmem [shape: bf16[4608,512], index: 1, kind: input, shape index: {}]   ;;  %s1836_s2 = inlined_call_operand.vmem [shape: f32[1,512], index: 2, kind: input, shape index: {}]   ;;  %s1837_s3 = inlined_call_operand.vmem [shape: f32[8,512], index: 3, kind: output, shape index: {}]  }
   0x1   :  { %s1518_s14 = smov 0   ;;  %s1520_s15 = smov 0  }
   0x2   :  { %s1522_s16 = smov 0   ;;  %s1524_s17 = smov 0  }
   0x3   :  { %s1526_s18 = smov 0  }
   0x4 LB: > { %s25_s19 = sadd.s32 1, %s1483_s16  ;;  %s28_s20 = sadd.s32 1, %s1487_s17  ;;  %s1491_s18 = sphi %s1526_s18, %s13_s18   ;;  %s1487_s17 = sphi %s1524_s17, %s1843_s17   ;;  %s1483_s16 = sphi %s1522_s16, %s1842_s16   ;;  %s1479_s15 = sphi %s1520_s15, %s1841_s15   ;;  %s1475_s14 = sphi %s1518_s14, %s1840_s14   ;;  %s1471_s13 = sphi %s1516_s13, %s1839_s13   ;;  %s1467_s12 = sphi %s1514_s12, %s1838_s12  }
   0x5   : > { %p26_p0 = scmp.ge.s32.totalorder %s25_s19, 9  ;;  %p76_p1 = scmp.ne.s32.totalorder %s1471_s13, %s1467_s12 }
   0x6   : > { %p77_p2 = scmp.eq.s32.totalorder %s1491_s18, 0  ;;  %s69_s24 = sadd.s32 1, %s1471_s13 }
   0x7   : > { %s1845_s19 = smov (%p26_p0, %s25_s19), 0  ;;  %s1847_s20 = smov (!%p26_p0, %s28_s20), %s1487_s17 }
   0x8   : > { %p78_p3 = por %p77_p2, %p76_p1  ;;  %p30_p4 = scmp.ge.s32.totalorder %s1847_s20, 2 }
   0x9   : > { %s64_s21 = ssub.s32 %s1483_s16, %s1845_s19  ;;  %p1194_p6 = scmp.ge.s32.totalorder %s1491_s18, 18 }
   0xa   : > { %s1849_s20 = smov (%p30_p4, %s1847_s20), 0 }
   0xb   : > { %s65_s22 = ssub.s32 %s1487_s17, %s1849_s20  ;;  %156 = sbr.rel (%p1194_p6) target bundleno = 57 (0x39), region = 16 }
   0xc   : > { %s66_s23 = sor.u32 %s65_s22, %s64_s21 }
   0xd   : > { %p67_p5 = scmp.eq.s32.totalorder %s66_s23, 0 }
   0xf   : > { %s1565_s25 = scalar_select %p67_p5, %s1471_s13, %s69_s24  }
  0x12   : > { %172 = sbr.rel (!%p78_p3) target bundleno = 57 (0x39), region = 24  ;;  %s174_s26 = sand.u32 (%p78_p3), 1, %s1471_s13  }
  0x13   : > { %s1197_s27 = sshll.u32 (%p78_p3), %s1487_s17, 1  ;;  %s1195_s28 = sshll.u32 (%p78_p3), %s174_s26, 9 }
  0x14   : > { %s1279_s29 = sshll.u32 (%p78_p3), %s1483_s16, 8  ;;  %s1579_s8 = scalar_lea.vmem (%p78_p3), [#allocation2], %s1195_s28 }
  0x15   : > { %s180_s30 = sadd.s32 (%p78_p3), %s1279_s29, %s1197_s27 }
  0x16   : > { %s1199_s4 = sshll.u32 (%p78_p3), %s180_s30, 2 }
  0x17   : > { %s1574_s7 = scalar_lea.vmem (%p78_p3), %s1835_s1, %s1199_s4 }
  0x18   : > { %v336_v0 = vld [vmem:[%s1574_s7] sm:$0xff] (%p78_p3)  ;;  %v338_v1 = vld [vmem:[%s1574_s7 + $0x10] sm:$0xff] (%p78_p3) }
  0x19   : > { %v340_v2 = vld [vmem:[%s1574_s7 + $0x20] sm:$0xff]  ;;  %337 = vst [vmem:[%s1579_s8] sm:$0xff] %v336_v0  ;;  %339 = vst [vmem:[%s1579_s8 + $0x8] sm:$0xff] %v338_v1  ;;  %v342_v3 = vld [vmem:[%s1574_s7 + $0x30] sm:$0xff] }
  0x1a   : > { %341 = vst [vmem:[%s1579_s8 + $0x10] sm:$0xff] %v340_v2  ;;  %v344_v4 = vld [vmem:[%s1574_s7 + $0x40] sm:$0xff]  ;;  %v346_v5 = vld [vmem:[%s1574_s7 + $0x50] sm:$0xff]  ;;  %343 = vst [vmem:[%s1579_s8 + $0x18] sm:$0xff] %v342_v3 }
  0x1b   : > { %345 = vst [vmem:[%s1579_s8 + $0x20] sm:$0xff] %v344_v4  ;;  %347 = vst [vmem:[%s1579_s8 + $0x28] sm:$0xff] %v346_v5  ;;  %v348_v6 = vld [vmem:[%s1574_s7 + $0x60] sm:$0xff]  ;;  %v350_v7 = vld [vmem:[%s1574_s7 + $0x70] sm:$0xff] }
  0x1c   : > { %v352_v8 = vld [vmem:[%s1574_s7 + $0x80] sm:$0xff]  ;;  %349 = vst [vmem:[%s1579_s8 + $0x30] sm:$0xff] %v348_v6  ;;  %351 = vst [vmem:[%s1579_s8 + $0x38] sm:$0xff] %v350_v7  ;;  %v354_v9 = vld [vmem:[%s1574_s7 + $0x90] sm:$0xff] }
  0x1d   : > { %353 = vst [vmem:[%s1579_s8 + $0x40] sm:$0xff] %v352_v8  ;;  %v356_v10 = vld [vmem:[%s1574_s7 + $0xa0] sm:$0xff]  ;;  %v358_v11 = vld [vmem:[%s1574_s7 + $0xb0] sm:$0xff]  ;;  %355 = vst [vmem:[%s1579_s8 + $0x48] sm:$0xff] %v354_v9 }
  0x1e   : > { %357 = vst [vmem:[%s1579_s8 + $0x50] sm:$0xff] %v356_v10  ;;  %359 = vst [vmem:[%s1579_s8 + $0x58] sm:$0xff] %v358_v11  ;;  %v360_v12 = vld [vmem:[%s1574_s7 + $0xc0] sm:$0xff]  ;;  %v362_v13 = vld [vmem:[%s1574_s7 + $0xd0] sm:$0xff] }
  0x1f   : > { %v364_v14 = vld [vmem:[%s1574_s7 + $0xe0] sm:$0xff]  ;;  %361 = vst [vmem:[%s1579_s8 + $0x60] sm:$0xff] %v360_v12  ;;  %363 = vst [vmem:[%s1579_s8 + $0x68] sm:$0xff] %v362_v13  ;;  %v366_v15 = vld [vmem:[%s1574_s7 + $0xf0] sm:$0xff] }
  0x20   : > { %365 = vst [vmem:[%s1579_s8 + $0x70] sm:$0xff] %v364_v14  ;;  %v368_v16 = vld [vmem:[%s1574_s7 + $0x100] sm:$0xff]  ;;  %v370_v17 = vld [vmem:[%s1574_s7 + $0x110] sm:$0xff]  ;;  %367 = vst [vmem:[%s1579_s8 + $0x78] sm:$0xff] %v366_v15 }
  0x21   : > { %369 = vst [vmem:[%s1579_s8 + $0x80] sm:$0xff] %v368_v16  ;;  %371 = vst [vmem:[%s1579_s8 + $0x88] sm:$0xff] %v370_v17  ;;  %v372_v18 = vld [vmem:[%s1574_s7 + $0x120] sm:$0xff]  ;;  %v374_v19 = vld [vmem:[%s1574_s7 + $0x130] sm:$0xff] }
  0x22   : > { %v376_v20 = vld [vmem:[%s1574_s7 + $0x140] sm:$0xff]  ;;  %373 = vst [vmem:[%s1579_s8 + $0x90] sm:$0xff] %v372_v18  ;;  %375 = vst [vmem:[%s1579_s8 + $0x98] sm:$0xff] %v374_v19  ;;  %v378_v21 = vld [vmem:[%s1574_s7 + $0x150] sm:$0xff] }
  0x23   : > { %377 = vst [vmem:[%s1579_s8 + $0xa0] sm:$0xff] %v376_v20  ;;  %v380_v22 = vld [vmem:[%s1574_s7 + $0x160] sm:$0xff]  ;;  %v382_v23 = vld [vmem:[%s1574_s7 + $0x170] sm:$0xff]  ;;  %379 = vst [vmem:[%s1579_s8 + $0xa8] sm:$0xff] %v378_v21 }
  0x24   : > { %381 = vst [vmem:[%s1579_s8 + $0xb0] sm:$0xff] %v380_v22  ;;  %383 = vst [vmem:[%s1579_s8 + $0xb8] sm:$0xff] %v382_v23  ;;  %v384_v24 = vld [vmem:[%s1574_s7 + $0x180] sm:$0xff]  ;;  %v386_v25 = vld [vmem:[%s1574_s7 + $0x190] sm:$0xff] }
  0x25   : > { %v388_v26 = vld [vmem:[%s1574_s7 + $0x1a0] sm:$0xff]  ;;  %385 = vst [vmem:[%s1579_s8 + $0xc0] sm:$0xff] %v384_v24  ;;  %387 = vst [vmem:[%s1579_s8 + $0xc8] sm:$0xff] %v386_v25  ;;  %v390_v27 = vld [vmem:[%s1574_s7 + $0x1b0] sm:$0xff] }
  0x26   : > { %389 = vst [vmem:[%s1579_s8 + $0xd0] sm:$0xff] %v388_v26  ;;  %v392_v28 = vld [vmem:[%s1574_s7 + $0x1c0] sm:$0xff]  ;;  %v394_v29 = vld [vmem:[%s1574_s7 + $0x1d0] sm:$0xff]  ;;  %391 = vst [vmem:[%s1579_s8 + $0xd8] sm:$0xff] %v390_v27 }
  0x27   : > { %393 = vst [vmem:[%s1579_s8 + $0xe0] sm:$0xff] %v392_v28  ;;  %395 = vst [vmem:[%s1579_s8 + $0xe8] sm:$0xff] %v394_v29  ;;  %v396_v30 = vld [vmem:[%s1574_s7 + $0x1e0] sm:$0xff]  ;;  %v398_v31 = vld [vmem:[%s1574_s7 + $0x1f0] sm:$0xff] }
  0x28   : > { %v400_v32 = vld [vmem:[%s1574_s7 + $0x200] sm:$0xff]  ;;  %397 = vst [vmem:[%s1579_s8 + $0xf0] sm:$0xff] %v396_v30  ;;  %399 = vst [vmem:[%s1579_s8 + $0xf8] sm:$0xff] %v398_v31  ;;  %v402_v33 = vld [vmem:[%s1574_s7 + $0x210] sm:$0xff] }
  0x29   : > { %401 = vst [vmem:[%s1579_s8 + $0x100] sm:$0xff] %v400_v32  ;;  %v404_v34 = vld [vmem:[%s1574_s7 + $0x220] sm:$0xff]  ;;  %v406_v35 = vld [vmem:[%s1574_s7 + $0x230] sm:$0xff]  ;;  %403 = vst [vmem:[%s1579_s8 + $0x108] sm:$0xff] %v402_v33 }
  0x2a   : > { %405 = vst [vmem:[%s1579_s8 + $0x110] sm:$0xff] %v404_v34  ;;  %407 = vst [vmem:[%s1579_s8 + $0x118] sm:$0xff] %v406_v35  ;;  %v408_v36 = vld [vmem:[%s1574_s7 + $0x240] sm:$0xff]  ;;  %v410_v37 = vld [vmem:[%s1574_s7 + $0x250] sm:$0xff] }
  0x2b   : > { %v412_v38 = vld [vmem:[%s1574_s7 + $0x260] sm:$0xff]  ;;  %409 = vst [vmem:[%s1579_s8 + $0x120] sm:$0xff] %v408_v36  ;;  %411 = vst [vmem:[%s1579_s8 + $0x128] sm:$0xff] %v410_v37  ;;  %v414_v39 = vld [vmem:[%s1574_s7 + $0x270] sm:$0xff] }
  0x2c   : > { %413 = vst [vmem:[%s1579_s8 + $0x130] sm:$0xff] %v412_v38  ;;  %v416_v40 = vld [vmem:[%s1574_s7 + $0x280] sm:$0xff]  ;;  %v418_v41 = vld [vmem:[%s1574_s7 + $0x290] sm:$0xff]  ;;  %415 = vst [vmem:[%s1579_s8 + $0x138] sm:$0xff] %v414_v39 }
  0x2d   : > { %417 = vst [vmem:[%s1579_s8 + $0x140] sm:$0xff] %v416_v40  ;;  %419 = vst [vmem:[%s1579_s8 + $0x148] sm:$0xff] %v418_v41  ;;  %v420_v42 = vld [vmem:[%s1574_s7 + $0x2a0] sm:$0xff]  ;;  %v422_v43 = vld [vmem:[%s1574_s7 + $0x2b0] sm:$0xff] }
  0x2e   : > { %v424_v44 = vld [vmem:[%s1574_s7 + $0x2c0] sm:$0xff]  ;;  %421 = vst [vmem:[%s1579_s8 + $0x150] sm:$0xff] %v420_v42  ;;  %423 = vst [vmem:[%s1579_s8 + $0x158] sm:$0xff] %v422_v43  ;;  %v426_v45 = vld [vmem:[%s1574_s7 + $0x2d0] sm:$0xff] }
  0x2f   : > { %425 = vst [vmem:[%s1579_s8 + $0x160] sm:$0xff] %v424_v44  ;;  %v428_v46 = vld [vmem:[%s1574_s7 + $0x2e0] sm:$0xff]  ;;  %v430_v47 = vld [vmem:[%s1574_s7 + $0x2f0] sm:$0xff]  ;;  %427 = vst [vmem:[%s1579_s8 + $0x168] sm:$0xff] %v426_v45 }
  0x30   : > { %429 = vst [vmem:[%s1579_s8 + $0x170] sm:$0xff] %v428_v46  ;;  %431 = vst [vmem:[%s1579_s8 + $0x178] sm:$0xff] %v430_v47  ;;  %v432_v48 = vld [vmem:[%s1574_s7 + $0x300] sm:$0xff]  ;;  %v434_v49 = vld [vmem:[%s1574_s7 + $0x310] sm:$0xff] }
  0x31   : > { %v436_v50 = vld [vmem:[%s1574_s7 + $0x320] sm:$0xff]  ;;  %433 = vst [vmem:[%s1579_s8 + $0x180] sm:$0xff] %v432_v48  ;;  %435 = vst [vmem:[%s1579_s8 + $0x188] sm:$0xff] %v434_v49  ;;  %v438_v51 = vld [vmem:[%s1574_s7 + $0x330] sm:$0xff] }
  0x32   : > { %437 = vst [vmem:[%s1579_s8 + $0x190] sm:$0xff] %v436_v50  ;;  %v440_v52 = vld [vmem:[%s1574_s7 + $0x340] sm:$0xff]  ;;  %v442_v53 = vld [vmem:[%s1574_s7 + $0x350] sm:$0xff]  ;;  %439 = vst [vmem:[%s1579_s8 + $0x198] sm:$0xff] %v438_v51 }
  0x33   : > { %441 = vst [vmem:[%s1579_s8 + $0x1a0] sm:$0xff] %v440_v52  ;;  %443 = vst [vmem:[%s1579_s8 + $0x1a8] sm:$0xff] %v442_v53  ;;  %v444_v54 = vld [vmem:[%s1574_s7 + $0x360] sm:$0xff]  ;;  %v446_v55 = vld [vmem:[%s1574_s7 + $0x370] sm:$0xff] }
  0x34   : > { %v448_v56 = vld [vmem:[%s1574_s7 + $0x380] sm:$0xff]  ;;  %445 = vst [vmem:[%s1579_s8 + $0x1b0] sm:$0xff] %v444_v54  ;;  %447 = vst [vmem:[%s1579_s8 + $0x1b8] sm:$0xff] %v446_v55  ;;  %v450_v57 = vld [vmem:[%s1574_s7 + $0x390] sm:$0xff] }
  0x35   : > { %449 = vst [vmem:[%s1579_s8 + $0x1c0] sm:$0xff] %v448_v56  ;;  %v452_v58 = vld [vmem:[%s1574_s7 + $0x3a0] sm:$0xff]  ;;  %v454_v59 = vld [vmem:[%s1574_s7 + $0x3b0] sm:$0xff]  ;;  %451 = vst [vmem:[%s1579_s8 + $0x1c8] sm:$0xff] %v450_v57 }
  0x36   : > { %453 = vst [vmem:[%s1579_s8 + $0x1d0] sm:$0xff] %v452_v58  ;;  %455 = vst [vmem:[%s1579_s8 + $0x1d8] sm:$0xff] %v454_v59  ;;  %v456_v60 = vld [vmem:[%s1574_s7 + $0x3c0] sm:$0xff]  ;;  %v458_v61 = vld [vmem:[%s1574_s7 + $0x3d0] sm:$0xff] }
  0x37   : > { %v460_v62 = vld [vmem:[%s1574_s7 + $0x3e0] sm:$0xff]  ;;  %457 = vst [vmem:[%s1579_s8 + $0x1e0] sm:$0xff] %v456_v60  ;;  %459 = vst [vmem:[%s1579_s8 + $0x1e8] sm:$0xff] %v458_v61  ;;  %v462_v63 = vld [vmem:[%s1574_s7 + $0x3f0] sm:$0xff] }
  0x38   : > { %461 = vst [vmem:[%s1579_s8 + $0x1f0] sm:$0xff] %v460_v62  ;;  %463 = vst [vmem:[%s1579_s8 + $0x1f8] sm:$0xff] %v462_v63 }
  0x39 PF: > { %p1200_p7 = scmp.ge.s32.totalorder %s1491_s18, 1  ;;  %p476_p8 = scmp.lt.s32.totalorder %s1491_s18, 19 }
  0x3b   : > { %p477_p9 = pnand %p1200_p7, %p476_p8 }
  0x3c   : > { %s483_s9 = sand.u32 (!%p477_p9), 1, %s1467_s12   ;;  %s1202_s10 = sshll.u32 (!%p477_p9), %s1475_s14, 2 }
  0x3d   : > { %480 = sbr.rel (%p477_p9) target bundleno = 374 (0x176), region = 66  ;;  %s1201_s11 = sshll.u32 (!%p477_p9), %s483_s9, 9 }
  0x3e   : > { %p526_p10 = scmp.lt.s32.totalorder (!%p477_p9), %s1202_s10, 35  ;;  %s1204_s21 = sshll.u32 (!%p477_p9), %s1479_s15, 1 }
  0x3f   : > { %p536_p11 = scmp.lt.s32.totalorder (!%p477_p9), %s1204_s21, 3  ;;  %s1728_s5 = scalar_lea.vmem (!%p477_p9), [#allocation2], %s1201_s11 }
  0x40   : > { %p1207_p12 = scmp.ne.s32.totalorder (!%p477_p9), %s1475_s14, 0 }
  0x44   : > { %s1851_s10 = smov (!%p526_p10, %s1202_s10), 35  ;;  %s1853_s21 = smov (!%p536_p11, %s1204_s21), 3 }
  0x45   : > { %s1203_s22 = sshll.u32 %s1851_s10, 2  ;;  %s538_s12 = scalar_lea.vmem %s1836_s2, %s1853_s21  ;;  %v1493_v0 = vmov (!%p1207_p12), 0.0  }
  0x46   : > { %s1714_s26 = scalar_lea.vmem %s1834_s0, %s1203_s22  ;;  %s1206_s29 = sshll.u32 %s1853_s21, 3 }
  0x47   : > { %s1726_s15 = scalar_lea.vmem %s1837_s3, %s1206_s29  ;;  %553 = sbr.rel (%p1207_p12) target bundleno = 78 (0x4e), region = 74 }
  0x48   : > { %554 = vst [vmem:[%s1726_s15] sm:$0xff] (!%p1207_p12), %v1493_v0  ;;  %555 = vst [vmem:[%s1726_s15 + $0x8] sm:$0xff] (!%p1207_p12), %v1493_v0 }
  0x4e PF: > { %v1337_v1 = vld [vmem:[%s1728_s5 + $0x4] ss:$8 sps:$4 sm:$0xff]   ;;  %v1341_v3 = vld [vmem:[%s1728_s5] ss:$8 sps:$4 sm:$0xff]   ;;  %v1343_v5 = vld [vmem:[%s1728_s5 + $0x14] ss:$8 sps:$4 sm:$0xff]  }
  0x4f   : > { %v1339_v2 = vld [vmem:[%s1728_s5 + $0x104] ss:$8 sps:$4 sm:$0xff]   ;;  %958 = vmatprep.subr.bf16.mxu0 %v1337_v1  ;;  %v1342_v4 = vld [vmem:[%s1728_s5 + $0x100] ss:$8 sps:$4 sm:$0xff]   ;;  %v1345_v6 = vld [vmem:[%s1728_s5 + $0x114] ss:$8 sps:$4 sm:$0xff]  }
  0x50   : > { %999 = vmatprep.subr.bf16.mxu1 %v1339_v2  ;;  %959 = vmatpush1.bf16.msra.mxu0 %v1341_v3  ;;  %v1347_v7 = vld [vmem:[%s1728_s5 + $0x10] ss:$8 sps:$4 sm:$0xff]   ;;  %v1349_v9 = vld [vmem:[%s1728_s5 + $0x24] ss:$8 sps:$4 sm:$0xff]   ;;  %v1353_v11 = vld [vmem:[%s1728_s5 + $0x20] ss:$8 sps:$4 sm:$0xff]  }
  0x51   : > { %1000 = vmatpush1.bf16.msra.mxu1 %v1342_v4  ;;  %960 = vmatprep.subr.bf16.mxu0 %v1343_v5  ;;  %v1348_v8 = vld [vmem:[%s1728_s5 + $0x110] ss:$8 sps:$4 sm:$0xff]   ;;  %v1351_v10 = vld [vmem:[%s1728_s5 + $0x124] ss:$8 sps:$4 sm:$0xff]   ;;  %v1354_v12 = vld [vmem:[%s1728_s5 + $0x120] ss:$8 sps:$4 sm:$0xff]  }
  0x52   : > { %1001 = vmatprep.subr.bf16.mxu1 %v1345_v6  ;;  %v1355_v13 = vld [vmem:[%s1728_s5 + $0x34] ss:$8 sps:$4 sm:$0xff]   ;;  %v1359_v15 = vld [vmem:[%s1728_s5 + $0x30] ss:$8 sps:$4 sm:$0xff]   ;;  %v1361_v17 = vld [vmem:[%s1728_s5 + $0x44] ss:$8 sps:$4 sm:$0xff]  }
  0x53   : > { %v1357_v14 = vld [vmem:[%s1728_s5 + $0x134] ss:$8 sps:$4 sm:$0xff]   ;;  %v1360_v16 = vld [vmem:[%s1728_s5 + $0x130] ss:$8 sps:$4 sm:$0xff]   ;;  %v1363_v18 = vld [vmem:[%s1728_s5 + $0x144] ss:$8 sps:$4 sm:$0xff]  }
  0x54   : > { %961 = vmatpush1.bf16.msra.mxu0 %v1347_v7  ;;  %v1365_v19 = vld [vmem:[%s1728_s5 + $0x40] ss:$8 sps:$4 sm:$0xff]   ;;  %v1367_v21 = vld [vmem:[%s1728_s5 + $0x54] ss:$8 sps:$4 sm:$0xff]   ;;  %v1371_v23 = vld [vmem:[%s1728_s5 + $0x50] ss:$8 sps:$4 sm:$0xff]  }
  0x55   : > { %1002 = vmatpush1.bf16.msra.mxu1 %v1348_v8  ;;  %962 = vmatprep.subr.bf16.mxu0 %v1349_v9  ;;  %v1366_v20 = vld [vmem:[%s1728_s5 + $0x140] ss:$8 sps:$4 sm:$0xff]   ;;  %v1369_v22 = vld [vmem:[%s1728_s5 + $0x154] ss:$8 sps:$4 sm:$0xff]   ;;  %v1372_v24 = vld [vmem:[%s1728_s5 + $0x150] ss:$8 sps:$4 sm:$0xff]  }
  0x56   : > { %1003 = vmatprep.subr.bf16.mxu1 %v1351_v10  ;;  %v1373_v25 = vld [vmem:[%s1728_s5 + $0x64] ss:$8 sps:$4 sm:$0xff]   ;;  %v1377_v27 = vld [vmem:[%s1728_s5 + $0x60] ss:$8 sps:$4 sm:$0xff]   ;;  %v1379_v29 = vld [vmem:[%s1728_s5 + $0x74] ss:$8 sps:$4 sm:$0xff]  }
  0x57   : > { %v1375_v26 = vld [vmem:[%s1728_s5 + $0x164] ss:$8 sps:$4 sm:$0xff]   ;;  %v1378_v28 = vld [vmem:[%s1728_s5 + $0x160] ss:$8 sps:$4 sm:$0xff]   ;;  %v1381_v30 = vld [vmem:[%s1728_s5 + $0x174] ss:$8 sps:$4 sm:$0xff]  }
  0x58   : > { %963 = vmatpush1.bf16.msra.mxu0 %v1353_v11  ;;  %v1383_v31 = vld [vmem:[%s1728_s5 + $0x70] ss:$8 sps:$4 sm:$0xff]   ;;  %v1385_v33 = vld [vmem:[%s1728_s5 + $0x84] ss:$8 sps:$4 sm:$0xff]   ;;  %v1389_v35 = vld [vmem:[%s1728_s5 + $0x80] ss:$8 sps:$4 sm:$0xff]  }
  0x59   : > { %1004 = vmatpush1.bf16.msra.mxu1 %v1354_v12  ;;  %964 = vmatprep.subr.bf16.mxu0 %v1355_v13  ;;  %v1384_v32 = vld [vmem:[%s1728_s5 + $0x170] ss:$8 sps:$4 sm:$0xff]   ;;  %v1387_v34 = vld [vmem:[%s1728_s5 + $0x184] ss:$8 sps:$4 sm:$0xff]   ;;  %v1390_v36 = vld [vmem:[%s1728_s5 + $0x180] ss:$8 sps:$4 sm:$0xff]  }
  0x5a   : > { %1005 = vmatprep.subr.bf16.mxu1 %v1357_v14  ;;  %v1391_v37 = vld [vmem:[%s1728_s5 + $0x94] ss:$8 sps:$4 sm:$0xff]   ;;  %v1395_v39 = vld [vmem:[%s1728_s5 + $0x90] ss:$8 sps:$4 sm:$0xff]   ;;  %v1397_v41 = vld [vmem:[%s1728_s5 + $0xa4] ss:$8 sps:$4 sm:$0xff]  }
  0x5b   : > { %v1393_v38 = vld [vmem:[%s1728_s5 + $0x194] ss:$8 sps:$4 sm:$0xff]   ;;  %v1396_v40 = vld [vmem:[%s1728_s5 + $0x190] ss:$8 sps:$4 sm:$0xff]   ;;  %v1399_v42 = vld [vmem:[%s1728_s5 + $0x1a4] ss:$8 sps:$4 sm:$0xff]  }
  0x5c   : > { %965 = vmatpush1.bf16.msra.mxu0 %v1359_v15  ;;  %v1401_v43 = vld [vmem:[%s1728_s5 + $0xa0] ss:$8 sps:$4 sm:$0xff]   ;;  %v1403_v45 = vld [vmem:[%s1728_s5 + $0xb4] ss:$8 sps:$4 sm:$0xff]   ;;  %v1407_v50 = vld [vmem:[%s1728_s5 + $0xb0] ss:$8 sps:$4 sm:$0xff]  }
  0x5d   : > { %1006 = vmatpush1.bf16.msra.mxu1 %v1360_v16  ;;  %966 = vmatprep.subr.bf16.mxu0 %v1361_v17  ;;  %v1402_v44 = vld [vmem:[%s1728_s5 + $0x1a0] ss:$8 sps:$4 sm:$0xff]   ;;  %v1405_v46 = vld [vmem:[%s1728_s5 + $0x1b4] ss:$8 sps:$4 sm:$0xff]   ;;  %v1408_v51 = vld [vmem:[%s1728_s5 + $0x1b0] ss:$8 sps:$4 sm:$0xff]  }
  0x5e   : > { %1007 = vmatprep.subr.bf16.mxu1 %v1363_v18  ;;  %v558_v47 = vld [vmem:[%s1714_s26] sm:$0xff]  ;;  %v559_v49 = vld [vmem:[%s1714_s26 + $0x8] sm:$0xff]  ;;  %v1415_v57 = vld [vmem:[%s1728_s5 + $0xd4] ss:$8 sps:$4 sm:$0xff]   ;;  %p1276_p13 = scmp.ne.s32.totalorder %s1475_s14, 8 }
  0x5f   : > { %v1209_v48 = vcombine.high %v558_v47, %v558_v47  ;;  %v1211_v52 = vcombine.high %v559_v49, %v559_v49  ;;  %v1409_v53 = vld [vmem:[%s1728_s5 + $0xc4] ss:$8 sps:$4 sm:$0xff]   ;;  %v1413_v55 = vld [vmem:[%s1728_s5 + $0xc0] ss:$8 sps:$4 sm:$0xff]   ;;  %v1417_v58 = vld [vmem:[%s1728_s5 + $0x1d4] ss:$8 sps:$4 sm:$0xff]   ;;  %v1208_v5 = vcombine.low %v558_v47, %v558_v47  ;;  %v1210_v6 = vcombine.low %v559_v49, %v559_v49 }
  0x60   : > { %967 = vmatpush1.bf16.msra.mxu0 %v1365_v19  ;;  %v1411_v54 = vld [vmem:[%s1728_s5 + $0x1c4] ss:$8 sps:$4 sm:$0xff]   ;;  %v1414_v56 = vld [vmem:[%s1728_s5 + $0x1c0] ss:$8 sps:$4 sm:$0xff]   ;;  %v1419_v59 = vld [vmem:[%s1728_s5 + $0xd0] ss:$8 sps:$4 sm:$0xff]  }
  0x61   : > { %1008 = vmatpush1.bf16.msra.mxu1 %v1366_v20  ;;  %968 = vmatprep.subr.bf16.mxu0 %v1367_v21  ;;  %v1420_v60 = vld [vmem:[%s1728_s5 + $0x1d0] ss:$8 sps:$4 sm:$0xff]   ;;  %v1421_v61 = vld [vmem:[%s1728_s5 + $0xe4] ss:$8 sps:$4 sm:$0xff]   ;;  %v1425_v63 = vld [vmem:[%s1728_s5 + $0xe0] ss:$8 sps:$4 sm:$0xff]   ;;  %v1052_v21 = vlaneseq (!%p1276_p13) }
  0x62   : > { %1009 = vmatprep.subr.bf16.mxu1 %v1369_v22  ;;  %990 = vmatprep.mubr.bf16.mxu0 %v1209_v48  ;;  %v1423_v62 = vld [vmem:[%s1728_s5 + $0x1e4] ss:$8 sps:$4 sm:$0xff]   ;;  %v1426_v0 = vld [vmem:[%s1728_s5 + $0x1e0] ss:$8 sps:$4 sm:$0xff]   ;;  %v1427_v1 = vld [vmem:[%s1728_s5 + $0xf4] ss:$8 sps:$4 sm:$0xff]  }
  0x63   : > { %1031 = vmatprep.mubr.bf16.mxu1 %v1211_v52  ;;  %v1429_v2 = vld [vmem:[%s1728_s5 + $0x1f4] ss:$8 sps:$4 sm:$0xff]   ;;  %v1431_v3 = vld [vmem:[%s1728_s5 + $0xf0] ss:$8 sps:$4 sm:$0xff]   ;;  %v556_v8 = vld [vmem:[%s1726_s15] sm:$0xff]  ;;  %v1053_v22 = vshrl.u32 (!%p1276_p13), %v1052_v21, 7 }
  0x64   : > { %969 = vmatpush1.bf16.msra.mxu0 %v1371_v23  ;;  %v1432_v4 = vld [vmem:[%s1728_s5 + $0x1f0] ss:$8 sps:$4 sm:$0xff]   ;;  %v557_v12 = vld [vmem:[%s1726_s15 + $0x8] sm:$0xff]  ;;  %v1050_v23 = vld [vmem:[%s538_s12] sm:$0x3] (!%p1276_p13) }
  0x65   : > { %1010 = vmatpush1.bf16.msra.mxu1 %v1372_v24  ;;  %970 = vmatprep.subr.bf16.mxu0 %v1373_v25  ;;  %v1054_v24 = vsub.s32 (!%p1276_p13), 0, %v1053_v22  ;;  %v1058_v25 = vsub.s32 (!%p1276_p13), 1, %v1053_v22 }
  0x66   : > { %1011 = vmatprep.subr.bf16.mxu1 %v1375_v26 }
  0x68   : > { %971 = vmatpush1.bf16.msra.mxu0 %v1377_v27 }
  0x69   : > { %1012 = vmatpush1.bf16.msra.mxu1 %v1378_v28  ;;  %972 = vmatprep.subr.bf16.mxu0 %v1379_v29  ;;  %v1055_v28 = vrot.slane (!%p1276_p13), %v1050_v23, %v1054_v24  ;;  %v1059_v29 = vrot.slane (!%p1276_p13), %v1050_v23, %v1058_v25 }
  0x6a   : > { %1013 = vmatprep.subr.bf16.mxu1 %v1381_v30 }
  0x6c   : > { %973 = vmatpush1.bf16.msra.mxu0 %v1383_v31 }
  0x6d   : > { %1014 = vmatpush1.bf16.msra.mxu1 %v1384_v32  ;;  %974 = vmatprep.subr.bf16.mxu0 %v1385_v33 }
  0x6e   : > { %1015 = vmatprep.subr.bf16.mxu1 %v1387_v34 }
  0x70   : > { %975 = vmatpush1.bf16.msra.mxu0 %v1389_v35 }
  0x71   : > { %1016 = vmatpush1.bf16.msra.mxu1 %v1390_v36  ;;  %976 = vmatprep.subr.bf16.mxu0 %v1391_v37 }
  0x72   : > { %1017 = vmatprep.subr.bf16.mxu1 %v1393_v38 }
  0x74   : > { %977 = vmatpush1.bf16.msra.mxu0 %v1395_v39 }
  0x75   : > { %1018 = vmatpush1.bf16.msra.mxu1 %v1396_v40  ;;  %978 = vmatprep.subr.bf16.mxu0 %v1397_v41 }
  0x76   : > { %1019 = vmatprep.subr.bf16.mxu1 %v1399_v42 }
  0x78   : > { %979 = vmatpush1.bf16.msra.mxu0 %v1401_v43 }
  0x79   : > { %1020 = vmatpush1.bf16.msra.mxu1 %v1402_v44  ;;  %980 = vmatprep.subr.bf16.mxu0 %v1403_v45 }
  0x7a   : > { %1021 = vmatprep.subr.bf16.mxu1 %v1405_v46 }
  0x7c   : > { %981 = vmatpush1.bf16.msra.mxu0 %v1407_v50 }
  0x7d   : > { %1022 = vmatpush1.bf16.msra.mxu1 %v1408_v51  ;;  %982 = vmatprep.subr.bf16.mxu0 %v1409_v53 }
  0x7e   : > { %1023 = vmatprep.subr.bf16.mxu1 %v1411_v54 }
  0x80   : > { %983 = vmatpush1.bf16.msra.mxu0 %v1413_v55 }
  0x81   : > { %1024 = vmatpush1.bf16.msra.mxu1 %v1414_v56  ;;  %984 = vmatprep.subr.bf16.mxu0 %v1415_v57 }
  0x82   : > { %1025 = vmatprep.subr.bf16.mxu1 %v1417_v58 }
  0x84   : > { %985 = vmatpush1.bf16.msra.mxu0 %v1419_v59 }
  0x85   : > { %1026 = vmatpush1.bf16.msra.mxu1 %v1420_v60  ;;  %986 = vmatprep.subr.bf16.mxu0 %v1421_v61 }
  0x86   : > { %1027 = vmatprep.subr.bf16.mxu1 %v1423_v62 }
  0x88   : > { %987 = vmatpush1.bf16.msra.mxu0 %v1425_v63 }
  0x89   : > { %1028 = vmatpush1.bf16.msra.mxu1 %v1426_v0  ;;  %988 = vmatprep.subr.bf16.mxu0 %v1427_v1 }
  0x8a   : > { %1029 = vmatprep.subr.bf16.mxu1 %v1429_v2 }
  0x8c   : > { %989 = vmatpush1.bf16.msra.mxu0 %v1431_v3 }
  0x8d   : > { %1030 = vmatpush1.bf16.msra.mxu1 %v1432_v4 }
  0x8f   : > { %991 = vmatmul.mubr.bf16.vlgmr.msra.gmra.mrb[0].mxu0 %v1208_v5 }
  0x90   : > { %1032 = vmatmul.mubr.bf16.vlgmr.msra.gmra.mrb[0].mxu1 %v1210_v6 }
 0x162   : > { %v992_v7 = vpop.f32.mrb[0].mxu0 }
 0x163   : > { %v1033_v9 = vpop.f32.mrb[0].mxu1  ;;  %v994_v11 = vpop.f32.mrb[1].mxu0  ;;  %1047 = sbr.rel (%p1276_p13) target bundleno = 374 (0x176), region = 78 }
 0x164   : > { %v1034_v10 = vadd.f32 %v1033_v9, %v992_v7  ;;  %v1035_v13 = vpop.f32.mrb[1].mxu1  ;;  %v996_v15 = vpop.f32.mrb[2].mxu0 }
 0x165   : > { %v1036_v14 = vadd.f32 %v1035_v13, %v994_v11  ;;  %v1037_v16 = vpop.f32.mrb[2].mxu1  ;;  %v997_v18 = vpop.f32.mrb[3].mxu0 }
 0x166   : > { %v1040_v17 = vadd.f32 %v1034_v10, %v556_v8  ;;  %v1038_v19 = vpop.f32.mrb[3].mxu1 }
 0x167   : > { %v1041_v20 = vadd.f32 %v1036_v14, %v557_v12 }
 0x168   : > { %1042 = vst [vmem:[%s1726_s15] sm:$0xff] %v1040_v17 }
 0x169   : > { %1043 = vst [vmem:[%s1726_s15 + $0x8] sm:$0xff] %v1041_v20 }
 0x16f   : > { %v1048_v26 = vld [vmem:[%s1726_s15] sm:$0xff] }
 0x170   : > { %v1049_v27 = vld [vmem:[%s1726_s15 + $0x8] sm:$0xff]  ;;  %v1062_v30 = vadd.f32 %v1055_v28, %v1048_v26 }
 0x171   : > { %v1063_v31 = vadd.f32 %v1059_v29, %v1049_v27 }
 0x172   : > { %v1064_v32 = vmax.f32 %v1062_v30, 0.0 }
 0x173   : > { %v1065_v33 = vmax.f32 %v1063_v31, 0.0 }
 0x174   : > { %1066 = vst [vmem:[%s1726_s15] sm:$0xff] %v1064_v32 }
 0x175   : > { %1067 = vst [vmem:[%s1726_s15 + $0x8] sm:$0xff] %v1065_v33 }
 0x176 PF: > { %s13_s18 = sadd.s32 1, %s1491_s18   ;;  %s1838_s12 = smov %s1471_s13 }
 0x177   : > { %p10_p0 = scmp.ge.s32.totalorder %s13_s18, 20   ;;  %s1839_s13 = smov %s1565_s25 }
 0x178   : > { %s1840_s14 = smov %s1483_s16  ;;  %s1841_s15 = smov %s1487_s17 }
 0x179   : > { %s1842_s16 = smov %s1845_s19  ;;  %s1843_s17 = smov %s1849_s20 }
 0x17a   :  { %12 = sbr.rel (!%p10_p0) target bundleno = 4 (0x4), region = 119 }

// kernel: resnet18_forward.44
= control target key start
LH: loop header
LB: loop body
LE: loop exit
PB: predicated region body
PF: predicated region fallthrough
CT: control target
= control target key end

     0   :  { %s303_s6 = smov 0   ;;  %s305_s7 = smov 0   ;;  %s357_s0 = inlined_call_operand.vmem [shape: f32[2,1,512], index: 0, kind: input, shape index: {}]   ;;  %s358_s1 = inlined_call_operand.vmem [shape: f32[2,512], index: 1, kind: output, shape index: {}]  }
   0x1   :  { %s307_s8 = smov 0  }
   0x2 LB: > { %s232_s9 = sadd.s32 4294967295, %s290_s8   ;;  %s320_s10 = sadd.s32 1, %s290_s8   ;;  %s290_s8 = sphi %s307_s8, %s361_s8   ;;  %s286_s7 = sphi %s305_s7, %s360_s7   ;;  %s282_s6 = sphi %s303_s6, %s359_s6  }
   0x3   : > { %s15_s11 = ssub.s32 %s290_s8, %s320_s10  ;;  %s18_s12 = sadd.s32 1, %s286_s7 }
   0x4   : > { %p16_p0 = scmp.eq.s32.totalorder %s15_s11, 0  ;;  %p25_p1 = scmp.ne.s32.totalorder %s286_s7, %s282_s6 }
   0x5   : > { %p26_p2 = scmp.eq.s32.totalorder %s290_s8, 0  ;;  %p235_p4 = scmp.ge.s32.totalorder %s290_s8, 4 }
   0x6   : > { %s329_s13 = scalar_select %p16_p0, %s286_s7, %s18_s12  }
   0x7   : > { %p27_p3 = por %p26_p2, %p25_p1  ;;  %77 = sbr.rel (%p235_p4) target bundleno = 21 (0x15), region = 16 }
   0xe   : > { %80 = sbr.rel (!%p27_p3) target bundleno = 21 (0x15), region = 20  ;;  %s82_s14 = sand.u32 (%p27_p3), 1, %s286_s7  }
   0xf   : > { %s85_s17 = scalar_lea.vmem (%p27_p3), %s357_s0, %s290_s8  ;;  %s236_s18 = sshll.u32 (%p27_p3), %s82_s14, 1 }
  0x10   : > { %v101_v0 = vld [vmem:[%s85_s17] sm:$0x1] (%p27_p3)  ;;  %v103_v1 = vld [vmem:[%s85_s17 + $0x4] sm:$0x1] (%p27_p3)  ;;  %s84_s19 = scalar_lea.vmem (%p27_p3), [#allocation2], %s236_s18 }
  0x11   : > { %102 = vst [vmem:[%s84_s19] sm:$0x1] (%p27_p3), %v101_v0  ;;  %104 = vst [vmem:[%s84_s19 + $0x1] sm:$0x1] (%p27_p3), %v103_v1 }
  0x15 PF: > { %p237_p5 = scmp.ge.s32.totalorder %s290_s8, 1  ;;  %p122_p6 = scmp.lt.s32.totalorder %s290_s8, 5 }
  0x17   : > { %p123_p7 = pnand %p237_p5, %p122_p6 }
  0x18   : > { %s129_s20 = sand.u32 (!%p123_p7), 1, %s282_s6   ;;  %p147_p8 = scmp.lt.s32.totalorder (!%p123_p7), %s232_s9, 3  ;;  %v161_v2 = vlaneseq (!%p123_p7)  ;;  %v292_v3 = vmov (!%p123_p7), 1966171168  }
  0x19   : > { %126 = sbr.rel (%p123_p7) target bundleno = 36 (0x24), region = 54  ;;  %s238_s21 = sshll.u32 (!%p123_p7), %s129_s20, 1  ;;  %v159_v4 = vunpack.c.l.s4 (!%p123_p7), %v292_v3 }
  0x1a   : > { %v162_v5 = vshrl.u32 (!%p123_p7), %v161_v2, 7  ;;  %s131_s22 = scalar_lea.vmem (!%p123_p7), [#allocation2], %s238_s21 }
  0x1b   : > { %v151_v6 = vld [vmem:[%s131_s22] sm:$0x1] (!%p123_p7)  ;;  %v152_v7 = vld [vmem:[%s131_s22 + $0x1] sm:$0x1] (!%p123_p7)  ;;  %v160_v8 = vunpack.c.0.s8 (!%p123_p7), %v159_v4 }
  0x1c   : > { %v157_v9 = vcombine.low (!%p123_p7), %v151_v6, %v152_v7 }
  0x1d   : > { %v163_v10 = vsub.s32 (!%p123_p7), %v160_v8, %v162_v5 }
  0x1f   : > { %v164_v11 = vrot.slane (!%p123_p7), %v157_v9, %v163_v10 }
  0x20   : > { %s363_s9 = smov (!%p147_p8, %s232_s9), 3 }
  0x21   : > { %s239_s23 = sshll.u32 %s363_s9, 1 }
  0x22   : > { %s150_s26 = scalar_lea.vmem %s358_s1, %s239_s23 }
  0x23   : > { %240 = vst.sshfl [vmem:[%s150_s26] sm:$0x5 pattern:$0x73625140] %v164_v11 }
  0x24 PF: > { %p8_p9 = scmp.ge.s32.totalorder %s320_s10, 6   ;;  %s359_s6 = smov %s286_s7 }
  0x25   : > { %s360_s7 = smov %s329_s13  ;;  %s361_s8 = smov %s320_s10 }
  0x26   :  { %10 = sbr.rel (!%p8_p9) target bundleno = 2 (0x2), region = 93 }

// kernel: resnet18_forward.45
= control target key start
LH: loop header
LB: loop body
LE: loop exit
PB: predicated region body
PF: predicated region fallthrough
CT: control target
= control target key end

     0   :  { %s638_s1 = inlined_call_operand.vmem [shape: bf16[512,128], index: 1, kind: input, shape index: {}]   ;;  %s639_s0 = inlined_call_operand.vmem [shape: bf16[8,512], index: 0, kind: input, shape index: {}]   ;;  %s640_s2 = inlined_call_operand.vmem [shape: f32[1,128], index: 2, kind: input, shape index: {}]   ;;  %s641_s3 = inlined_call_operand.vmem [shape: f32[8,128], index: 3, kind: output, shape index: {}]  }
   0x1   :  { %v474_v0 = vld [vmem:[%s638_s1 + $0x40] sm:$0xff]   ;;  %v478_v4 = vld [vmem:[%s638_s1 + $0x48] sm:$0xff]   ;;  %v482_v8 = vld [vmem:[%s638_s1 + $0x50] sm:$0xff]  }
   0x2   :  { %v475_v1 = vld [vmem:[%s638_s1 + $0xc0] sm:$0xff]   ;;  %429 = vmatprep.subr.bf16.mxu0 %v474_v0  ;;  %v479_v5 = vld [vmem:[%s638_s1 + $0xc8] sm:$0xff]   ;;  %v483_v9 = vld [vmem:[%s638_s1 + $0xd0] sm:$0xff]  }
   0x3   :  { %v476_v2 = vld [vmem:[%s638_s1] sm:$0xff]   ;;  %451 = vmatprep.subr.bf16.mxu1 %v475_v1  ;;  %v480_v6 = vld [vmem:[%s638_s1 + $0x8] sm:$0xff]   ;;  %v484_v10 = vld [vmem:[%s638_s1 + $0x10] sm:$0xff]  }
   0x4   :  { %v477_v3 = vld [vmem:[%s638_s1 + $0x80] sm:$0xff]   ;;  %430 = vmatpush3.bf16.msra.mxu0 %v476_v2  ;;  %v481_v7 = vld [vmem:[%s638_s1 + $0x88] sm:$0xff]   ;;  %v485_v11 = vld [vmem:[%s638_s1 + $0x90] sm:$0xff]  }
   0x5   :  { %452 = vmatpush3.bf16.msra.mxu1 %v477_v3  ;;  %431 = vmatprep.subr.bf16.mxu0 %v478_v4  ;;  %v486_v12 = vld [vmem:[%s638_s1 + $0x58] sm:$0xff]   ;;  %v490_v16 = vld [vmem:[%s638_s1 + $0x60] sm:$0xff]   ;;  %v494_v20 = vld [vmem:[%s638_s1 + $0x68] sm:$0xff]  }
   0x6   :  { %453 = vmatprep.subr.bf16.mxu1 %v479_v5  ;;  %v487_v13 = vld [vmem:[%s638_s1 + $0xd8] sm:$0xff]   ;;  %v491_v17 = vld [vmem:[%s638_s1 + $0xe0] sm:$0xff]   ;;  %v495_v21 = vld [vmem:[%s638_s1 + $0xe8] sm:$0xff]  }
   0x7   :  { %v488_v14 = vld [vmem:[%s638_s1 + $0x18] sm:$0xff]   ;;  %v492_v18 = vld [vmem:[%s638_s1 + $0x20] sm:$0xff]   ;;  %v496_v22 = vld [vmem:[%s638_s1 + $0x28] sm:$0xff]  }
   0x8   :  { %432 = vmatpush3.bf16.msra.mxu0 %v480_v6  ;;  %v489_v15 = vld [vmem:[%s638_s1 + $0x98] sm:$0xff]   ;;  %v493_v19 = vld [vmem:[%s638_s1 + $0xa0] sm:$0xff]   ;;  %v497_v23 = vld [vmem:[%s638_s1 + $0xa8] sm:$0xff]  }
   0x9   :  { %454 = vmatpush3.bf16.msra.mxu1 %v481_v7  ;;  %433 = vmatprep.subr.bf16.mxu0 %v482_v8  ;;  %v498_v24 = vld [vmem:[%s638_s1 + $0x70] sm:$0xff]   ;;  %v502_v28 = vld [vmem:[%s638_s1 + $0x78] sm:$0xff]   ;;  %v21_v32 = vld [vmem:[%s639_s0] sm:$0xff] }
   0xa   :  { %455 = vmatprep.subr.bf16.mxu1 %v483_v9  ;;  %v499_v25 = vld [vmem:[%s638_s1 + $0xf0] sm:$0xff]   ;;  %v503_v29 = vld [vmem:[%s638_s1 + $0xf8] sm:$0xff]   ;;  %v22_v33 = vld [vmem:[%s639_s0 + $0x8] sm:$0xff]  ;;  %v392_v34 = vcombine.low %v21_v32, %v21_v32  ;;  %v393_v35 = vcombine.high %v21_v32, %v21_v32 }
   0xb   :  { %v500_v26 = vld [vmem:[%s638_s1 + $0x30] sm:$0xff]   ;;  %v504_v30 = vld [vmem:[%s638_s1 + $0x38] sm:$0xff]   ;;  %v394_v36 = vcombine.low %v22_v33, %v22_v33  ;;  %v395_v37 = vcombine.high %v22_v33, %v22_v33  ;;  %v428_v49 = vld [vmem:[%s640_s2] ss:$0 sm:$0xff] }
   0xc   :  { %434 = vmatpush3.bf16.msra.mxu0 %v484_v10  ;;  %v501_v27 = vld [vmem:[%s638_s1 + $0xb0] sm:$0xff]   ;;  %v505_v31 = vld [vmem:[%s638_s1 + $0xb8] sm:$0xff]   ;;  %325 = vmatprep.mubr.bf16.mxu0 %v393_v35 }
   0xd   :  { %456 = vmatpush3.bf16.msra.mxu1 %v485_v11  ;;  %435 = vmatprep.subr.bf16.mxu0 %v486_v12 }
   0xe   :  { %457 = vmatprep.subr.bf16.mxu1 %v487_v13  ;;  %365 = vmatprep.mubr.bf16.mxu1 %v395_v37 }
  0x10   :  { %436 = vmatpush3.bf16.msra.mxu0 %v488_v14 }
  0x11   :  { %458 = vmatpush3.bf16.msra.mxu1 %v489_v15  ;;  %437 = vmatprep.subr.bf16.mxu0 %v490_v16 }
  0x12   :  { %459 = vmatprep.subr.bf16.mxu1 %v491_v17 }
  0x14   :  { %438 = vmatpush3.bf16.msra.mxu0 %v492_v18 }
  0x15   :  { %460 = vmatpush3.bf16.msra.mxu1 %v493_v19  ;;  %439 = vmatprep.subr.bf16.mxu0 %v494_v20 }
  0x16   :  { %461 = vmatprep.subr.bf16.mxu1 %v495_v21 }
  0x18   :  { %440 = vmatpush3.bf16.msra.mxu0 %v496_v22 }
  0x19   :  { %462 = vmatpush3.bf16.msra.mxu1 %v497_v23  ;;  %441 = vmatprep.subr.bf16.mxu0 %v498_v24 }
  0x1a   :  { %463 = vmatprep.subr.bf16.mxu1 %v499_v25 }
  0x1c   :  { %442 = vmatpush3.bf16.msra.mxu0 %v500_v26 }
  0x1d   :  { %464 = vmatpush3.bf16.msra.mxu1 %v501_v27  ;;  %443 = vmatprep.subr.bf16.mxu0 %v502_v28 }
  0x1e   :  { %465 = vmatprep.subr.bf16.mxu1 %v503_v29 }
  0x20   :  { %444 = vmatpush3.bf16.msra.mxu0 %v504_v30 }
  0x21   :  { %466 = vmatpush3.bf16.msra.mxu1 %v505_v31 }
  0x23   :  { %326 = vmatmul.mubr.bf16.vlgmr.msra.gmra.mrb[0].mxu0 %v392_v34 }
  0x24   :  { %366 = vmatmul.mubr.bf16.vlgmr.msra.gmra.mrb[0].mxu1 %v394_v36 }
  0xf6   :  { %v445_v38 = vpop.f32.mrb[0].mxu0 }
  0xf7   :  { %v467_v39 = vpop.f32.mrb[0].mxu1  ;;  %v446_v40 = vpop.f32.mrb[1].mxu0 }
  0xf8   :  { %v468_v41 = vpop.f32.mrb[1].mxu1  ;;  %v447_v42 = vadd.f32 %v446_v40, %v445_v38  ;;  %v448_v44 = vpop.f32.mrb[2].mxu0 }
  0xf9   :  { %v469_v43 = vadd.f32 %v468_v41, %v467_v39  ;;  %v470_v45 = vpop.f32.mrb[2].mxu1  ;;  %v449_v46 = vpop.f32.mrb[3].mxu0 }
  0xfa   :  { %v471_v47 = vpop.f32.mrb[3].mxu1 }
  0xfb   :  { %v368_v48 = vadd.f32 %v469_v43, %v447_v42 }
  0xfd   :  { %v386_v50 = vadd.f32 %v428_v49, %v368_v48 }
  0xff   :  { %387 = vst [vmem:[%s641_s3] sm:$0xff] %v386_v50 }

</bundles_post_ra>
